<compile_context>
chip_gen: v6e
topology: v6e:2x2x1
jax: 0.10.0
libtpu: 0.0.40
codegen_flags: <defaults>
</compile_context>

<pallas_src>
import functools

import jax
import jax.numpy as jnp
import numpy as np
from jax import lax
from jax.experimental import pallas as pl
from jax.experimental.pallas import tpu as pltpu


def _round_up(x, m):
    return ((x + m - 1) // m) * m


# ----------------------------------------------------------------------------
# Fused Pallas kernel: LSTM0 stack + LSTM1 stack + fc head, all VMEM-resident.
# ----------------------------------------------------------------------------
def _log_anomaly_kernel(num_layers, hidden_size, x_seq_ref, x_quant_ref, *refs):
    """x_seq_ref: (T, B, E) TIME-MAJOR.  x_quant_ref: (B, 1, V) TIME-MAJOR."""
    H = hidden_size
    n = 3 * num_layers
    lstm0 = [refs[3 * l: 3 * l + 3] for l in range(num_layers)]
    lstm1 = [refs[n + 3 * l: n + 3 * l + 3] for l in range(num_layers)]
    fc_w_ref = refs[2 * n]        # (2H, V_pad)
    fc_b_ref = refs[2 * n + 1]    # (1, V_pad)
    out_ref = refs[2 * n + 2]     # (B, V_pad)

    def lstm_stack(seq_tm, layers, collect_last_seq):
        """seq_tm: time-major (T, Bb, In). Returns (last_layer_seq|None, last_hidden)."""
        last_seq = None
        h = None
        for li, (wih_ref, whh_ref, b_ref) in enumerate(layers):
            T, Bb, In = seq_tm.shape
            wih = wih_ref[...]                      # (In, 4H)
            whh = whh_ref[...]                      # (H, 4H)
            # Hoisted input projection: ONE MXU matmul over all timesteps,
            # bias folded in (removes a per-step matmul + VALU add). Time-major
            # so gx[t] below is a contiguous, sublane-aligned (Bb, 4H) tile.
            gx = (jnp.dot(seq_tm.reshape(T * Bb, In).astype(wih.dtype), wih,
                          preferred_element_type=jnp.float32)
                  + b_ref[...]).reshape(T, Bb, 4 * H)

            h = jnp.zeros((Bb, H), jnp.float32)
            c = jnp.zeros((Bb, H), jnp.float32)
            is_last = li == len(layers) - 1
            need_seq = (not is_last) or collect_last_seq
            hs = []
            # TODO(synk): switch to lax.fori_loop(unroll=2..4) + VMEM scratch for
            #             hs once T (or B for the lstm1 stack) grows.
            for t in range(T):                      # static unroll (small fixed T)
                # TODO(synk): hold whh resident in the MXU across the loop via
                #             pltpu.matmul_push_rhs / matmul_acc_lhs.
                g = gx[t] + jnp.dot(h.astype(whh.dtype), whh,
                                    preferred_element_type=jnp.float32)
                # H is a multiple of 128 -> these are aligned lane-group views.
                i_g = jax.nn.sigmoid(g[:, 0 * H:1 * H])
                f_g = jax.nn.sigmoid(g[:, 1 * H:2 * H])
                g_g = jnp.tanh(g[:, 2 * H:3 * H])
                o_g = jax.nn.sigmoid(g[:, 3 * H:4 * H])
                c = f_g * c + i_g * g_g
                h = o_g * jnp.tanh(c)
                if need_seq:
                    hs.append(h)
            if need_seq:
                new_seq = jnp.stack(hs, axis=0)     # (T, Bb, H), time-major, VMEM only
                if is_last:
                    last_seq = new_seq
                else:
                    seq_tm = new_seq
            # TODO(synk): inter-layer dropout (p=0.5) is training-only; identity here (eval).
        return last_seq, h

    # LSTM0 over x_seq. Only the last hidden is consumed, so the last layer's
    # full sequence is never materialized.
    _, out0_last = lstm_stack(x_seq_ref[...], lstm0, collect_last_seq=False)

    # LSTM1 over x_quant (unbatched length-B sequence, time-major (B, 1, V)).
    out1_seq, _ = lstm_stack(x_quant_ref[...], lstm1, collect_last_seq=True)
    out1 = out1_seq.reshape(out1_seq.shape[0], H)   # (B, H): plain squeeze

    # fc(concat(out0_last, out1)) == out0_last @ W[:H] + out1 @ W[H:] + b
    # (static ref slices are free; avoids a lane-dim concatenate).
    logits = (
        jnp.dot(out0_last.astype(fc_w_ref.dtype), fc_w_ref[0:H, :],
                preferred_element_type=jnp.float32)
        + jnp.dot(out1.astype(fc_w_ref.dtype), fc_w_ref[H:2 * H, :],
                  preferred_element_type=jnp.float32)
        + fc_b_ref[...]
    )
    out_ref[...] = logits                            # lane-dense (B, V_pad) store


# ----------------------------------------------------------------------------
# One-time parameter packing (transposes, bias folding, V padding, dtype cast).
# ----------------------------------------------------------------------------
def prepare_params(raw, compute_dtype=jnp.float32):
    def prep_lstm(layers):
        out = []
        for (w_ih, w_hh, b_ih, b_hh) in layers:
            out.append((
                jnp.asarray(w_ih.T, compute_dtype),                 # (In, 4H)
                jnp.asarray(w_hh.T, compute_dtype),                 # (H, 4H)
                jnp.asarray((b_ih + b_hh)[None, :], jnp.float32),   # (1, 4H)
            ))
        return tuple(out)

    hidden_size = raw["lstm0"][0][1].shape[1]
    vocab_size = raw["fc_w"].shape[0]
    v_pad = _round_up(vocab_size, 128)               # lane-dense output padding

    fc_w_t = jnp.asarray(raw["fc_w"], jnp.float32).T                 # (2H, V)
    fc_w_pad = jnp.pad(fc_w_t, ((0, 0), (0, v_pad - vocab_size)))
    fc_b_pad = jnp.pad(jnp.asarray(raw["fc_b"], jnp.float32),
                       (0, v_pad - vocab_size))[None, :]             # (1, V_pad)

    return {
        "hidden_size": hidden_size,
        "num_layers": len(raw["lstm0"]),
        "vocab_size": vocab_size,
        "compute_dtype": compute_dtype,
        "lstm0": prep_lstm(raw["lstm0"]),
        "lstm1": prep_lstm(raw["lstm1"]),
        "fc_w": jnp.asarray(fc_w_pad, compute_dtype),                # (2H, V_pad)
        "fc_b": fc_b_pad,                                            # (1, V_pad)
    }


def log_anomaly_forward(prepared, x_seq, x_quant):
    """x_seq: (B, T, E) batch_first; x_quant: (B, V). Returns logits (B, V)."""
    B = x_seq.shape[0]
    H = prepared["hidden_size"]
    num_layers = prepared["num_layers"]
    V = prepared["vocab_size"]
    V_pad = prepared["fc_w"].shape[1]
    cdt = prepared["compute_dtype"]

    flat_weights = []
    for stack in ("lstm0", "lstm1"):
        for layer in prepared[stack]:
            flat_weights.extend(layer)

    # Layout plumbing OUTSIDE the kernel (one-off XLA transposes):
    #   x_seq  -> time-major (T, B, E)
    #   x_quant-> time-major (B, 1, V)  (PyTorch 2D input == unbatched length-B seq)
    x_seq_tm = jnp.transpose(jnp.asarray(x_seq, cdt), (1, 0, 2))
    x_quant_tm = jnp.asarray(x_quant, cdt)[:, None, :]

    kernel = functools.partial(_log_anomaly_kernel, num_layers, H)
    # Single fused call: no grid, all operands land fully in VMEM (tiny at these
    # sizes). Only the (B, V_pad) logits go back to HBM.
    # TODO(synk): production V~30k -> tile fc_w / lstm1-layer-0 W_ih over a grid
    #             axis with BlockSpecs and recompute vmem_limit_bytes from the
    #             double-buffered tile footprints per chip generation.
    out_pad = pl.pallas_call(
        kernel,
        out_shape=jax.ShapeDtypeStruct((B, V_pad), jnp.float32),
        compiler_params=pltpu.CompilerParams(vmem_limit_bytes=32 * 1024 * 1024),
    )(x_seq_tm, x_quant_tm, *flat_weights, prepared["fc_w"], prepared["fc_b"])
    return out_pad[:, :V]


# ----------------------------------------------------------------------------
# Pure-JAX reference (lax.scan) for correctness checking.
# ----------------------------------------------------------------------------
def _ref_lstm_layer(x_tm, w_ih, w_hh, b_ih, b_hh):
    T, B, _ = x_tm.shape
    H = w_hh.shape[1]

    def step(carry, x_t):
        h, c = carry
        gates = x_t @ w_ih.T + h @ w_hh.T + b_ih + b_hh
        i, f, g, o = jnp.split(gates, 4, axis=-1)
        c = jax.nn.sigmoid(f) * c + jax.nn.sigmoid(i) * jnp.tanh(g)
        h = jax.nn.sigmoid(o) * jnp.tanh(c)
        return (h, c), h

    init = (jnp.zeros((B, H), jnp.float32), jnp.zeros((B, H), jnp.float32))
    _, out = lax.scan(step, init, x_tm)
    return out


def _ref_forward(params, x_seq, x_quant):
    h = jnp.transpose(x_seq, (1, 0, 2))
    for p in params["lstm0"]:
        h = _ref_lstm_layer(h, *p)
    out0_last = h[-1]
    h = x_quant[:, None, :]
    for p in params["lstm1"]:
        h = _ref_lstm_layer(h, *p)
    out1 = h[:, 0, :]
    multi = jnp.concatenate([out0_last, out1], axis=-1)
    return multi @ params["fc_w"].T + params["fc_b"]


# ----------------------------------------------------------------------------
# Deterministic parameter init (PyTorch LSTM/Linear uniform(-1/sqrt(H), 1/sqrt(H)))
# ----------------------------------------------------------------------------
def init_params(key, hidden_size, num_layers, vocab_size, embedding_dim):
    k = 1.0 / np.sqrt(hidden_size)

    def uinit(key, shape):
        return jax.random.uniform(key, shape, jnp.float32, -k, k)

    def make_lstm(key, input_size):
        layers = []
        in_sz = input_size
        for _ in range(num_layers):
            key, k1, k2, k3, k4 = jax.random.split(key, 5)
            layers.append((
                uinit(k1, (4 * hidden_size, in_sz)),        # w_ih
                uinit(k2, (4 * hidden_size, hidden_size)),  # w_hh
                uinit(k3, (4 * hidden_size,)),              # b_ih
                uinit(k4, (4 * hidden_size,)),              # b_hh
            ))
            in_sz = hidden_size
        return key, layers

    key, lstm0 = make_lstm(key, embedding_dim)
    key, lstm1 = make_lstm(key, vocab_size)
    key, kw, kb = jax.random.split(key, 3)
    kf = 1.0 / np.sqrt(2 * hidden_size)
    fc_w = jax.random.uniform(kw, (vocab_size, 2 * hidden_size), jnp.float32, -kf, kf)
    fc_b = jax.random.uniform(kb, (vocab_size,), jnp.float32, -kf, kf)
    return {"lstm0": lstm0, "lstm1": lstm1, "fc_w": fc_w, "fc_b": fc_b}


if __name__ == "__main__":
    B, T = 2, 8
    hidden_size = 128          # module default; multiple of 128 -> aligned gate slices
    num_layers = 2
    vocab_size = 16
    embedding_dim = 32

    key = jax.random.PRNGKey(0)
    kp, kx, kq = jax.random.split(key, 3)
    raw_params = init_params(kp, hidden_size, num_layers, vocab_size, embedding_dim)
    params = prepare_params(raw_params)            # one-time weight packing (f32 demo)
    # TODO(synk): production on v6e/v7x -> prepare_params(..., compute_dtype=jnp.bfloat16)
    #             (f32 accumulation/state kept inside the kernel).

    x_seq = jax.random.normal(kx, (B, T, embedding_dim), jnp.float32)
    x_quant = jax.random.normal(kq, (B, vocab_size), jnp.float32)

    logits = jax.block_until_ready(log_anomaly_forward(params, x_seq, x_quant))

    ref = jax.block_until_ready(_ref_forward(raw_params, x_seq, x_quant))
    np.testing.assert_allclose(np.asarray(logits), np.asarray(ref),
                               rtol=1e-4, atol=1e-4)
    assert logits.shape == (B, vocab_size)
    print("KERNEL_OK")
</pallas_src>

<mosaic_0001>
module attributes {stable_mosaic.version = 11 : i64} {
  func.func @_log_anomaly_kernel(%arg0: memref<8x2x32xf32, #tpu.memory_space<vmem>>, %arg1: memref<2x1x16xf32, #tpu.memory_space<vmem>>, %arg2: memref<32x512xf32, #tpu.memory_space<vmem>>, %arg3: memref<128x512xf32, #tpu.memory_space<vmem>>, %arg4: memref<1x512xf32, #tpu.memory_space<vmem>>, %arg5: memref<128x512xf32, #tpu.memory_space<vmem>>, %arg6: memref<128x512xf32, #tpu.memory_space<vmem>>, %arg7: memref<1x512xf32, #tpu.memory_space<vmem>>, %arg8: memref<16x512xf32, #tpu.memory_space<vmem>>, %arg9: memref<128x512xf32, #tpu.memory_space<vmem>>, %arg10: memref<1x512xf32, #tpu.memory_space<vmem>>, %arg11: memref<128x512xf32, #tpu.memory_space<vmem>>, %arg12: memref<128x512xf32, #tpu.memory_space<vmem>>, %arg13: memref<1x512xf32, #tpu.memory_space<vmem>>, %arg14: memref<256x128xf32, #tpu.memory_space<vmem>>, %arg15: memref<1x128xf32, #tpu.memory_space<vmem>>, %arg16: memref<2x128xf32, #tpu.memory_space<vmem>>) attributes {dimension_semantics = [], scalar_prefetch = 0 : i64, scratch_operands = 0 : i64, tpu.core_type = #tpu.core_type<tc>} {
    %c0 = arith.constant 0 : index
    %c0_0 = arith.constant 0 : index
    %c0_1 = arith.constant 0 : index
    %0 = vector.load %arg0[%c0, %c0_0, %c0_1] : memref<8x2x32xf32, #tpu.memory_space<vmem>>, vector<8x2x32xf32>
    %c0_2 = arith.constant 0 : index
    %c0_3 = arith.constant 0 : index
    %1 = vector.load %arg2[%c0_2, %c0_3] : memref<32x512xf32, #tpu.memory_space<vmem>>, vector<32x512xf32>
    %c0_4 = arith.constant 0 : index
    %c0_5 = arith.constant 0 : index
    %2 = vector.load %arg3[%c0_4, %c0_5] : memref<128x512xf32, #tpu.memory_space<vmem>>, vector<128x512xf32>
    %3 = vector.shape_cast %0 : vector<8x2x32xf32> to vector<16x32xf32>
    %cst = arith.constant dense<0.000000e+00> : vector<16x512xf32>
    %4 = tpu.matmul %3, %1, %cst {dimension_numbers = #tpu.dot_dimension_numbers<[1], [0], [0], [1], [0, 0, 1, 1], [], []>} : vector<16x32xf32>, vector<32x512xf32>, vector<16x512xf32> -> vector<16x512xf32>
    %c0_6 = arith.constant 0 : index
    %c0_7 = arith.constant 0 : index
    %5 = vector.load %arg4[%c0_6, %c0_7] : memref<1x512xf32, #tpu.memory_space<vmem>>, vector<1x512xf32>
    %6 = vector.broadcast %5 : vector<1x512xf32> to vector<16x512xf32>
    %7 = arith.addf %4, %6 : vector<16x512xf32>
    %8 = vector.shape_cast %7 : vector<16x512xf32> to vector<8x2x512xf32>
    %cst_8 = arith.constant 0.000000e+00 : f32
    %9 = vector.broadcast %cst_8 : f32 to vector<2x128xf32>
    %cst_9 = arith.constant 0.000000e+00 : f32
    %10 = vector.broadcast %cst_9 : f32 to vector<2x128xf32>
    %11 = vector.extract_strided_slice %8 {offsets = [0, 0, 0], sizes = [1, 2, 512], strides = [1, 1, 1]} : vector<8x2x512xf32> to vector<1x2x512xf32>
    %12 = vector.shape_cast %11 : vector<1x2x512xf32> to vector<2x512xf32>
    %cst_10 = arith.constant dense<0.000000e+00> : vector<2x512xf32>
    %13 = tpu.matmul %9, %2, %cst_10 {dimension_numbers = #tpu.dot_dimension_numbers<[1], [0], [0], [1], [0, 0, 1, 1], [], []>} : vector<2x128xf32>, vector<128x512xf32>, vector<2x512xf32> -> vector<2x512xf32>
    %14 = arith.addf %12, %13 : vector<2x512xf32>
    %15 = vector.extract_strided_slice %14 {offsets = [0, 0], sizes = [2, 128], strides = [1, 1]} : vector<2x512xf32> to vector<2x128xf32>
    %16 = arith.negf %15 : vector<2x128xf32>
    %17 = math.exp %16 : vector<2x128xf32>
    %cst_11 = arith.constant 1.000000e+00 : f32
    %18 = vector.broadcast %cst_11 : f32 to vector<2x128xf32>
    %19 = arith.addf %18, %17 : vector<2x128xf32>
    %20 = arith.divf %18, %19 : vector<2x128xf32>
    %21 = vector.extract_strided_slice %14 {offsets = [0, 128], sizes = [2, 128], strides = [1, 1]} : vector<2x512xf32> to vector<2x128xf32>
    %22 = arith.negf %21 : vector<2x128xf32>
    %23 = math.exp %22 : vector<2x128xf32>
    %cst_12 = arith.constant 1.000000e+00 : f32
    %24 = vector.broadcast %cst_12 : f32 to vector<2x128xf32>
    %25 = arith.addf %24, %23 : vector<2x128xf32>
    %26 = arith.divf %24, %25 : vector<2x128xf32>
    %27 = vector.extract_strided_slice %14 {offsets = [0, 256], sizes = [2, 128], strides = [1, 1]} : vector<2x512xf32> to vector<2x128xf32>
    %28 = math.tanh %27 : vector<2x128xf32>
    %29 = vector.extract_strided_slice %14 {offsets = [0, 384], sizes = [2, 128], strides = [1, 1]} : vector<2x512xf32> to vector<2x128xf32>
    %30 = arith.negf %29 : vector<2x128xf32>
    %31 = math.exp %30 : vector<2x128xf32>
    %cst_13 = arith.constant 1.000000e+00 : f32
    %32 = vector.broadcast %cst_13 : f32 to vector<2x128xf32>
    %33 = arith.addf %32, %31 : vector<2x128xf32>
    %34 = arith.divf %32, %33 : vector<2x128xf32>
    %35 = arith.mulf %26, %10 : vector<2x128xf32>
    %36 = arith.mulf %20, %28 : vector<2x128xf32>
    %37 = arith.addf %35, %36 : vector<2x128xf32>
    %38 = math.tanh %37 : vector<2x128xf32>
    %39 = arith.mulf %34, %38 : vector<2x128xf32>
    %40 = vector.extract_strided_slice %8 {offsets = [1, 0, 0], sizes = [1, 2, 512], strides = [1, 1, 1]} : vector<8x2x512xf32> to vector<1x2x512xf32>
    %41 = vector.shape_cast %40 : vector<1x2x512xf32> to vector<2x512xf32>
    %cst_14 = arith.constant dense<0.000000e+00> : vector<2x512xf32>
    %42 = tpu.matmul %39, %2, %cst_14 {dimension_numbers = #tpu.dot_dimension_numbers<[1], [0], [0], [1], [0, 0, 1, 1], [], []>} : vector<2x128xf32>, vector<128x512xf32>, vector<2x512xf32> -> vector<2x512xf32>
    %43 = arith.addf %41, %42 : vector<2x512xf32>
    %44 = vector.extract_strided_slice %43 {offsets = [0, 0], sizes = [2, 128], strides = [1, 1]} : vector<2x512xf32> to vector<2x128xf32>
    %45 = arith.negf %44 : vector<2x128xf32>
    %46 = math.exp %45 : vector<2x128xf32>
    %cst_15 = arith.constant 1.000000e+00 : f32
    %47 = vector.broadcast %cst_15 : f32 to vector<2x128xf32>
    %48 = arith.addf %47, %46 : vector<2x128xf32>
    %49 = arith.divf %47, %48 : vector<2x128xf32>
    %50 = vector.extract_strided_slice %43 {offsets = [0, 128], sizes = [2, 128], strides = [1, 1]} : vector<2x512xf32> to vector<2x128xf32>
    %51 = arith.negf %50 : vector<2x128xf32>
    %52 = math.exp %51 : vector<2x128xf32>
    %cst_16 = arith.constant 1.000000e+00 : f32
    %53 = vector.broadcast %cst_16 : f32 to vector<2x128xf32>
    %54 = arith.addf %53, %52 : vector<2x128xf32>
    %55 = arith.divf %53, %54 : vector<2x128xf32>
    %56 = vector.extract_strided_slice %43 {offsets = [0, 256], sizes = [2, 128], strides = [1, 1]} : vector<2x512xf32> to vector<2x128xf32>
    %57 = math.tanh %56 : vector<2x128xf32>
    %58 = vector.extract_strided_slice %43 {offsets = [0, 384], sizes = [2, 128], strides = [1, 1]} : vector<2x512xf32> to vector<2x128xf32>
    %59 = arith.negf %58 : vector<2x128xf32>
    %60 = math.exp %59 : vector<2x128xf32>
    %cst_17 = arith.constant 1.000000e+00 : f32
    %61 = vector.broadcast %cst_17 : f32 to vector<2x128xf32>
    %62 = arith.addf %61, %60 : vector<2x128xf32>
    %63 = arith.divf %61, %62 : vector<2x128xf32>
    %64 = arith.mulf %55, %37 : vector<2x128xf32>
    %65 = arith.mulf %49, %57 : vector<2x128xf32>
    %66 = arith.addf %64, %65 : vector<2x128xf32>
    %67 = math.tanh %66 : vector<2x128xf32>
    %68 = arith.mulf %63, %67 : vector<2x128xf32>
    %69 = vector.extract_strided_slice %8 {offsets = [2, 0, 0], sizes = [1, 2, 512], strides = [1, 1, 1]} : vector<8x2x512xf32> to vector<1x2x512xf32>
    %70 = vector.shape_cast %69 : vector<1x2x512xf32> to vector<2x512xf32>
    %cst_18 = arith.constant dense<0.000000e+00> : vector<2x512xf32>
    %71 = tpu.matmul %68, %2, %cst_18 {dimension_numbers = #tpu.dot_dimension_numbers<[1], [0], [0], [1], [0, 0, 1, 1], [], []>} : vector<2x128xf32>, vector<128x512xf32>, vector<2x512xf32> -> vector<2x512xf32>
    %72 = arith.addf %70, %71 : vector<2x512xf32>
    %73 = vector.extract_strided_slice %72 {offsets = [0, 0], sizes = [2, 128], strides = [1, 1]} : vector<2x512xf32> to vector<2x128xf32>
    %74 = arith.negf %73 : vector<2x128xf32>
    %75 = math.exp %74 : vector<2x128xf32>
    %cst_19 = arith.constant 1.000000e+00 : f32
    %76 = vector.broadcast %cst_19 : f32 to vector<2x128xf32>
    %77 = arith.addf %76, %75 : vector<2x128xf32>
    %78 = arith.divf %76, %77 : vector<2x128xf32>
    %79 = vector.extract_strided_slice %72 {offsets = [0, 128], sizes = [2, 128], strides = [1, 1]} : vector<2x512xf32> to vector<2x128xf32>
    %80 = arith.negf %79 : vector<2x128xf32>
    %81 = math.exp %80 : vector<2x128xf32>
    %cst_20 = arith.constant 1.000000e+00 : f32
    %82 = vector.broadcast %cst_20 : f32 to vector<2x128xf32>
    %83 = arith.addf %82, %81 : vector<2x128xf32>
    %84 = arith.divf %82, %83 : vector<2x128xf32>
    %85 = vector.extract_strided_slice %72 {offsets = [0, 256], sizes = [2, 128], strides = [1, 1]} : vector<2x512xf32> to vector<2x128xf32>
    %86 = math.tanh %85 : vector<2x128xf32>
    %87 = vector.extract_strided_slice %72 {offsets = [0, 384], sizes = [2, 128], strides = [1, 1]} : vector<2x512xf32> to vector<2x128xf32>
    %88 = arith.negf %87 : vector<2x128xf32>
    %89 = math.exp %88 : vector<2x128xf32>
    %cst_21 = arith.constant 1.000000e+00 : f32
    %90 = vector.broadcast %cst_21 : f32 to vector<2x128xf32>
    %91 = arith.addf %90, %89 : vector<2x128xf32>
    %92 = arith.divf %90, %91 : vector<2x128xf32>
    %93 = arith.mulf %84, %66 : vector<2x128xf32>
    %94 = arith.mulf %78, %86 : vector<2x128xf32>
    %95 = arith.addf %93, %94 : vector<2x128xf32>
    %96 = math.tanh %95 : vector<2x128xf32>
    %97 = arith.mulf %92, %96 : vector<2x128xf32>
    %98 = vector.extract_strided_slice %8 {offsets = [3, 0, 0], sizes = [1, 2, 512], strides = [1, 1, 1]} : vector<8x2x512xf32> to vector<1x2x512xf32>
    %99 = vector.shape_cast %98 : vector<1x2x512xf32> to vector<2x512xf32>
    %cst_22 = arith.constant dense<0.000000e+00> : vector<2x512xf32>
    %100 = tpu.matmul %97, %2, %cst_22 {dimension_numbers = #tpu.dot_dimension_numbers<[1], [0], [0], [1], [0, 0, 1, 1], [], []>} : vector<2x128xf32>, vector<128x512xf32>, vector<2x512xf32> -> vector<2x512xf32>
    %101 = arith.addf %99, %100 : vector<2x512xf32>
    %102 = vector.extract_strided_slice %101 {offsets = [0, 0], sizes = [2, 128], strides = [1, 1]} : vector<2x512xf32> to vector<2x128xf32>
    %103 = arith.negf %102 : vector<2x128xf32>
    %104 = math.exp %103 : vector<2x128xf32>
    %cst_23 = arith.constant 1.000000e+00 : f32
    %105 = vector.broadcast %cst_23 : f32 to vector<2x128xf32>
    %106 = arith.addf %105, %104 : vector<2x128xf32>
    %107 = arith.divf %105, %106 : vector<2x128xf32>
    %108 = vector.extract_strided_slice %101 {offsets = [0, 128], sizes = [2, 128], strides = [1, 1]} : vector<2x512xf32> to vector<2x128xf32>
    %109 = arith.negf %108 : vector<2x128xf32>
    %110 = math.exp %109 : vector<2x128xf32>
    %cst_24 = arith.constant 1.000000e+00 : f32
    %111 = vector.broadcast %cst_24 : f32 to vector<2x128xf32>
    %112 = arith.addf %111, %110 : vector<2x128xf32>
    %113 = arith.divf %111, %112 : vector<2x128xf32>
    %114 = vector.extract_strided_slice %101 {offsets = [0, 256], sizes = [2, 128], strides = [1, 1]} : vector<2x512xf32> to vector<2x128xf32>
    %115 = math.tanh %114 : vector<2x128xf32>
    %116 = vector.extract_strided_slice %101 {offsets = [0, 384], sizes = [2, 128], strides = [1, 1]} : vector<2x512xf32> to vector<2x128xf32>
    %117 = arith.negf %116 : vector<2x128xf32>
    %118 = math.exp %117 : vector<2x128xf32>
    %cst_25 = arith.constant 1.000000e+00 : f32
    %119 = vector.broadcast %cst_25 : f32 to vector<2x128xf32>
    %120 = arith.addf %119, %118 : vector<2x128xf32>
    %121 = arith.divf %119, %120 : vector<2x128xf32>
    %122 = arith.mulf %113, %95 : vector<2x128xf32>
    %123 = arith.mulf %107, %115 : vector<2x128xf32>
    %124 = arith.addf %122, %123 : vector<2x128xf32>
    %125 = math.tanh %124 : vector<2x128xf32>
    %126 = arith.mulf %121, %125 : vector<2x128xf32>
    %127 = vector.extract_strided_slice %8 {offsets = [4, 0, 0], sizes = [1, 2, 512], strides = [1, 1, 1]} : vector<8x2x512xf32> to vector<1x2x512xf32>
    %128 = vector.shape_cast %127 : vector<1x2x512xf32> to vector<2x512xf32>
    %cst_26 = arith.constant dense<0.000000e+00> : vector<2x512xf32>
    %129 = tpu.matmul %126, %2, %cst_26 {dimension_numbers = #tpu.dot_dimension_numbers<[1], [0], [0], [1], [0, 0, 1, 1], [], []>} : vector<2x128xf32>, vector<128x512xf32>, vector<2x512xf32> -> vector<2x512xf32>
    %130 = arith.addf %128, %129 : vector<2x512xf32>
    %131 = vector.extract_strided_slice %130 {offsets = [0, 0], sizes = [2, 128], strides = [1, 1]} : vector<2x512xf32> to vector<2x128xf32>
    %132 = arith.negf %131 : vector<2x128xf32>
    %133 = math.exp %132 : vector<2x128xf32>
    %cst_27 = arith.constant 1.000000e+00 : f32
    %134 = vector.broadcast %cst_27 : f32 to vector<2x128xf32>
    %135 = arith.addf %134, %133 : vector<2x128xf32>
    %136 = arith.divf %134, %135 : vector<2x128xf32>
    %137 = vector.extract_strided_slice %130 {offsets = [0, 128], sizes = [2, 128], strides = [1, 1]} : vector<2x512xf32> to vector<2x128xf32>
    %138 = arith.negf %137 : vector<2x128xf32>
    %139 = math.exp %138 : vector<2x128xf32>
    %cst_28 = arith.constant 1.000000e+00 : f32
    %140 = vector.broadcast %cst_28 : f32 to vector<2x128xf32>
    %141 = arith.addf %140, %139 : vector<2x128xf32>
    %142 = arith.divf %140, %141 : vector<2x128xf32>
    %143 = vector.extract_strided_slice %130 {offsets = [0, 256], sizes = [2, 128], strides = [1, 1]} : vector<2x512xf32> to vector<2x128xf32>
    %144 = math.tanh %143 : vector<2x128xf32>
    %145 = vector.extract_strided_slice %130 {offsets = [0, 384], sizes = [2, 128], strides = [1, 1]} : vector<2x512xf32> to vector<2x128xf32>
    %146 = arith.negf %145 : vector<2x128xf32>
    %147 = math.exp %146 : vector<2x128xf32>
    %cst_29 = arith.constant 1.000000e+00 : f32
    %148 = vector.broadcast %cst_29 : f32 to vector<2x128xf32>
    %149 = arith.addf %148, %147 : vector<2x128xf32>
    %150 = arith.divf %148, %149 : vector<2x128xf32>
    %151 = arith.mulf %142, %124 : vector<2x128xf32>
    %152 = arith.mulf %136, %144 : vector<2x128xf32>
    %153 = arith.addf %151, %152 : vector<2x128xf32>
    %154 = math.tanh %153 : vector<2x128xf32>
    %155 = arith.mulf %150, %154 : vector<2x128xf32>
    %156 = vector.extract_strided_slice %8 {offsets = [5, 0, 0], sizes = [1, 2, 512], strides = [1, 1, 1]} : vector<8x2x512xf32> to vector<1x2x512xf32>
    %157 = vector.shape_cast %156 : vector<1x2x512xf32> to vector<2x512xf32>
    %cst_30 = arith.constant dense<0.000000e+00> : vector<2x512xf32>
    %158 = tpu.matmul %155, %2, %cst_30 {dimension_numbers = #tpu.dot_dimension_numbers<[1], [0], [0], [1], [0, 0, 1, 1], [], []>} : vector<2x128xf32>, vector<128x512xf32>, vector<2x512xf32> -> vector<2x512xf32>
    %159 = arith.addf %157, %158 : vector<2x512xf32>
    %160 = vector.extract_strided_slice %159 {offsets = [0, 0], sizes = [2, 128], strides = [1, 1]} : vector<2x512xf32> to vector<2x128xf32>
    %161 = arith.negf %160 : vector<2x128xf32>
    %162 = math.exp %161 : vector<2x128xf32>
    %cst_31 = arith.constant 1.000000e+00 : f32
    %163 = vector.broadcast %cst_31 : f32 to vector<2x128xf32>
    %164 = arith.addf %163, %162 : vector<2x128xf32>
    %165 = arith.divf %163, %164 : vector<2x128xf32>
    %166 = vector.extract_strided_slice %159 {offsets = [0, 128], sizes = [2, 128], strides = [1, 1]} : vector<2x512xf32> to vector<2x128xf32>
    %167 = arith.negf %166 : vector<2x128xf32>
    %168 = math.exp %167 : vector<2x128xf32>
    %cst_32 = arith.constant 1.000000e+00 : f32
    %169 = vector.broadcast %cst_32 : f32 to vector<2x128xf32>
    %170 = arith.addf %169, %168 : vector<2x128xf32>
    %171 = arith.divf %169, %170 : vector<2x128xf32>
    %172 = vector.extract_strided_slice %159 {offsets = [0, 256], sizes = [2, 128], strides = [1, 1]} : vector<2x512xf32> to vector<2x128xf32>
    %173 = math.tanh %172 : vector<2x128xf32>
    %174 = vector.extract_strided_slice %159 {offsets = [0, 384], sizes = [2, 128], strides = [1, 1]} : vector<2x512xf32> to vector<2x128xf32>
    %175 = arith.negf %174 : vector<2x128xf32>
    %176 = math.exp %175 : vector<2x128xf32>
    %cst_33 = arith.constant 1.000000e+00 : f32
    %177 = vector.broadcast %cst_33 : f32 to vector<2x128xf32>
    %178 = arith.addf %177, %176 : vector<2x128xf32>
    %179 = arith.divf %177, %178 : vector<2x128xf32>
    %180 = arith.mulf %171, %153 : vector<2x128xf32>
    %181 = arith.mulf %165, %173 : vector<2x128xf32>
    %182 = arith.addf %180, %181 : vector<2x128xf32>
    %183 = math.tanh %182 : vector<2x128xf32>
    %184 = arith.mulf %179, %183 : vector<2x128xf32>
    %185 = vector.extract_strided_slice %8 {offsets = [6, 0, 0], sizes = [1, 2, 512], strides = [1, 1, 1]} : vector<8x2x512xf32> to vector<1x2x512xf32>
    %186 = vector.shape_cast %185 : vector<1x2x512xf32> to vector<2x512xf32>
    %cst_34 = arith.constant dense<0.000000e+00> : vector<2x512xf32>
    %187 = tpu.matmul %184, %2, %cst_34 {dimension_numbers = #tpu.dot_dimension_numbers<[1], [0], [0], [1], [0, 0, 1, 1], [], []>} : vector<2x128xf32>, vector<128x512xf32>, vector<2x512xf32> -> vector<2x512xf32>
    %188 = arith.addf %186, %187 : vector<2x512xf32>
    %189 = vector.extract_strided_slice %188 {offsets = [0, 0], sizes = [2, 128], strides = [1, 1]} : vector<2x512xf32> to vector<2x128xf32>
    %190 = arith.negf %189 : vector<2x128xf32>
    %191 = math.exp %190 : vector<2x128xf32>
    %cst_35 = arith.constant 1.000000e+00 : f32
    %192 = vector.broadcast %cst_35 : f32 to vector<2x128xf32>
    %193 = arith.addf %192, %191 : vector<2x128xf32>
    %194 = arith.divf %192, %193 : vector<2x128xf32>
    %195 = vector.extract_strided_slice %188 {offsets = [0, 128], sizes = [2, 128], strides = [1, 1]} : vector<2x512xf32> to vector<2x128xf32>
    %196 = arith.negf %195 : vector<2x128xf32>
    %197 = math.exp %196 : vector<2x128xf32>
    %cst_36 = arith.constant 1.000000e+00 : f32
    %198 = vector.broadcast %cst_36 : f32 to vector<2x128xf32>
    %199 = arith.addf %198, %197 : vector<2x128xf32>
    %200 = arith.divf %198, %199 : vector<2x128xf32>
    %201 = vector.extract_strided_slice %188 {offsets = [0, 256], sizes = [2, 128], strides = [1, 1]} : vector<2x512xf32> to vector<2x128xf32>
    %202 = math.tanh %201 : vector<2x128xf32>
    %203 = vector.extract_strided_slice %188 {offsets = [0, 384], sizes = [2, 128], strides = [1, 1]} : vector<2x512xf32> to vector<2x128xf32>
    %204 = arith.negf %203 : vector<2x128xf32>
    %205 = math.exp %204 : vector<2x128xf32>
    %cst_37 = arith.constant 1.000000e+00 : f32
    %206 = vector.broadcast %cst_37 : f32 to vector<2x128xf32>
    %207 = arith.addf %206, %205 : vector<2x128xf32>
    %208 = arith.divf %206, %207 : vector<2x128xf32>
    %209 = arith.mulf %200, %182 : vector<2x128xf32>
    %210 = arith.mulf %194, %202 : vector<2x128xf32>
    %211 = arith.addf %209, %210 : vector<2x128xf32>
    %212 = math.tanh %211 : vector<2x128xf32>
    %213 = arith.mulf %208, %212 : vector<2x128xf32>
    %214 = vector.extract_strided_slice %8 {offsets = [7, 0, 0], sizes = [1, 2, 512], strides = [1, 1, 1]} : vector<8x2x512xf32> to vector<1x2x512xf32>
    %215 = vector.shape_cast %214 : vector<1x2x512xf32> to vector<2x512xf32>
    %cst_38 = arith.constant dense<0.000000e+00> : vector<2x512xf32>
    %216 = tpu.matmul %213, %2, %cst_38 {dimension_numbers = #tpu.dot_dimension_numbers<[1], [0], [0], [1], [0, 0, 1, 1], [], []>} : vector<2x128xf32>, vector<128x512xf32>, vector<2x512xf32> -> vector<2x512xf32>
    %217 = arith.addf %215, %216 : vector<2x512xf32>
    %218 = vector.extract_strided_slice %217 {offsets = [0, 0], sizes = [2, 128], strides = [1, 1]} : vector<2x512xf32> to vector<2x128xf32>
    %219 = arith.negf %218 : vector<2x128xf32>
    %220 = math.exp %219 : vector<2x128xf32>
    %cst_39 = arith.constant 1.000000e+00 : f32
    %221 = vector.broadcast %cst_39 : f32 to vector<2x128xf32>
    %222 = arith.addf %221, %220 : vector<2x128xf32>
    %223 = arith.divf %221, %222 : vector<2x128xf32>
    %224 = vector.extract_strided_slice %217 {offsets = [0, 128], sizes = [2, 128], strides = [1, 1]} : vector<2x512xf32> to vector<2x128xf32>
    %225 = arith.negf %224 : vector<2x128xf32>
    %226 = math.exp %225 : vector<2x128xf32>
    %cst_40 = arith.constant 1.000000e+00 : f32
    %227 = vector.broadcast %cst_40 : f32 to vector<2x128xf32>
    %228 = arith.addf %227, %226 : vector<2x128xf32>
    %229 = arith.divf %227, %228 : vector<2x128xf32>
    %230 = vector.extract_strided_slice %217 {offsets = [0, 256], sizes = [2, 128], strides = [1, 1]} : vector<2x512xf32> to vector<2x128xf32>
    %231 = math.tanh %230 : vector<2x128xf32>
    %232 = vector.extract_strided_slice %217 {offsets = [0, 384], sizes = [2, 128], strides = [1, 1]} : vector<2x512xf32> to vector<2x128xf32>
    %233 = arith.negf %232 : vector<2x128xf32>
    %234 = math.exp %233 : vector<2x128xf32>
    %cst_41 = arith.constant 1.000000e+00 : f32
    %235 = vector.broadcast %cst_41 : f32 to vector<2x128xf32>
    %236 = arith.addf %235, %234 : vector<2x128xf32>
    %237 = arith.divf %235, %236 : vector<2x128xf32>
    %238 = arith.mulf %229, %211 : vector<2x128xf32>
    %239 = arith.mulf %223, %231 : vector<2x128xf32>
    %240 = arith.addf %238, %239 : vector<2x128xf32>
    %241 = math.tanh %240 : vector<2x128xf32>
    %242 = arith.mulf %237, %241 : vector<2x128xf32>
    %243 = vector.shape_cast %39 : vector<2x128xf32> to vector<1x2x128xf32>
    %244 = vector.shape_cast %68 : vector<2x128xf32> to vector<1x2x128xf32>
    %245 = vector.shape_cast %97 : vector<2x128xf32> to vector<1x2x128xf32>
    %246 = vector.shape_cast %126 : vector<2x128xf32> to vector<1x2x128xf32>
    %247 = vector.shape_cast %155 : vector<2x128xf32> to vector<1x2x128xf32>
    %248 = vector.shape_cast %184 : vector<2x128xf32> to vector<1x2x128xf32>
    %249 = vector.shape_cast %213 : vector<2x128xf32> to vector<1x2x128xf32>
    %250 = vector.shape_cast %242 : vector<2x128xf32> to vector<1x2x128xf32>
    %251 = tpu.concatenate %243, %244, %245, %246, %247, %248, %249, %250 in 0 : vector<1x2x128xf32>, vector<1x2x128xf32>, vector<1x2x128xf32>, vector<1x2x128xf32>, vector<1x2x128xf32>, vector<1x2x128xf32>, vector<1x2x128xf32>, vector<1x2x128xf32> -> vector<8x2x128xf32>
    %c0_42 = arith.constant 0 : index
    %c0_43 = arith.constant 0 : index
    %252 = vector.load %arg5[%c0_42, %c0_43] : memref<128x512xf32, #tpu.memory_space<vmem>>, vector<128x512xf32>
    %c0_44 = arith.constant 0 : index
    %c0_45 = arith.constant 0 : index
    %253 = vector.load %arg6[%c0_44, %c0_45] : memref<128x512xf32, #tpu.memory_space<vmem>>, vector<128x512xf32>
    %254 = vector.shape_cast %251 : vector<8x2x128xf32> to vector<16x128xf32>
    %cst_46 = arith.constant dense<0.000000e+00> : vector<16x512xf32>
    %255 = tpu.matmul %254, %252, %cst_46 {dimension_numbers = #tpu.dot_dimension_numbers<[1], [0], [0], [1], [0, 0, 1, 1], [], []>} : vector<16x128xf32>, vector<128x512xf32>, vector<16x512xf32> -> vector<16x512xf32>
    %c0_47 = arith.constant 0 : index
    %c0_48 = arith.constant 0 : index
    %256 = vector.load %arg7[%c0_47, %c0_48] : memref<1x512xf32, #tpu.memory_space<vmem>>, vector<1x512xf32>
    %257 = vector.broadcast %256 : vector<1x512xf32> to vector<16x512xf32>
    %258 = arith.addf %255, %257 : vector<16x512xf32>
    %259 = vector.shape_cast %258 : vector<16x512xf32> to vector<8x2x512xf32>
    %cst_49 = arith.constant 0.000000e+00 : f32
    %260 = vector.broadcast %cst_49 : f32 to vector<2x128xf32>
    %cst_50 = arith.constant 0.000000e+00 : f32
    %261 = vector.broadcast %cst_50 : f32 to vector<2x128xf32>
    %262 = vector.extract_strided_slice %259 {offsets = [0, 0, 0], sizes = [1, 2, 512], strides = [1, 1, 1]} : vector<8x2x512xf32> to vector<1x2x512xf32>
    %263 = vector.shape_cast %262 : vector<1x2x512xf32> to vector<2x512xf32>
    %cst_51 = arith.constant dense<0.000000e+00> : vector<2x512xf32>
    %264 = tpu.matmul %260, %253, %cst_51 {dimension_numbers = #tpu.dot_dimension_numbers<[1], [0], [0], [1], [0, 0, 1, 1], [], []>} : vector<2x128xf32>, vector<128x512xf32>, vector<2x512xf32> -> vector<2x512xf32>
    %265 = arith.addf %263, %264 : vector<2x512xf32>
    %266 = vector.extract_strided_slice %265 {offsets = [0, 0], sizes = [2, 128], strides = [1, 1]} : vector<2x512xf32> to vector<2x128xf32>
    %267 = arith.negf %266 : vector<2x128xf32>
    %268 = math.exp %267 : vector<2x128xf32>
    %cst_52 = arith.constant 1.000000e+00 : f32
    %269 = vector.broadcast %cst_52 : f32 to vector<2x128xf32>
    %270 = arith.addf %269, %268 : vector<2x128xf32>
    %271 = arith.divf %269, %270 : vector<2x128xf32>
    %272 = vector.extract_strided_slice %265 {offsets = [0, 128], sizes = [2, 128], strides = [1, 1]} : vector<2x512xf32> to vector<2x128xf32>
    %273 = arith.negf %272 : vector<2x128xf32>
    %274 = math.exp %273 : vector<2x128xf32>
    %cst_53 = arith.constant 1.000000e+00 : f32
    %275 = vector.broadcast %cst_53 : f32 to vector<2x128xf32>
    %276 = arith.addf %275, %274 : vector<2x128xf32>
    %277 = arith.divf %275, %276 : vector<2x128xf32>
    %278 = vector.extract_strided_slice %265 {offsets = [0, 256], sizes = [2, 128], strides = [1, 1]} : vector<2x512xf32> to vector<2x128xf32>
    %279 = math.tanh %278 : vector<2x128xf32>
    %280 = vector.extract_strided_slice %265 {offsets = [0, 384], sizes = [2, 128], strides = [1, 1]} : vector<2x512xf32> to vector<2x128xf32>
    %281 = arith.negf %280 : vector<2x128xf32>
    %282 = math.exp %281 : vector<2x128xf32>
    %cst_54 = arith.constant 1.000000e+00 : f32
    %283 = vector.broadcast %cst_54 : f32 to vector<2x128xf32>
    %284 = arith.addf %283, %282 : vector<2x128xf32>
    %285 = arith.divf %283, %284 : vector<2x128xf32>
    %286 = arith.mulf %277, %261 : vector<2x128xf32>
    %287 = arith.mulf %271, %279 : vector<2x128xf32>
    %288 = arith.addf %286, %287 : vector<2x128xf32>
    %289 = math.tanh %288 : vector<2x128xf32>
    %290 = arith.mulf %285, %289 : vector<2x128xf32>
    %291 = vector.extract_strided_slice %259 {offsets = [1, 0, 0], sizes = [1, 2, 512], strides = [1, 1, 1]} : vector<8x2x512xf32> to vector<1x2x512xf32>
    %292 = vector.shape_cast %291 : vector<1x2x512xf32> to vector<2x512xf32>
    %cst_55 = arith.constant dense<0.000000e+00> : vector<2x512xf32>
    %293 = tpu.matmul %290, %253, %cst_55 {dimension_numbers = #tpu.dot_dimension_numbers<[1], [0], [0], [1], [0, 0, 1, 1], [], []>} : vector<2x128xf32>, vector<128x512xf32>, vector<2x512xf32> -> vector<2x512xf32>
    %294 = arith.addf %292, %293 : vector<2x512xf32>
    %295 = vector.extract_strided_slice %294 {offsets = [0, 0], sizes = [2, 128], strides = [1, 1]} : vector<2x512xf32> to vector<2x128xf32>
    %296 = arith.negf %295 : vector<2x128xf32>
    %297 = math.exp %296 : vector<2x128xf32>
    %cst_56 = arith.constant 1.000000e+00 : f32
    %298 = vector.broadcast %cst_56 : f32 to vector<2x128xf32>
    %299 = arith.addf %298, %297 : vector<2x128xf32>
    %300 = arith.divf %298, %299 : vector<2x128xf32>
    %301 = vector.extract_strided_slice %294 {offsets = [0, 128], sizes = [2, 128], strides = [1, 1]} : vector<2x512xf32> to vector<2x128xf32>
    %302 = arith.negf %301 : vector<2x128xf32>
    %303 = math.exp %302 : vector<2x128xf32>
    %cst_57 = arith.constant 1.000000e+00 : f32
    %304 = vector.broadcast %cst_57 : f32 to vector<2x128xf32>
    %305 = arith.addf %304, %303 : vector<2x128xf32>
    %306 = arith.divf %304, %305 : vector<2x128xf32>
    %307 = vector.extract_strided_slice %294 {offsets = [0, 256], sizes = [2, 128], strides = [1, 1]} : vector<2x512xf32> to vector<2x128xf32>
    %308 = math.tanh %307 : vector<2x128xf32>
    %309 = vector.extract_strided_slice %294 {offsets = [0, 384], sizes = [2, 128], strides = [1, 1]} : vector<2x512xf32> to vector<2x128xf32>
    %310 = arith.negf %309 : vector<2x128xf32>
    %311 = math.exp %310 : vector<2x128xf32>
    %cst_58 = arith.constant 1.000000e+00 : f32
    %312 = vector.broadcast %cst_58 : f32 to vector<2x128xf32>
    %313 = arith.addf %312, %311 : vector<2x128xf32>
    %314 = arith.divf %312, %313 : vector<2x128xf32>
    %315 = arith.mulf %306, %288 : vector<2x128xf32>
    %316 = arith.mulf %300, %308 : vector<2x128xf32>
    %317 = arith.addf %315, %316 : vector<2x128xf32>
    %318 = math.tanh %317 : vector<2x128xf32>
    %319 = arith.mulf %314, %318 : vector<2x128xf32>
    %320 = vector.extract_strided_slice %259 {offsets = [2, 0, 0], sizes = [1, 2, 512], strides = [1, 1, 1]} : vector<8x2x512xf32> to vector<1x2x512xf32>
    %321 = vector.shape_cast %320 : vector<1x2x512xf32> to vector<2x512xf32>
    %cst_59 = arith.constant dense<0.000000e+00> : vector<2x512xf32>
    %322 = tpu.matmul %319, %253, %cst_59 {dimension_numbers = #tpu.dot_dimension_numbers<[1], [0], [0], [1], [0, 0, 1, 1], [], []>} : vector<2x128xf32>, vector<128x512xf32>, vector<2x512xf32> -> vector<2x512xf32>
    %323 = arith.addf %321, %322 : vector<2x512xf32>
    %324 = vector.extract_strided_slice %323 {offsets = [0, 0], sizes = [2, 128], strides = [1, 1]} : vector<2x512xf32> to vector<2x128xf32>
    %325 = arith.negf %324 : vector<2x128xf32>
    %326 = math.exp %325 : vector<2x128xf32>
    %cst_60 = arith.constant 1.000000e+00 : f32
    %327 = vector.broadcast %cst_60 : f32 to vector<2x128xf32>
    %328 = arith.addf %327, %326 : vector<2x128xf32>
    %329 = arith.divf %327, %328 : vector<2x128xf32>
    %330 = vector.extract_strided_slice %323 {offsets = [0, 128], sizes = [2, 128], strides = [1, 1]} : vector<2x512xf32> to vector<2x128xf32>
    %331 = arith.negf %330 : vector<2x128xf32>
    %332 = math.exp %331 : vector<2x128xf32>
    %cst_61 = arith.constant 1.000000e+00 : f32
    %333 = vector.broadcast %cst_61 : f32 to vector<2x128xf32>
    %334 = arith.addf %333, %332 : vector<2x128xf32>
    %335 = arith.divf %333, %334 : vector<2x128xf32>
    %336 = vector.extract_strided_slice %323 {offsets = [0, 256], sizes = [2, 128], strides = [1, 1]} : vector<2x512xf32> to vector<2x128xf32>
    %337 = math.tanh %336 : vector<2x128xf32>
    %338 = vector.extract_strided_slice %323 {offsets = [0, 384], sizes = [2, 128], strides = [1, 1]} : vector<2x512xf32> to vector<2x128xf32>
    %339 = arith.negf %338 : vector<2x128xf32>
    %340 = math.exp %339 : vector<2x128xf32>
    %cst_62 = arith.constant 1.000000e+00 : f32
    %341 = vector.broadcast %cst_62 : f32 to vector<2x128xf32>
    %342 = arith.addf %341, %340 : vector<2x128xf32>
    %343 = arith.divf %341, %342 : vector<2x128xf32>
    %344 = arith.mulf %335, %317 : vector<2x128xf32>
    %345 = arith.mulf %329, %337 : vector<2x128xf32>
    %346 = arith.addf %344, %345 : vector<2x128xf32>
    %347 = math.tanh %346 : vector<2x128xf32>
    %348 = arith.mulf %343, %347 : vector<2x128xf32>
    %349 = vector.extract_strided_slice %259 {offsets = [3, 0, 0], sizes = [1, 2, 512], strides = [1, 1, 1]} : vector<8x2x512xf32> to vector<1x2x512xf32>
    %350 = vector.shape_cast %349 : vector<1x2x512xf32> to vector<2x512xf32>
    %cst_63 = arith.constant dense<0.000000e+00> : vector<2x512xf32>
    %351 = tpu.matmul %348, %253, %cst_63 {dimension_numbers = #tpu.dot_dimension_numbers<[1], [0], [0], [1], [0, 0, 1, 1], [], []>} : vector<2x128xf32>, vector<128x512xf32>, vector<2x512xf32> -> vector<2x512xf32>
    %352 = arith.addf %350, %351 : vector<2x512xf32>
    %353 = vector.extract_strided_slice %352 {offsets = [0, 0], sizes = [2, 128], strides = [1, 1]} : vector<2x512xf32> to vector<2x128xf32>
    %354 = arith.negf %353 : vector<2x128xf32>
    %355 = math.exp %354 : vector<2x128xf32>
    %cst_64 = arith.constant 1.000000e+00 : f32
    %356 = vector.broadcast %cst_64 : f32 to vector<2x128xf32>
    %357 = arith.addf %356, %355 : vector<2x128xf32>
    %358 = arith.divf %356, %357 : vector<2x128xf32>
    %359 = vector.extract_strided_slice %352 {offsets = [0, 128], sizes = [2, 128], strides = [1, 1]} : vector<2x512xf32> to vector<2x128xf32>
    %360 = arith.negf %359 : vector<2x128xf32>
    %361 = math.exp %360 : vector<2x128xf32>
    %cst_65 = arith.constant 1.000000e+00 : f32
    %362 = vector.broadcast %cst_65 : f32 to vector<2x128xf32>
    %363 = arith.addf %362, %361 : vector<2x128xf32>
    %364 = arith.divf %362, %363 : vector<2x128xf32>
    %365 = vector.extract_strided_slice %352 {offsets = [0, 256], sizes = [2, 128], strides = [1, 1]} : vector<2x512xf32> to vector<2x128xf32>
    %366 = math.tanh %365 : vector<2x128xf32>
    %367 = vector.extract_strided_slice %352 {offsets = [0, 384], sizes = [2, 128], strides = [1, 1]} : vector<2x512xf32> to vector<2x128xf32>
    %368 = arith.negf %367 : vector<2x128xf32>
    %369 = math.exp %368 : vector<2x128xf32>
    %cst_66 = arith.constant 1.000000e+00 : f32
    %370 = vector.broadcast %cst_66 : f32 to vector<2x128xf32>
    %371 = arith.addf %370, %369 : vector<2x128xf32>
    %372 = arith.divf %370, %371 : vector<2x128xf32>
    %373 = arith.mulf %364, %346 : vector<2x128xf32>
    %374 = arith.mulf %358, %366 : vector<2x128xf32>
    %375 = arith.addf %373, %374 : vector<2x128xf32>
    %376 = math.tanh %375 : vector<2x128xf32>
    %377 = arith.mulf %372, %376 : vector<2x128xf32>
    %378 = vector.extract_strided_slice %259 {offsets = [4, 0, 0], sizes = [1, 2, 512], strides = [1, 1, 1]} : vector<8x2x512xf32> to vector<1x2x512xf32>
    %379 = vector.shape_cast %378 : vector<1x2x512xf32> to vector<2x512xf32>
    %cst_67 = arith.constant dense<0.000000e+00> : vector<2x512xf32>
    %380 = tpu.matmul %377, %253, %cst_67 {dimension_numbers = #tpu.dot_dimension_numbers<[1], [0], [0], [1], [0, 0, 1, 1], [], []>} : vector<2x128xf32>, vector<128x512xf32>, vector<2x512xf32> -> vector<2x512xf32>
    %381 = arith.addf %379, %380 : vector<2x512xf32>
    %382 = vector.extract_strided_slice %381 {offsets = [0, 0], sizes = [2, 128], strides = [1, 1]} : vector<2x512xf32> to vector<2x128xf32>
    %383 = arith.negf %382 : vector<2x128xf32>
    %384 = math.exp %383 : vector<2x128xf32>
    %cst_68 = arith.constant 1.000000e+00 : f32
    %385 = vector.broadcast %cst_68 : f32 to vector<2x128xf32>
    %386 = arith.addf %385, %384 : vector<2x128xf32>
    %387 = arith.divf %385, %386 : vector<2x128xf32>
    %388 = vector.extract_strided_slice %381 {offsets = [0, 128], sizes = [2, 128], strides = [1, 1]} : vector<2x512xf32> to vector<2x128xf32>
    %389 = arith.negf %388 : vector<2x128xf32>
    %390 = math.exp %389 : vector<2x128xf32>
    %cst_69 = arith.constant 1.000000e+00 : f32
    %391 = vector.broadcast %cst_69 : f32 to vector<2x128xf32>
    %392 = arith.addf %391, %390 : vector<2x128xf32>
    %393 = arith.divf %391, %392 : vector<2x128xf32>
    %394 = vector.extract_strided_slice %381 {offsets = [0, 256], sizes = [2, 128], strides = [1, 1]} : vector<2x512xf32> to vector<2x128xf32>
    %395 = math.tanh %394 : vector<2x128xf32>
    %396 = vector.extract_strided_slice %381 {offsets = [0, 384], sizes = [2, 128], strides = [1, 1]} : vector<2x512xf32> to vector<2x128xf32>
    %397 = arith.negf %396 : vector<2x128xf32>
    %398 = math.exp %397 : vector<2x128xf32>
    %cst_70 = arith.constant 1.000000e+00 : f32
    %399 = vector.broadcast %cst_70 : f32 to vector<2x128xf32>
    %400 = arith.addf %399, %398 : vector<2x128xf32>
    %401 = arith.divf %399, %400 : vector<2x128xf32>
    %402 = arith.mulf %393, %375 : vector<2x128xf32>
    %403 = arith.mulf %387, %395 : vector<2x128xf32>
    %404 = arith.addf %402, %403 : vector<2x128xf32>
    %405 = math.tanh %404 : vector<2x128xf32>
    %406 = arith.mulf %401, %405 : vector<2x128xf32>
    %407 = vector.extract_strided_slice %259 {offsets = [5, 0, 0], sizes = [1, 2, 512], strides = [1, 1, 1]} : vector<8x2x512xf32> to vector<1x2x512xf32>
    %408 = vector.shape_cast %407 : vector<1x2x512xf32> to vector<2x512xf32>
    %cst_71 = arith.constant dense<0.000000e+00> : vector<2x512xf32>
    %409 = tpu.matmul %406, %253, %cst_71 {dimension_numbers = #tpu.dot_dimension_numbers<[1], [0], [0], [1], [0, 0, 1, 1], [], []>} : vector<2x128xf32>, vector<128x512xf32>, vector<2x512xf32> -> vector<2x512xf32>
    %410 = arith.addf %408, %409 : vector<2x512xf32>
    %411 = vector.extract_strided_slice %410 {offsets = [0, 0], sizes = [2, 128], strides = [1, 1]} : vector<2x512xf32> to vector<2x128xf32>
    %412 = arith.negf %411 : vector<2x128xf32>
    %413 = math.exp %412 : vector<2x128xf32>
    %cst_72 = arith.constant 1.000000e+00 : f32
    %414 = vector.broadcast %cst_72 : f32 to vector<2x128xf32>
    %415 = arith.addf %414, %413 : vector<2x128xf32>
    %416 = arith.divf %414, %415 : vector<2x128xf32>
    %417 = vector.extract_strided_slice %410 {offsets = [0, 128], sizes = [2, 128], strides = [1, 1]} : vector<2x512xf32> to vector<2x128xf32>
    %418 = arith.negf %417 : vector<2x128xf32>
    %419 = math.exp %418 : vector<2x128xf32>
    %cst_73 = arith.constant 1.000000e+00 : f32
    %420 = vector.broadcast %cst_73 : f32 to vector<2x128xf32>
    %421 = arith.addf %420, %419 : vector<2x128xf32>
    %422 = arith.divf %420, %421 : vector<2x128xf32>
    %423 = vector.extract_strided_slice %410 {offsets = [0, 256], sizes = [2, 128], strides = [1, 1]} : vector<2x512xf32> to vector<2x128xf32>
    %424 = math.tanh %423 : vector<2x128xf32>
    %425 = vector.extract_strided_slice %410 {offsets = [0, 384], sizes = [2, 128], strides = [1, 1]} : vector<2x512xf32> to vector<2x128xf32>
    %426 = arith.negf %425 : vector<2x128xf32>
    %427 = math.exp %426 : vector<2x128xf32>
    %cst_74 = arith.constant 1.000000e+00 : f32
    %428 = vector.broadcast %cst_74 : f32 to vector<2x128xf32>
    %429 = arith.addf %428, %427 : vector<2x128xf32>
    %430 = arith.divf %428, %429 : vector<2x128xf32>
    %431 = arith.mulf %422, %404 : vector<2x128xf32>
    %432 = arith.mulf %416, %424 : vector<2x128xf32>
    %433 = arith.addf %431, %432 : vector<2x128xf32>
    %434 = math.tanh %433 : vector<2x128xf32>
    %435 = arith.mulf %430, %434 : vector<2x128xf32>
    %436 = vector.extract_strided_slice %259 {offsets = [6, 0, 0], sizes = [1, 2, 512], strides = [1, 1, 1]} : vector<8x2x512xf32> to vector<1x2x512xf32>
    %437 = vector.shape_cast %436 : vector<1x2x512xf32> to vector<2x512xf32>
    %cst_75 = arith.constant dense<0.000000e+00> : vector<2x512xf32>
    %438 = tpu.matmul %435, %253, %cst_75 {dimension_numbers = #tpu.dot_dimension_numbers<[1], [0], [0], [1], [0, 0, 1, 1], [], []>} : vector<2x128xf32>, vector<128x512xf32>, vector<2x512xf32> -> vector<2x512xf32>
    %439 = arith.addf %437, %438 : vector<2x512xf32>
    %440 = vector.extract_strided_slice %439 {offsets = [0, 0], sizes = [2, 128], strides = [1, 1]} : vector<2x512xf32> to vector<2x128xf32>
    %441 = arith.negf %440 : vector<2x128xf32>
    %442 = math.exp %441 : vector<2x128xf32>
    %cst_76 = arith.constant 1.000000e+00 : f32
    %443 = vector.broadcast %cst_76 : f32 to vector<2x128xf32>
    %444 = arith.addf %443, %442 : vector<2x128xf32>
    %445 = arith.divf %443, %444 : vector<2x128xf32>
    %446 = vector.extract_strided_slice %439 {offsets = [0, 128], sizes = [2, 128], strides = [1, 1]} : vector<2x512xf32> to vector<2x128xf32>
    %447 = arith.negf %446 : vector<2x128xf32>
    %448 = math.exp %447 : vector<2x128xf32>
    %cst_77 = arith.constant 1.000000e+00 : f32
    %449 = vector.broadcast %cst_77 : f32 to vector<2x128xf32>
    %450 = arith.addf %449, %448 : vector<2x128xf32>
    %451 = arith.divf %449, %450 : vector<2x128xf32>
    %452 = vector.extract_strided_slice %439 {offsets = [0, 256], sizes = [2, 128], strides = [1, 1]} : vector<2x512xf32> to vector<2x128xf32>
    %453 = math.tanh %452 : vector<2x128xf32>
    %454 = vector.extract_strided_slice %439 {offsets = [0, 384], sizes = [2, 128], strides = [1, 1]} : vector<2x512xf32> to vector<2x128xf32>
    %455 = arith.negf %454 : vector<2x128xf32>
    %456 = math.exp %455 : vector<2x128xf32>
    %cst_78 = arith.constant 1.000000e+00 : f32
    %457 = vector.broadcast %cst_78 : f32 to vector<2x128xf32>
    %458 = arith.addf %457, %456 : vector<2x128xf32>
    %459 = arith.divf %457, %458 : vector<2x128xf32>
    %460 = arith.mulf %451, %433 : vector<2x128xf32>
    %461 = arith.mulf %445, %453 : vector<2x128xf32>
    %462 = arith.addf %460, %461 : vector<2x128xf32>
    %463 = math.tanh %462 : vector<2x128xf32>
    %464 = arith.mulf %459, %463 : vector<2x128xf32>
    %465 = vector.extract_strided_slice %259 {offsets = [7, 0, 0], sizes = [1, 2, 512], strides = [1, 1, 1]} : vector<8x2x512xf32> to vector<1x2x512xf32>
    %466 = vector.shape_cast %465 : vector<1x2x512xf32> to vector<2x512xf32>
    %cst_79 = arith.constant dense<0.000000e+00> : vector<2x512xf32>
    %467 = tpu.matmul %464, %253, %cst_79 {dimension_numbers = #tpu.dot_dimension_numbers<[1], [0], [0], [1], [0, 0, 1, 1], [], []>} : vector<2x128xf32>, vector<128x512xf32>, vector<2x512xf32> -> vector<2x512xf32>
    %468 = arith.addf %466, %467 : vector<2x512xf32>
    %469 = vector.extract_strided_slice %468 {offsets = [0, 0], sizes = [2, 128], strides = [1, 1]} : vector<2x512xf32> to vector<2x128xf32>
    %470 = arith.negf %469 : vector<2x128xf32>
    %471 = math.exp %470 : vector<2x128xf32>
    %cst_80 = arith.constant 1.000000e+00 : f32
    %472 = vector.broadcast %cst_80 : f32 to vector<2x128xf32>
    %473 = arith.addf %472, %471 : vector<2x128xf32>
    %474 = arith.divf %472, %473 : vector<2x128xf32>
    %475 = vector.extract_strided_slice %468 {offsets = [0, 128], sizes = [2, 128], strides = [1, 1]} : vector<2x512xf32> to vector<2x128xf32>
    %476 = arith.negf %475 : vector<2x128xf32>
    %477 = math.exp %476 : vector<2x128xf32>
    %cst_81 = arith.constant 1.000000e+00 : f32
    %478 = vector.broadcast %cst_81 : f32 to vector<2x128xf32>
    %479 = arith.addf %478, %477 : vector<2x128xf32>
    %480 = arith.divf %478, %479 : vector<2x128xf32>
    %481 = vector.extract_strided_slice %468 {offsets = [0, 256], sizes = [2, 128], strides = [1, 1]} : vector<2x512xf32> to vector<2x128xf32>
    %482 = math.tanh %481 : vector<2x128xf32>
    %483 = vector.extract_strided_slice %468 {offsets = [0, 384], sizes = [2, 128], strides = [1, 1]} : vector<2x512xf32> to vector<2x128xf32>
    %484 = arith.negf %483 : vector<2x128xf32>
    %485 = math.exp %484 : vector<2x128xf32>
    %cst_82 = arith.constant 1.000000e+00 : f32
    %486 = vector.broadcast %cst_82 : f32 to vector<2x128xf32>
    %487 = arith.addf %486, %485 : vector<2x128xf32>
    %488 = arith.divf %486, %487 : vector<2x128xf32>
    %489 = arith.mulf %480, %462 : vector<2x128xf32>
    %490 = arith.mulf %474, %482 : vector<2x128xf32>
    %491 = arith.addf %489, %490 : vector<2x128xf32>
    %492 = math.tanh %491 : vector<2x128xf32>
    %493 = arith.mulf %488, %492 : vector<2x128xf32>
    %c0_83 = arith.constant 0 : index
    %c0_84 = arith.constant 0 : index
    %c0_85 = arith.constant 0 : index
    %494 = vector.load %arg1[%c0_83, %c0_84, %c0_85] : memref<2x1x16xf32, #tpu.memory_space<vmem>>, vector<2x1x16xf32>
    %c0_86 = arith.constant 0 : index
    %c0_87 = arith.constant 0 : index
    %495 = vector.load %arg8[%c0_86, %c0_87] : memref<16x512xf32, #tpu.memory_space<vmem>>, vector<16x512xf32>
    %c0_88 = arith.constant 0 : index
    %c0_89 = arith.constant 0 : index
    %496 = vector.load %arg9[%c0_88, %c0_89] : memref<128x512xf32, #tpu.memory_space<vmem>>, vector<128x512xf32>
    %497 = vector.shape_cast %494 : vector<2x1x16xf32> to vector<2x16xf32>
    %cst_90 = arith.constant dense<0.000000e+00> : vector<2x512xf32>
    %498 = tpu.matmul %497, %495, %cst_90 {dimension_numbers = #tpu.dot_dimension_numbers<[1], [0], [0], [1], [0, 0, 1, 1], [], []>} : vector<2x16xf32>, vector<16x512xf32>, vector<2x512xf32> -> vector<2x512xf32>
    %c0_91 = arith.constant 0 : index
    %c0_92 = arith.constant 0 : index
    %499 = vector.load %arg10[%c0_91, %c0_92] : memref<1x512xf32, #tpu.memory_space<vmem>>, vector<1x512xf32>
    %500 = vector.broadcast %499 : vector<1x512xf32> to vector<2x512xf32>
    %501 = arith.addf %498, %500 : vector<2x512xf32>
    %502 = vector.shape_cast %501 : vector<2x512xf32> to vector<2x1x512xf32>
    %cst_93 = arith.constant 0.000000e+00 : f32
    %503 = vector.broadcast %cst_93 : f32 to vector<1x128xf32>
    %cst_94 = arith.constant 0.000000e+00 : f32
    %504 = vector.broadcast %cst_94 : f32 to vector<1x128xf32>
    %505 = vector.extract_strided_slice %502 {offsets = [0, 0, 0], sizes = [1, 1, 512], strides = [1, 1, 1]} : vector<2x1x512xf32> to vector<1x1x512xf32>
    %506 = vector.shape_cast %505 : vector<1x1x512xf32> to vector<1x512xf32>
    %cst_95 = arith.constant dense<0.000000e+00> : vector<1x512xf32>
    %507 = tpu.matmul %503, %496, %cst_95 {dimension_numbers = #tpu.dot_dimension_numbers<[1], [0], [0], [1], [0, 0, 1, 1], [], []>} : vector<1x128xf32>, vector<128x512xf32>, vector<1x512xf32> -> vector<1x512xf32>
    %508 = arith.addf %506, %507 : vector<1x512xf32>
    %509 = vector.extract_strided_slice %508 {offsets = [0, 0], sizes = [1, 128], strides = [1, 1]} : vector<1x512xf32> to vector<1x128xf32>
    %510 = arith.negf %509 : vector<1x128xf32>
    %511 = math.exp %510 : vector<1x128xf32>
    %cst_96 = arith.constant 1.000000e+00 : f32
    %512 = vector.broadcast %cst_96 : f32 to vector<1x128xf32>
    %513 = arith.addf %512, %511 : vector<1x128xf32>
    %514 = arith.divf %512, %513 : vector<1x128xf32>
    %515 = vector.extract_strided_slice %508 {offsets = [0, 128], sizes = [1, 128], strides = [1, 1]} : vector<1x512xf32> to vector<1x128xf32>
    %516 = arith.negf %515 : vector<1x128xf32>
    %517 = math.exp %516 : vector<1x128xf32>
    %cst_97 = arith.constant 1.000000e+00 : f32
    %518 = vector.broadcast %cst_97 : f32 to vector<1x128xf32>
    %519 = arith.addf %518, %517 : vector<1x128xf32>
    %520 = arith.divf %518, %519 : vector<1x128xf32>
    %521 = vector.extract_strided_slice %508 {offsets = [0, 256], sizes = [1, 128], strides = [1, 1]} : vector<1x512xf32> to vector<1x128xf32>
    %522 = math.tanh %521 : vector<1x128xf32>
    %523 = vector.extract_strided_slice %508 {offsets = [0, 384], sizes = [1, 128], strides = [1, 1]} : vector<1x512xf32> to vector<1x128xf32>
    %524 = arith.negf %523 : vector<1x128xf32>
    %525 = math.exp %524 : vector<1x128xf32>
    %cst_98 = arith.constant 1.000000e+00 : f32
    %526 = vector.broadcast %cst_98 : f32 to vector<1x128xf32>
    %527 = arith.addf %526, %525 : vector<1x128xf32>
    %528 = arith.divf %526, %527 : vector<1x128xf32>
    %529 = arith.mulf %520, %504 : vector<1x128xf32>
    %530 = arith.mulf %514, %522 : vector<1x128xf32>
    %531 = arith.addf %529, %530 : vector<1x128xf32>
    %532 = math.tanh %531 : vector<1x128xf32>
    %533 = arith.mulf %528, %532 : vector<1x128xf32>
    %534 = vector.extract_strided_slice %502 {offsets = [1, 0, 0], sizes = [1, 1, 512], strides = [1, 1, 1]} : vector<2x1x512xf32> to vector<1x1x512xf32>
    %535 = vector.shape_cast %534 : vector<1x1x512xf32> to vector<1x512xf32>
    %cst_99 = arith.constant dense<0.000000e+00> : vector<1x512xf32>
    %536 = tpu.matmul %533, %496, %cst_99 {dimension_numbers = #tpu.dot_dimension_numbers<[1], [0], [0], [1], [0, 0, 1, 1], [], []>} : vector<1x128xf32>, vector<128x512xf32>, vector<1x512xf32> -> vector<1x512xf32>
    %537 = arith.addf %535, %536 : vector<1x512xf32>
    %538 = vector.extract_strided_slice %537 {offsets = [0, 0], sizes = [1, 128], strides = [1, 1]} : vector<1x512xf32> to vector<1x128xf32>
    %539 = arith.negf %538 : vector<1x128xf32>
    %540 = math.exp %539 : vector<1x128xf32>
    %cst_100 = arith.constant 1.000000e+00 : f32
    %541 = vector.broadcast %cst_100 : f32 to vector<1x128xf32>
    %542 = arith.addf %541, %540 : vector<1x128xf32>
    %543 = arith.divf %541, %542 : vector<1x128xf32>
    %544 = vector.extract_strided_slice %537 {offsets = [0, 128], sizes = [1, 128], strides = [1, 1]} : vector<1x512xf32> to vector<1x128xf32>
    %545 = arith.negf %544 : vector<1x128xf32>
    %546 = math.exp %545 : vector<1x128xf32>
    %cst_101 = arith.constant 1.000000e+00 : f32
    %547 = vector.broadcast %cst_101 : f32 to vector<1x128xf32>
    %548 = arith.addf %547, %546 : vector<1x128xf32>
    %549 = arith.divf %547, %548 : vector<1x128xf32>
    %550 = vector.extract_strided_slice %537 {offsets = [0, 256], sizes = [1, 128], strides = [1, 1]} : vector<1x512xf32> to vector<1x128xf32>
    %551 = math.tanh %550 : vector<1x128xf32>
    %552 = vector.extract_strided_slice %537 {offsets = [0, 384], sizes = [1, 128], strides = [1, 1]} : vector<1x512xf32> to vector<1x128xf32>
    %553 = arith.negf %552 : vector<1x128xf32>
    %554 = math.exp %553 : vector<1x128xf32>
    %cst_102 = arith.constant 1.000000e+00 : f32
    %555 = vector.broadcast %cst_102 : f32 to vector<1x128xf32>
    %556 = arith.addf %555, %554 : vector<1x128xf32>
    %557 = arith.divf %555, %556 : vector<1x128xf32>
    %558 = arith.mulf %549, %531 : vector<1x128xf32>
    %559 = arith.mulf %543, %551 : vector<1x128xf32>
    %560 = arith.addf %558, %559 : vector<1x128xf32>
    %561 = math.tanh %560 : vector<1x128xf32>
    %562 = arith.mulf %557, %561 : vector<1x128xf32>
    %563 = vector.shape_cast %533 : vector<1x128xf32> to vector<1x1x128xf32>
    %564 = vector.shape_cast %562 : vector<1x128xf32> to vector<1x1x128xf32>
    %565 = tpu.concatenate %563, %564 in 0 : vector<1x1x128xf32>, vector<1x1x128xf32> -> vector<2x1x128xf32>
    %c0_103 = arith.constant 0 : index
    %c0_104 = arith.constant 0 : index
    %566 = vector.load %arg11[%c0_103, %c0_104] : memref<128x512xf32, #tpu.memory_space<vmem>>, vector<128x512xf32>
    %c0_105 = arith.constant 0 : index
    %c0_106 = arith.constant 0 : index
    %567 = vector.load %arg12[%c0_105, %c0_106] : memref<128x512xf32, #tpu.memory_space<vmem>>, vector<128x512xf32>
    %568 = vector.shape_cast %565 : vector<2x1x128xf32> to vector<2x128xf32>
    %cst_107 = arith.constant dense<0.000000e+00> : vector<2x512xf32>
    %569 = tpu.matmul %568, %566, %cst_107 {dimension_numbers = #tpu.dot_dimension_numbers<[1], [0], [0], [1], [0, 0, 1, 1], [], []>} : vector<2x128xf32>, vector<128x512xf32>, vector<2x512xf32> -> vector<2x512xf32>
    %c0_108 = arith.constant 0 : index
    %c0_109 = arith.constant 0 : index
    %570 = vector.load %arg13[%c0_108, %c0_109] : memref<1x512xf32, #tpu.memory_space<vmem>>, vector<1x512xf32>
    %571 = vector.broadcast %570 : vector<1x512xf32> to vector<2x512xf32>
    %572 = arith.addf %569, %571 : vector<2x512xf32>
    %573 = vector.shape_cast %572 : vector<2x512xf32> to vector<2x1x512xf32>
    %cst_110 = arith.constant 0.000000e+00 : f32
    %574 = vector.broadcast %cst_110 : f32 to vector<1x128xf32>
    %cst_111 = arith.constant 0.000000e+00 : f32
    %575 = vector.broadcast %cst_111 : f32 to vector<1x128xf32>
    %576 = vector.extract_strided_slice %573 {offsets = [0, 0, 0], sizes = [1, 1, 512], strides = [1, 1, 1]} : vector<2x1x512xf32> to vector<1x1x512xf32>
    %577 = vector.shape_cast %576 : vector<1x1x512xf32> to vector<1x512xf32>
    %cst_112 = arith.constant dense<0.000000e+00> : vector<1x512xf32>
    %578 = tpu.matmul %574, %567, %cst_112 {dimension_numbers = #tpu.dot_dimension_numbers<[1], [0], [0], [1], [0, 0, 1, 1], [], []>} : vector<1x128xf32>, vector<128x512xf32>, vector<1x512xf32> -> vector<1x512xf32>
    %579 = arith.addf %577, %578 : vector<1x512xf32>
    %580 = vector.extract_strided_slice %579 {offsets = [0, 0], sizes = [1, 128], strides = [1, 1]} : vector<1x512xf32> to vector<1x128xf32>
    %581 = arith.negf %580 : vector<1x128xf32>
    %582 = math.exp %581 : vector<1x128xf32>
    %cst_113 = arith.constant 1.000000e+00 : f32
    %583 = vector.broadcast %cst_113 : f32 to vector<1x128xf32>
    %584 = arith.addf %583, %582 : vector<1x128xf32>
    %585 = arith.divf %583, %584 : vector<1x128xf32>
    %586 = vector.extract_strided_slice %579 {offsets = [0, 128], sizes = [1, 128], strides = [1, 1]} : vector<1x512xf32> to vector<1x128xf32>
    %587 = arith.negf %586 : vector<1x128xf32>
    %588 = math.exp %587 : vector<1x128xf32>
    %cst_114 = arith.constant 1.000000e+00 : f32
    %589 = vector.broadcast %cst_114 : f32 to vector<1x128xf32>
    %590 = arith.addf %589, %588 : vector<1x128xf32>
    %591 = arith.divf %589, %590 : vector<1x128xf32>
    %592 = vector.extract_strided_slice %579 {offsets = [0, 256], sizes = [1, 128], strides = [1, 1]} : vector<1x512xf32> to vector<1x128xf32>
    %593 = math.tanh %592 : vector<1x128xf32>
    %594 = vector.extract_strided_slice %579 {offsets = [0, 384], sizes = [1, 128], strides = [1, 1]} : vector<1x512xf32> to vector<1x128xf32>
    %595 = arith.negf %594 : vector<1x128xf32>
    %596 = math.exp %595 : vector<1x128xf32>
    %cst_115 = arith.constant 1.000000e+00 : f32
    %597 = vector.broadcast %cst_115 : f32 to vector<1x128xf32>
    %598 = arith.addf %597, %596 : vector<1x128xf32>
    %599 = arith.divf %597, %598 : vector<1x128xf32>
    %600 = arith.mulf %591, %575 : vector<1x128xf32>
    %601 = arith.mulf %585, %593 : vector<1x128xf32>
    %602 = arith.addf %600, %601 : vector<1x128xf32>
    %603 = math.tanh %602 : vector<1x128xf32>
    %604 = arith.mulf %599, %603 : vector<1x128xf32>
    %605 = vector.extract_strided_slice %573 {offsets = [1, 0, 0], sizes = [1, 1, 512], strides = [1, 1, 1]} : vector<2x1x512xf32> to vector<1x1x512xf32>
    %606 = vector.shape_cast %605 : vector<1x1x512xf32> to vector<1x512xf32>
    %cst_116 = arith.constant dense<0.000000e+00> : vector<1x512xf32>
    %607 = tpu.matmul %604, %567, %cst_116 {dimension_numbers = #tpu.dot_dimension_numbers<[1], [0], [0], [1], [0, 0, 1, 1], [], []>} : vector<1x128xf32>, vector<128x512xf32>, vector<1x512xf32> -> vector<1x512xf32>
    %608 = arith.addf %606, %607 : vector<1x512xf32>
    %609 = vector.extract_strided_slice %608 {offsets = [0, 0], sizes = [1, 128], strides = [1, 1]} : vector<1x512xf32> to vector<1x128xf32>
    %610 = arith.negf %609 : vector<1x128xf32>
    %611 = math.exp %610 : vector<1x128xf32>
    %cst_117 = arith.constant 1.000000e+00 : f32
    %612 = vector.broadcast %cst_117 : f32 to vector<1x128xf32>
    %613 = arith.addf %612, %611 : vector<1x128xf32>
    %614 = arith.divf %612, %613 : vector<1x128xf32>
    %615 = vector.extract_strided_slice %608 {offsets = [0, 128], sizes = [1, 128], strides = [1, 1]} : vector<1x512xf32> to vector<1x128xf32>
    %616 = arith.negf %615 : vector<1x128xf32>
    %617 = math.exp %616 : vector<1x128xf32>
    %cst_118 = arith.constant 1.000000e+00 : f32
    %618 = vector.broadcast %cst_118 : f32 to vector<1x128xf32>
    %619 = arith.addf %618, %617 : vector<1x128xf32>
    %620 = arith.divf %618, %619 : vector<1x128xf32>
    %621 = vector.extract_strided_slice %608 {offsets = [0, 256], sizes = [1, 128], strides = [1, 1]} : vector<1x512xf32> to vector<1x128xf32>
    %622 = math.tanh %621 : vector<1x128xf32>
    %623 = vector.extract_strided_slice %608 {offsets = [0, 384], sizes = [1, 128], strides = [1, 1]} : vector<1x512xf32> to vector<1x128xf32>
    %624 = arith.negf %623 : vector<1x128xf32>
    %625 = math.exp %624 : vector<1x128xf32>
    %cst_119 = arith.constant 1.000000e+00 : f32
    %626 = vector.broadcast %cst_119 : f32 to vector<1x128xf32>
    %627 = arith.addf %626, %625 : vector<1x128xf32>
    %628 = arith.divf %626, %627 : vector<1x128xf32>
    %629 = arith.mulf %620, %602 : vector<1x128xf32>
    %630 = arith.mulf %614, %622 : vector<1x128xf32>
    %631 = arith.addf %629, %630 : vector<1x128xf32>
    %632 = math.tanh %631 : vector<1x128xf32>
    %633 = arith.mulf %628, %632 : vector<1x128xf32>
    %634 = vector.shape_cast %604 : vector<1x128xf32> to vector<1x1x128xf32>
    %635 = vector.shape_cast %633 : vector<1x128xf32> to vector<1x1x128xf32>
    %636 = tpu.concatenate %634, %635 in 0 : vector<1x1x128xf32>, vector<1x1x128xf32> -> vector<2x1x128xf32>
    %637 = vector.shape_cast %636 : vector<2x1x128xf32> to vector<2x128xf32>
    %c0_120 = arith.constant 0 : index
    %c0_121 = arith.constant 0 : index
    %638 = vector.load %arg14[%c0_120, %c0_121] : memref<256x128xf32, #tpu.memory_space<vmem>>, vector<128x128xf32>
    %cst_122 = arith.constant dense<0.000000e+00> : vector<2x128xf32>
    %639 = tpu.matmul %493, %638, %cst_122 {dimension_numbers = #tpu.dot_dimension_numbers<[1], [0], [0], [1], [0, 0, 1, 1], [], []>} : vector<2x128xf32>, vector<128x128xf32>, vector<2x128xf32> -> vector<2x128xf32>
    %c128 = arith.constant 128 : index
    %c0_123 = arith.constant 0 : index
    %640 = vector.load %arg14[%c128, %c0_123] : memref<256x128xf32, #tpu.memory_space<vmem>>, vector<128x128xf32>
    %cst_124 = arith.constant dense<0.000000e+00> : vector<2x128xf32>
    %641 = tpu.matmul %637, %640, %cst_124 {dimension_numbers = #tpu.dot_dimension_numbers<[1], [0], [0], [1], [0, 0, 1, 1], [], []>} : vector<2x128xf32>, vector<128x128xf32>, vector<2x128xf32> -> vector<2x128xf32>
    %642 = arith.addf %639, %641 : vector<2x128xf32>
    %c0_125 = arith.constant 0 : index
    %c0_126 = arith.constant 0 : index
    %643 = vector.load %arg15[%c0_125, %c0_126] : memref<1x128xf32, #tpu.memory_space<vmem>>, vector<1x128xf32>
    %644 = vector.broadcast %643 : vector<1x128xf32> to vector<2x128xf32>
    %645 = arith.addf %642, %644 : vector<2x128xf32>
    %c0_127 = arith.constant 0 : index
    %c0_128 = arith.constant 0 : index
    %646 = vector.load %arg16[%c0_127, %c0_128] : memref<2x128xf32, #tpu.memory_space<vmem>>, vector<2x128xf32>
    tpu.vector_store %arg16[%c0_127, %c0_128], %645 {strides = array<i32>} : memref<2x128xf32, #tpu.memory_space<vmem>>, vector<2x128xf32>,
    return
  }
}

</mosaic_0001>

<bundles_post_ra>
// kernel: tpu_custom_call.1
= control target key start
LH: loop header
LB: loop body
LE: loop exit
PB: predicated region body
PF: predicated region fallthrough
CT: control target
= control target key end

     0   :  { %s9237_s0 = inlined_call_operand.hbm [shape: f32[8,2,32], index: 0, kind: input, shape index: {}]   ;;  %s9238_s1 = inlined_call_operand.hbm [shape: f32[2,1,16], index: 1, kind: input, shape index: {}]   ;;  %s9239_s2 = inlined_call_operand.hbm [shape: f32[32,512], index: 2, kind: input, shape index: {}]   ;;  %s9240_s3 = inlined_call_operand.hbm [shape: f32[128,512], index: 3, kind: input, shape index: {}]   ;;  %s9241_s4 = inlined_call_operand.vmem [shape: f32[1,512], index: 4, kind: input, shape index: {}]   ;;  %s9242_s5 = inlined_call_operand.hbm [shape: f32[128,512], index: 5, kind: input, shape index: {}]   ;;  %s9243_s6 = inlined_call_operand.hbm [shape: f32[128,512], index: 6, kind: input, shape index: {}]   ;;  %s9244_s7 = inlined_call_operand.vmem [shape: f32[1,512], index: 7, kind: input, shape index: {}]   ;;  %s9245_s8 = inlined_call_operand.hbm [shape: f32[16,512], index: 8, kind: input, shape index: {}]   ;;  %s9246_s9 = inlined_call_operand.hbm [shape: f32[128,512], index: 9, kind: input, shape index: {}]   ;;  %s9247_s10 = inlined_call_operand.vmem [shape: f32[1,512], index: 10, kind: input, shape index: {}]   ;;  %s9248_s11 = inlined_call_operand.hbm [shape: f32[128,512], index: 11, kind: input, shape index: {}]   ;;  %s9249_s12 = inlined_call_operand.hbm [shape: f32[128,512], index: 12, kind: input, shape index: {}]   ;;  %s9250_s13 = inlined_call_operand.vmem [shape: f32[1,512], index: 13, kind: input, shape index: {}]   ;;  %s9251_s14 = inlined_call_operand.hbm [shape: f32[256,128], index: 14, kind: input, shape index: {}]   ;;  %s9252_s15 = inlined_call_operand.vmem [shape: f32[1,128], index: 15, kind: input, shape index: {}]   ;;  %s9253_s16 = inlined_call_operand.hbm [shape: f32[2,128], index: 16, kind: output, shape index: {}]  }
   0x1   :  { %9505 = sst [smem:[#allocation66_spill]] %s9237_s0 }
   0x2   :  { %21 = vsyncpa [#allocation3], 0 }
   0x3   :  { %22 = vsyncpa [#allocation6], 0 }
   0x4   :  { %23 = vsyncpa [#allocation9], 0 }
   0x5   :  { %24 = vsyncpa [#allocation12], 0 }
   0x6   :  { %25 = vsyncpa [#allocation15], 0 }
   0x7   :  { %26 = vsyncpa [#allocation18], 0 }
   0x8   :  { %27 = vsyncpa [#allocation4], 0  ;;  %s6546_s21 = smov [#allocation5]  }
   0x9   :  { %s45_s22 = sshll.u32 %s6546_s21, 4  ;;  %s46_s22 = int_to_ptr.vmem [resolvable:$true] %s45_s22 }
   0xa   :  { %s6300_s23 = scalar_lea.vmem %s46_s22, 32  ;;  %p6305_p1 = scmp.lt.s32.totalorder %s46_s22, %s46_s22 }
   0xb   :  { %p6301_p0 = scmp.ne.s32.totalorder %s46_s22, %s6300_s23  ;;  %p6306_p2 = scmp.lt.s32.totalorder %s6300_s23, %s6300_s23 }
   0xd   :  { %p6307_p3 = por %p6306_p2, %p6305_p1 }
   0xf   :  { %p6308_p4 = pnand %p6307_p3, %p6301_p0 }
  0x11   :  { %6311 = shalt.err (!%p6308_p4)
}
  0x12   :  { %s6547_s24 = smov 16   ;;  %s6548_s25 = smov 1  }
  0x13   :  { %51 = dma.hbm_to_vmem [thread:$0]  %s9238_s1, 32, %s46_s22, [#allocation6], %s6547_s24, %s6547_s24, %s6548_s25  }
  0x14   :  { %s6549_s28 = smov [#allocation8]   ;;  %s6550_s30 = smov [#allocation11]  }
  0x15   :  { %s69_s29 = sshll.u32 %s6549_s28, 4  ;;  %s95_s0 = sshll.u32 %s6550_s30, 4  ;;  %s70_s29 = int_to_ptr.vmem [resolvable:$true] %s69_s29  ;;  %s96_s0 = int_to_ptr.vmem [resolvable:$true] %s95_s0 }
  0x16   :  { %s6320_s17 = scalar_lea.vmem %s70_s29, 8192  ;;  %p6325_p6 = scmp.lt.s32.totalorder %s70_s29, %s70_s29 }
  0x17   :  { %p6321_p5 = scmp.ne.s32.totalorder %s70_s29, %s6320_s17  ;;  %p6326_p7 = scmp.lt.s32.totalorder %s6320_s17, %s6320_s17 }
  0x19   :  { %p6327_p8 = por %p6326_p7, %p6325_p6 }
  0x1b   :  { %p6328_p9 = pnand %p6327_p8, %p6321_p5 }
  0x1d   :  { %6331 = shalt.err (!%p6328_p9)
}
  0x1e   :  { %s6551_s18 = smov 512   ;;  %s6552_s19 = smov 32  }
  0x1f   :  { %75 = dma.hbm_to_vmem [thread:$0]  %s9240_s3, 8192, %s70_s29, [#allocation9], %s6551_s18, %s6551_s18, %s6552_s19  }
  0x20   :  { %s6340_s1 = scalar_lea.vmem %s96_s0, 8192  ;;  %p6345_p11 = scmp.lt.s32.totalorder %s96_s0, %s96_s0 }
  0x21   :  { %p6341_p10 = scmp.ne.s32.totalorder %s96_s0, %s6340_s1  ;;  %p6346_p12 = scmp.lt.s32.totalorder %s6340_s1, %s6340_s1 }
  0x23   :  { %p6347_p13 = por %p6346_p12, %p6345_p11 }
  0x25   :  { %p6348_p0 = pnand %p6347_p13, %p6341_p10 }
  0x27   :  { %6351 = shalt.err (!%p6348_p0)
}
  0x28   :  { %101 = dma.hbm_to_vmem [thread:$0]  %s9243_s6, 8192, %s96_s0, [#allocation12], %s6551_s18, %s6551_s18, %s6552_s19  }
  0x29   :  { %s6553_s24 = smov [#allocation14]   ;;  %s6554_s26 = smov [#allocation17]  }
  0x2a   :  { %s121_s25 = sshll.u32 %s6553_s24, 4  ;;  %s147_s3 = sshll.u32 %s6554_s26, 4  ;;  %s122_s25 = int_to_ptr.vmem [resolvable:$true] %s121_s25  ;;  %s148_s3 = int_to_ptr.vmem [resolvable:$true] %s147_s3 }
  0x2b   :  { %s6360_s27 = scalar_lea.vmem %s122_s25, 8192  ;;  %p6365_p2 = scmp.lt.s32.totalorder %s122_s25, %s122_s25 }
  0x2c   :  { %p6361_p1 = scmp.ne.s32.totalorder %s122_s25, %s6360_s27  ;;  %p6366_p3 = scmp.lt.s32.totalorder %s6360_s27, %s6360_s27 }
  0x2e   :  { %p6367_p4 = por %p6366_p3, %p6365_p2 }
  0x30   :  { %p6368_p5 = pnand %p6367_p4, %p6361_p1 }
  0x32   :  { %6371 = shalt.err (!%p6368_p5)
}
  0x33   :  { %127 = dma.hbm_to_vmem [thread:$0]  %s9246_s9, 8192, %s122_s25, [#allocation15], %s6551_s18, %s6551_s18, %s6552_s19  }
  0x34   :  { %s6380_s6 = scalar_lea.vmem %s148_s3, 8192  ;;  %p6385_p7 = scmp.lt.s32.totalorder %s148_s3, %s148_s3 }
  0x35   :  { %p6381_p6 = scmp.ne.s32.totalorder %s148_s3, %s6380_s6  ;;  %p6386_p8 = scmp.lt.s32.totalorder %s6380_s6, %s6380_s6 }
  0x37   :  { %p6387_p9 = por %p6386_p8, %p6385_p7 }
  0x39   :  { %p6388_p10 = pnand %p6387_p9, %p6381_p6 }
  0x3b   :  { %6391 = shalt.err (!%p6388_p10)
}
  0x3c   :  { %153 = dma.hbm_to_vmem [thread:$0]  %s9249_s12, 8192, %s148_s3, [#allocation18], %s6551_s18, %s6551_s18, %s6552_s19  }
  0x3d   :  { %s6555_s17 = smov [#allocation2]  }
  0x3e   :  { %s33_s20 = sshll.u32 %s6555_s17, 4  ;;  %s34_s20 = int_to_ptr.vmem [resolvable:$true] %s33_s20 }
  0x3f   :  { %s6400_s21 = scalar_lea.vmem %s34_s20, 256  ;;  %p6405_p12 = scmp.lt.s32.totalorder %s34_s20, %s34_s20 }
  0x40   :  { %p6401_p11 = scmp.ne.s32.totalorder %s34_s20, %s6400_s21  ;;  %p6406_p13 = scmp.lt.s32.totalorder %s6400_s21, %s6400_s21 }
  0x42   :  { %p6407_p0 = por %p6406_p13, %p6405_p12 }
  0x44   :  { %p6408_p1 = pnand %p6407_p0, %p6401_p11 }
  0x46   :  { %6411 = shalt.err (!%p6408_p1)
}
  0x47   :  { %s6556_s9 = smov 2   ;;  %s9506_s23 = sld [smem:[#allocation66_spill]] }
  0x48   :  { %s6557_s24 = smov [#allocation7]   ;;  %s6558_s12 = smov [#allocation10]  }
  0x49   :  { %s57_s25 = sshll.u32 %s6557_s24, 4  ;;  %s83_s26 = sshll.u32 %s6558_s12, 4  ;;  %s58_s25 = int_to_ptr.vmem [resolvable:$true] %s57_s25  ;;  %s84_s26 = int_to_ptr.vmem [resolvable:$true] %s83_s26 }
  0x4a   :  { %s6420_s3 = scalar_lea.vmem %s58_s25, 2048  ;;  %p6425_p3 = scmp.lt.s32.totalorder %s58_s25, %s58_s25 }
  0x4b   :  { %p6421_p2 = scmp.ne.s32.totalorder %s58_s25, %s6420_s3  ;;  %p6426_p4 = scmp.lt.s32.totalorder %s6420_s3, %s6420_s3 }
  0x4d   :  { %39 = dma.hbm_to_vmem [thread:$0]  %s9506_s23, 256, %s34_s20, [#allocation3], %s6552_s19, %s6552_s19, %s6556_s9  }
  0x4e   :  { %p6427_p5 = por %p6426_p4, %p6425_p3 }
  0x50   :  { %p6428_p6 = pnand %p6427_p5, %p6421_p2 }
  0x52   :  { %6431 = shalt.err (!%p6428_p6)
}
  0x53   :  { %63 = dma.hbm_to_vmem [thread:$0]  %s9239_s2, 2048, %s58_s25, [#allocation6], %s6551_s18, %s6551_s18, %s6552_s19  }
  0x54   :  { %s6440_s29 = scalar_lea.vmem %s84_s26, 8192  ;;  %p6445_p8 = scmp.lt.s32.totalorder %s84_s26, %s84_s26 }
  0x55   :  { %p6441_p7 = scmp.ne.s32.totalorder %s84_s26, %s6440_s29  ;;  %p6446_p9 = scmp.lt.s32.totalorder %s6440_s29, %s6440_s29 }
  0x57   :  { %p6447_p10 = por %p6446_p9, %p6445_p8 }
  0x59   :  { %p6448_p11 = pnand %p6447_p10, %p6441_p7 }
  0x5b   :  { %6451 = shalt.err (!%p6448_p11)
}
  0x5c   :  { %89 = dma.hbm_to_vmem [thread:$0]  %s9242_s5, 8192, %s84_s26, [#allocation9], %s6551_s18, %s6551_s18, %s6552_s19  }
  0x5d   :  { %s6559_s0 = smov [#allocation13]   ;;  %s6560_s20 = smov [#allocation16]  }
  0x5e   :  { %s109_s17 = sshll.u32 %s6559_s0, 4  ;;  %s135_s2 = sshll.u32 %s6560_s20, 4  ;;  %s110_s17 = int_to_ptr.vmem [resolvable:$true] %s109_s17  ;;  %s136_s2 = int_to_ptr.vmem [resolvable:$true] %s135_s2 }
  0x5f   :  { %s6460_s21 = scalar_lea.vmem %s110_s17, 1024  ;;  %p6465_p13 = scmp.lt.s32.totalorder %s110_s17, %s110_s17 }
  0x60   :  { %p6461_p12 = scmp.ne.s32.totalorder %s110_s17, %s6460_s21  ;;  %p6466_p0 = scmp.lt.s32.totalorder %s6460_s21, %s6460_s21 }
  0x62   :  { %p6467_p1 = por %p6466_p0, %p6465_p13 }
  0x64   :  { %p6468_p2 = pnand %p6467_p1, %p6461_p12 }
  0x66   :  { %6471 = shalt.err (!%p6468_p2)
}
  0x67   :  { %115 = dma.hbm_to_vmem [thread:$0]  %s9245_s8, 1024, %s110_s17, [#allocation12], %s6551_s18, %s6551_s18, %s6552_s19  }
  0x68   :  { %s6480_s5 = scalar_lea.vmem %s136_s2, 8192  ;;  %p6485_p4 = scmp.lt.s32.totalorder %s136_s2, %s136_s2 }
  0x69   :  { %p6481_p3 = scmp.ne.s32.totalorder %s136_s2, %s6480_s5  ;;  %p6486_p5 = scmp.lt.s32.totalorder %s6480_s5, %s6480_s5 }
  0x6b   :  { %p6487_p6 = por %p6486_p5, %p6485_p4 }
  0x6d   :  { %p6488_p7 = pnand %p6487_p6, %p6481_p3 }
  0x6f   :  { %6491 = shalt.err (!%p6488_p7)
}
  0x70   :  { %141 = dma.hbm_to_vmem [thread:$0]  %s9248_s11, 8192, %s136_s2, [#allocation15], %s6551_s18, %s6551_s18, %s6552_s19  }
  0x71   :  { %s6561_s24 = smov [#allocation19]  }
  0x72   :  { %s161_s25 = sshll.u32 %s6561_s24, 4  ;;  %s162_s25 = int_to_ptr.vmem [resolvable:$true] %s161_s25 }
  0x73   :  { %s6500_s12 = scalar_lea.vmem %s162_s25, 4096  ;;  %p6505_p9 = scmp.lt.s32.totalorder %s162_s25, %s162_s25 }
  0x74   :  { %p6501_p8 = scmp.ne.s32.totalorder %s162_s25, %s6500_s12  ;;  %p6506_p10 = scmp.lt.s32.totalorder %s6500_s12, %s6500_s12 }
  0x76   :  { %p6507_p11 = por %p6506_p10, %p6505_p9 }
  0x78   :  { %p6508_p12 = pnand %p6507_p11, %p6501_p8 }
  0x7a   :  { %6511 = shalt.err (!%p6508_p12)
}
  0x7b   :  { %s6562_s8 = smov 128   ;;  %s6563_s26 = smov 8  }
  0x7c   :  { %167 = dma.hbm_to_vmem [thread:$0]  %s9251_s14, 4096, %s162_s25, [#allocation18], %s6562_s8, %s6562_s8, %s6563_s26  }
  0x7d   :  { %6532 = dma.done.wait [#allocation3], 256  }
  0x7e   :  { %6533 = vsyncadd [#allocation3], 4294967040 }
  0x7f   :  { %6534 = dma.done.wait [#allocation6], 2080  }
  0x80   :  { %6535 = vsyncadd [#allocation6], 4294965216 }
  0x81   :  { %6536 = dma.done.wait [#allocation9], 16384  }
  0x82   :  { %6537 = vsyncadd [#allocation9], 4294950912 }
  0x83   :  { %6538 = dma.done.wait [#allocation12], 9216  }
  0x84   :  { %6539 = vsyncadd [#allocation12], 4294958080 }
  0x85   :  { %6540 = dma.done.wait [#allocation15], 16384  }
  0x86   :  { %6541 = vsyncadd [#allocation15], 4294950912 }
  0x87   :  { %6542 = dma.done.wait [#allocation18], 12288  }
  0x88   :  { %6543 = vsyncadd [#allocation18], 4294955008  ;;  %v9254_v0 = vmov 0.0   ;;  %v293_v1 = vlaneseq  ;;  %v6565_v2 = vmov 1983009808   ;;  %v224_v4 = vld [vmem:[#allocation7 + $0x68] sm:$0xff] }
  0x89   :  { %424 = vmatprep.mubr.f32.mxu0 %v9254_v0  ;;  %501 = vmatprep.mubr.f32.mxu1 %v9254_v0  ;;  %v324_v3 = vunpack.c.l.s4 %v6565_v2  ;;  %v226_v5 = vld [vmem:[#allocation7 + $0x78] sm:$0xff]  ;;  %v223_v6 = vld [vmem:[#allocation7 + $0x60] sm:$0xff]  ;;  %v225_v9 = vld [vmem:[#allocation7 + $0x70] sm:$0xff]  ;;  %vm355_vm0 = vcmask 261120   ;;  %vm4287_vm1 = vcmask 130048   ;;  %vm4941_vm2 = vcmask 1041409  }
  0x8a   :  { %v6715_v7 = vshrl.u32 %v293_v1, 7  ;;  %384 = vmatprep.subr.mxu0 %v224_v4  ;;  %461 = vmatprep.subr.mxu1 %v226_v5  ;;  %v220_v10 = vld [vmem:[#allocation7 + $0x48] sm:$0xff]  ;;  %v222_v11 = vld [vmem:[#allocation7 + $0x58] sm:$0xff]  ;;  %v219_v12 = vld [vmem:[#allocation7 + $0x40] sm:$0xff]  ;;  %vm6567_vm3 = vmmov 0   ;;  %s6568_s6 = smov [#allocation20]  }
  0x8b   :  { %v325_v8 = vunpack.c.0.s8 %v324_v3  ;;  %385 = vmatpush1.msra.mxu0 %v223_v6  ;;  %462 = vmatpush1.msra.mxu1 %v225_v9  ;;  %v221_v13 = vld [vmem:[#allocation7 + $0x50] sm:$0xff]  ;;  %v216_v14 = vld [vmem:[#allocation7 + $0x28] sm:$0xff]  ;;  %v218_v15 = vld [vmem:[#allocation7 + $0x38] sm:$0xff]  ;;  %s5634_s30 = sshll.u32 %s6568_s6, 4  ;;  %s5635_s30 = int_to_ptr.vmem [resolvable:$true] %s5634_s30 }
  0x8c   :  { %9507 = vst [vmem:[#allocation28_spill] sm:$0xff] %v6715_v7  ;;  %386 = vmatprep.subr.mxu0 %v220_v10  ;;  %463 = vmatprep.subr.mxu1 %v222_v11  ;;  %v215_v16 = vld [vmem:[#allocation7 + $0x20] sm:$0xff]  ;;  %v217_v17 = vld [vmem:[#allocation7 + $0x30] sm:$0xff]  ;;  %v212_v18 = vld [vmem:[#allocation7 + $0x8] sm:$0xff]  ;;  %s6512_s0 = scalar_lea.vmem %s5635_s30, 32  ;;  %p6517_p0 = scmp.lt.s32.totalorder %s5635_s30, %s5635_s30 }
  0x8d   :  { %387 = vmatpush1.msra.mxu0 %v219_v12  ;;  %464 = vmatpush1.msra.mxu1 %v221_v13  ;;  %v214_v19 = vld [vmem:[#allocation7 + $0x18] sm:$0xff]  ;;  %v211_v20 = vld [vmem:[#allocation7] sm:$0xff]  ;;  %v6718_v21 = vsub.s32 %v325_v8, %v6715_v7  ;;  %v213_v22 = vld [vmem:[#allocation7 + $0x10] sm:$0xff]  ;;  %p6513_p13 = scmp.ne.s32.totalorder %s5635_s30, %s6512_s0  ;;  %p6518_p1 = scmp.lt.s32.totalorder %s6512_s0, %s6512_s0 }
  0x8e   :  { %388 = vmatprep.subr.mxu0 %v216_v14  ;;  %465 = vmatprep.subr.mxu1 %v218_v15  ;;  %v203_v23 = vld [vmem:[#allocation2] sm:$0x3]  ;;  %v204_v24 = vld [vmem:[#allocation2 + $0x2] sm:$0x3]  ;;  %v205_v25 = vld [vmem:[#allocation2 + $0x4] sm:$0x3] }
  0x8f   :  { %9508 = vst [vmem:[#allocation29_spill] sm:$0xff] %v6718_v21  ;;  %389 = vmatpush1.msra.mxu0 %v215_v16  ;;  %466 = vmatpush1.msra.mxu1 %v217_v17  ;;  %v206_v26 = vld [vmem:[#allocation2 + $0x6] sm:$0x3]  ;;  %v321_v27 = vcombine.low %v203_v23, %v204_v24  ;;  %v6720_v28 = vld [vmem:[#allocation8 + $0x1e8] sm:$0xff]  ;;  %v6722_v30 = vld [vmem:[#allocation8 + $0x1f8] sm:$0xff]  ;;  %p6519_p2 = por %p6518_p1, %p6517_p0 }
  0x90   :  { %9509 = vst [vmem:[#allocation30_spill] sm:$0xff] %v6720_v28  ;;  %390 = vmatprep.subr.mxu0 %v212_v18  ;;  %467 = vmatprep.subr.mxu1 %v214_v19  ;;  %v322_v29 = vcombine.low %v205_v25, %v206_v26  ;;  %9510 = vst [vmem:[#allocation31_spill] sm:$0xff] %v6722_v30  ;;  %v6728_v34 = vld [vmem:[#allocation8 + $0x1e0] sm:$0xff]  ;;  %v6730_v35 = vld [vmem:[#allocation8 + $0x1f0] sm:$0xff] }
  0x91   :  { %391 = vmatpush1.msra.mxu0 %v211_v20  ;;  %468 = vmatpush1.msra.mxu1 %v213_v22  ;;  %v329_v31 = vrot.slane %v321_v27, %v6718_v21  ;;  %v6732_v36 = vld [vmem:[#allocation8 + $0x1c8] sm:$0xff]  ;;  %v6734_v37 = vld [vmem:[#allocation8 + $0x1d8] sm:$0xff]  ;;  %v6738_v38 = vld [vmem:[#allocation8 + $0x1c0] sm:$0xff]  ;;  %p6520_p3 = pnand %p6519_p2, %p6513_p13 }
  0x92   :  { %v336_v32 = vrot.slane %v322_v29, %v6718_v21  ;;  %602 = vmatprep.subr.mxu0 %v6720_v28  ;;  %673 = vmatprep.subr.mxu1 %v6722_v30  ;;  %v6740_v39 = vld [vmem:[#allocation8 + $0x1d0] sm:$0xff]  ;;  %v6744_v40 = vld [vmem:[#allocation8 + $0x1a8] sm:$0xff]  ;;  %v6746_v41 = vld [vmem:[#allocation8 + $0x1b8] sm:$0xff] }
  0x93   :  { %v6750_v42 = vld [vmem:[#allocation8 + $0x1a0] sm:$0xff]  ;;  %v6752_v43 = vld [vmem:[#allocation8 + $0x1b0] sm:$0xff]  ;;  %v6756_v44 = vld [vmem:[#allocation8 + $0x188] sm:$0xff] }
  0x94   :  { %v337_v33 = vcombine.low %v329_v31, %v336_v32  ;;  %v6758_v45 = vld [vmem:[#allocation8 + $0x198] sm:$0xff]  ;;  %v6762_v46 = vld [vmem:[#allocation8 + $0x180] sm:$0xff]  ;;  %v6764_v47 = vld [vmem:[#allocation8 + $0x190] sm:$0xff] }
  0x95   :  { %v6768_v48 = vld [vmem:[#allocation8 + $0x168] sm:$0xff]  ;;  %v6770_v49 = vld [vmem:[#allocation8 + $0x178] sm:$0xff]  ;;  %v6774_v50 = vld [vmem:[#allocation8 + $0x160] sm:$0xff] }
  0x96   :  { %5648 = vmatmul.mubr.msk.f32.vlgmr.msra.gmra.mxu0 %vm355_vm0, %v337_v33  ;;  %5650 = vmatmul.mubr.msk.f32.vlgmr.msra.gmra.mxu1 %vm355_vm0, %v337_v33  ;;  %v6776_v51 = vld [vmem:[#allocation8 + $0x170] sm:$0xff]  ;;  %v6780_v52 = vld [vmem:[#allocation8 + $0x148] sm:$0xff]  ;;  %v6782_v53 = vld [vmem:[#allocation8 + $0x158] sm:$0xff] }
  0x97   :  { %603 = vmatpush1.msra.mxu0 %v6728_v34  ;;  %674 = vmatpush1.msra.mxu1 %v6730_v35  ;;  %v6786_v54 = vld [vmem:[#allocation8 + $0x140] sm:$0xff]  ;;  %v6788_v55 = vld [vmem:[#allocation8 + $0x150] sm:$0xff]  ;;  %v6792_v56 = vld [vmem:[#allocation8 + $0x128] sm:$0xff] }
  0x98   :  { %604 = vmatprep.subr.mxu0 %v6732_v36  ;;  %675 = vmatprep.subr.mxu1 %v6734_v37  ;;  %v6794_v57 = vld [vmem:[#allocation8 + $0x138] sm:$0xff]  ;;  %v6796_v58 = vld [vmem:[#allocation8 + $0x120] sm:$0xff]  ;;  %v6800_v59 = vld [vmem:[#allocation8 + $0x130] sm:$0xff] }
  0x99   :  { %605 = vmatpush1.msra.mxu0 %v6738_v38  ;;  %676 = vmatpush1.msra.mxu1 %v6740_v39  ;;  %v6802_v60 = vld [vmem:[#allocation8 + $0x108] sm:$0xff]  ;;  %v6804_v61 = vld [vmem:[#allocation8 + $0x118] sm:$0xff]  ;;  %v6808_v62 = vld [vmem:[#allocation8 + $0x100] sm:$0xff] }
  0x9a   :  { %606 = vmatprep.subr.mxu0 %v6744_v40  ;;  %677 = vmatprep.subr.mxu1 %v6746_v41  ;;  %v6810_v63 = vld [vmem:[#allocation8 + $0x110] sm:$0xff]  ;;  %v208_v2 = vld [vmem:[#allocation2 + $0xa] sm:$0x3]  ;;  %v209_v3 = vld [vmem:[#allocation2 + $0xc] sm:$0x3] }
  0x9b   :  { %607 = vmatpush1.msra.mxu0 %v6750_v42  ;;  %678 = vmatpush1.msra.mxu1 %v6752_v43  ;;  %v207_v1 = vld [vmem:[#allocation2 + $0x8] sm:$0x3]  ;;  %v210_v4 = vld [vmem:[#allocation2 + $0xe] sm:$0x3]  ;;  %v6816_v5 = vld [vmem:[#allocation8 + $0xe8] sm:$0xff] }
  0x9c   :  { %608 = vmatprep.subr.mxu0 %v6756_v44  ;;  %679 = vmatprep.subr.mxu1 %v6758_v45  ;;  %v6818_v6 = vld [vmem:[#allocation8 + $0xf8] sm:$0xff]  ;;  %v6822_v8 = vld [vmem:[#allocation8 + $0xe0] sm:$0xff]  ;;  %v6824_v9 = vld [vmem:[#allocation8 + $0xf0] sm:$0xff]  ;;  %v338_v12 = vcombine.low %v207_v1, %v208_v2  ;;  %v339_v13 = vcombine.low %v209_v3, %v210_v4 }
  0x9d   :  { %609 = vmatpush1.msra.mxu0 %v6762_v46  ;;  %680 = vmatpush1.msra.mxu1 %v6764_v47  ;;  %v6828_v10 = vld [vmem:[#allocation8 + $0xc8] sm:$0xff]  ;;  %v6830_v11 = vld [vmem:[#allocation8 + $0xd8] sm:$0xff]  ;;  %v6834_v14 = vld [vmem:[#allocation8 + $0xc0] sm:$0xff] }
  0x9e   :  { %610 = vmatprep.subr.mxu0 %v6768_v48  ;;  %681 = vmatprep.subr.mxu1 %v6770_v49  ;;  %v6836_v15 = vld [vmem:[#allocation8 + $0xd0] sm:$0xff]  ;;  %v6840_v16 = vld [vmem:[#allocation8 + $0xa8] sm:$0xff]  ;;  %v6842_v17 = vld [vmem:[#allocation8 + $0xb8] sm:$0xff]  ;;  %v346_v23 = vrot.slane %v338_v12, %v6718_v21  ;;  %v353_v24 = vrot.slane %v339_v13, %v6718_v21 }
  0x9f   :  { %611 = vmatpush1.msra.mxu0 %v6774_v50  ;;  %682 = vmatpush1.msra.mxu1 %v6776_v51  ;;  %v6846_v18 = vld [vmem:[#allocation8 + $0xa0] sm:$0xff]  ;;  %v6848_v19 = vld [vmem:[#allocation8 + $0xb0] sm:$0xff]  ;;  %v6852_v20 = vld [vmem:[#allocation8 + $0x88] sm:$0xff] }
  0xa0   :  { %612 = vmatprep.subr.mxu0 %v6780_v52  ;;  %683 = vmatprep.subr.mxu1 %v6782_v53  ;;  %9511 = vst [vmem:[#allocation32_spill] sm:$0xff] %v6846_v18  ;;  %9512 = vst [vmem:[#allocation33_spill] sm:$0xff] %v6848_v19  ;;  %v6854_v22 = vld [vmem:[#allocation8 + $0x98] sm:$0xff]  ;;  %v6860_v25 = vld [vmem:[#allocation8 + $0x80] sm:$0xff]  ;;  %v354_v33 = vcombine.low %v346_v23, %v353_v24 }
  0xa1   :  { %613 = vmatpush1.msra.mxu0 %v6786_v54  ;;  %684 = vmatpush1.msra.mxu1 %v6788_v55  ;;  %9513 = vst [vmem:[#allocation34_spill] sm:$0xff] %v6852_v20  ;;  %9514 = vst [vmem:[#allocation35_spill] sm:$0xff] %v6854_v22  ;;  %v6862_v26 = vld [vmem:[#allocation8 + $0x90] sm:$0xff]  ;;  %v6866_v27 = vld [vmem:[#allocation8 + $0x68] sm:$0xff] }
  0xa2   :  { %614 = vmatprep.subr.mxu0 %v6792_v56  ;;  %685 = vmatprep.subr.mxu1 %v6794_v57  ;;  %9515 = vst [vmem:[#allocation36_spill] sm:$0xff] %v6860_v25  ;;  %9516 = vst [vmem:[#allocation37_spill] sm:$0xff] %v6862_v26  ;;  %v6868_v29 = vld [vmem:[#allocation8 + $0x78] sm:$0xff]  ;;  %v6874_v31 = vld [vmem:[#allocation8 + $0x60] sm:$0xff] }
  0xa3   :  { %615 = vmatpush1.msra.mxu0 %v6796_v58  ;;  %686 = vmatpush1.msra.mxu1 %v6800_v59  ;;  %9517 = vst [vmem:[#allocation38_spill] sm:$0xff] %v6866_v27  ;;  %9518 = vst [vmem:[#allocation39_spill] sm:$0xff] %v6868_v29  ;;  %v6876_v32 = vld [vmem:[#allocation8 + $0x70] sm:$0xff]  ;;  %v6882_v1 = vld [vmem:[#allocation8 + $0x48] sm:$0xff] }
  0xa4   :  { %616 = vmatprep.subr.mxu0 %v6802_v60  ;;  %687 = vmatprep.subr.mxu1 %v6804_v61  ;;  %9519 = vst [vmem:[#allocation40_spill] sm:$0xff] %v6874_v31  ;;  %9520 = vst [vmem:[#allocation41_spill] sm:$0xff] %v6876_v32  ;;  %v6884_v2 = vld [vmem:[#allocation8 + $0x58] sm:$0xff]  ;;  %v6888_v3 = vld [vmem:[#allocation8 + $0x40] sm:$0xff] }
  0xa5   :  { %617 = vmatpush1.msra.mxu0 %v6808_v62  ;;  %688 = vmatpush1.msra.mxu1 %v6810_v63  ;;  %9521 = vst [vmem:[#allocation42_spill] sm:$0xff] %v6882_v1  ;;  %9522 = vst [vmem:[#allocation43_spill] sm:$0xff] %v6884_v2  ;;  %v6890_v4 = vld [vmem:[#allocation8 + $0x50] sm:$0xff]  ;;  %v6894_v12 = vld [vmem:[#allocation8 + $0x28] sm:$0xff] }
  0xa6   :  { %618 = vmatprep.subr.mxu0 %v6816_v5  ;;  %689 = vmatprep.subr.mxu1 %v6818_v6  ;;  %9523 = vst [vmem:[#allocation44_spill] sm:$0xff] %v6888_v3  ;;  %9524 = vst [vmem:[#allocation45_spill] sm:$0xff] %v6890_v4  ;;  %v6896_v13 = vld [vmem:[#allocation8 + $0x38] sm:$0xff]  ;;  %v6900_v23 = vld [vmem:[#allocation8 + $0x20] sm:$0xff] }
  0xa7   :  { %619 = vmatpush1.msra.mxu0 %v6822_v8  ;;  %690 = vmatpush1.msra.mxu1 %v6824_v9  ;;  %9525 = vst [vmem:[#allocation46_spill] sm:$0xff] %v6894_v12  ;;  %9526 = vst [vmem:[#allocation47_spill] sm:$0xff] %v6896_v13  ;;  %v6902_v24 = vld [vmem:[#allocation8 + $0x30] sm:$0xff]  ;;  %v6908_v21 = vld [vmem:[#allocation8 + $0x18] sm:$0xff] }
  0xa8   :  { %620 = vmatprep.subr.mxu0 %v6828_v10  ;;  %691 = vmatprep.subr.mxu1 %v6830_v11  ;;  %9527 = vst [vmem:[#allocation48_spill] sm:$0xff] %v6900_v23  ;;  %9528 = vst [vmem:[#allocation49_spill] sm:$0xff] %v6902_v24  ;;  %v6916_v7 = vld [vmem:[#allocation8 + $0x10] sm:$0xff] }
  0xa9   :  { %621 = vmatpush1.msra.mxu0 %v6834_v14  ;;  %692 = vmatpush1.msra.mxu1 %v6836_v15  ;;  %9530 = vst [vmem:[#allocation51_spill] sm:$0xff] %v6908_v21  ;;  %9532 = vst [vmem:[#allocation53_spill] sm:$0xff] %v6916_v7 }
  0xaa   :  { %622 = vmatprep.subr.mxu0 %v6840_v16  ;;  %693 = vmatprep.subr.mxu1 %v6842_v17 }
  0xab   :  { %623 = vmatpush1.msra.mxu0 %v6846_v18  ;;  %694 = vmatpush1.msra.mxu1 %v6848_v19 }
  0xac   :  { %624 = vmatprep.subr.mxu0 %v6852_v20  ;;  %695 = vmatprep.subr.mxu1 %v6854_v22 }
  0xad   :  { %625 = vmatpush1.msra.mxu0 %v6860_v25  ;;  %696 = vmatpush1.msra.mxu1 %v6862_v26 }
  0xae   :  { %626 = vmatprep.subr.mxu0 %v6866_v27  ;;  %697 = vmatprep.subr.mxu1 %v6868_v29 }
  0xaf   :  { %430 = vmatprep.mubr.f32.mxu0 %v9254_v0  ;;  %507 = vmatprep.mubr.f32.mxu1 %v9254_v0  ;;  %v6906_v0 = vld [vmem:[#allocation8 + $0x8] sm:$0xff] }
  0xb0   :  { %627 = vmatpush1.msra.mxu0 %v6874_v31  ;;  %698 = vmatpush1.msra.mxu1 %v6876_v32  ;;  %9529 = vst [vmem:[#allocation50_spill] sm:$0xff] %v6906_v0 }
  0xb1   :  { %5649 = vmatmul.mubr.msk.f32.gmra.mxu0 %vm355_vm0, %v354_v33  ;;  %5651 = vmatmul.mubr.msk.f32.gmra.mxu1 %vm355_vm0, %v354_v33  ;;  %v6912_v33 = vld [vmem:[#allocation8] sm:$0xff] }
  0xb2   :  { %628 = vmatprep.subr.mxu0 %v6882_v1  ;;  %699 = vmatprep.subr.mxu1 %v6884_v2  ;;  %9531 = vst [vmem:[#allocation52_spill] sm:$0xff] %v6912_v33 }
  0xb3   :  { %629 = vmatpush1.msra.mxu0 %v6888_v3  ;;  %700 = vmatpush1.msra.mxu1 %v6890_v4  ;;  %v9533_v4 = vmov 0.0  }
  0xb4   :  { %630 = vmatprep.subr.mxu0 %v6894_v12  ;;  %701 = vmatprep.subr.mxu1 %v6896_v13 }
  0xb5   :  { %631 = vmatpush1.msra.mxu0 %v6900_v23  ;;  %702 = vmatpush1.msra.mxu1 %v6902_v24 }
  0xb6   :  { %632 = vmatprep.subr.mxu0 %v6906_v0  ;;  %703 = vmatprep.subr.mxu1 %v6908_v21 }
  0xb7   :  { %633 = vmatpush1.msra.mxu0 %v6912_v33  ;;  %666 = vmatprep.mubr.f32.mxu0 %v9533_v4 }
  0xb8   :  { %704 = vmatpush1.msra.mxu1 %v6916_v7  ;;  %737 = vmatprep.mubr.f32.mxu1 %v9533_v4 }
  0xb9   :  { %667 = vmatmul.mubr.f32.vlgmr.msra.gmra.mxu0 %v9533_v4  ;;  %738 = vmatmul.mubr.f32.vlgmr.msra.gmra.mxu1 %v9533_v4 }
  0xba   :  { %798 = vmatprep.subr.mxu0 %v6720_v28  ;;  %869 = vmatprep.subr.mxu1 %v6722_v30 }
  0xbb   :  { %799 = vmatpush1.msra.mxu0 %v6728_v34  ;;  %870 = vmatpush1.msra.mxu1 %v6730_v35 }
  0xbc   :  { %800 = vmatprep.subr.mxu0 %v6732_v36  ;;  %871 = vmatprep.subr.mxu1 %v6734_v37 }
  0xbd   :  { %801 = vmatpush1.msra.mxu0 %v6738_v38  ;;  %872 = vmatpush1.msra.mxu1 %v6740_v39 }
  0xbe   :  { %802 = vmatprep.subr.mxu0 %v6744_v40  ;;  %873 = vmatprep.subr.mxu1 %v6746_v41 }
  0xbf   :  { %803 = vmatpush1.msra.mxu0 %v6750_v42  ;;  %874 = vmatpush1.msra.mxu1 %v6752_v43 }
  0xc0   :  { %804 = vmatprep.subr.mxu0 %v6756_v44  ;;  %875 = vmatprep.subr.mxu1 %v6758_v45 }
  0xc1   :  { %805 = vmatpush1.msra.mxu0 %v6762_v46  ;;  %876 = vmatpush1.msra.mxu1 %v6764_v47 }
  0xc2   :  { %806 = vmatprep.subr.mxu0 %v6768_v48  ;;  %877 = vmatprep.subr.mxu1 %v6770_v49 }
  0xc3   :  { %807 = vmatpush1.msra.mxu0 %v6774_v50  ;;  %878 = vmatpush1.msra.mxu1 %v6776_v51 }
  0xc4   :  { %808 = vmatprep.subr.mxu0 %v6780_v52  ;;  %879 = vmatprep.subr.mxu1 %v6782_v53 }
  0xc5   :  { %809 = vmatpush1.msra.mxu0 %v6786_v54  ;;  %880 = vmatpush1.msra.mxu1 %v6788_v55 }
  0xc6   :  { %810 = vmatprep.subr.mxu0 %v6792_v56  ;;  %881 = vmatprep.subr.mxu1 %v6794_v57 }
  0xc7   :  { %811 = vmatpush1.msra.mxu0 %v6796_v58  ;;  %882 = vmatpush1.msra.mxu1 %v6800_v59 }
  0xc8   :  { %812 = vmatprep.subr.mxu0 %v6802_v60  ;;  %883 = vmatprep.subr.mxu1 %v6804_v61 }
  0xc9   :  { %813 = vmatpush1.msra.mxu0 %v6808_v62  ;;  %884 = vmatpush1.msra.mxu1 %v6810_v63 }
  0xca   :  { %814 = vmatprep.subr.mxu0 %v6816_v5  ;;  %885 = vmatprep.subr.mxu1 %v6818_v6 }
  0xcb   :  { %815 = vmatpush1.msra.mxu0 %v6822_v8  ;;  %886 = vmatpush1.msra.mxu1 %v6824_v9 }
  0xcc   :  { %816 = vmatprep.subr.mxu0 %v6828_v10  ;;  %887 = vmatprep.subr.mxu1 %v6830_v11 }
  0xcd   :  { %817 = vmatpush1.msra.mxu0 %v6834_v14  ;;  %888 = vmatpush1.msra.mxu1 %v6836_v15 }
  0xce   :  { %818 = vmatprep.subr.mxu0 %v6840_v16  ;;  %889 = vmatprep.subr.mxu1 %v6842_v17 }
  0xcf   :  { %819 = vmatpush1.msra.mxu0 %v6846_v18  ;;  %890 = vmatpush1.msra.mxu1 %v6848_v19 }
  0xd0   :  { %820 = vmatprep.subr.mxu0 %v6852_v20  ;;  %891 = vmatprep.subr.mxu1 %v6854_v22  ;;  %v9534_v20 = vld [vmem:[#allocation45_spill] sm:$0xff] }
  0xd1   :  { %821 = vmatpush1.msra.mxu0 %v6860_v25  ;;  %892 = vmatpush1.msra.mxu1 %v6862_v26  ;;  %v9540_v22 = vld [vmem:[#allocation29_spill] sm:$0xff] }
  0xd2   :  { %822 = vmatprep.subr.mxu0 %v6866_v27  ;;  %893 = vmatprep.subr.mxu1 %v6868_v29 }
  0xd3   :  { %823 = vmatpush1.msra.mxu0 %v6874_v31  ;;  %894 = vmatpush1.msra.mxu1 %v6876_v32 }
  0xd4   :  { %824 = vmatprep.subr.mxu0 %v6882_v1  ;;  %895 = vmatprep.subr.mxu1 %v6884_v2 }
  0xd5   :  { %825 = vmatpush1.msra.mxu0 %v6888_v3  ;;  %896 = vmatpush1.msra.mxu1 %v9534_v20 }
  0xd6   :  { %826 = vmatprep.subr.mxu0 %v6894_v12  ;;  %897 = vmatprep.subr.mxu1 %v6896_v13  ;;  %v9535_v13 = vld [vmem:[#allocation28_spill] sm:$0xff] }
  0xd7   :  { %827 = vmatpush1.msra.mxu0 %v6900_v23  ;;  %898 = vmatpush1.msra.mxu1 %v6902_v24  ;;  %v6995_v23 = vsub.s32 0, %v9535_v13  ;;  %v6998_v24 = vsub.s32 2, %v9535_v13 }
  0xd8   :  { %828 = vmatprep.subr.mxu0 %v6906_v0  ;;  %899 = vmatprep.subr.mxu1 %v6908_v21  ;;  %v7004_v21 = vsub.s32 1, %v9535_v13 }
  0xd9   :  { %829 = vmatpush1.msra.mxu0 %v6912_v33  ;;  %862 = vmatprep.mubr.f32.mxu0 %v9533_v4  ;;  %9536 = vst [vmem:[#allocation54_spill] sm:$0xff] %v6995_v23  ;;  %9537 = vst [vmem:[#allocation55_spill] sm:$0xff] %v6998_v24  ;;  %v291_v33 = vld [vmem:[%s9241_s4] sm:$0xf] }
  0xda   :  { %900 = vmatpush1.msra.mxu1 %v6916_v7  ;;  %933 = vmatprep.mubr.f32.mxu1 %v9533_v4  ;;  %9538 = vst [vmem:[#allocation56_spill] sm:$0xff] %v7004_v21  ;;  %v7007_v7 = vsub.s32 3, %v9535_v13  ;;  %v300_v4 = vrot.slane %v291_v33, %v7004_v21 }
  0xdb   :  { %994 = vmatprep.subr.mxu0 %v6720_v28  ;;  %1065 = vmatprep.subr.mxu1 %v6722_v30  ;;  %v296_v28 = vrot.slane %v291_v33, %v6995_v23  ;;  %v304_v30 = vrot.slane %v291_v33, %v6998_v24 }
  0xdc   :  { %9539 = vst [vmem:[#allocation57_spill] sm:$0xff] %v7007_v7  ;;  %v308_v0 = vrot.slane %v291_v33, %v7007_v7 }
 0x156   :  { %v426_v12 = vpop.f32.mrf.mxu0  ;;  %v503_v20 = vpop.f32.mrf.mxu1 }
 0x157   :  { %v427_v3 = vadd.f32 %v426_v12, %v296_v28  ;;  %v504_v2 = vadd.f32 %v503_v20, %v304_v30 }
 0x158   :  { %v428_v1 = vpop.f32.mrf.mxu0  ;;  %v505_v32 = vpop.f32.mrf.mxu1 }
 0x159   :  { %v429_v31 = vadd.f32 %v428_v1, %v300_v4  ;;  %v506_v29 = vadd.f32 %v505_v32, %v308_v0 }
 0x15b   :  { %v522_v27 = vcombine.low %v427_v3, %v429_v31  ;;  %v523_v26 = vcombine.high %v427_v3, %v429_v31  ;;  %v524_v13 = vcombine.low %v504_v2, %v506_v29  ;;  %v525_v25 = vcombine.high %v504_v2, %v506_v29 }
 0x15d   :  { %v7014_v23 = vrot.slane %v522_v27, %v9540_v22  ;;  %v7017_v24 = vrot.slane %v523_v26, %v9540_v22  ;;  %v7020_v33 = vrot.slane %v524_v13, %v9540_v22  ;;  %v7023_v12 = vrot.slane %v525_v25, %v9540_v22 }
 0x15f   :  { %9541 = vst [vmem:[#allocation58_spill] sm:$0xff] %v7017_v24  ;;  %9542 = vst [vmem:[#allocation59_spill] sm:$0xff] %v7023_v12  ;;  %v9566_v12 = vld [vmem:[#allocation50_spill] sm:$0xff]  ;;  %v9567_v24 = vld [vmem:[#allocation51_spill] sm:$0xff] }
 0x171   :  { %v432_v27 = vpop.f32.mrf.mxu0  ;;  %v509_v32 = vpop.f32.mrf.mxu1 }
 0x172   :  { %v433_v1 = vadd.f32 %v432_v27, %v296_v28  ;;  %v510_v26 = vadd.f32 %v509_v32, %v304_v30 }
 0x173   :  { %v434_v2 = vpop.f32.mrf.mxu0  ;;  %v511_v3 = vpop.f32.mrf.mxu1 }
 0x174   :  { %v435_v13 = vadd.f32 %v434_v2, %v300_v4  ;;  %v512_v7 = vadd.f32 %v511_v3, %v308_v0  ;;  %v554_v3 = vcombine.low %v7014_v23, %v7020_v33 }
 0x176   :  { %v558_v21 = vcombine.low %v433_v1, %v435_v13  ;;  %v559_v25 = vcombine.high %v433_v1, %v435_v13  ;;  %v560_v19 = vcombine.low %v510_v26, %v512_v7  ;;  %v561_v18 = vcombine.high %v510_v26, %v512_v7 }
 0x178   :  { %v7032_v20 = vrot.slane %v558_v21, %v9540_v22  ;;  %v7035_v31 = vrot.slane %v559_v25, %v9540_v22  ;;  %v7038_v29 = vrot.slane %v560_v19, %v9540_v22  ;;  %v7041_v28 = vrot.slane %v561_v18, %v9540_v22 }
 0x179   :  { %v668_v30 = vpop.f32.mrf.mxu0  ;;  %v739_v27 = vpop.f32.mrf.mxu1 }
 0x17a   :  { %9543 = vst [vmem:[#allocation60_spill] sm:$0xff] %v7032_v20  ;;  %9544 = vst [vmem:[#allocation61_spill] sm:$0xff] %v7035_v31  ;;  %v9564_v20 = vld [vmem:[#allocation48_spill] sm:$0xff] }
 0x17b   :  { %9545 = vst [vmem:[#allocation62_spill] sm:$0xff] %v7038_v29  ;;  %9546 = vst [vmem:[#allocation63_spill] sm:$0xff] %v7041_v28  ;;  %v670_v32 = vpop.f32.mrf.mxu0  ;;  %v741_v19 = vpop.f32.mrf.mxu1 }
 0x17c   :  { %v748_v1 = vcombine.low %v668_v30, %v670_v32  ;;  %v749_v26 = vcombine.low %v739_v27, %v741_v19 }
 0x17e   :  { %v756_v18 = vrot.slane %v748_v1, %v9540_v22  ;;  %v763_v2 = vrot.slane %v749_v26, %v9540_v22 }
 0x180   :  { %v764_v13 = vcombine.low %v756_v18, %v763_v2 }
 0x182   :  { %v766_v25 = vadd.f32 %v764_v13, %v554_v3  ;;  %v9550_v13 = vld [vmem:[#allocation34_spill] sm:$0xff] }
 0x184   :  { %v5652_v7 = vmul.f32 -1.442695, %v766_v25  ;;  %v774_v0 = vrot.slane %v766_v25, 2  ;;  %v785_v29 = vrot.slane %v766_v25, 6  ;;  %v782_v31 = vrot.slane %v766_v25, 4  ;;  %v9551_v25 = vld [vmem:[#allocation35_spill] sm:$0xff] }
 0x186   :  { %5844 = vpow2.f32 %v5652_v7  ;;  %v5653_v21 = vmul.f32 -1.442695, %v774_v0  ;;  %v5654_v4 = vmul.f32 -1.442695, %v785_v29 }
 0x188   :  { %5846 = vpow2.f32 %v5653_v21 }
 0x189   :  { %5848 = vpow2.f32 %v5654_v4  ;;  %v9549_v4 = vld [vmem:[#allocation33_spill] sm:$0xff] }
 0x193   :  { %v5845_v28 = vpop.eup %5844 }
 0x194   :  { %v770_v30 = vadd.f32 1.0, %v5845_v28 }
 0x195   :  { %v5847_v27 = vpop.eup %5846 }
 0x196   :  { %5850 = vrcp.f32 %v770_v30  ;;  %v779_v32 = vadd.f32 1.0, %v5847_v27  ;;  %v5849_v19 = vpop.eup %5848  ;;  %v9552_v30 = vld [vmem:[#allocation36_spill] sm:$0xff]  ;;  %v9553_v27 = vld [vmem:[#allocation37_spill] sm:$0xff] }
 0x197   :  { %5852 = vtanh.f32 %v782_v31  ;;  %v790_v2 = vadd.f32 1.0, %v5849_v19  ;;  %v9548_v31 = vld [vmem:[#allocation32_spill] sm:$0xff]  ;;  %v9555_v19 = vld [vmem:[#allocation39_spill] sm:$0xff] }
 0x198   :  { %5854 = vrcp.f32 %v779_v32  ;;  %v9554_v32 = vld [vmem:[#allocation38_spill] sm:$0xff] }
 0x199   :  { %5856 = vrcp.f32 %v790_v2  ;;  %v9559_v2 = vld [vmem:[#allocation43_spill] sm:$0xff] }
 0x1a3   :  { %v5851_v1 = vpop.eup %5850 }
 0x1a4   :  { %v5853_v26 = vpop.eup %5852 }
 0x1a5   :  { %v5855_v18 = vpop.eup %5854  ;;  %v794_v7 = vmul.f32 %v5853_v26, %v5851_v1  ;;  %v9556_v1 = vld [vmem:[#allocation40_spill] sm:$0xff]  ;;  %v9557_v26 = vld [vmem:[#allocation41_spill] sm:$0xff] }
 0x1a6   :  { %v793_v3 = vmul.f32 0.0, %v5855_v18  ;;  %v5857_v29 = vpop.eup %5856  ;;  %v9558_v18 = vld [vmem:[#allocation42_spill] sm:$0xff] }
 0x1a8   :  { %v7055_v0 = vadd.f32 %v794_v7, %v793_v3  ;;  %v9560_v3 = vld [vmem:[#allocation44_spill] sm:$0xff]  ;;  %v9561_v7 = vld [vmem:[#allocation45_spill] sm:$0xff] }
 0x1aa   :  { %5858 = vtanh.f32 %v7055_v0 }
 0x1b7   :  { %v5859_v28 = vpop.eup %5858 }
 0x1b8   :  { %v7058_v21 = vmul.f32 %v5859_v28, %v5857_v29  ;;  %v9562_v29 = vld [vmem:[#allocation46_spill] sm:$0xff]  ;;  %v9563_v28 = vld [vmem:[#allocation47_spill] sm:$0xff] }
 0x1ba   :  { %9547 = vst [vmem:[#allocation64_spill] sm:$0xff] %v7058_v21  ;;  %863 = vmatmul.mubr.f32.vlgmr.msra.gmra.mxu0 %v7058_v21  ;;  %934 = vmatmul.mubr.f32.vlgmr.msra.gmra.mxu1 %v7058_v21  ;;  %v9565_v21 = vld [vmem:[#allocation49_spill] sm:$0xff] }
 0x1bb   :  { %995 = vmatpush1.msra.mxu0 %v6728_v34  ;;  %1066 = vmatpush1.msra.mxu1 %v6730_v35 }
 0x1bc   :  { %996 = vmatprep.subr.mxu0 %v6732_v36  ;;  %1067 = vmatprep.subr.mxu1 %v6734_v37 }
 0x1bd   :  { %997 = vmatpush1.msra.mxu0 %v6738_v38  ;;  %1068 = vmatpush1.msra.mxu1 %v6740_v39 }
 0x1be   :  { %998 = vmatprep.subr.mxu0 %v6744_v40  ;;  %1069 = vmatprep.subr.mxu1 %v6746_v41 }
 0x1bf   :  { %999 = vmatpush1.msra.mxu0 %v6750_v42  ;;  %1070 = vmatpush1.msra.mxu1 %v6752_v43 }
 0x1c0   :  { %1000 = vmatprep.subr.mxu0 %v6756_v44  ;;  %1071 = vmatprep.subr.mxu1 %v6758_v45 }
 0x1c1   :  { %1001 = vmatpush1.msra.mxu0 %v6762_v46  ;;  %1072 = vmatpush1.msra.mxu1 %v6764_v47 }
 0x1c2   :  { %1002 = vmatprep.subr.mxu0 %v6768_v48  ;;  %1073 = vmatprep.subr.mxu1 %v6770_v49 }
 0x1c3   :  { %1003 = vmatpush1.msra.mxu0 %v6774_v50  ;;  %1074 = vmatpush1.msra.mxu1 %v6776_v51 }
 0x1c4   :  { %1004 = vmatprep.subr.mxu0 %v6780_v52  ;;  %1075 = vmatprep.subr.mxu1 %v6782_v53 }
 0x1c5   :  { %1005 = vmatpush1.msra.mxu0 %v6786_v54  ;;  %1076 = vmatpush1.msra.mxu1 %v6788_v55 }
 0x1c6   :  { %1006 = vmatprep.subr.mxu0 %v6792_v56  ;;  %1077 = vmatprep.subr.mxu1 %v6794_v57 }
 0x1c7   :  { %1007 = vmatpush1.msra.mxu0 %v6796_v58  ;;  %1078 = vmatpush1.msra.mxu1 %v6800_v59 }
 0x1c8   :  { %1008 = vmatprep.subr.mxu0 %v6802_v60  ;;  %1079 = vmatprep.subr.mxu1 %v6804_v61 }
 0x1c9   :  { %1009 = vmatpush1.msra.mxu0 %v6808_v62  ;;  %1080 = vmatpush1.msra.mxu1 %v6810_v63 }
 0x1ca   :  { %1010 = vmatprep.subr.mxu0 %v6816_v5  ;;  %1081 = vmatprep.subr.mxu1 %v6818_v6 }
 0x1cb   :  { %1011 = vmatpush1.msra.mxu0 %v6822_v8  ;;  %1082 = vmatpush1.msra.mxu1 %v6824_v9 }
 0x1cc   :  { %1012 = vmatprep.subr.mxu0 %v6828_v10  ;;  %1083 = vmatprep.subr.mxu1 %v6830_v11 }
 0x1cd   :  { %1013 = vmatpush1.msra.mxu0 %v6834_v14  ;;  %1084 = vmatpush1.msra.mxu1 %v6836_v15 }
 0x1ce   :  { %1014 = vmatprep.subr.mxu0 %v6840_v16  ;;  %1085 = vmatprep.subr.mxu1 %v6842_v17 }
 0x1cf   :  { %1015 = vmatpush1.msra.mxu0 %v9548_v31  ;;  %1086 = vmatpush1.msra.mxu1 %v9549_v4 }
 0x1d0   :  { %1016 = vmatprep.subr.mxu0 %v9550_v13  ;;  %1087 = vmatprep.subr.mxu1 %v9551_v25 }
 0x1d1   :  { %1017 = vmatpush1.msra.mxu0 %v9552_v30  ;;  %1088 = vmatpush1.msra.mxu1 %v9553_v27 }
 0x1d2   :  { %1018 = vmatprep.subr.mxu0 %v9554_v32  ;;  %1089 = vmatprep.subr.mxu1 %v9555_v19 }
 0x1d3   :  { %1019 = vmatpush1.msra.mxu0 %v9556_v1  ;;  %1090 = vmatpush1.msra.mxu1 %v9557_v26  ;;  %v9568_v26 = vld [vmem:[#allocation52_spill] sm:$0xff] }
 0x1d4   :  { %1020 = vmatprep.subr.mxu0 %v9558_v18  ;;  %1091 = vmatprep.subr.mxu1 %v9559_v2  ;;  %v9569_v18 = vmov 0.0   ;;  %v9570_v2 = vld [vmem:[#allocation53_spill] sm:$0xff] }
 0x1d5   :  { %1021 = vmatpush1.msra.mxu0 %v9560_v3  ;;  %1092 = vmatpush1.msra.mxu1 %v9561_v7  ;;  %v9571_v7 = vld [vmem:[#allocation30_spill] sm:$0xff] }
 0x1d6   :  { %1022 = vmatprep.subr.mxu0 %v9562_v29  ;;  %1093 = vmatprep.subr.mxu1 %v9563_v28  ;;  %v9572_v29 = vld [vmem:[#allocation31_spill] sm:$0xff] }
 0x1d7   :  { %1023 = vmatpush1.msra.mxu0 %v9564_v20  ;;  %1094 = vmatpush1.msra.mxu1 %v9565_v21 }
 0x1d8   :  { %1024 = vmatprep.subr.mxu0 %v9566_v12  ;;  %1095 = vmatprep.subr.mxu1 %v9567_v24 }
 0x1d9   :  { %1025 = vmatpush1.msra.mxu0 %v9568_v26  ;;  %1058 = vmatprep.mubr.f32.mxu0 %v9569_v18 }
 0x1da   :  { %1096 = vmatpush1.msra.mxu1 %v9570_v2  ;;  %1129 = vmatprep.mubr.f32.mxu1 %v9569_v18  ;;  %v9573_v2 = vcombine.high %v7014_v23, %v7020_v33 }
 0x1db   :  { %1190 = vmatprep.subr.mxu0 %v9571_v7  ;;  %1261 = vmatprep.subr.mxu1 %v9572_v29 }
 0x27a   :  { %v864_v28 = vpop.f32.mrf.mxu0  ;;  %v935_v20 = vpop.f32.mrf.mxu1 }
 0x27c   :  { %v866_v3 = vpop.f32.mrf.mxu0  ;;  %v937_v21 = vpop.f32.mrf.mxu1 }
 0x27d   :  { %v944_v1 = vcombine.low %v864_v28, %v866_v3  ;;  %v945_v12 = vcombine.low %v935_v20, %v937_v21  ;;  %v9587_v28 = vld [vmem:[#allocation46_spill] sm:$0xff] }
 0x27f   :  { %v952_v24 = vrot.slane %v944_v1, %v9540_v22  ;;  %v959_v26 = vrot.slane %v945_v12, %v9540_v22 }
 0x281   :  { %v960_v19 = vcombine.low %v952_v24, %v959_v26 }
 0x283   :  { %v962_v32 = vadd.f32 %v960_v19, %v9573_v2  ;;  %v9584_v2 = vld [vmem:[#allocation43_spill] sm:$0xff] }
 0x285   :  { %v5655_v18 = vmul.f32 -1.442695, %v962_v32  ;;  %v970_v27 = vrot.slane %v962_v32, 2  ;;  %v981_v29 = vrot.slane %v962_v32, 6  ;;  %v978_v13 = vrot.slane %v962_v32, 4 }
 0x287   :  { %5860 = vpow2.f32 %v5655_v18  ;;  %v5656_v7 = vmul.f32 -1.442695, %v970_v27  ;;  %v5657_v30 = vmul.f32 -1.442695, %v981_v29  ;;  %v9583_v18 = vld [vmem:[#allocation42_spill] sm:$0xff]  ;;  %v9586_v29 = vld [vmem:[#allocation45_spill] sm:$0xff] }
 0x289   :  { %5862 = vpow2.f32 %v5656_v7  ;;  %v9585_v7 = vld [vmem:[#allocation44_spill] sm:$0xff] }
 0x28a   :  { %5864 = vpow2.f32 %v5657_v30 }
 0x294   :  { %v5861_v25 = vpop.eup %5860 }
 0x295   :  { %v966_v3 = vadd.f32 1.0, %v5861_v25 }
 0x296   :  { %v5863_v20 = vpop.eup %5862 }
 0x297   :  { %5866 = vrcp.f32 %v966_v3  ;;  %v975_v21 = vadd.f32 1.0, %v5863_v20  ;;  %v5865_v24 = vpop.eup %5864  ;;  %v9588_v3 = vld [vmem:[#allocation47_spill] sm:$0xff]  ;;  %v9589_v20 = vld [vmem:[#allocation48_spill] sm:$0xff] }
 0x298   :  { %5868 = vtanh.f32 %v978_v13  ;;  %v986_v19 = vadd.f32 1.0, %v5865_v24  ;;  %v9582_v13 = vld [vmem:[#allocation41_spill] sm:$0xff]  ;;  %v9591_v24 = vld [vmem:[#allocation50_spill] sm:$0xff] }
 0x299   :  { %5870 = vrcp.f32 %v975_v21  ;;  %v9590_v21 = vld [vmem:[#allocation49_spill] sm:$0xff] }
 0x29a   :  { %5872 = vrcp.f32 %v986_v19  ;;  %v9595_v19 = vld [vmem:[#allocation53_spill] sm:$0xff] }
 0x2a4   :  { %v5867_v12 = vpop.eup %5866 }
 0x2a5   :  { %v5869_v23 = vpop.eup %5868 }
 0x2a6   :  { %v5871_v33 = vpop.eup %5870  ;;  %v990_v27 = vmul.f32 %v5869_v23, %v5867_v12  ;;  %v9592_v12 = vld [vmem:[#allocation51_spill] sm:$0xff]  ;;  %v9593_v23 = vld [vmem:[#allocation52_spill] sm:$0xff] }
 0x2a7   :  { %v989_v1 = vmul.f32 %v5871_v33, %v7055_v0  ;;  %v5873_v25 = vpop.eup %5872  ;;  %v9581_v0 = vld [vmem:[#allocation40_spill] sm:$0xff]  ;;  %v9594_v33 = vmov 0.0  }
 0x2a9   :  { %v7134_v26 = vadd.f32 %v990_v27, %v989_v1  ;;  %v9596_v1 = vld [vmem:[#allocation30_spill] sm:$0xff]  ;;  %v9597_v27 = vld [vmem:[#allocation31_spill] sm:$0xff] }
 0x2ab   :  { %5874 = vtanh.f32 %v7134_v26 }
 0x2b8   :  { %v5875_v32 = vpop.eup %5874 }
 0x2b9   :  { %v7137_v30 = vmul.f32 %v5875_v32, %v5873_v25 }
 0x2bb   :  { %9574 = vst [vmem:[#allocation32_spill] sm:$0xff] %v7137_v30  ;;  %1059 = vmatmul.mubr.f32.vlgmr.msra.gmra.mxu0 %v7137_v30  ;;  %1130 = vmatmul.mubr.f32.vlgmr.msra.gmra.mxu1 %v7137_v30 }
 0x2bc   :  { %1191 = vmatpush1.msra.mxu0 %v6728_v34  ;;  %1262 = vmatpush1.msra.mxu1 %v6730_v35  ;;  %v9575_v34 = vld [vmem:[#allocation34_spill] sm:$0xff]  ;;  %v9576_v35 = vld [vmem:[#allocation35_spill] sm:$0xff] }
 0x2bd   :  { %1192 = vmatprep.subr.mxu0 %v6732_v36  ;;  %1263 = vmatprep.subr.mxu1 %v6734_v37  ;;  %v9577_v36 = vld [vmem:[#allocation36_spill] sm:$0xff]  ;;  %v9578_v37 = vld [vmem:[#allocation37_spill] sm:$0xff] }
 0x2be   :  { %1193 = vmatpush1.msra.mxu0 %v6738_v38  ;;  %1264 = vmatpush1.msra.mxu1 %v6740_v39  ;;  %v9579_v38 = vld [vmem:[#allocation38_spill] sm:$0xff]  ;;  %v9580_v39 = vld [vmem:[#allocation39_spill] sm:$0xff] }
 0x2bf   :  { %1194 = vmatprep.subr.mxu0 %v6744_v40  ;;  %1265 = vmatprep.subr.mxu1 %v6746_v41 }
 0x2c0   :  { %1195 = vmatpush1.msra.mxu0 %v6750_v42  ;;  %1266 = vmatpush1.msra.mxu1 %v6752_v43 }
 0x2c1   :  { %1196 = vmatprep.subr.mxu0 %v6756_v44  ;;  %1267 = vmatprep.subr.mxu1 %v6758_v45 }
 0x2c2   :  { %1197 = vmatpush1.msra.mxu0 %v6762_v46  ;;  %1268 = vmatpush1.msra.mxu1 %v6764_v47 }
 0x2c3   :  { %1198 = vmatprep.subr.mxu0 %v6768_v48  ;;  %1269 = vmatprep.subr.mxu1 %v6770_v49 }
 0x2c4   :  { %1199 = vmatpush1.msra.mxu0 %v6774_v50  ;;  %1270 = vmatpush1.msra.mxu1 %v6776_v51 }
 0x2c5   :  { %1200 = vmatprep.subr.mxu0 %v6780_v52  ;;  %1271 = vmatprep.subr.mxu1 %v6782_v53 }
 0x2c6   :  { %1201 = vmatpush1.msra.mxu0 %v6786_v54  ;;  %1272 = vmatpush1.msra.mxu1 %v6788_v55 }
 0x2c7   :  { %1202 = vmatprep.subr.mxu0 %v6792_v56  ;;  %1273 = vmatprep.subr.mxu1 %v6794_v57 }
 0x2c8   :  { %1203 = vmatpush1.msra.mxu0 %v6796_v58  ;;  %1274 = vmatpush1.msra.mxu1 %v6800_v59 }
 0x2c9   :  { %1204 = vmatprep.subr.mxu0 %v6802_v60  ;;  %1275 = vmatprep.subr.mxu1 %v6804_v61 }
 0x2ca   :  { %1205 = vmatpush1.msra.mxu0 %v6808_v62  ;;  %1276 = vmatpush1.msra.mxu1 %v6810_v63 }
 0x2cb   :  { %1206 = vmatprep.subr.mxu0 %v6816_v5  ;;  %1277 = vmatprep.subr.mxu1 %v6818_v6 }
 0x2cc   :  { %1207 = vmatpush1.msra.mxu0 %v6822_v8  ;;  %1278 = vmatpush1.msra.mxu1 %v6824_v9 }
 0x2cd   :  { %1208 = vmatprep.subr.mxu0 %v6828_v10  ;;  %1279 = vmatprep.subr.mxu1 %v6830_v11 }
 0x2ce   :  { %1209 = vmatpush1.msra.mxu0 %v6834_v14  ;;  %1280 = vmatpush1.msra.mxu1 %v6836_v15 }
 0x2cf   :  { %1210 = vmatprep.subr.mxu0 %v6840_v16  ;;  %1281 = vmatprep.subr.mxu1 %v6842_v17 }
 0x2d0   :  { %1211 = vmatpush1.msra.mxu0 %v9548_v31  ;;  %1282 = vmatpush1.msra.mxu1 %v9549_v4 }
 0x2d1   :  { %1212 = vmatprep.subr.mxu0 %v9575_v34  ;;  %1283 = vmatprep.subr.mxu1 %v9576_v35 }
 0x2d2   :  { %1213 = vmatpush1.msra.mxu0 %v9577_v36  ;;  %1284 = vmatpush1.msra.mxu1 %v9578_v37 }
 0x2d3   :  { %1214 = vmatprep.subr.mxu0 %v9579_v38  ;;  %1285 = vmatprep.subr.mxu1 %v9580_v39 }
 0x2d4   :  { %1215 = vmatpush1.msra.mxu0 %v9581_v0  ;;  %1286 = vmatpush1.msra.mxu1 %v9582_v13 }
 0x2d5   :  { %1216 = vmatprep.subr.mxu0 %v9583_v18  ;;  %1287 = vmatprep.subr.mxu1 %v9584_v2 }
 0x2d6   :  { %1217 = vmatpush1.msra.mxu0 %v9585_v7  ;;  %1288 = vmatpush1.msra.mxu1 %v9586_v29  ;;  %v9599_v29 = vld [vmem:[#allocation59_spill] sm:$0xff] }
 0x2d7   :  { %1218 = vmatprep.subr.mxu0 %v9587_v28  ;;  %1289 = vmatprep.subr.mxu1 %v9588_v3  ;;  %v9598_v28 = vld [vmem:[#allocation58_spill] sm:$0xff] }
 0x2d8   :  { %1219 = vmatpush1.msra.mxu0 %v9589_v20  ;;  %1290 = vmatpush1.msra.mxu1 %v9590_v21 }
 0x2d9   :  { %1220 = vmatprep.subr.mxu0 %v9591_v24  ;;  %1291 = vmatprep.subr.mxu1 %v9592_v12 }
 0x2da   :  { %1221 = vmatpush1.msra.mxu0 %v9593_v23  ;;  %1254 = vmatprep.mubr.f32.mxu0 %v9594_v33 }
 0x2db   :  { %1292 = vmatpush1.msra.mxu1 %v9595_v19  ;;  %1325 = vmatprep.mubr.f32.mxu1 %v9594_v33  ;;  %v9600_v19 = vcombine.low %v9598_v28, %v9599_v29 }
 0x2dc   :  { %1386 = vmatprep.subr.mxu0 %v9596_v1  ;;  %1457 = vmatprep.subr.mxu1 %v9597_v27 }
 0x37b   :  { %v1060_v25 = vpop.f32.mrf.mxu0  ;;  %v1131_v32 = vpop.f32.mrf.mxu1 }
 0x37d   :  { %v1062_v30 = vpop.f32.mrf.mxu0  ;;  %v1133_v21 = vpop.f32.mrf.mxu1 }
 0x37e   :  { %v1140_v20 = vcombine.low %v1060_v25, %v1062_v30  ;;  %v1141_v24 = vcombine.low %v1131_v32, %v1133_v21  ;;  %v7223_v32 = vld [vmem:[#allocation8 + $0x1f0] sm:$0xff] }
 0x380   :  { %v1148_v12 = vrot.slane %v1140_v20, %v9540_v22  ;;  %v1155_v23 = vrot.slane %v1141_v24, %v9540_v22 }
 0x382   :  { %v1156_v3 = vcombine.low %v1148_v12, %v1155_v23 }
 0x384   :  { %v1158_v7 = vadd.f32 %v1156_v3, %v9600_v19 }
 0x386   :  { %v5658_v33 = vmul.f32 -1.442695, %v1158_v7  ;;  %v1166_v2 = vrot.slane %v1158_v7, 2  ;;  %v1177_v27 = vrot.slane %v1158_v7, 6  ;;  %v1174_v0 = vrot.slane %v1158_v7, 4 }
 0x388   :  { %5876 = vpow2.f32 %v5658_v33  ;;  %v5659_v1 = vmul.f32 -1.442695, %v1166_v2  ;;  %v5660_v18 = vmul.f32 -1.442695, %v1177_v27  ;;  %v7232_v27 = vld [vmem:[#allocation8 + $0x1c0] sm:$0xff] }
 0x38a   :  { %5878 = vpow2.f32 %v5659_v1  ;;  %v7229_v1 = vld [vmem:[#allocation8 + $0x1d8] sm:$0xff] }
 0x38b   :  { %5880 = vpow2.f32 %v5660_v18 }
 0x395   :  { %v5877_v13 = vpop.eup %5876 }
 0x396   :  { %v1162_v30 = vadd.f32 1.0, %v5877_v13 }
 0x397   :  { %v5879_v21 = vpop.eup %5878 }
 0x398   :  { %5882 = vrcp.f32 %v1162_v30  ;;  %v1171_v20 = vadd.f32 1.0, %v5879_v21  ;;  %v5881_v24 = vpop.eup %5880  ;;  %v7235_v30 = vld [vmem:[#allocation8 + $0x1d0] sm:$0xff] }
 0x399   :  { %5884 = vtanh.f32 %v1174_v0  ;;  %v1182_v19 = vadd.f32 1.0, %v5881_v24  ;;  %v7220_v0 = vld [vmem:[#allocation8 + $0x1e0] sm:$0xff] }
 0x39a   :  { %5886 = vrcp.f32 %v1171_v20 }
 0x39b   :  { %5888 = vrcp.f32 %v1182_v19  ;;  %v9620_v19 = vld [vmem:[#allocation64_spill] sm:$0xff] }
 0x3a5   :  { %v5883_v12 = vpop.eup %5882 }
 0x3a6   :  { %v5885_v23 = vpop.eup %5884 }
 0x3a7   :  { %v5887_v3 = vpop.eup %5886  ;;  %v1186_v2 = vmul.f32 %v5885_v23, %v5883_v12 }
 0x3a8   :  { %v1185_v33 = vmul.f32 %v5887_v3, %v7134_v26  ;;  %v5889_v13 = vpop.eup %5888  ;;  %v7226_v26 = vld [vmem:[#allocation8 + $0x1c8] sm:$0xff] }
 0x3a9   :  { %v9619_v3 = vld [vmem:[#allocation32_spill] sm:$0xff] }
 0x3aa   :  { %v7213_v25 = vadd.f32 %v1186_v2, %v1185_v33  ;;  %v2328_v33 = vcombine.low %v9620_v19, %v9619_v3  ;;  %v7462_v3 = vld [vmem:[#allocation8 + $0x40] sm:$0xff]  ;;  %v7465_v19 = vld [vmem:[#allocation8 + $0x50] sm:$0xff] }
 0x3ac   :  { %5890 = vtanh.f32 %v7213_v25 }
 0x3b9   :  { %v5891_v7 = vpop.eup %5890 }
 0x3ba   :  { %v7216_v18 = vmul.f32 %v5891_v7, %v5889_v13  ;;  %v7322_v7 = vld [vmem:[#allocation8 + $0x1a8] sm:$0xff] }
 0x3bc   :  { %1255 = vmatmul.mubr.f32.vlgmr.msra.gmra.mxu0 %v7216_v18  ;;  %1326 = vmatmul.mubr.f32.vlgmr.msra.gmra.mxu1 %v7216_v18 }
 0x3bd   :  { %1387 = vmatpush1.msra.mxu0 %v7220_v0  ;;  %1458 = vmatpush1.msra.mxu1 %v7223_v32 }
 0x3be   :  { %1388 = vmatprep.subr.mxu0 %v7226_v26  ;;  %1459 = vmatprep.subr.mxu1 %v7229_v1 }
 0x3bf   :  { %1389 = vmatpush1.msra.mxu0 %v7232_v27  ;;  %1460 = vmatpush1.msra.mxu1 %v7235_v30 }
 0x3c0   :  { %1390 = vmatprep.subr.mxu0 %v6744_v40  ;;  %1461 = vmatprep.subr.mxu1 %v6746_v41  ;;  %v9601_v40 = vld [vmem:[#allocation40_spill] sm:$0xff]  ;;  %v9602_v41 = vld [vmem:[#allocation41_spill] sm:$0xff] }
 0x3c1   :  { %1391 = vmatpush1.msra.mxu0 %v6750_v42  ;;  %1462 = vmatpush1.msra.mxu1 %v6752_v43  ;;  %v9603_v42 = vld [vmem:[#allocation42_spill] sm:$0xff]  ;;  %v9604_v43 = vld [vmem:[#allocation43_spill] sm:$0xff] }
 0x3c2   :  { %1392 = vmatprep.subr.mxu0 %v6756_v44  ;;  %1463 = vmatprep.subr.mxu1 %v6758_v45  ;;  %v9605_v44 = vld [vmem:[#allocation44_spill] sm:$0xff]  ;;  %v9606_v45 = vld [vmem:[#allocation45_spill] sm:$0xff]  ;;  %9632 = vst [vmem:[#allocation42_spill] sm:$0xff] %v7462_v3  ;;  %9633 = vst [vmem:[#allocation43_spill] sm:$0xff] %v7465_v19 }
 0x3c3   :  { %1393 = vmatpush1.msra.mxu0 %v6762_v46  ;;  %1464 = vmatpush1.msra.mxu1 %v6764_v47  ;;  %v9607_v46 = vld [vmem:[#allocation46_spill] sm:$0xff]  ;;  %v9608_v47 = vld [vmem:[#allocation47_spill] sm:$0xff] }
 0x3c4   :  { %1394 = vmatprep.subr.mxu0 %v6768_v48  ;;  %1465 = vmatprep.subr.mxu1 %v6770_v49  ;;  %v9609_v48 = vld [vmem:[#allocation48_spill] sm:$0xff]  ;;  %v9610_v49 = vld [vmem:[#allocation49_spill] sm:$0xff] }
 0x3c5   :  { %1395 = vmatpush1.msra.mxu0 %v6774_v50  ;;  %1466 = vmatpush1.msra.mxu1 %v6776_v51  ;;  %v9611_v50 = vld [vmem:[#allocation50_spill] sm:$0xff]  ;;  %v9612_v51 = vld [vmem:[#allocation51_spill] sm:$0xff] }
 0x3c6   :  { %1396 = vmatprep.subr.mxu0 %v6780_v52  ;;  %1467 = vmatprep.subr.mxu1 %v6782_v53  ;;  %v9613_v52 = vld [vmem:[#allocation52_spill] sm:$0xff]  ;;  %v9614_v53 = vmov 0.0  }
 0x3c7   :  { %1397 = vmatpush1.msra.mxu0 %v6786_v54  ;;  %1468 = vmatpush1.msra.mxu1 %v6788_v55  ;;  %v9615_v54 = vld [vmem:[#allocation53_spill] sm:$0xff] }
 0x3c8   :  { %1398 = vmatprep.subr.mxu0 %v6792_v56  ;;  %1469 = vmatprep.subr.mxu1 %v6794_v57  ;;  %v7296_v55 = vld [vmem:[#allocation8 + $0x1e8] sm:$0xff]  ;;  %v7299_v56 = vld [vmem:[#allocation8 + $0x1f8] sm:$0xff] }
 0x3c9   :  { %1399 = vmatpush1.msra.mxu0 %v6796_v58  ;;  %1470 = vmatpush1.msra.mxu1 %v6800_v59  ;;  %9616 = vst [vmem:[#allocation33_spill] sm:$0xff] %v7296_v55  ;;  %9617 = vst [vmem:[#allocation34_spill] sm:$0xff] %v7299_v56 }
 0x3ca   :  { %1400 = vmatprep.subr.mxu0 %v6802_v60  ;;  %1471 = vmatprep.subr.mxu1 %v6804_v61 }
 0x3cb   :  { %1401 = vmatpush1.msra.mxu0 %v6808_v62  ;;  %1472 = vmatpush1.msra.mxu1 %v6810_v63 }
 0x3cc   :  { %1402 = vmatprep.subr.mxu0 %v6816_v5  ;;  %1473 = vmatprep.subr.mxu1 %v6818_v6 }
 0x3cd   :  { %1403 = vmatpush1.msra.mxu0 %v6822_v8  ;;  %1474 = vmatpush1.msra.mxu1 %v6824_v9  ;;  %v9618_v8 = vcombine.high %v9598_v28, %v9599_v29 }
 0x3ce   :  { %1404 = vmatprep.subr.mxu0 %v6828_v10  ;;  %1475 = vmatprep.subr.mxu1 %v6830_v11 }
 0x3cf   :  { %1405 = vmatpush1.msra.mxu0 %v6834_v14  ;;  %1476 = vmatpush1.msra.mxu1 %v6836_v15 }
 0x3d0   :  { %1406 = vmatprep.subr.mxu0 %v6840_v16  ;;  %1477 = vmatprep.subr.mxu1 %v6842_v17 }
 0x3d1   :  { %1407 = vmatpush1.msra.mxu0 %v9548_v31  ;;  %1478 = vmatpush1.msra.mxu1 %v9549_v4 }
 0x3d2   :  { %1408 = vmatprep.subr.mxu0 %v9575_v34  ;;  %1479 = vmatprep.subr.mxu1 %v9576_v35 }
 0x3d3   :  { %1409 = vmatpush1.msra.mxu0 %v9577_v36  ;;  %1480 = vmatpush1.msra.mxu1 %v9578_v37 }
 0x3d4   :  { %1410 = vmatprep.subr.mxu0 %v9579_v38  ;;  %1481 = vmatprep.subr.mxu1 %v9580_v39 }
 0x3d5   :  { %1411 = vmatpush1.msra.mxu0 %v9601_v40  ;;  %1482 = vmatpush1.msra.mxu1 %v9602_v41  ;;  %v7330_v41 = vld [vmem:[#allocation8 + $0x1a0] sm:$0xff] }
 0x3d6   :  { %1412 = vmatprep.subr.mxu0 %v9603_v42  ;;  %1483 = vmatprep.subr.mxu1 %v9604_v43  ;;  %v7333_v42 = vld [vmem:[#allocation8 + $0x1b0] sm:$0xff]  ;;  %v7336_v43 = vld [vmem:[#allocation8 + $0x188] sm:$0xff] }
 0x3d7   :  { %1413 = vmatpush1.msra.mxu0 %v9605_v44  ;;  %1484 = vmatpush1.msra.mxu1 %v9606_v45  ;;  %v7339_v44 = vld [vmem:[#allocation8 + $0x198] sm:$0xff]  ;;  %v7342_v45 = vld [vmem:[#allocation8 + $0x180] sm:$0xff] }
 0x3d8   :  { %1414 = vmatprep.subr.mxu0 %v9607_v46  ;;  %1485 = vmatprep.subr.mxu1 %v9608_v47  ;;  %v7345_v46 = vld [vmem:[#allocation8 + $0x190] sm:$0xff]  ;;  %v7348_v47 = vld [vmem:[#allocation8 + $0x168] sm:$0xff] }
 0x3d9   :  { %1415 = vmatpush1.msra.mxu0 %v9609_v48  ;;  %1486 = vmatpush1.msra.mxu1 %v9610_v49  ;;  %v7351_v48 = vld [vmem:[#allocation8 + $0x178] sm:$0xff]  ;;  %v7354_v49 = vld [vmem:[#allocation8 + $0x160] sm:$0xff] }
 0x3da   :  { %1416 = vmatprep.subr.mxu0 %v9611_v50  ;;  %1487 = vmatprep.subr.mxu1 %v9612_v51  ;;  %v7357_v50 = vld [vmem:[#allocation8 + $0x170] sm:$0xff]  ;;  %v7360_v51 = vld [vmem:[#allocation8 + $0x148] sm:$0xff] }
 0x3db   :  { %1417 = vmatpush1.msra.mxu0 %v9613_v52  ;;  %1450 = vmatprep.mubr.f32.mxu0 %v9614_v53  ;;  %v7363_v52 = vld [vmem:[#allocation8 + $0x158] sm:$0xff] }
 0x3dc   :  { %1488 = vmatpush1.msra.mxu1 %v9615_v54  ;;  %1521 = vmatprep.mubr.f32.mxu1 %v9614_v53  ;;  %v7366_v54 = vld [vmem:[#allocation8 + $0x140] sm:$0xff] }
 0x3dd   :  { %1582 = vmatprep.subr.mxu0 %v7296_v55  ;;  %1653 = vmatprep.subr.mxu1 %v7299_v56 }
 0x47c   :  { %v1256_v57 = vpop.f32.mrf.mxu0  ;;  %v1327_v58 = vpop.f32.mrf.mxu1 }
 0x47e   :  { %v1258_v59 = vpop.f32.mrf.mxu0  ;;  %v1329_v60 = vpop.f32.mrf.mxu1 }
 0x47f   :  { %v1336_v61 = vcombine.low %v1256_v57, %v1258_v59  ;;  %v1337_v62 = vcombine.low %v1327_v58, %v1329_v60  ;;  %v7369_v57 = vld [vmem:[#allocation8 + $0x150] sm:$0xff]  ;;  %v7372_v58 = vld [vmem:[#allocation8 + $0x128] sm:$0xff]  ;;  %v7375_v59 = vld [vmem:[#allocation8 + $0x138] sm:$0xff] }
 0x480   :  { %v7378_v60 = vld [vmem:[#allocation8 + $0x120] sm:$0xff] }
 0x481   :  { %v1344_v63 = vrot.slane %v1336_v61, %v9540_v22  ;;  %v1351_v5 = vrot.slane %v1337_v62, %v9540_v22  ;;  %v7381_v61 = vld [vmem:[#allocation8 + $0x130] sm:$0xff]  ;;  %v7384_v62 = vld [vmem:[#allocation8 + $0x108] sm:$0xff] }
 0x483   :  { %v1352_v6 = vcombine.low %v1344_v63, %v1351_v5  ;;  %v7387_v63 = vld [vmem:[#allocation8 + $0x118] sm:$0xff]  ;;  %v7390_v5 = vld [vmem:[#allocation8 + $0x100] sm:$0xff] }
 0x485   :  { %v1354_v9 = vadd.f32 %v1352_v6, %v9618_v8  ;;  %v7393_v6 = vld [vmem:[#allocation8 + $0x110] sm:$0xff]  ;;  %v7396_v8 = vld [vmem:[#allocation8 + $0xe8] sm:$0xff] }
 0x487   :  { %v5661_v10 = vmul.f32 -1.442695, %v1354_v9  ;;  %v1362_v11 = vrot.slane %v1354_v9, 2  ;;  %v1373_v15 = vrot.slane %v1354_v9, 6  ;;  %v1370_v31 = vrot.slane %v1354_v9, 4  ;;  %v7399_v9 = vld [vmem:[#allocation8 + $0xf8] sm:$0xff] }
 0x489   :  { %5892 = vpow2.f32 %v5661_v10  ;;  %v5662_v14 = vmul.f32 -1.442695, %v1362_v11  ;;  %v5663_v16 = vmul.f32 -1.442695, %v1373_v15  ;;  %v7402_v10 = vld [vmem:[#allocation8 + $0xe0] sm:$0xff]  ;;  %v7405_v11 = vld [vmem:[#allocation8 + $0xf0] sm:$0xff] }
 0x48a   :  { %v7411_v15 = vld [vmem:[#allocation8 + $0xd8] sm:$0xff] }
 0x48b   :  { %5894 = vpow2.f32 %v5662_v14  ;;  %v7408_v14 = vld [vmem:[#allocation8 + $0xc8] sm:$0xff] }
 0x48c   :  { %5896 = vpow2.f32 %v5663_v16  ;;  %v7414_v16 = vld [vmem:[#allocation8 + $0xc0] sm:$0xff] }
 0x496   :  { %v5893_v17 = vpop.eup %5892 }
 0x497   :  { %v1358_v4 = vadd.f32 1.0, %v5893_v17  ;;  %v7417_v17 = vld [vmem:[#allocation8 + $0xd0] sm:$0xff] }
 0x498   :  { %v5895_v34 = vpop.eup %5894 }
 0x499   :  { %5898 = vrcp.f32 %v1358_v4  ;;  %v1367_v35 = vadd.f32 1.0, %v5895_v34  ;;  %v5897_v36 = vpop.eup %5896  ;;  %v7423_v4 = vld [vmem:[#allocation8 + $0xb8] sm:$0xff]  ;;  %v7426_v34 = vld [vmem:[#allocation8 + $0xa0] sm:$0xff] }
 0x49a   :  { %5900 = vtanh.f32 %v1370_v31  ;;  %v1378_v29 = vadd.f32 1.0, %v5897_v36  ;;  %v7420_v31 = vld [vmem:[#allocation8 + $0xa8] sm:$0xff] }
 0x49b   :  { %5902 = vrcp.f32 %v1367_v35  ;;  %v7429_v35 = vld [vmem:[#allocation8 + $0xb0] sm:$0xff]  ;;  %v7432_v36 = vld [vmem:[#allocation8 + $0x88] sm:$0xff] }
 0x49c   :  { %5904 = vrcp.f32 %v1378_v29  ;;  %9622 = vst [vmem:[#allocation36_spill] sm:$0xff] %v7432_v36  ;;  %v7444_v29 = vld [vmem:[#allocation8 + $0x68] sm:$0xff] }
 0x49d   :  { %9626 = vst [vmem:[#allocation30_spill] sm:$0xff] %v7444_v29 }
 0x4a6   :  { %v5899_v37 = vpop.eup %5898 }
 0x4a7   :  { %v5901_v38 = vpop.eup %5900 }
 0x4a8   :  { %v5903_v39 = vpop.eup %5902  ;;  %v1382_v21 = vmul.f32 %v5901_v38, %v5899_v37  ;;  %v7435_v37 = vld [vmem:[#allocation8 + $0x98] sm:$0xff]  ;;  %v7438_v38 = vld [vmem:[#allocation8 + $0x80] sm:$0xff] }
 0x4a9   :  { %v1381_v28 = vmul.f32 %v5903_v39, %v7213_v25  ;;  %v5905_v24 = vpop.eup %5904  ;;  %v2336_v25 = vrot.slane %v2328_v33, %v9540_v22  ;;  %9623 = vst [vmem:[#allocation37_spill] sm:$0xff] %v7435_v37  ;;  %9624 = vst [vmem:[#allocation38_spill] sm:$0xff] %v7438_v38  ;;  %v7441_v39 = vld [vmem:[#allocation8 + $0x90] sm:$0xff]  ;;  %v7468_v33 = vld [vmem:[#allocation8 + $0x28] sm:$0xff] }
 0x4aa   :  { %9625 = vst [vmem:[#allocation39_spill] sm:$0xff] %v7441_v39  ;;  %9634 = vst [vmem:[#allocation44_spill] sm:$0xff] %v7468_v33 }
 0x4ab   :  { %v7308_v20 = vadd.f32 %v1382_v21, %v1381_v28  ;;  %v7447_v28 = vld [vmem:[#allocation8 + $0x78] sm:$0xff]  ;;  %v7450_v21 = vld [vmem:[#allocation8 + $0x60] sm:$0xff] }
 0x4ac   :  { %9627 = vst [vmem:[#allocation31_spill] sm:$0xff] %v7447_v28  ;;  %9628 = vst [vmem:[#allocation58_spill] sm:$0xff] %v7450_v21 }
 0x4ad   :  { %5906 = vtanh.f32 %v7308_v20 }
 0x4ba   :  { %v5907_v12 = vpop.eup %5906 }
 0x4bb   :  { %v1385_v23 = vmul.f32 %v5907_v12, %v5905_v24  ;;  %v7453_v24 = vld [vmem:[#allocation8 + $0x70] sm:$0xff]  ;;  %v7456_v12 = vld [vmem:[#allocation8 + $0x48] sm:$0xff] }
 0x4bc   :  { %9629 = vst [vmem:[#allocation59_spill] sm:$0xff] %v7453_v24  ;;  %9630 = vst [vmem:[#allocation40_spill] sm:$0xff] %v7456_v12 }
 0x4bd   :  { %1451 = vmatmul.mubr.f32.vlgmr.msra.gmra.mxu0 %v1385_v23  ;;  %1522 = vmatmul.mubr.f32.vlgmr.msra.gmra.mxu1 %v1385_v23  ;;  %v2329_v2 = vcombine.low %v7216_v18, %v1385_v23  ;;  %v7325_v18 = vld [vmem:[#allocation8 + $0x1b8] sm:$0xff] }
 0x4be   :  { %1583 = vmatpush1.msra.mxu0 %v7220_v0  ;;  %1654 = vmatpush1.msra.mxu1 %v7223_v32  ;;  %v7459_v23 = vld [vmem:[#allocation8 + $0x58] sm:$0xff] }
 0x4bf   :  { %1584 = vmatprep.subr.mxu0 %v7226_v26  ;;  %1655 = vmatprep.subr.mxu1 %v7229_v1  ;;  %v2343_v13 = vrot.slane %v2329_v2, %v9540_v22  ;;  %9631 = vst [vmem:[#allocation41_spill] sm:$0xff] %v7459_v23  ;;  %v7471_v2 = vld [vmem:[#allocation8 + $0x38] sm:$0xff] }
 0x4c0   :  { %1585 = vmatpush1.msra.mxu0 %v7232_v27  ;;  %1656 = vmatpush1.msra.mxu1 %v7235_v30  ;;  %9635 = vst [vmem:[#allocation45_spill] sm:$0xff] %v7471_v2 }
 0x4c1   :  { %1586 = vmatprep.subr.mxu0 %v7322_v7  ;;  %1657 = vmatprep.subr.mxu1 %v7325_v18  ;;  %v7328_v40 = vcombine.low %v2336_v25, %v2343_v13  ;;  %v7474_v25 = vld [vmem:[#allocation8 + $0x20] sm:$0xff]  ;;  %v7477_v13 = vld [vmem:[#allocation8 + $0x30] sm:$0xff] }
 0x4c2   :  { %1587 = vmatpush1.msra.mxu0 %v7330_v41  ;;  %1658 = vmatpush1.msra.mxu1 %v7333_v42  ;;  %9636 = vst [vmem:[#allocation46_spill] sm:$0xff] %v7474_v25  ;;  %9637 = vst [vmem:[#allocation47_spill] sm:$0xff] %v7477_v13 }
 0x4c3   :  { %9621 = vst [vmem:[#allocation35_spill] sm:$0xff] %v7328_v40  ;;  %1588 = vmatprep.subr.mxu0 %v7336_v43  ;;  %1659 = vmatprep.subr.mxu1 %v7339_v44  ;;  %v7480_v40 = vld [vmem:[#allocation8 + $0x8] sm:$0xff] }
 0x4c4   :  { %1589 = vmatpush1.msra.mxu0 %v7342_v45  ;;  %1660 = vmatpush1.msra.mxu1 %v7345_v46  ;;  %9638 = vst [vmem:[#allocation48_spill] sm:$0xff] %v7480_v40 }
 0x4c5   :  { %1590 = vmatprep.subr.mxu0 %v7348_v47  ;;  %1661 = vmatprep.subr.mxu1 %v7351_v48 }
 0x4c6   :  { %1591 = vmatpush1.msra.mxu0 %v7354_v49  ;;  %1662 = vmatpush1.msra.mxu1 %v7357_v50 }
 0x4c7   :  { %1592 = vmatprep.subr.mxu0 %v7360_v51  ;;  %1663 = vmatprep.subr.mxu1 %v7363_v52 }
 0x4c8   :  { %1593 = vmatpush1.msra.mxu0 %v7366_v54  ;;  %1664 = vmatpush1.msra.mxu1 %v7369_v57 }
 0x4c9   :  { %1594 = vmatprep.subr.mxu0 %v7372_v58  ;;  %1665 = vmatprep.subr.mxu1 %v7375_v59 }
 0x4ca   :  { %1595 = vmatpush1.msra.mxu0 %v7378_v60  ;;  %1666 = vmatpush1.msra.mxu1 %v7381_v61 }
 0x4cb   :  { %1596 = vmatprep.subr.mxu0 %v7384_v62  ;;  %1667 = vmatprep.subr.mxu1 %v7387_v63 }
 0x4cc   :  { %1597 = vmatpush1.msra.mxu0 %v7390_v5  ;;  %1668 = vmatpush1.msra.mxu1 %v7393_v6 }
 0x4cd   :  { %1598 = vmatprep.subr.mxu0 %v7396_v8  ;;  %1669 = vmatprep.subr.mxu1 %v7399_v9 }
 0x4ce   :  { %1599 = vmatpush1.msra.mxu0 %v7402_v10  ;;  %1670 = vmatpush1.msra.mxu1 %v7405_v11 }
 0x4cf   :  { %1600 = vmatprep.subr.mxu0 %v7408_v14  ;;  %1671 = vmatprep.subr.mxu1 %v7411_v15 }
 0x4d0   :  { %1601 = vmatpush1.msra.mxu0 %v7414_v16  ;;  %1672 = vmatpush1.msra.mxu1 %v7417_v17 }
 0x4d1   :  { %1602 = vmatprep.subr.mxu0 %v7420_v31  ;;  %1673 = vmatprep.subr.mxu1 %v7423_v4 }
 0x4d2   :  { %1603 = vmatpush1.msra.mxu0 %v7426_v34  ;;  %1674 = vmatpush1.msra.mxu1 %v7429_v35 }
 0x4d3   :  { %1604 = vmatprep.subr.mxu0 %v7432_v36  ;;  %1675 = vmatprep.subr.mxu1 %v7435_v37 }
 0x4d4   :  { %1605 = vmatpush1.msra.mxu0 %v7438_v38  ;;  %1676 = vmatpush1.msra.mxu1 %v7441_v39 }
 0x4d5   :  { %1606 = vmatprep.subr.mxu0 %v7444_v29  ;;  %1677 = vmatprep.subr.mxu1 %v7447_v28  ;;  %v9643_v28 = vld [vmem:[#allocation62_spill] sm:$0xff] }
 0x4d6   :  { %1607 = vmatpush1.msra.mxu0 %v7450_v21  ;;  %1678 = vmatpush1.msra.mxu1 %v7453_v24  ;;  %v9642_v21 = vld [vmem:[#allocation60_spill] sm:$0xff] }
 0x4d7   :  { %1608 = vmatprep.subr.mxu0 %v7456_v12  ;;  %1679 = vmatprep.subr.mxu1 %v7459_v23 }
 0x4d8   :  { %1609 = vmatpush1.msra.mxu0 %v7462_v3  ;;  %1680 = vmatpush1.msra.mxu1 %v7465_v19  ;;  %v7483_v19 = vld [vmem:[#allocation8 + $0x18] sm:$0xff] }
 0x4d9   :  { %1610 = vmatprep.subr.mxu0 %v7468_v33  ;;  %1681 = vmatprep.subr.mxu1 %v7471_v2  ;;  %9639 = vst [vmem:[#allocation49_spill] sm:$0xff] %v7483_v19  ;;  %v7486_v33 = vld [vmem:[#allocation8] sm:$0xff]  ;;  %v7490_v2 = vld [vmem:[#allocation8 + $0x10] sm:$0xff] }
 0x4da   :  { %1611 = vmatpush1.msra.mxu0 %v7474_v25  ;;  %1682 = vmatpush1.msra.mxu1 %v7477_v13  ;;  %9640 = vst [vmem:[#allocation50_spill] sm:$0xff] %v7486_v33  ;;  %9641 = vst [vmem:[#allocation51_spill] sm:$0xff] %v7490_v2 }
 0x4db   :  { %1612 = vmatprep.subr.mxu0 %v7480_v40  ;;  %1683 = vmatprep.subr.mxu1 %v7483_v19 }
 0x4dc   :  { %1613 = vmatpush1.msra.mxu0 %v7486_v33  ;;  %1646 = vmatprep.mubr.f32.mxu0 %v9614_v53 }
 0x4dd   :  { %1684 = vmatpush1.msra.mxu1 %v7490_v2  ;;  %1717 = vmatprep.mubr.f32.mxu1 %v9614_v53  ;;  %v9644_v2 = vcombine.low %v9642_v21, %v9643_v28 }
 0x4de   :  { %1778 = vmatprep.subr.mxu0 %v7296_v55  ;;  %1849 = vmatprep.subr.mxu1 %v7299_v56 }
 0x57d   :  { %v1452_v40 = vpop.f32.mrf.mxu0  ;;  %v1523_v13 = vpop.f32.mrf.mxu1 }
 0x57f   :  { %v1454_v25 = vpop.f32.mrf.mxu0  ;;  %v1525_v19 = vpop.f32.mrf.mxu1 }
 0x580   :  { %v1532_v3 = vcombine.low %v1452_v40, %v1454_v25  ;;  %v1533_v23 = vcombine.low %v1523_v13, %v1525_v19  ;;  %v9649_v25 = vld [vmem:[#allocation39_spill] sm:$0xff]  ;;  %v9650_v13 = vld [vmem:[#allocation30_spill] sm:$0xff] }
 0x582   :  { %v1540_v33 = vrot.slane %v1532_v3, %v9540_v22  ;;  %v1547_v12 = vrot.slane %v1533_v23, %v9540_v22 }
 0x584   :  { %v1548_v24 = vcombine.low %v1540_v33, %v1547_v12 }
 0x586   :  { %v1550_v29 = vadd.f32 %v1548_v24, %v9644_v2 }
 0x588   :  { %v5664_v53 = vmul.f32 -1.442695, %v1550_v29  ;;  %v1558_v39 = vrot.slane %v1550_v29, 2  ;;  %v1569_v56 = vrot.slane %v1550_v29, 6  ;;  %v1566_v36 = vrot.slane %v1550_v29, 4  ;;  %v9648_v29 = vld [vmem:[#allocation38_spill] sm:$0xff] }
 0x58a   :  { %5908 = vpow2.f32 %v5664_v53  ;;  %v5665_v55 = vmul.f32 -1.442695, %v1558_v39  ;;  %v5666_v38 = vmul.f32 -1.442695, %v1569_v56 }
 0x58c   :  { %5910 = vpow2.f32 %v5665_v55 }
 0x58d   :  { %5912 = vpow2.f32 %v5666_v38 }
 0x597   :  { %v5909_v37 = vpop.eup %5908 }
 0x598   :  { %v1554_v40 = vadd.f32 1.0, %v5909_v37 }
 0x599   :  { %v5911_v19 = vpop.eup %5910 }
 0x59a   :  { %5914 = vrcp.f32 %v1554_v40  ;;  %v1563_v3 = vadd.f32 1.0, %v5911_v19  ;;  %v5913_v12 = vpop.eup %5912  ;;  %v9651_v40 = vld [vmem:[#allocation31_spill] sm:$0xff]  ;;  %v9652_v19 = vld [vmem:[#allocation58_spill] sm:$0xff] }
 0x59b   :  { %5916 = vtanh.f32 %v1566_v36  ;;  %v1574_v2 = vadd.f32 1.0, %v5913_v12  ;;  %v9647_v36 = vld [vmem:[#allocation37_spill] sm:$0xff]  ;;  %v9654_v12 = vld [vmem:[#allocation40_spill] sm:$0xff] }
 0x59c   :  { %5918 = vrcp.f32 %v1563_v3  ;;  %v9653_v3 = vld [vmem:[#allocation59_spill] sm:$0xff] }
 0x59d   :  { %5920 = vrcp.f32 %v1574_v2  ;;  %v9658_v2 = vld [vmem:[#allocation44_spill] sm:$0xff] }
 0x5a7   :  { %v5915_v23 = vpop.eup %5914 }
 0x5a8   :  { %v5917_v33 = vpop.eup %5916 }
 0x5a9   :  { %v5919_v24 = vpop.eup %5918  ;;  %v1578_v39 = vmul.f32 %v5917_v33, %v5915_v23  ;;  %v9655_v23 = vld [vmem:[#allocation41_spill] sm:$0xff]  ;;  %v9656_v33 = vld [vmem:[#allocation42_spill] sm:$0xff] }
 0x5aa   :  { %v1577_v53 = vmul.f32 %v5919_v24, %v7308_v20  ;;  %v5921_v56 = vpop.eup %5920  ;;  %v9646_v20 = vld [vmem:[#allocation36_spill] sm:$0xff]  ;;  %v9657_v24 = vld [vmem:[#allocation43_spill] sm:$0xff] }
 0x5ac   :  { %v7502_v55 = vadd.f32 %v1578_v39, %v1577_v53  ;;  %v9659_v53 = vld [vmem:[#allocation45_spill] sm:$0xff]  ;;  %v9660_v39 = vld [vmem:[#allocation46_spill] sm:$0xff] }
 0x5ae   :  { %5922 = vtanh.f32 %v7502_v55 }
 0x5bb   :  { %v5923_v37 = vpop.eup %5922 }
 0x5bc   :  { %v7505_v38 = vmul.f32 %v5923_v37, %v5921_v56  ;;  %v9661_v56 = vld [vmem:[#allocation47_spill] sm:$0xff]  ;;  %v9662_v37 = vld [vmem:[#allocation48_spill] sm:$0xff] }
 0x5be   :  { %9645 = vst [vmem:[#allocation52_spill] sm:$0xff] %v7505_v38  ;;  %1647 = vmatmul.mubr.f32.vlgmr.msra.gmra.mxu0 %v7505_v38  ;;  %1718 = vmatmul.mubr.f32.vlgmr.msra.gmra.mxu1 %v7505_v38  ;;  %v9663_v38 = vld [vmem:[#allocation49_spill] sm:$0xff] }
 0x5bf   :  { %1779 = vmatpush1.msra.mxu0 %v7220_v0  ;;  %1850 = vmatpush1.msra.mxu1 %v7223_v32 }
 0x5c0   :  { %1780 = vmatprep.subr.mxu0 %v7226_v26  ;;  %1851 = vmatprep.subr.mxu1 %v7229_v1 }
 0x5c1   :  { %1781 = vmatpush1.msra.mxu0 %v7232_v27  ;;  %1852 = vmatpush1.msra.mxu1 %v7235_v30 }
 0x5c2   :  { %1782 = vmatprep.subr.mxu0 %v7322_v7  ;;  %1853 = vmatprep.subr.mxu1 %v7325_v18 }
 0x5c3   :  { %1783 = vmatpush1.msra.mxu0 %v7330_v41  ;;  %1854 = vmatpush1.msra.mxu1 %v7333_v42 }
 0x5c4   :  { %1784 = vmatprep.subr.mxu0 %v7336_v43  ;;  %1855 = vmatprep.subr.mxu1 %v7339_v44 }
 0x5c5   :  { %1785 = vmatpush1.msra.mxu0 %v7342_v45  ;;  %1856 = vmatpush1.msra.mxu1 %v7345_v46 }
 0x5c6   :  { %1786 = vmatprep.subr.mxu0 %v7348_v47  ;;  %1857 = vmatprep.subr.mxu1 %v7351_v48 }
 0x5c7   :  { %1787 = vmatpush1.msra.mxu0 %v7354_v49  ;;  %1858 = vmatpush1.msra.mxu1 %v7357_v50 }
 0x5c8   :  { %1788 = vmatprep.subr.mxu0 %v7360_v51  ;;  %1859 = vmatprep.subr.mxu1 %v7363_v52 }
 0x5c9   :  { %1789 = vmatpush1.msra.mxu0 %v7366_v54  ;;  %1860 = vmatpush1.msra.mxu1 %v7369_v57 }
 0x5ca   :  { %1790 = vmatprep.subr.mxu0 %v7372_v58  ;;  %1861 = vmatprep.subr.mxu1 %v7375_v59 }
 0x5cb   :  { %1791 = vmatpush1.msra.mxu0 %v7378_v60  ;;  %1862 = vmatpush1.msra.mxu1 %v7381_v61 }
 0x5cc   :  { %1792 = vmatprep.subr.mxu0 %v7384_v62  ;;  %1863 = vmatprep.subr.mxu1 %v7387_v63 }
 0x5cd   :  { %1793 = vmatpush1.msra.mxu0 %v7390_v5  ;;  %1864 = vmatpush1.msra.mxu1 %v7393_v6 }
 0x5ce   :  { %1794 = vmatprep.subr.mxu0 %v7396_v8  ;;  %1865 = vmatprep.subr.mxu1 %v7399_v9 }
 0x5cf   :  { %1795 = vmatpush1.msra.mxu0 %v7402_v10  ;;  %1866 = vmatpush1.msra.mxu1 %v7405_v11 }
 0x5d0   :  { %1796 = vmatprep.subr.mxu0 %v7408_v14  ;;  %1867 = vmatprep.subr.mxu1 %v7411_v15 }
 0x5d1   :  { %1797 = vmatpush1.msra.mxu0 %v7414_v16  ;;  %1868 = vmatpush1.msra.mxu1 %v7417_v17 }
 0x5d2   :  { %1798 = vmatprep.subr.mxu0 %v7420_v31  ;;  %1869 = vmatprep.subr.mxu1 %v7423_v4 }
 0x5d3   :  { %1799 = vmatpush1.msra.mxu0 %v7426_v34  ;;  %1870 = vmatpush1.msra.mxu1 %v7429_v35 }
 0x5d4   :  { %1800 = vmatprep.subr.mxu0 %v9646_v20  ;;  %1871 = vmatprep.subr.mxu1 %v9647_v36 }
 0x5d5   :  { %1801 = vmatpush1.msra.mxu0 %v9648_v29  ;;  %1872 = vmatpush1.msra.mxu1 %v9649_v25 }
 0x5d6   :  { %1802 = vmatprep.subr.mxu0 %v9650_v13  ;;  %1873 = vmatprep.subr.mxu1 %v9651_v40 }
 0x5d7   :  { %1803 = vmatpush1.msra.mxu0 %v9652_v19  ;;  %1874 = vmatpush1.msra.mxu1 %v9653_v3  ;;  %v9664_v3 = vld [vmem:[#allocation50_spill] sm:$0xff] }
 0x5d8   :  { %1804 = vmatprep.subr.mxu0 %v9654_v12  ;;  %1875 = vmatprep.subr.mxu1 %v9655_v23  ;;  %v9665_v12 = vmov 0.0   ;;  %v9666_v23 = vld [vmem:[#allocation51_spill] sm:$0xff] }
 0x5d9   :  { %1805 = vmatpush1.msra.mxu0 %v9656_v33  ;;  %1876 = vmatpush1.msra.mxu1 %v9657_v24  ;;  %v9667_v24 = vld [vmem:[#allocation33_spill] sm:$0xff] }
 0x5da   :  { %1806 = vmatprep.subr.mxu0 %v9658_v2  ;;  %1877 = vmatprep.subr.mxu1 %v9659_v53  ;;  %v9668_v2 = vld [vmem:[#allocation34_spill] sm:$0xff] }
 0x5db   :  { %1807 = vmatpush1.msra.mxu0 %v9660_v39  ;;  %1878 = vmatpush1.msra.mxu1 %v9661_v56 }
 0x5dc   :  { %1808 = vmatprep.subr.mxu0 %v9662_v37  ;;  %1879 = vmatprep.subr.mxu1 %v9663_v38 }
 0x5dd   :  { %1809 = vmatpush1.msra.mxu0 %v9664_v3  ;;  %1842 = vmatprep.mubr.f32.mxu0 %v9665_v12 }
 0x5de   :  { %1880 = vmatpush1.msra.mxu1 %v9666_v23  ;;  %1913 = vmatprep.mubr.f32.mxu1 %v9665_v12  ;;  %v9669_v23 = vcombine.high %v9642_v21, %v9643_v28 }
 0x5df   :  { %1974 = vmatprep.subr.mxu0 %v9667_v24  ;;  %2045 = vmatprep.subr.mxu1 %v9668_v2 }
 0x67e   :  { %v1648_v53 = vpop.f32.mrf.mxu0  ;;  %v1719_v39 = vpop.f32.mrf.mxu1 }
 0x680   :  { %v1650_v33 = vpop.f32.mrf.mxu0  ;;  %v1721_v56 = vpop.f32.mrf.mxu1 }
 0x681   :  { %v1728_v19 = vcombine.low %v1648_v53, %v1650_v33  ;;  %v1729_v37 = vcombine.low %v1719_v39, %v1721_v56 }
 0x683   :  { %v1736_v38 = vrot.slane %v1728_v19, %v9540_v22  ;;  %v1743_v3 = vrot.slane %v1729_v37, %v9540_v22 }
 0x685   :  { %v1744_v40 = vcombine.low %v1736_v38, %v1743_v3 }
 0x687   :  { %v1746_v13 = vadd.f32 %v1744_v40, %v9669_v23 }
 0x689   :  { %v5667_v12 = vmul.f32 -1.442695, %v1746_v13  ;;  %v1754_v25 = vrot.slane %v1746_v13, 2  ;;  %v1765_v2 = vrot.slane %v1746_v13, 6  ;;  %v1762_v20 = vrot.slane %v1746_v13, 4 }
 0x68b   :  { %5924 = vpow2.f32 %v5667_v12  ;;  %v5668_v24 = vmul.f32 -1.442695, %v1754_v25  ;;  %v5669_v29 = vmul.f32 -1.442695, %v1765_v2 }
 0x68d   :  { %5926 = vpow2.f32 %v5668_v24 }
 0x68e   :  { %5928 = vpow2.f32 %v5669_v29 }
 0x698   :  { %v5925_v36 = vpop.eup %5924 }
 0x699   :  { %v1750_v33 = vadd.f32 1.0, %v5925_v36 }
 0x69a   :  { %v5927_v53 = vpop.eup %5926 }
 0x69b   :  { %5930 = vrcp.f32 %v1750_v33  ;;  %v1759_v19 = vadd.f32 1.0, %v5927_v53  ;;  %v5929_v38 = vpop.eup %5928 }
 0x69c   :  { %5932 = vtanh.f32 %v1762_v20  ;;  %v1770_v40 = vadd.f32 1.0, %v5929_v38 }
 0x69d   :  { %5934 = vrcp.f32 %v1759_v19 }
 0x69e   :  { %5936 = vrcp.f32 %v1770_v40 }
 0x6a8   :  { %v5931_v3 = vpop.eup %5930 }
 0x6a9   :  { %v5933_v28 = vpop.eup %5932 }
 0x6aa   :  { %v5935_v21 = vpop.eup %5934  ;;  %v1774_v25 = vmul.f32 %v5933_v28, %v5931_v3 }
 0x6ab   :  { %v1773_v12 = vmul.f32 %v5935_v21, %v7502_v55  ;;  %v5937_v36 = vpop.eup %5936 }
 0x6ad   :  { %v7581_v23 = vadd.f32 %v1774_v25, %v1773_v12  ;;  %v2230_v12 = vld [vmem:[#allocation10 + $0x1e0] sm:$0xff]  ;;  %v2232_v25 = vld [vmem:[#allocation10 + $0x1f0] sm:$0xff] }
 0x6af   :  { %5938 = vtanh.f32 %v7581_v23 }
 0x6bc   :  { %v5939_v13 = vpop.eup %5938 }
 0x6bd   :  { %v7584_v29 = vmul.f32 %v5939_v13, %v5937_v36  ;;  %v2227_v36 = vld [vmem:[#allocation10 + $0x1c8] sm:$0xff]  ;;  %v2229_v13 = vld [vmem:[#allocation10 + $0x1d8] sm:$0xff] }
 0x6bf   :  { %1843 = vmatmul.mubr.f32.vlgmr.msra.gmra.mxu0 %v7584_v29  ;;  %1914 = vmatmul.mubr.f32.vlgmr.msra.gmra.mxu1 %v7584_v29 }
 0x6c0   :  { %1975 = vmatpush1.msra.mxu0 %v7220_v0  ;;  %2046 = vmatpush1.msra.mxu1 %v7223_v32  ;;  %v9670_v0 = vld [vmem:[#allocation36_spill] sm:$0xff]  ;;  %v9671_v32 = vld [vmem:[#allocation37_spill] sm:$0xff] }
 0x6c1   :  { %1976 = vmatprep.subr.mxu0 %v7226_v26  ;;  %2047 = vmatprep.subr.mxu1 %v7229_v1  ;;  %v9672_v26 = vld [vmem:[#allocation38_spill] sm:$0xff]  ;;  %v9673_v1 = vld [vmem:[#allocation39_spill] sm:$0xff] }
 0x6c2   :  { %1977 = vmatpush1.msra.mxu0 %v7232_v27  ;;  %2048 = vmatpush1.msra.mxu1 %v7235_v30  ;;  %v9674_v27 = vld [vmem:[#allocation30_spill] sm:$0xff]  ;;  %v9675_v30 = vld [vmem:[#allocation31_spill] sm:$0xff] }
 0x6c3   :  { %1978 = vmatprep.subr.mxu0 %v7322_v7  ;;  %2049 = vmatprep.subr.mxu1 %v7325_v18  ;;  %v9676_v7 = vld [vmem:[#allocation58_spill] sm:$0xff]  ;;  %v9677_v18 = vld [vmem:[#allocation59_spill] sm:$0xff] }
 0x6c4   :  { %1979 = vmatpush1.msra.mxu0 %v7330_v41  ;;  %2050 = vmatpush1.msra.mxu1 %v7333_v42  ;;  %v9678_v41 = vld [vmem:[#allocation40_spill] sm:$0xff]  ;;  %v9679_v42 = vld [vmem:[#allocation41_spill] sm:$0xff] }
 0x6c5   :  { %1980 = vmatprep.subr.mxu0 %v7336_v43  ;;  %2051 = vmatprep.subr.mxu1 %v7339_v44  ;;  %v9680_v43 = vld [vmem:[#allocation42_spill] sm:$0xff]  ;;  %v9681_v44 = vld [vmem:[#allocation43_spill] sm:$0xff] }
 0x6c6   :  { %1981 = vmatpush1.msra.mxu0 %v7342_v45  ;;  %2052 = vmatpush1.msra.mxu1 %v7345_v46  ;;  %v9682_v45 = vld [vmem:[#allocation44_spill] sm:$0xff]  ;;  %v9683_v46 = vld [vmem:[#allocation45_spill] sm:$0xff] }
 0x6c7   :  { %1982 = vmatprep.subr.mxu0 %v7348_v47  ;;  %2053 = vmatprep.subr.mxu1 %v7351_v48  ;;  %v9684_v47 = vld [vmem:[#allocation46_spill] sm:$0xff]  ;;  %v9685_v48 = vld [vmem:[#allocation47_spill] sm:$0xff] }
 0x6c8   :  { %1983 = vmatpush1.msra.mxu0 %v7354_v49  ;;  %2054 = vmatpush1.msra.mxu1 %v7357_v50  ;;  %v9686_v49 = vld [vmem:[#allocation48_spill] sm:$0xff]  ;;  %v9687_v50 = vld [vmem:[#allocation49_spill] sm:$0xff] }
 0x6c9   :  { %1984 = vmatprep.subr.mxu0 %v7360_v51  ;;  %2055 = vmatprep.subr.mxu1 %v7363_v52  ;;  %v9688_v51 = vld [vmem:[#allocation50_spill] sm:$0xff]  ;;  %v9689_v52 = vld [vmem:[#allocation51_spill] sm:$0xff] }
 0x6ca   :  { %1985 = vmatpush1.msra.mxu0 %v7366_v54  ;;  %2056 = vmatpush1.msra.mxu1 %v7369_v57  ;;  %v9690_v54 = vmov 0.0   ;;  %v2231_v57 = vld [vmem:[#allocation10 + $0x1e8] sm:$0xff] }
 0x6cb   :  { %1986 = vmatprep.subr.mxu0 %v7372_v58  ;;  %2057 = vmatprep.subr.mxu1 %v7375_v59  ;;  %v2233_v58 = vld [vmem:[#allocation10 + $0x1f8] sm:$0xff] }
 0x6cc   :  { %1987 = vmatpush1.msra.mxu0 %v7378_v60  ;;  %2058 = vmatpush1.msra.mxu1 %v7381_v61 }
 0x6cd   :  { %1988 = vmatprep.subr.mxu0 %v7384_v62  ;;  %2059 = vmatprep.subr.mxu1 %v7387_v63 }
 0x6ce   :  { %1989 = vmatpush1.msra.mxu0 %v7390_v5  ;;  %2060 = vmatpush1.msra.mxu1 %v7393_v6 }
 0x6cf   :  { %1990 = vmatprep.subr.mxu0 %v7396_v8  ;;  %2061 = vmatprep.subr.mxu1 %v7399_v9 }
 0x6d0   :  { %1991 = vmatpush1.msra.mxu0 %v7402_v10  ;;  %2062 = vmatpush1.msra.mxu1 %v7405_v11  ;;  %v9691_v10 = vld [vmem:[#allocation61_spill] sm:$0xff]  ;;  %v9692_v11 = vld [vmem:[#allocation63_spill] sm:$0xff] }
 0x6d1   :  { %1992 = vmatprep.subr.mxu0 %v7408_v14  ;;  %2063 = vmatprep.subr.mxu1 %v7411_v15  ;;  %v9693_v14 = vcombine.low %v9691_v10, %v9692_v11 }
 0x6d2   :  { %1993 = vmatpush1.msra.mxu0 %v7414_v16  ;;  %2064 = vmatpush1.msra.mxu1 %v7417_v17 }
 0x6d3   :  { %1994 = vmatprep.subr.mxu0 %v7420_v31  ;;  %2065 = vmatprep.subr.mxu1 %v7423_v4 }
 0x6d4   :  { %1995 = vmatpush1.msra.mxu0 %v7426_v34  ;;  %2066 = vmatpush1.msra.mxu1 %v7429_v35 }
 0x6d5   :  { %1996 = vmatprep.subr.mxu0 %v9670_v0  ;;  %2067 = vmatprep.subr.mxu1 %v9671_v32  ;;  %v2226_v0 = vld [vmem:[#allocation10 + $0x1c0] sm:$0xff]  ;;  %v2223_v32 = vld [vmem:[#allocation10 + $0x1a8] sm:$0xff] }
 0x6d6   :  { %1997 = vmatpush1.msra.mxu0 %v9672_v26  ;;  %2068 = vmatpush1.msra.mxu1 %v9673_v1  ;;  %v2225_v26 = vld [vmem:[#allocation10 + $0x1b8] sm:$0xff]  ;;  %v2222_v1 = vld [vmem:[#allocation10 + $0x1a0] sm:$0xff] }
 0x6d7   :  { %1998 = vmatprep.subr.mxu0 %v9674_v27  ;;  %2069 = vmatprep.subr.mxu1 %v9675_v30  ;;  %v2224_v27 = vld [vmem:[#allocation10 + $0x1b0] sm:$0xff]  ;;  %v2219_v30 = vld [vmem:[#allocation10 + $0x188] sm:$0xff] }
 0x6d8   :  { %1999 = vmatpush1.msra.mxu0 %v9676_v7  ;;  %2070 = vmatpush1.msra.mxu1 %v9677_v18  ;;  %v2221_v7 = vld [vmem:[#allocation10 + $0x198] sm:$0xff]  ;;  %v2218_v18 = vld [vmem:[#allocation10 + $0x180] sm:$0xff] }
 0x6d9   :  { %2000 = vmatprep.subr.mxu0 %v9678_v41  ;;  %2071 = vmatprep.subr.mxu1 %v9679_v42  ;;  %v2220_v41 = vld [vmem:[#allocation10 + $0x190] sm:$0xff]  ;;  %v2215_v42 = vld [vmem:[#allocation10 + $0x168] sm:$0xff] }
 0x6da   :  { %2001 = vmatpush1.msra.mxu0 %v9680_v43  ;;  %2072 = vmatpush1.msra.mxu1 %v9681_v44  ;;  %v2217_v43 = vld [vmem:[#allocation10 + $0x178] sm:$0xff]  ;;  %v2214_v44 = vld [vmem:[#allocation10 + $0x160] sm:$0xff] }
 0x6db   :  { %2002 = vmatprep.subr.mxu0 %v9682_v45  ;;  %2073 = vmatprep.subr.mxu1 %v9683_v46  ;;  %v2216_v45 = vld [vmem:[#allocation10 + $0x170] sm:$0xff]  ;;  %v2211_v46 = vld [vmem:[#allocation10 + $0x148] sm:$0xff] }
 0x6dc   :  { %2003 = vmatpush1.msra.mxu0 %v9684_v47  ;;  %2074 = vmatpush1.msra.mxu1 %v9685_v48  ;;  %v2213_v47 = vld [vmem:[#allocation10 + $0x158] sm:$0xff]  ;;  %v2210_v48 = vld [vmem:[#allocation10 + $0x140] sm:$0xff] }
 0x6dd   :  { %2004 = vmatprep.subr.mxu0 %v9686_v49  ;;  %2075 = vmatprep.subr.mxu1 %v9687_v50  ;;  %v2212_v49 = vld [vmem:[#allocation10 + $0x150] sm:$0xff]  ;;  %v2207_v50 = vld [vmem:[#allocation10 + $0x128] sm:$0xff] }
 0x6de   :  { %2005 = vmatpush1.msra.mxu0 %v9688_v51  ;;  %2076 = vmatpush1.msra.mxu1 %v9689_v52  ;;  %v2209_v51 = vld [vmem:[#allocation10 + $0x138] sm:$0xff]  ;;  %v2206_v52 = vld [vmem:[#allocation10 + $0x120] sm:$0xff] }
 0x6df   :  { %2038 = vmatprep.mubr.f32.mxu0 %v9690_v54  ;;  %2109 = vmatprep.mubr.f32.mxu1 %v9690_v54 }
 0x6e0   :  { %2364 = vmatprep.subr.mxu0 %v2231_v57  ;;  %2441 = vmatprep.subr.mxu1 %v2233_v58  ;;  %v2208_v57 = vld [vmem:[#allocation10 + $0x130] sm:$0xff]  ;;  %v2203_v58 = vld [vmem:[#allocation10 + $0x108] sm:$0xff] }
 0x77f   :  { %v1844_v59 = vpop.f32.mrf.mxu0  ;;  %v1915_v60 = vpop.f32.mrf.mxu1 }
 0x781   :  { %v1846_v61 = vpop.f32.mrf.mxu0  ;;  %v1917_v62 = vpop.f32.mrf.mxu1 }
 0x782   :  { %v1924_v63 = vcombine.low %v1844_v59, %v1846_v61  ;;  %v1925_v5 = vcombine.low %v1915_v60, %v1917_v62  ;;  %v2205_v59 = vld [vmem:[#allocation10 + $0x118] sm:$0xff]  ;;  %v2202_v60 = vld [vmem:[#allocation10 + $0x100] sm:$0xff]  ;;  %v2204_v61 = vld [vmem:[#allocation10 + $0x110] sm:$0xff] }
 0x783   :  { %v2199_v62 = vld [vmem:[#allocation10 + $0xe8] sm:$0xff] }
 0x784   :  { %v1932_v6 = vrot.slane %v1924_v63, %v9540_v22  ;;  %v1939_v8 = vrot.slane %v1925_v5, %v9540_v22  ;;  %v2201_v63 = vld [vmem:[#allocation10 + $0xf8] sm:$0xff]  ;;  %v2198_v5 = vld [vmem:[#allocation10 + $0xe0] sm:$0xff] }
 0x786   :  { %v1940_v9 = vcombine.low %v1932_v6, %v1939_v8  ;;  %v2200_v6 = vld [vmem:[#allocation10 + $0xf0] sm:$0xff]  ;;  %v2195_v8 = vld [vmem:[#allocation10 + $0xc8] sm:$0xff] }
 0x788   :  { %v1942_v15 = vadd.f32 %v1940_v9, %v9693_v14  ;;  %v2197_v9 = vld [vmem:[#allocation10 + $0xd8] sm:$0xff]  ;;  %v2194_v14 = vld [vmem:[#allocation10 + $0xc0] sm:$0xff] }
 0x78a   :  { %v5670_v16 = vmul.f32 -1.442695, %v1942_v15  ;;  %v1950_v17 = vrot.slane %v1942_v15, 2  ;;  %v1961_v4 = vrot.slane %v1942_v15, 6  ;;  %v1958_v55 = vrot.slane %v1942_v15, 4  ;;  %v2196_v15 = vld [vmem:[#allocation10 + $0xd0] sm:$0xff] }
 0x78c   :  { %5940 = vpow2.f32 %v5670_v16  ;;  %v5671_v31 = vmul.f32 -1.442695, %v1950_v17  ;;  %v5672_v34 = vmul.f32 -1.442695, %v1961_v4  ;;  %v2191_v16 = vld [vmem:[#allocation10 + $0xa8] sm:$0xff]  ;;  %v2193_v17 = vld [vmem:[#allocation10 + $0xb8] sm:$0xff] }
 0x78d   :  { %v2192_v4 = vld [vmem:[#allocation10 + $0xb0] sm:$0xff] }
 0x78e   :  { %5942 = vpow2.f32 %v5671_v31  ;;  %v2190_v31 = vld [vmem:[#allocation10 + $0xa0] sm:$0xff] }
 0x78f   :  { %5944 = vpow2.f32 %v5672_v34  ;;  %v2187_v34 = vld [vmem:[#allocation10 + $0x88] sm:$0xff] }
 0x799   :  { %v5941_v35 = vpop.eup %5940 }
 0x79a   :  { %v1946_v20 = vadd.f32 1.0, %v5941_v35  ;;  %v2189_v35 = vld [vmem:[#allocation10 + $0x98] sm:$0xff] }
 0x79b   :  { %v5943_v39 = vpop.eup %5942 }
 0x79c   :  { %5946 = vrcp.f32 %v1946_v20  ;;  %v1955_v56 = vadd.f32 1.0, %v5943_v39  ;;  %v5945_v37 = vpop.eup %5944  ;;  %v2188_v20 = vld [vmem:[#allocation10 + $0x90] sm:$0xff]  ;;  %v2183_v39 = vld [vmem:[#allocation10 + $0x68] sm:$0xff] }
 0x79d   :  { %5948 = vtanh.f32 %v1958_v55  ;;  %v1966_v53 = vadd.f32 1.0, %v5945_v37  ;;  %v2186_v55 = vld [vmem:[#allocation10 + $0x80] sm:$0xff] }
 0x79e   :  { %5950 = vrcp.f32 %v1955_v56  ;;  %v2185_v56 = vld [vmem:[#allocation10 + $0x78] sm:$0xff]  ;;  %v2182_v37 = vld [vmem:[#allocation10 + $0x60] sm:$0xff] }
 0x79f   :  { %5952 = vrcp.f32 %v1966_v53  ;;  %v2178_v53 = vld [vmem:[#allocation10 + $0x40] sm:$0xff] }
 0x7a9   :  { %v5947_v24 = vpop.eup %5946 }
 0x7aa   :  { %v5949_v2 = vpop.eup %5948 }
 0x7ab   :  { %v5951_v33 = vpop.eup %5950  ;;  %v1970_v38 = vmul.f32 %v5949_v2, %v5947_v24  ;;  %v2184_v24 = vld [vmem:[#allocation10 + $0x70] sm:$0xff]  ;;  %v2179_v2 = vld [vmem:[#allocation10 + $0x48] sm:$0xff] }
 0x7ac   :  { %v1969_v19 = vmul.f32 %v5951_v33, %v7581_v23  ;;  %v5953_v28 = vpop.eup %5952  ;;  %v2228_v23 = vld [vmem:[#allocation10 + $0x1d0] sm:$0xff]  ;;  %v2181_v33 = vld [vmem:[#allocation10 + $0x58] sm:$0xff] }
 0x7ae   :  { %v7658_v3 = vadd.f32 %v1970_v38, %v1969_v19  ;;  %v2180_v19 = vld [vmem:[#allocation10 + $0x50] sm:$0xff]  ;;  %v2175_v38 = vld [vmem:[#allocation10 + $0x28] sm:$0xff] }
 0x7b0   :  { %5954 = vtanh.f32 %v7658_v3 }
 0x7bd   :  { %v5955_v21 = vpop.eup %5954 }
 0x7be   :  { %v7661_v40 = vmul.f32 %v5955_v21, %v5953_v28  ;;  %v2177_v28 = vld [vmem:[#allocation10 + $0x38] sm:$0xff]  ;;  %v2174_v21 = vld [vmem:[#allocation10 + $0x20] sm:$0xff] }
 0x7c0   :  { %2039 = vmatmul.mubr.f32.vlgmr.msra.gmra.mxu0 %v7661_v40  ;;  %2110 = vmatmul.mubr.f32.vlgmr.msra.gmra.mxu1 %v7661_v40 }
 0x7c1   :  { %2365 = vmatpush1.msra.mxu0 %v2230_v12  ;;  %2442 = vmatpush1.msra.mxu1 %v2232_v25  ;;  %v2176_v12 = vld [vmem:[#allocation10 + $0x30] sm:$0xff]  ;;  %v2171_v25 = vld [vmem:[#allocation10 + $0x8] sm:$0xff] }
 0x7c2   :  { %2366 = vmatprep.subr.mxu0 %v2227_v36  ;;  %2443 = vmatprep.subr.mxu1 %v2229_v13  ;;  %v2173_v36 = vld [vmem:[#allocation10 + $0x18] sm:$0xff]  ;;  %v2170_v13 = vld [vmem:[#allocation10] sm:$0xff] }
 0x7c3   :  { %2367 = vmatpush1.msra.mxu0 %v2226_v0  ;;  %2444 = vmatpush1.msra.mxu1 %v2228_v23  ;;  %v2172_v0 = vld [vmem:[#allocation10 + $0x10] sm:$0xff]  ;;  %v9694_v23 = vld [vmem:[#allocation35_spill] sm:$0xff] }
 0x7c4   :  { %2368 = vmatprep.subr.mxu0 %v2223_v32  ;;  %2445 = vmatprep.subr.mxu1 %v2225_v26  ;;  %v7671_v32 = vld [vmem:[#allocation11 + $0x1e8] sm:$0xff]  ;;  %v7673_v26 = vld [vmem:[#allocation11 + $0x1f8] sm:$0xff] }
 0x7c5   :  { %2369 = vmatpush1.msra.mxu0 %v2222_v1  ;;  %2446 = vmatpush1.msra.mxu1 %v2224_v27  ;;  %9695 = vst [vmem:[#allocation53_spill] sm:$0xff] %v7671_v32  ;;  %9696 = vst [vmem:[#allocation32_spill] sm:$0xff] %v7673_v26  ;;  %v7675_v1 = vld [vmem:[#allocation11 + $0x1e0] sm:$0xff]  ;;  %v7679_v27 = vld [vmem:[#allocation11 + $0x1f0] sm:$0xff] }
 0x7c6   :  { %2370 = vmatprep.subr.mxu0 %v2219_v30  ;;  %2447 = vmatprep.subr.mxu1 %v2221_v7  ;;  %v7681_v30 = vld [vmem:[#allocation11 + $0x1c8] sm:$0xff]  ;;  %v7683_v7 = vld [vmem:[#allocation11 + $0x1d8] sm:$0xff] }
 0x7c7   :  { %2371 = vmatpush1.msra.mxu0 %v2218_v18  ;;  %2448 = vmatpush1.msra.mxu1 %v2220_v41  ;;  %v7687_v18 = vld [vmem:[#allocation11 + $0x1c0] sm:$0xff]  ;;  %v7689_v41 = vld [vmem:[#allocation11 + $0x1d0] sm:$0xff] }
 0x7c8   :  { %2372 = vmatprep.subr.mxu0 %v2215_v42  ;;  %2449 = vmatprep.subr.mxu1 %v2217_v43  ;;  %v7691_v42 = vld [vmem:[#allocation11 + $0x1a8] sm:$0xff]  ;;  %v7695_v43 = vld [vmem:[#allocation11 + $0x1b8] sm:$0xff] }
 0x7c9   :  { %2373 = vmatpush1.msra.mxu0 %v2214_v44  ;;  %2450 = vmatpush1.msra.mxu1 %v2216_v45  ;;  %v7697_v44 = vld [vmem:[#allocation11 + $0x1a0] sm:$0xff]  ;;  %v7699_v45 = vld [vmem:[#allocation11 + $0x1b0] sm:$0xff] }
 0x7ca   :  { %2374 = vmatprep.subr.mxu0 %v2211_v46  ;;  %2451 = vmatprep.subr.mxu1 %v2213_v47  ;;  %v7703_v46 = vld [vmem:[#allocation11 + $0x188] sm:$0xff]  ;;  %v7705_v47 = vld [vmem:[#allocation11 + $0x198] sm:$0xff] }
 0x7cb   :  { %2375 = vmatpush1.msra.mxu0 %v2210_v48  ;;  %2452 = vmatpush1.msra.mxu1 %v2212_v49  ;;  %v7709_v48 = vld [vmem:[#allocation11 + $0x180] sm:$0xff]  ;;  %v7711_v49 = vld [vmem:[#allocation11 + $0x190] sm:$0xff] }
 0x7cc   :  { %2376 = vmatprep.subr.mxu0 %v2207_v50  ;;  %2453 = vmatprep.subr.mxu1 %v2209_v51  ;;  %v7715_v50 = vld [vmem:[#allocation11 + $0x168] sm:$0xff]  ;;  %v7717_v51 = vld [vmem:[#allocation11 + $0x178] sm:$0xff] }
 0x7cd   :  { %2377 = vmatpush1.msra.mxu0 %v2206_v52  ;;  %2454 = vmatpush1.msra.mxu1 %v2208_v57  ;;  %v7721_v52 = vld [vmem:[#allocation11 + $0x160] sm:$0xff]  ;;  %v7723_v57 = vld [vmem:[#allocation11 + $0x170] sm:$0xff] }
 0x7ce   :  { %2378 = vmatprep.subr.mxu0 %v2203_v58  ;;  %2455 = vmatprep.subr.mxu1 %v2205_v59  ;;  %v7727_v58 = vld [vmem:[#allocation11 + $0x148] sm:$0xff]  ;;  %v7729_v59 = vld [vmem:[#allocation11 + $0x158] sm:$0xff] }
 0x7cf   :  { %2379 = vmatpush1.msra.mxu0 %v2202_v60  ;;  %2456 = vmatpush1.msra.mxu1 %v2204_v61  ;;  %v7733_v60 = vld [vmem:[#allocation11 + $0x140] sm:$0xff]  ;;  %v7735_v61 = vld [vmem:[#allocation11 + $0x150] sm:$0xff] }
 0x7d0   :  { %2380 = vmatprep.subr.mxu0 %v2199_v62  ;;  %2457 = vmatprep.subr.mxu1 %v2201_v63  ;;  %v7739_v62 = vld [vmem:[#allocation11 + $0x128] sm:$0xff]  ;;  %v7741_v63 = vld [vmem:[#allocation11 + $0x138] sm:$0xff] }
 0x7d1   :  { %2381 = vmatpush1.msra.mxu0 %v2198_v5  ;;  %2458 = vmatpush1.msra.mxu1 %v2200_v6  ;;  %v7745_v5 = vld [vmem:[#allocation11 + $0x120] sm:$0xff]  ;;  %v7747_v6 = vld [vmem:[#allocation11 + $0x130] sm:$0xff] }
 0x7d2   :  { %2382 = vmatprep.subr.mxu0 %v2195_v8  ;;  %2459 = vmatprep.subr.mxu1 %v2197_v9  ;;  %v7751_v8 = vld [vmem:[#allocation11 + $0x108] sm:$0xff]  ;;  %v7753_v9 = vld [vmem:[#allocation11 + $0x118] sm:$0xff] }
 0x7d3   :  { %2383 = vmatpush1.msra.mxu0 %v2194_v14  ;;  %2460 = vmatpush1.msra.mxu1 %v2196_v15  ;;  %v7757_v14 = vld [vmem:[#allocation11 + $0x100] sm:$0xff]  ;;  %v7759_v15 = vld [vmem:[#allocation11 + $0x110] sm:$0xff] }
 0x7d4   :  { %2384 = vmatprep.subr.mxu0 %v2191_v16  ;;  %2461 = vmatprep.subr.mxu1 %v2193_v17  ;;  %v7763_v16 = vld [vmem:[#allocation11 + $0xe8] sm:$0xff]  ;;  %v7765_v17 = vld [vmem:[#allocation11 + $0xf8] sm:$0xff] }
 0x7d5   :  { %2385 = vmatpush1.msra.mxu0 %v2190_v31  ;;  %2462 = vmatpush1.msra.mxu1 %v2192_v4  ;;  %v7769_v31 = vld [vmem:[#allocation11 + $0xe0] sm:$0xff]  ;;  %v7771_v4 = vld [vmem:[#allocation11 + $0xf0] sm:$0xff] }
 0x7d6   :  { %2386 = vmatprep.subr.mxu0 %v2187_v34  ;;  %2463 = vmatprep.subr.mxu1 %v2189_v35  ;;  %v7775_v34 = vld [vmem:[#allocation11 + $0xc8] sm:$0xff]  ;;  %v7777_v35 = vld [vmem:[#allocation11 + $0xd8] sm:$0xff] }
 0x7d7   :  { %2387 = vmatpush1.msra.mxu0 %v2186_v55  ;;  %2464 = vmatpush1.msra.mxu1 %v2188_v20  ;;  %v7781_v55 = vld [vmem:[#allocation11 + $0xc0] sm:$0xff]  ;;  %v7783_v20 = vld [vmem:[#allocation11 + $0xd0] sm:$0xff] }
 0x7d8   :  { %2388 = vmatprep.subr.mxu0 %v2183_v39  ;;  %2465 = vmatprep.subr.mxu1 %v2185_v56  ;;  %v7787_v39 = vld [vmem:[#allocation11 + $0xa8] sm:$0xff]  ;;  %v7789_v56 = vld [vmem:[#allocation11 + $0xb8] sm:$0xff] }
 0x7d9   :  { %2389 = vmatpush1.msra.mxu0 %v2182_v37  ;;  %2466 = vmatpush1.msra.mxu1 %v2184_v24  ;;  %9697 = vst [vmem:[#allocation64_spill] sm:$0xff] %v7789_v56  ;;  %v7793_v37 = vld [vmem:[#allocation11 + $0xa0] sm:$0xff]  ;;  %v7795_v24 = vld [vmem:[#allocation11 + $0xb0] sm:$0xff] }
 0x7da   :  { %2390 = vmatprep.subr.mxu0 %v2179_v2  ;;  %2467 = vmatprep.subr.mxu1 %v2181_v33  ;;  %9698 = vst [vmem:[#allocation60_spill] sm:$0xff] %v7793_v37  ;;  %9699 = vst [vmem:[#allocation62_spill] sm:$0xff] %v7795_v24  ;;  %v7799_v2 = vld [vmem:[#allocation11 + $0x88] sm:$0xff]  ;;  %v7801_v33 = vld [vmem:[#allocation11 + $0x98] sm:$0xff] }
 0x7db   :  { %2391 = vmatpush1.msra.mxu0 %v2178_v53  ;;  %2468 = vmatpush1.msra.mxu1 %v2180_v19  ;;  %9700 = vst [vmem:[#allocation33_spill] sm:$0xff] %v7799_v2  ;;  %9701 = vst [vmem:[#allocation34_spill] sm:$0xff] %v7801_v33  ;;  %v7805_v53 = vld [vmem:[#allocation11 + $0x80] sm:$0xff]  ;;  %v7807_v19 = vld [vmem:[#allocation11 + $0x90] sm:$0xff] }
 0x7dc   :  { %2392 = vmatprep.subr.mxu0 %v2175_v38  ;;  %2469 = vmatprep.subr.mxu1 %v2177_v28  ;;  %9702 = vst [vmem:[#allocation36_spill] sm:$0xff] %v7805_v53  ;;  %9703 = vst [vmem:[#allocation37_spill] sm:$0xff] %v7807_v19  ;;  %v7811_v38 = vld [vmem:[#allocation11 + $0x68] sm:$0xff]  ;;  %v7813_v28 = vld [vmem:[#allocation11 + $0x78] sm:$0xff] }
 0x7dd   :  { %2393 = vmatpush1.msra.mxu0 %v2174_v21  ;;  %2470 = vmatpush1.msra.mxu1 %v2176_v12  ;;  %9704 = vst [vmem:[#allocation38_spill] sm:$0xff] %v7811_v38  ;;  %9705 = vst [vmem:[#allocation39_spill] sm:$0xff] %v7813_v28  ;;  %v7817_v21 = vld [vmem:[#allocation11 + $0x60] sm:$0xff]  ;;  %v7819_v12 = vld [vmem:[#allocation11 + $0x70] sm:$0xff] }
 0x7de   :  { %2394 = vmatprep.subr.mxu0 %v2171_v25  ;;  %2471 = vmatprep.subr.mxu1 %v2173_v36  ;;  %9706 = vst [vmem:[#allocation30_spill] sm:$0xff] %v7817_v21  ;;  %9707 = vst [vmem:[#allocation31_spill] sm:$0xff] %v7819_v12  ;;  %v7823_v25 = vld [vmem:[#allocation11 + $0x48] sm:$0xff]  ;;  %v7825_v36 = vld [vmem:[#allocation11 + $0x58] sm:$0xff] }
 0x7df   :  { %2395 = vmatpush1.msra.mxu0 %v2170_v13  ;;  %2428 = vmatprep.mubr.f32.mxu0 %v9690_v54  ;;  %9708 = vst [vmem:[#allocation58_spill] sm:$0xff] %v7823_v25  ;;  %9709 = vst [vmem:[#allocation59_spill] sm:$0xff] %v7825_v36  ;;  %v7829_v13 = vld [vmem:[#allocation11 + $0x40] sm:$0xff] }
 0x7e0   :  { %2472 = vmatpush1.msra.mxu1 %v2172_v0  ;;  %2505 = vmatprep.mubr.f32.mxu1 %v9690_v54  ;;  %9710 = vst [vmem:[#allocation40_spill] sm:$0xff] %v7829_v13  ;;  %v7831_v0 = vld [vmem:[#allocation11 + $0x50] sm:$0xff] }
 0x7e1   :  { %2429 = vmatmul.mubr.f32.vlgmr.msra.gmra.mxu0 %v9694_v23  ;;  %2506 = vmatmul.mubr.f32.vlgmr.msra.gmra.mxu1 %v9694_v23  ;;  %9711 = vst [vmem:[#allocation41_spill] sm:$0xff] %v7831_v0  ;;  %v7839_v23 = vld [vmem:[#allocation11 + $0x28] sm:$0xff] }
 0x7e2   :  { %2434 = vmatprep.mubr.f32.mxu0 %v9690_v54  ;;  %2511 = vmatprep.mubr.f32.mxu1 %v9690_v54  ;;  %9712 = vst [vmem:[#allocation42_spill] sm:$0xff] %v7839_v23 }
 0x7e3   :  { %2606 = vmatprep.subr.mxu0 %v7671_v32  ;;  %2677 = vmatprep.subr.mxu1 %v7673_v26 }
 0x7e4   :  { %2607 = vmatpush1.msra.mxu0 %v7675_v1  ;;  %2678 = vmatpush1.msra.mxu1 %v7679_v27 }
 0x7e5   :  { %2608 = vmatprep.subr.mxu0 %v7681_v30  ;;  %2679 = vmatprep.subr.mxu1 %v7683_v7 }
 0x7e6   :  { %2609 = vmatpush1.msra.mxu0 %v7687_v18  ;;  %2680 = vmatpush1.msra.mxu1 %v7689_v41 }
 0x7e7   :  { %2610 = vmatprep.subr.mxu0 %v7691_v42  ;;  %2681 = vmatprep.subr.mxu1 %v7695_v43 }
 0x7e8   :  { %2611 = vmatpush1.msra.mxu0 %v7697_v44  ;;  %2682 = vmatpush1.msra.mxu1 %v7699_v45 }
 0x7e9   :  { %2612 = vmatprep.subr.mxu0 %v7703_v46  ;;  %2683 = vmatprep.subr.mxu1 %v7705_v47 }
 0x7ea   :  { %2613 = vmatpush1.msra.mxu0 %v7709_v48  ;;  %2684 = vmatpush1.msra.mxu1 %v7711_v49 }
 0x7eb   :  { %2614 = vmatprep.subr.mxu0 %v7715_v50  ;;  %2685 = vmatprep.subr.mxu1 %v7717_v51 }
 0x7ec   :  { %2615 = vmatpush1.msra.mxu0 %v7721_v52  ;;  %2686 = vmatpush1.msra.mxu1 %v7723_v57 }
 0x7ed   :  { %2616 = vmatprep.subr.mxu0 %v7727_v58  ;;  %2687 = vmatprep.subr.mxu1 %v7729_v59 }
 0x7ee   :  { %2617 = vmatpush1.msra.mxu0 %v7733_v60  ;;  %2688 = vmatpush1.msra.mxu1 %v7735_v61 }
 0x7ef   :  { %2618 = vmatprep.subr.mxu0 %v7739_v62  ;;  %2689 = vmatprep.subr.mxu1 %v7741_v63 }
 0x7f0   :  { %2619 = vmatpush1.msra.mxu0 %v7745_v5  ;;  %2690 = vmatpush1.msra.mxu1 %v7747_v6 }
 0x7f1   :  { %2620 = vmatprep.subr.mxu0 %v7751_v8  ;;  %2691 = vmatprep.subr.mxu1 %v7753_v9 }
 0x7f2   :  { %2621 = vmatpush1.msra.mxu0 %v7757_v14  ;;  %2692 = vmatpush1.msra.mxu1 %v7759_v15 }
 0x7f3   :  { %2622 = vmatprep.subr.mxu0 %v7763_v16  ;;  %2693 = vmatprep.subr.mxu1 %v7765_v17 }
 0x7f4   :  { %2623 = vmatpush1.msra.mxu0 %v7769_v31  ;;  %2694 = vmatpush1.msra.mxu1 %v7771_v4 }
 0x7f5   :  { %2624 = vmatprep.subr.mxu0 %v7775_v34  ;;  %2695 = vmatprep.subr.mxu1 %v7777_v35 }
 0x7f6   :  { %2625 = vmatpush1.msra.mxu0 %v7781_v55  ;;  %2696 = vmatpush1.msra.mxu1 %v7783_v20 }
 0x7f7   :  { %2626 = vmatprep.subr.mxu0 %v7787_v39  ;;  %2697 = vmatprep.subr.mxu1 %v7789_v56 }
 0x7f8   :  { %2627 = vmatpush1.msra.mxu0 %v7793_v37  ;;  %2698 = vmatpush1.msra.mxu1 %v7795_v24 }
 0x7f9   :  { %2628 = vmatprep.subr.mxu0 %v7799_v2  ;;  %2699 = vmatprep.subr.mxu1 %v7801_v33 }
 0x7fa   :  { %2629 = vmatpush1.msra.mxu0 %v7805_v53  ;;  %2700 = vmatpush1.msra.mxu1 %v7807_v19 }
 0x7fb   :  { %2630 = vmatprep.subr.mxu0 %v7811_v38  ;;  %2701 = vmatprep.subr.mxu1 %v7813_v28  ;;  %v7841_v38 = vld [vmem:[#allocation11 + $0x38] sm:$0xff]  ;;  %v7843_v28 = vld [vmem:[#allocation11 + $0x20] sm:$0xff] }
 0x7fc   :  { %2631 = vmatpush1.msra.mxu0 %v7817_v21  ;;  %2702 = vmatpush1.msra.mxu1 %v7819_v12  ;;  %9713 = vst [vmem:[#allocation43_spill] sm:$0xff] %v7841_v38  ;;  %9714 = vst [vmem:[#allocation44_spill] sm:$0xff] %v7843_v28  ;;  %v7847_v21 = vld [vmem:[#allocation11 + $0x30] sm:$0xff]  ;;  %v7849_v12 = vld [vmem:[#allocation11 + $0x8] sm:$0xff] }
 0x7fd   :  { %2632 = vmatprep.subr.mxu0 %v7823_v25  ;;  %2703 = vmatprep.subr.mxu1 %v7825_v36  ;;  %9715 = vst [vmem:[#allocation45_spill] sm:$0xff] %v7847_v21  ;;  %9716 = vst [vmem:[#allocation46_spill] sm:$0xff] %v7849_v12  ;;  %v7851_v25 = vld [vmem:[#allocation11 + $0x18] sm:$0xff] }
 0x7fe   :  { %2633 = vmatpush1.msra.mxu0 %v7829_v13  ;;  %2704 = vmatpush1.msra.mxu1 %v7831_v0  ;;  %9717 = vst [vmem:[#allocation47_spill] sm:$0xff] %v7851_v25  ;;  %v7855_v0 = vld [vmem:[#allocation11] sm:$0xff]  ;;  %v7857_v13 = vld [vmem:[#allocation11 + $0x10] sm:$0xff] }
 0x7ff   :  { %2634 = vmatprep.subr.mxu0 %v7839_v23  ;;  %2705 = vmatprep.subr.mxu1 %v7841_v38  ;;  %9718 = vst [vmem:[#allocation48_spill] sm:$0xff] %v7855_v0  ;;  %9719 = vst [vmem:[#allocation49_spill] sm:$0xff] %v7857_v13 }
 0x800   :  { %2635 = vmatpush1.msra.mxu0 %v7843_v28  ;;  %2706 = vmatpush1.msra.mxu1 %v7847_v21 }
 0x801   :  { %2636 = vmatprep.subr.mxu0 %v7849_v12  ;;  %2707 = vmatprep.subr.mxu1 %v7851_v25 }
 0x802   :  { %2637 = vmatpush1.msra.mxu0 %v7855_v0  ;;  %2708 = vmatpush1.msra.mxu1 %v7857_v13  ;;  %v9720_v0 = vcombine.high %v9691_v10, %v9692_v11  ;;  %v9721_v10 = vld [vmem:[#allocation54_spill] sm:$0xff] }
 0x803   :  { %2802 = vmatprep.subr.mxu0 %v7671_v32  ;;  %2873 = vmatprep.subr.mxu1 %v7673_v26 }
 0x880   :  { %v2040_v38 = vpop.f32.mrf.mxu0  ;;  %v2111_v28 = vpop.f32.mrf.mxu1 }
 0x882   :  { %v2042_v23 = vpop.f32.mrf.mxu0  ;;  %v2113_v21 = vpop.f32.mrf.mxu1 }
 0x883   :  { %v2120_v36 = vcombine.low %v2040_v38, %v2042_v23  ;;  %v2121_v19 = vcombine.low %v2111_v28, %v2113_v21 }
 0x885   :  { %v2128_v53 = vrot.slane %v2120_v36, %v9540_v22  ;;  %v2135_v12 = vrot.slane %v2121_v19, %v9540_v22 }
 0x887   :  { %v2136_v33 = vcombine.low %v2128_v53, %v2135_v12  ;;  %v2298_v53 = vld [vmem:[%s9244_s7] sm:$0xf] }
 0x888   :  { %v7874_v11 = vrot.slane %v2298_v53, %v9721_v10 }
 0x889   :  { %v2138_v25 = vadd.f32 %v2136_v33, %v9720_v0 }
 0x88b   :  { %v5673_v13 = vmul.f32 -1.442695, %v2138_v25  ;;  %v2146_v2 = vrot.slane %v2138_v25, 2  ;;  %v2157_v26 = vrot.slane %v2138_v25, 6  ;;  %v2154_v56 = vrot.slane %v2138_v25, 4 }
 0x88d   :  { %5956 = vpow2.f32 %v5673_v13  ;;  %v5674_v32 = vmul.f32 -1.442695, %v2146_v2  ;;  %v5675_v24 = vmul.f32 -1.442695, %v2157_v26  ;;  %v9722_v2 = vld [vmem:[#allocation55_spill] sm:$0xff]  ;;  %v9723_v26 = vld [vmem:[#allocation56_spill] sm:$0xff] }
 0x88e   :  { %v7880_v33 = vrot.slane %v2298_v53, %v9723_v26 }
 0x88f   :  { %5958 = vpow2.f32 %v5674_v32  ;;  %v7877_v32 = vrot.slane %v2298_v53, %v9722_v2 }
 0x890   :  { %5960 = vpow2.f32 %v5675_v24  ;;  %9724 = vst [vmem:[#allocation50_spill] sm:$0xff] %v7880_v33 }
 0x89a   :  { %v5957_v37 = vpop.eup %5956 }
 0x89b   :  { %v2142_v38 = vadd.f32 1.0, %v5957_v37  ;;  %v9725_v37 = vld [vmem:[#allocation57_spill] sm:$0xff] }
 0x89c   :  { %v5959_v28 = vpop.eup %5958  ;;  %v7883_v19 = vrot.slane %v2298_v53, %v9725_v37 }
 0x89d   :  { %5962 = vrcp.f32 %v2142_v38  ;;  %v2151_v21 = vadd.f32 1.0, %v5959_v28 }
 0x89e   :  { %5964 = vtanh.f32 %v2154_v56  ;;  %9726 = vst [vmem:[#allocation51_spill] sm:$0xff] %v7883_v19 }
 0x89f   :  { %5966 = vrcp.f32 %v2151_v21 }
 0x8a1   :  { %v2430_v24 = vpop.f32.mrf.mxu0  ;;  %v2507_v12 = vpop.f32.mrf.mxu1 }
 0x8a2   :  { %v2431_v13 = vadd.f32 %v2430_v24, %v7874_v11  ;;  %v2508_v56 = vadd.f32 %v2507_v12, %v7877_v32  ;;  %v5961_v12 = vpop.eup %5960 }
 0x8a3   :  { %v2432_v25 = vpop.f32.mrf.mxu0  ;;  %v2509_v36 = vpop.f32.mrf.mxu1 }
 0x8a4   :  { %v2433_v0 = vadd.f32 %v2432_v25, %v7880_v33  ;;  %v2510_v23 = vadd.f32 %v2509_v36, %v7883_v19  ;;  %v9731_v36 = vld [vmem:[#allocation52_spill] sm:$0xff] }
 0x8a6   :  { %v2526_v38 = vcombine.low %v2431_v13, %v2433_v0  ;;  %v2527_v28 = vcombine.high %v2431_v13, %v2433_v0  ;;  %v2528_v21 = vcombine.low %v2508_v56, %v2510_v23  ;;  %v2529_v2 = vcombine.high %v2508_v56, %v2510_v23 }
 0x8a8   :  { %v7890_v26 = vrot.slane %v2526_v38, %v9540_v22  ;;  %v7893_v53 = vrot.slane %v2527_v28, %v9540_v22  ;;  %v7896_v37 = vrot.slane %v2528_v21, %v9540_v22  ;;  %v7899_v24 = vrot.slane %v2529_v2, %v9540_v22 }
 0x8a9   :  { %v2162_v38 = vadd.f32 1.0, %v5961_v12  ;;  %v9741_v12 = vld [vmem:[#allocation30_spill] sm:$0xff] }
 0x8aa   :  { %9727 = vst [vmem:[#allocation61_spill] sm:$0xff] %v7890_v26  ;;  %9728 = vst [vmem:[#allocation63_spill] sm:$0xff] %v7893_v53  ;;  %v5963_v25 = vpop.eup %5962  ;;  %v2345_v26 = vcombine.low %v9731_v36, %v7584_v29  ;;  %v9732_v29 = vld [vmem:[#allocation64_spill] sm:$0xff]  ;;  %v9743_v36 = vld [vmem:[#allocation58_spill] sm:$0xff] }
 0x8ab   :  { %9729 = vst [vmem:[#allocation35_spill] sm:$0xff] %v7896_v37  ;;  %9730 = vst [vmem:[#allocation65_spill] sm:$0xff] %v7899_v24  ;;  %v5965_v0 = vpop.eup %5964  ;;  %5968 = vrcp.f32 %v2162_v38  ;;  %v9748_v38 = vld [vmem:[#allocation43_spill] sm:$0xff] }
 0x8ac   :  { %v5967_v23 = vpop.eup %5966  ;;  %v2166_v21 = vmul.f32 %v5965_v0, %v5963_v25  ;;  %v2353_v37 = vrot.slane %v2345_v26, %v9540_v22  ;;  %v9736_v26 = vld [vmem:[#allocation34_spill] sm:$0xff]  ;;  %v9742_v25 = vld [vmem:[#allocation31_spill] sm:$0xff]  ;;  %v9746_v0 = vld [vmem:[#allocation41_spill] sm:$0xff] }
 0x8ad   :  { %v2165_v28 = vmul.f32 %v5967_v23, %v7658_v3  ;;  %v9733_v3 = vld [vmem:[#allocation60_spill] sm:$0xff]  ;;  %v9747_v23 = vld [vmem:[#allocation42_spill] sm:$0xff]  ;;  %v9752_v53 = vld [vmem:[#allocation47_spill] sm:$0xff] }
 0x8af   :  { %v2167_v10 = vadd.f32 %v2166_v21, %v2165_v28  ;;  %v9749_v28 = vld [vmem:[#allocation44_spill] sm:$0xff]  ;;  %v9750_v21 = vld [vmem:[#allocation45_spill] sm:$0xff] }
 0x8b1   :  { %5970 = vtanh.f32 %v2167_v10  ;;  %v9735_v10 = vld [vmem:[#allocation33_spill] sm:$0xff] }
 0x8b8   :  { %v5969_v2 = vpop.eup %5968 }
 0x8be   :  { %v5971_v19 = vpop.eup %5970 }
 0x8bf   :  { %v2169_v33 = vmul.f32 %v5971_v19, %v5969_v2  ;;  %v9739_v19 = vld [vmem:[#allocation38_spill] sm:$0xff] }
 0x8c0   :  { %v9751_v2 = vld [vmem:[#allocation46_spill] sm:$0xff] }
 0x8c1   :  { %v2346_v13 = vcombine.low %v7661_v40, %v2169_v33  ;;  %v9734_v40 = vld [vmem:[#allocation62_spill] sm:$0xff]  ;;  %v9737_v33 = vld [vmem:[#allocation36_spill] sm:$0xff] }
 0x8c3   :  { %v2360_v56 = vrot.slane %v2346_v13, %v9540_v22  ;;  %v9744_v13 = vld [vmem:[#allocation59_spill] sm:$0xff] }
 0x8c5   :  { %v2361_v24 = vcombine.low %v2353_v37, %v2360_v56  ;;  %v9738_v37 = vld [vmem:[#allocation37_spill] sm:$0xff]  ;;  %v9745_v56 = vld [vmem:[#allocation40_spill] sm:$0xff] }
 0x8c7   :  { %2435 = vmatmul.mubr.f32.gmra.mxu0 %v2361_v24  ;;  %2512 = vmatmul.mubr.f32.gmra.mxu1 %v2361_v24  ;;  %v9740_v24 = vld [vmem:[#allocation39_spill] sm:$0xff] }
 0x8c8   :  { %2670 = vmatprep.mubr.f32.mxu0 %v9690_v54  ;;  %2741 = vmatprep.mubr.f32.mxu1 %v9690_v54 }
 0x8cb   :  { %2671 = vmatmul.mubr.f32.vlgmr.msra.gmra.mxu0 %v9690_v54  ;;  %2742 = vmatmul.mubr.f32.vlgmr.msra.gmra.mxu1 %v9690_v54 }
 0x8cc   :  { %2803 = vmatpush1.msra.mxu0 %v7675_v1  ;;  %2874 = vmatpush1.msra.mxu1 %v7679_v27 }
 0x8cd   :  { %2804 = vmatprep.subr.mxu0 %v7681_v30  ;;  %2875 = vmatprep.subr.mxu1 %v7683_v7 }
 0x8ce   :  { %2805 = vmatpush1.msra.mxu0 %v7687_v18  ;;  %2876 = vmatpush1.msra.mxu1 %v7689_v41 }
 0x8cf   :  { %2806 = vmatprep.subr.mxu0 %v7691_v42  ;;  %2877 = vmatprep.subr.mxu1 %v7695_v43 }
 0x8d0   :  { %2807 = vmatpush1.msra.mxu0 %v7697_v44  ;;  %2878 = vmatpush1.msra.mxu1 %v7699_v45 }
 0x8d1   :  { %2808 = vmatprep.subr.mxu0 %v7703_v46  ;;  %2879 = vmatprep.subr.mxu1 %v7705_v47 }
 0x8d2   :  { %2809 = vmatpush1.msra.mxu0 %v7709_v48  ;;  %2880 = vmatpush1.msra.mxu1 %v7711_v49 }
 0x8d3   :  { %2810 = vmatprep.subr.mxu0 %v7715_v50  ;;  %2881 = vmatprep.subr.mxu1 %v7717_v51 }
 0x8d4   :  { %2811 = vmatpush1.msra.mxu0 %v7721_v52  ;;  %2882 = vmatpush1.msra.mxu1 %v7723_v57 }
 0x8d5   :  { %2812 = vmatprep.subr.mxu0 %v7727_v58  ;;  %2883 = vmatprep.subr.mxu1 %v7729_v59 }
 0x8d6   :  { %2813 = vmatpush1.msra.mxu0 %v7733_v60  ;;  %2884 = vmatpush1.msra.mxu1 %v7735_v61 }
 0x8d7   :  { %2814 = vmatprep.subr.mxu0 %v7739_v62  ;;  %2885 = vmatprep.subr.mxu1 %v7741_v63 }
 0x8d8   :  { %2815 = vmatpush1.msra.mxu0 %v7745_v5  ;;  %2886 = vmatpush1.msra.mxu1 %v7747_v6 }
 0x8d9   :  { %2816 = vmatprep.subr.mxu0 %v7751_v8  ;;  %2887 = vmatprep.subr.mxu1 %v7753_v9 }
 0x8da   :  { %2817 = vmatpush1.msra.mxu0 %v7757_v14  ;;  %2888 = vmatpush1.msra.mxu1 %v7759_v15 }
 0x8db   :  { %2818 = vmatprep.subr.mxu0 %v7763_v16  ;;  %2889 = vmatprep.subr.mxu1 %v7765_v17 }
 0x8dc   :  { %2819 = vmatpush1.msra.mxu0 %v7769_v31  ;;  %2890 = vmatpush1.msra.mxu1 %v7771_v4 }
 0x8dd   :  { %2820 = vmatprep.subr.mxu0 %v7775_v34  ;;  %2891 = vmatprep.subr.mxu1 %v7777_v35 }
 0x8de   :  { %2821 = vmatpush1.msra.mxu0 %v7781_v55  ;;  %2892 = vmatpush1.msra.mxu1 %v7783_v20 }
 0x8df   :  { %2822 = vmatprep.subr.mxu0 %v7787_v39  ;;  %2893 = vmatprep.subr.mxu1 %v9732_v29 }
 0x8e0   :  { %2823 = vmatpush1.msra.mxu0 %v9733_v3  ;;  %2894 = vmatpush1.msra.mxu1 %v9734_v40 }
 0x8e1   :  { %2824 = vmatprep.subr.mxu0 %v9735_v10  ;;  %2895 = vmatprep.subr.mxu1 %v9736_v26 }
 0x8e2   :  { %2825 = vmatpush1.msra.mxu0 %v9737_v33  ;;  %2896 = vmatpush1.msra.mxu1 %v9738_v37 }
 0x8e3   :  { %2826 = vmatprep.subr.mxu0 %v9739_v19  ;;  %2897 = vmatprep.subr.mxu1 %v9740_v24 }
 0x8e4   :  { %2827 = vmatpush1.msra.mxu0 %v9741_v12  ;;  %2898 = vmatpush1.msra.mxu1 %v9742_v25  ;;  %v9753_v25 = vld [vmem:[#allocation48_spill] sm:$0xff]  ;;  %v9758_v12 = vld [vmem:[#allocation51_spill] sm:$0xff] }
 0x8e5   :  { %2828 = vmatprep.subr.mxu0 %v9743_v36  ;;  %2899 = vmatprep.subr.mxu1 %v9744_v13  ;;  %v9754_v13 = vld [vmem:[#allocation49_spill] sm:$0xff]  ;;  %v9757_v36 = vld [vmem:[#allocation50_spill] sm:$0xff] }
 0x8e6   :  { %2829 = vmatpush1.msra.mxu0 %v9745_v56  ;;  %2900 = vmatpush1.msra.mxu1 %v9746_v0  ;;  %v9755_v0 = vld [vmem:[#allocation53_spill] sm:$0xff] }
 0x8e7   :  { %2830 = vmatprep.subr.mxu0 %v9747_v23  ;;  %2901 = vmatprep.subr.mxu1 %v9748_v38  ;;  %v9756_v23 = vld [vmem:[#allocation32_spill] sm:$0xff] }
 0x8e8   :  { %2831 = vmatpush1.msra.mxu0 %v9749_v28  ;;  %2902 = vmatpush1.msra.mxu1 %v9750_v21 }
 0x8e9   :  { %2832 = vmatprep.subr.mxu0 %v9751_v2  ;;  %2903 = vmatprep.subr.mxu1 %v9752_v53 }
 0x8ea   :  { %2833 = vmatpush1.msra.mxu0 %v9753_v25  ;;  %2866 = vmatprep.mubr.f32.mxu0 %v9690_v54 }
 0x8eb   :  { %2904 = vmatpush1.msra.mxu1 %v9754_v13  ;;  %2937 = vmatprep.mubr.f32.mxu1 %v9690_v54 }
 0x8ec   :  { %2998 = vmatprep.subr.mxu0 %v9755_v0  ;;  %3069 = vmatprep.subr.mxu1 %v9756_v23 }
 0x987   :  { %v2436_v38 = vpop.f32.mrf.mxu0  ;;  %v2513_v28 = vpop.f32.mrf.mxu1 }
 0x988   :  { %v2437_v2 = vadd.f32 %v2436_v38, %v7874_v11  ;;  %v2514_v53 = vadd.f32 %v2513_v28, %v7877_v32 }
 0x989   :  { %v2438_v56 = vpop.f32.mrf.mxu0  ;;  %v2515_v21 = vpop.f32.mrf.mxu1 }
 0x98a   :  { %v2439_v25 = vadd.f32 %v2438_v56, %v9757_v36  ;;  %v2516_v24 = vadd.f32 %v2515_v21, %v9758_v12  ;;  %v9763_v56 = vld [vmem:[#allocation35_spill] sm:$0xff] }
 0x98b   :  { %v2672_v19 = vpop.f32.mrf.mxu0  ;;  %v2743_v13 = vpop.f32.mrf.mxu1 }
 0x98c   :  { %v2562_v37 = vcombine.low %v2437_v2, %v2439_v25  ;;  %v2563_v54 = vcombine.high %v2437_v2, %v2439_v25  ;;  %v2564_v33 = vcombine.low %v2514_v53, %v2516_v24  ;;  %v2565_v0 = vcombine.high %v2514_v53, %v2516_v24 }
 0x98d   :  { %v2674_v26 = vpop.f32.mrf.mxu0  ;;  %v2745_v23 = vpop.f32.mrf.mxu1 }
 0x98e   :  { %v7988_v10 = vrot.slane %v2562_v37, %v9540_v22  ;;  %v7991_v40 = vrot.slane %v2563_v54, %v9540_v22  ;;  %v7994_v11 = vrot.slane %v2564_v33, %v9540_v22  ;;  %v7997_v32 = vrot.slane %v2565_v0, %v9540_v22  ;;  %v9764_v0 = vld [vmem:[#allocation61_spill] sm:$0xff] }
 0x98f   :  { %v2752_v12 = vcombine.low %v2672_v19, %v2674_v26  ;;  %v2753_v36 = vcombine.low %v2743_v13, %v2745_v23  ;;  %v2558_v26 = vcombine.low %v9764_v0, %v9763_v56 }
 0x990   :  { %9759 = vst [vmem:[#allocation52_spill] sm:$0xff] %v7988_v10  ;;  %9760 = vst [vmem:[#allocation64_spill] sm:$0xff] %v7991_v40  ;;  %v9781_v40 = vld [vmem:[#allocation45_spill] sm:$0xff]  ;;  %v9783_v10 = vld [vmem:[#allocation47_spill] sm:$0xff] }
 0x991   :  { %9761 = vst [vmem:[#allocation60_spill] sm:$0xff] %v7994_v11  ;;  %9762 = vst [vmem:[#allocation50_spill] sm:$0xff] %v7997_v32  ;;  %v2760_v33 = vrot.slane %v2752_v12, %v9540_v22  ;;  %v2767_v24 = vrot.slane %v2753_v36, %v9540_v22  ;;  %v9782_v11 = vld [vmem:[#allocation46_spill] sm:$0xff] }
 0x993   :  { %v2768_v19 = vcombine.low %v2760_v33, %v2767_v24 }
 0x995   :  { %v2770_v13 = vadd.f32 %v2768_v19, %v2558_v26 }
 0x997   :  { %v5676_v23 = vmul.f32 -1.442695, %v2770_v13  ;;  %v2778_v38 = vrot.slane %v2770_v13, 2  ;;  %v2789_v21 = vrot.slane %v2770_v13, 6  ;;  %v2786_v53 = vrot.slane %v2770_v13, 4 }
 0x999   :  { %5972 = vpow2.f32 %v5676_v23  ;;  %v5677_v28 = vmul.f32 -1.442695, %v2778_v38  ;;  %v5678_v2 = vmul.f32 -1.442695, %v2789_v21  ;;  %v9769_v21 = vld [vmem:[#allocation37_spill] sm:$0xff] }
 0x99b   :  { %5974 = vpow2.f32 %v5677_v28 }
 0x99c   :  { %5976 = vpow2.f32 %v5678_v2  ;;  %v9770_v2 = vld [vmem:[#allocation38_spill] sm:$0xff] }
 0x9a6   :  { %v5973_v37 = vpop.eup %5972 }
 0x9a7   :  { %v2774_v25 = vadd.f32 1.0, %v5973_v37 }
 0x9a8   :  { %v5975_v54 = vpop.eup %5974 }
 0x9a9   :  { %5978 = vrcp.f32 %v2774_v25  ;;  %v2783_v12 = vadd.f32 1.0, %v5975_v54  ;;  %v5977_v36 = vpop.eup %5976  ;;  %v9766_v25 = vld [vmem:[#allocation33_spill] sm:$0xff]  ;;  %v9768_v54 = vld [vmem:[#allocation36_spill] sm:$0xff] }
 0x9aa   :  { %5980 = vtanh.f32 %v2786_v53  ;;  %v2794_v26 = vadd.f32 1.0, %v5977_v36  ;;  %v9767_v53 = vld [vmem:[#allocation34_spill] sm:$0xff] }
 0x9ab   :  { %5982 = vrcp.f32 %v2783_v12  ;;  %v9771_v12 = vld [vmem:[#allocation39_spill] sm:$0xff]  ;;  %v9772_v36 = vld [vmem:[#allocation30_spill] sm:$0xff] }
 0x9ac   :  { %5984 = vrcp.f32 %v2794_v26  ;;  %v9775_v26 = vld [vmem:[#allocation59_spill] sm:$0xff] }
 0x9b6   :  { %v5979_v32 = vpop.eup %5978 }
 0x9b7   :  { %v5981_v33 = vpop.eup %5980 }
 0x9b8   :  { %v5983_v24 = vpop.eup %5982  ;;  %v2798_v23 = vmul.f32 %v5981_v33, %v5979_v32  ;;  %v9765_v32 = vld [vmem:[#allocation62_spill] sm:$0xff]  ;;  %v9773_v33 = vld [vmem:[#allocation31_spill] sm:$0xff] }
 0x9b9   :  { %v2797_v19 = vmul.f32 0.0, %v5983_v24  ;;  %v5985_v13 = vpop.eup %5984  ;;  %v9774_v24 = vld [vmem:[#allocation58_spill] sm:$0xff] }
 0x9bb   :  { %v8011_v38 = vadd.f32 %v2798_v23, %v2797_v19  ;;  %v9776_v19 = vld [vmem:[#allocation40_spill] sm:$0xff]  ;;  %v9777_v23 = vld [vmem:[#allocation41_spill] sm:$0xff] }
 0x9bd   :  { %5986 = vtanh.f32 %v8011_v38 }
 0x9ca   :  { %v5987_v37 = vpop.eup %5986 }
 0x9cb   :  { %v2801_v28 = vmul.f32 %v5987_v37, %v5985_v13  ;;  %v9778_v13 = vld [vmem:[#allocation42_spill] sm:$0xff]  ;;  %v9779_v37 = vld [vmem:[#allocation43_spill] sm:$0xff] }
 0x9cd   :  { %2867 = vmatmul.mubr.f32.vlgmr.msra.gmra.mxu0 %v2801_v28  ;;  %2938 = vmatmul.mubr.f32.vlgmr.msra.gmra.mxu1 %v2801_v28  ;;  %v9780_v28 = vld [vmem:[#allocation44_spill] sm:$0xff] }
 0x9ce   :  { %2999 = vmatpush1.msra.mxu0 %v7675_v1  ;;  %3070 = vmatpush1.msra.mxu1 %v7679_v27 }
 0x9cf   :  { %3000 = vmatprep.subr.mxu0 %v7681_v30  ;;  %3071 = vmatprep.subr.mxu1 %v7683_v7 }
 0x9d0   :  { %3001 = vmatpush1.msra.mxu0 %v7687_v18  ;;  %3072 = vmatpush1.msra.mxu1 %v7689_v41 }
 0x9d1   :  { %3002 = vmatprep.subr.mxu0 %v7691_v42  ;;  %3073 = vmatprep.subr.mxu1 %v7695_v43 }
 0x9d2   :  { %3003 = vmatpush1.msra.mxu0 %v7697_v44  ;;  %3074 = vmatpush1.msra.mxu1 %v7699_v45 }
 0x9d3   :  { %3004 = vmatprep.subr.mxu0 %v7703_v46  ;;  %3075 = vmatprep.subr.mxu1 %v7705_v47 }
 0x9d4   :  { %3005 = vmatpush1.msra.mxu0 %v7709_v48  ;;  %3076 = vmatpush1.msra.mxu1 %v7711_v49 }
 0x9d5   :  { %3006 = vmatprep.subr.mxu0 %v7715_v50  ;;  %3077 = vmatprep.subr.mxu1 %v7717_v51 }
 0x9d6   :  { %3007 = vmatpush1.msra.mxu0 %v7721_v52  ;;  %3078 = vmatpush1.msra.mxu1 %v7723_v57 }
 0x9d7   :  { %3008 = vmatprep.subr.mxu0 %v7727_v58  ;;  %3079 = vmatprep.subr.mxu1 %v7729_v59 }
 0x9d8   :  { %3009 = vmatpush1.msra.mxu0 %v7733_v60  ;;  %3080 = vmatpush1.msra.mxu1 %v7735_v61 }
 0x9d9   :  { %3010 = vmatprep.subr.mxu0 %v7739_v62  ;;  %3081 = vmatprep.subr.mxu1 %v7741_v63 }
 0x9da   :  { %3011 = vmatpush1.msra.mxu0 %v7745_v5  ;;  %3082 = vmatpush1.msra.mxu1 %v7747_v6 }
 0x9db   :  { %3012 = vmatprep.subr.mxu0 %v7751_v8  ;;  %3083 = vmatprep.subr.mxu1 %v7753_v9 }
 0x9dc   :  { %3013 = vmatpush1.msra.mxu0 %v7757_v14  ;;  %3084 = vmatpush1.msra.mxu1 %v7759_v15 }
 0x9dd   :  { %3014 = vmatprep.subr.mxu0 %v7763_v16  ;;  %3085 = vmatprep.subr.mxu1 %v7765_v17 }
 0x9de   :  { %3015 = vmatpush1.msra.mxu0 %v7769_v31  ;;  %3086 = vmatpush1.msra.mxu1 %v7771_v4 }
 0x9df   :  { %3016 = vmatprep.subr.mxu0 %v7775_v34  ;;  %3087 = vmatprep.subr.mxu1 %v7777_v35 }
 0x9e0   :  { %3017 = vmatpush1.msra.mxu0 %v7781_v55  ;;  %3088 = vmatpush1.msra.mxu1 %v7783_v20 }
 0x9e1   :  { %3018 = vmatprep.subr.mxu0 %v7787_v39  ;;  %3089 = vmatprep.subr.mxu1 %v9732_v29 }
 0x9e2   :  { %3019 = vmatpush1.msra.mxu0 %v9733_v3  ;;  %3090 = vmatpush1.msra.mxu1 %v9765_v32 }
 0x9e3   :  { %3020 = vmatprep.subr.mxu0 %v9766_v25  ;;  %3091 = vmatprep.subr.mxu1 %v9767_v53 }
 0x9e4   :  { %3021 = vmatpush1.msra.mxu0 %v9768_v54  ;;  %3092 = vmatpush1.msra.mxu1 %v9769_v21 }
 0x9e5   :  { %3022 = vmatprep.subr.mxu0 %v9770_v2  ;;  %3093 = vmatprep.subr.mxu1 %v9771_v12 }
 0x9e6   :  { %3023 = vmatpush1.msra.mxu0 %v9772_v36  ;;  %3094 = vmatpush1.msra.mxu1 %v9773_v33  ;;  %v9784_v33 = vld [vmem:[#allocation48_spill] sm:$0xff] }
 0x9e7   :  { %3024 = vmatprep.subr.mxu0 %v9774_v24  ;;  %3095 = vmatprep.subr.mxu1 %v9775_v26  ;;  %v9785_v24 = vmov 0.0   ;;  %v9786_v26 = vld [vmem:[#allocation49_spill] sm:$0xff] }
 0x9e8   :  { %3025 = vmatpush1.msra.mxu0 %v9776_v19  ;;  %3096 = vmatpush1.msra.mxu1 %v9777_v23  ;;  %v9787_v23 = vld [vmem:[#allocation53_spill] sm:$0xff] }
 0x9e9   :  { %3026 = vmatprep.subr.mxu0 %v9778_v13  ;;  %3097 = vmatprep.subr.mxu1 %v9779_v37  ;;  %v9788_v13 = vld [vmem:[#allocation32_spill] sm:$0xff] }
 0x9ea   :  { %3027 = vmatpush1.msra.mxu0 %v9780_v28  ;;  %3098 = vmatpush1.msra.mxu1 %v9781_v40 }
 0x9eb   :  { %3028 = vmatprep.subr.mxu0 %v9782_v11  ;;  %3099 = vmatprep.subr.mxu1 %v9783_v10 }
 0x9ec   :  { %3029 = vmatpush1.msra.mxu0 %v9784_v33  ;;  %3062 = vmatprep.mubr.f32.mxu0 %v9785_v24 }
 0x9ed   :  { %3100 = vmatpush1.msra.mxu1 %v9786_v26  ;;  %3133 = vmatprep.mubr.f32.mxu1 %v9785_v24  ;;  %v9789_v26 = vcombine.high %v9764_v0, %v9763_v56 }
 0x9ee   :  { %3194 = vmatprep.subr.mxu0 %v9787_v23  ;;  %3265 = vmatprep.subr.mxu1 %v9788_v13 }
 0xa8d   :  { %v2868_v37 = vpop.f32.mrf.mxu0  ;;  %v2939_v28 = vpop.f32.mrf.mxu1 }
 0xa8f   :  { %v2870_v19 = vpop.f32.mrf.mxu0  ;;  %v2941_v40 = vpop.f32.mrf.mxu1 }
 0xa90   :  { %v2948_v36 = vcombine.low %v2868_v37, %v2870_v19  ;;  %v2949_v11 = vcombine.low %v2939_v28, %v2941_v40 }
 0xa92   :  { %v2956_v10 = vrot.slane %v2948_v36, %v9540_v22  ;;  %v2963_v33 = vrot.slane %v2949_v11, %v9540_v22 }
 0xa94   :  { %v2964_v12 = vcombine.low %v2956_v10, %v2963_v33 }
 0xa96   :  { %v2966_v2 = vadd.f32 %v2964_v12, %v9789_v26 }
 0xa98   :  { %v5679_v24 = vmul.f32 -1.442695, %v2966_v2  ;;  %v2974_v21 = vrot.slane %v2966_v2, 2  ;;  %v2985_v13 = vrot.slane %v2966_v2, 6  ;;  %v2982_v25 = vrot.slane %v2966_v2, 4 }
 0xa9a   :  { %5988 = vpow2.f32 %v5679_v24  ;;  %v5680_v23 = vmul.f32 -1.442695, %v2974_v21  ;;  %v5681_v54 = vmul.f32 -1.442695, %v2985_v13 }
 0xa9c   :  { %5990 = vpow2.f32 %v5680_v23 }
 0xa9d   :  { %5992 = vpow2.f32 %v5681_v54 }
 0xaa7   :  { %v5989_v53 = vpop.eup %5988 }
 0xaa8   :  { %v2970_v19 = vadd.f32 1.0, %v5989_v53 }
 0xaa9   :  { %v5991_v40 = vpop.eup %5990 }
 0xaaa   :  { %5994 = vrcp.f32 %v2970_v19  ;;  %v2979_v36 = vadd.f32 1.0, %v5991_v40  ;;  %v5993_v10 = vpop.eup %5992 }
 0xaab   :  { %5996 = vtanh.f32 %v2982_v25  ;;  %v2990_v12 = vadd.f32 1.0, %v5993_v10 }
 0xaac   :  { %5998 = vrcp.f32 %v2979_v36 }
 0xaad   :  { %6000 = vrcp.f32 %v2990_v12 }
 0xab7   :  { %v5995_v11 = vpop.eup %5994 }
 0xab8   :  { %v5997_v56 = vpop.eup %5996 }
 0xab9   :  { %v5999_v0 = vpop.eup %5998  ;;  %v2994_v21 = vmul.f32 %v5997_v56, %v5995_v11 }
 0xaba   :  { %v2993_v33 = vmul.f32 %v5999_v0, %v8011_v38  ;;  %v6001_v53 = vpop.eup %6000 }
 0xabc   :  { %v8086_v24 = vadd.f32 %v2994_v21, %v2993_v33 }
 0xabe   :  { %6002 = vtanh.f32 %v8086_v24 }
 0xacb   :  { %v6003_v2 = vpop.eup %6002 }
 0xacc   :  { %v2997_v54 = vmul.f32 %v6003_v2, %v6001_v53 }
 0xace   :  { %3063 = vmatmul.mubr.f32.vlgmr.msra.gmra.mxu0 %v2997_v54  ;;  %3134 = vmatmul.mubr.f32.vlgmr.msra.gmra.mxu1 %v2997_v54 }
 0xacf   :  { %3195 = vmatpush1.msra.mxu0 %v7675_v1  ;;  %3266 = vmatpush1.msra.mxu1 %v7679_v27  ;;  %v9790_v1 = vld [vmem:[#allocation33_spill] sm:$0xff]  ;;  %v9791_v27 = vld [vmem:[#allocation34_spill] sm:$0xff] }
 0xad0   :  { %3196 = vmatprep.subr.mxu0 %v7681_v30  ;;  %3267 = vmatprep.subr.mxu1 %v7683_v7  ;;  %v9792_v30 = vld [vmem:[#allocation36_spill] sm:$0xff]  ;;  %v9793_v7 = vld [vmem:[#allocation37_spill] sm:$0xff] }
 0xad1   :  { %3197 = vmatpush1.msra.mxu0 %v7687_v18  ;;  %3268 = vmatpush1.msra.mxu1 %v7689_v41  ;;  %v9794_v18 = vld [vmem:[#allocation38_spill] sm:$0xff]  ;;  %v9795_v41 = vld [vmem:[#allocation39_spill] sm:$0xff] }
 0xad2   :  { %3198 = vmatprep.subr.mxu0 %v7691_v42  ;;  %3269 = vmatprep.subr.mxu1 %v7695_v43  ;;  %v9796_v42 = vld [vmem:[#allocation30_spill] sm:$0xff]  ;;  %v9797_v43 = vld [vmem:[#allocation31_spill] sm:$0xff] }
 0xad3   :  { %3199 = vmatpush1.msra.mxu0 %v7697_v44  ;;  %3270 = vmatpush1.msra.mxu1 %v7699_v45  ;;  %v9798_v44 = vld [vmem:[#allocation58_spill] sm:$0xff]  ;;  %v9799_v45 = vld [vmem:[#allocation59_spill] sm:$0xff] }
 0xad4   :  { %3200 = vmatprep.subr.mxu0 %v7703_v46  ;;  %3271 = vmatprep.subr.mxu1 %v7705_v47  ;;  %v9800_v46 = vld [vmem:[#allocation40_spill] sm:$0xff]  ;;  %v9801_v47 = vld [vmem:[#allocation41_spill] sm:$0xff] }
 0xad5   :  { %3201 = vmatpush1.msra.mxu0 %v7709_v48  ;;  %3272 = vmatpush1.msra.mxu1 %v7711_v49  ;;  %v9802_v48 = vld [vmem:[#allocation42_spill] sm:$0xff]  ;;  %v9803_v49 = vld [vmem:[#allocation43_spill] sm:$0xff] }
 0xad6   :  { %3202 = vmatprep.subr.mxu0 %v7715_v50  ;;  %3273 = vmatprep.subr.mxu1 %v7717_v51  ;;  %v9804_v50 = vld [vmem:[#allocation44_spill] sm:$0xff]  ;;  %v9805_v51 = vld [vmem:[#allocation45_spill] sm:$0xff] }
 0xad7   :  { %3203 = vmatpush1.msra.mxu0 %v7721_v52  ;;  %3274 = vmatpush1.msra.mxu1 %v7723_v57  ;;  %v9806_v52 = vld [vmem:[#allocation46_spill] sm:$0xff]  ;;  %v9807_v57 = vld [vmem:[#allocation47_spill] sm:$0xff] }
 0xad8   :  { %3204 = vmatprep.subr.mxu0 %v7727_v58  ;;  %3275 = vmatprep.subr.mxu1 %v7729_v59  ;;  %v9808_v58 = vld [vmem:[#allocation48_spill] sm:$0xff]  ;;  %v9809_v59 = vmov 0.0  }
 0xad9   :  { %3205 = vmatpush1.msra.mxu0 %v7733_v60  ;;  %3276 = vmatpush1.msra.mxu1 %v7735_v61  ;;  %v9810_v60 = vld [vmem:[#allocation49_spill] sm:$0xff] }
 0xada   :  { %3206 = vmatprep.subr.mxu0 %v7739_v62  ;;  %3277 = vmatprep.subr.mxu1 %v7741_v63  ;;  %v9811_v61 = vld [vmem:[#allocation53_spill] sm:$0xff]  ;;  %v9812_v62 = vld [vmem:[#allocation32_spill] sm:$0xff] }
 0xadb   :  { %3207 = vmatpush1.msra.mxu0 %v7745_v5  ;;  %3278 = vmatpush1.msra.mxu1 %v7747_v6 }
 0xadc   :  { %3208 = vmatprep.subr.mxu0 %v7751_v8  ;;  %3279 = vmatprep.subr.mxu1 %v7753_v9 }
 0xadd   :  { %3209 = vmatpush1.msra.mxu0 %v7757_v14  ;;  %3280 = vmatpush1.msra.mxu1 %v7759_v15 }
 0xade   :  { %3210 = vmatprep.subr.mxu0 %v7763_v16  ;;  %3281 = vmatprep.subr.mxu1 %v7765_v17 }
 0xadf   :  { %3211 = vmatpush1.msra.mxu0 %v7769_v31  ;;  %3282 = vmatpush1.msra.mxu1 %v7771_v4  ;;  %v9813_v31 = vld [vmem:[#allocation63_spill] sm:$0xff]  ;;  %v9814_v4 = vld [vmem:[#allocation65_spill] sm:$0xff] }
 0xae0   :  { %3212 = vmatprep.subr.mxu0 %v7775_v34  ;;  %3283 = vmatprep.subr.mxu1 %v7777_v35  ;;  %v9815_v34 = vcombine.low %v9813_v31, %v9814_v4 }
 0xae1   :  { %3213 = vmatpush1.msra.mxu0 %v7781_v55  ;;  %3284 = vmatpush1.msra.mxu1 %v7783_v20 }
 0xae2   :  { %3214 = vmatprep.subr.mxu0 %v7787_v39  ;;  %3285 = vmatprep.subr.mxu1 %v9732_v29 }
 0xae3   :  { %3215 = vmatpush1.msra.mxu0 %v9733_v3  ;;  %3286 = vmatpush1.msra.mxu1 %v9765_v32 }
 0xae4   :  { %3216 = vmatprep.subr.mxu0 %v9790_v1  ;;  %3287 = vmatprep.subr.mxu1 %v9791_v27 }
 0xae5   :  { %3217 = vmatpush1.msra.mxu0 %v9792_v30  ;;  %3288 = vmatpush1.msra.mxu1 %v9793_v7 }
 0xae6   :  { %3218 = vmatprep.subr.mxu0 %v9794_v18  ;;  %3289 = vmatprep.subr.mxu1 %v9795_v41 }
 0xae7   :  { %3219 = vmatpush1.msra.mxu0 %v9796_v42  ;;  %3290 = vmatpush1.msra.mxu1 %v9797_v43 }
 0xae8   :  { %3220 = vmatprep.subr.mxu0 %v9798_v44  ;;  %3291 = vmatprep.subr.mxu1 %v9799_v45 }
 0xae9   :  { %3221 = vmatpush1.msra.mxu0 %v9800_v46  ;;  %3292 = vmatpush1.msra.mxu1 %v9801_v47 }
 0xaea   :  { %3222 = vmatprep.subr.mxu0 %v9802_v48  ;;  %3293 = vmatprep.subr.mxu1 %v9803_v49 }
 0xaeb   :  { %3223 = vmatpush1.msra.mxu0 %v9804_v50  ;;  %3294 = vmatpush1.msra.mxu1 %v9805_v51 }
 0xaec   :  { %3224 = vmatprep.subr.mxu0 %v9806_v52  ;;  %3295 = vmatprep.subr.mxu1 %v9807_v57 }
 0xaed   :  { %3225 = vmatpush1.msra.mxu0 %v9808_v58  ;;  %3258 = vmatprep.mubr.f32.mxu0 %v9809_v59 }
 0xaee   :  { %3296 = vmatpush1.msra.mxu1 %v9810_v60  ;;  %3329 = vmatprep.mubr.f32.mxu1 %v9809_v59 }
 0xaef   :  { %3390 = vmatprep.subr.mxu0 %v9811_v61  ;;  %3461 = vmatprep.subr.mxu1 %v9812_v62  ;;  %v8164_v62 = vld [vmem:[#allocation11 + $0x1e0] sm:$0xff] }
 0xb8e   :  { %v3064_v63 = vpop.f32.mrf.mxu0  ;;  %v3135_v5 = vpop.f32.mrf.mxu1 }
 0xb90   :  { %v3066_v6 = vpop.f32.mrf.mxu0  ;;  %v3137_v8 = vpop.f32.mrf.mxu1 }
 0xb91   :  { %v3144_v9 = vcombine.low %v3064_v63, %v3066_v6  ;;  %v3145_v14 = vcombine.low %v3135_v5, %v3137_v8  ;;  %v8167_v63 = vld [vmem:[#allocation11 + $0x1f0] sm:$0xff]  ;;  %v8173_v5 = vld [vmem:[#allocation11 + $0x1d8] sm:$0xff]  ;;  %v8176_v6 = vld [vmem:[#allocation11 + $0x1c0] sm:$0xff] }
 0xb92   :  { %v8179_v8 = vld [vmem:[#allocation11 + $0x1d0] sm:$0xff] }
 0xb93   :  { %v3152_v15 = vrot.slane %v3144_v9, %v9540_v22  ;;  %v3159_v16 = vrot.slane %v3145_v14, %v9540_v22  ;;  %v8182_v9 = vld [vmem:[#allocation11 + $0x1a8] sm:$0xff]  ;;  %v8185_v14 = vld [vmem:[#allocation11 + $0x1b8] sm:$0xff] }
 0xb95   :  { %v3160_v17 = vcombine.low %v3152_v15, %v3159_v16  ;;  %v8188_v15 = vld [vmem:[#allocation11 + $0x1a0] sm:$0xff]  ;;  %v8191_v16 = vld [vmem:[#allocation11 + $0x1b0] sm:$0xff] }
 0xb97   :  { %v3162_v35 = vadd.f32 %v3160_v17, %v9815_v34  ;;  %v8194_v17 = vld [vmem:[#allocation11 + $0x188] sm:$0xff]  ;;  %v8197_v34 = vld [vmem:[#allocation11 + $0x198] sm:$0xff] }
 0xb99   :  { %v5682_v38 = vmul.f32 -1.442695, %v3162_v35  ;;  %v3170_v25 = vrot.slane %v3162_v35, 2  ;;  %v3181_v23 = vrot.slane %v3162_v35, 6  ;;  %v3178_v28 = vrot.slane %v3162_v35, 4  ;;  %v8200_v35 = vld [vmem:[#allocation11 + $0x180] sm:$0xff] }
 0xb9b   :  { %6004 = vpow2.f32 %v5682_v38  ;;  %v5683_v26 = vmul.f32 -1.442695, %v3170_v25  ;;  %v5684_v13 = vmul.f32 -1.442695, %v3181_v23  ;;  %v8203_v38 = vld [vmem:[#allocation11 + $0x190] sm:$0xff]  ;;  %v8206_v25 = vld [vmem:[#allocation11 + $0x168] sm:$0xff] }
 0xb9c   :  { %v8212_v23 = vld [vmem:[#allocation11 + $0x160] sm:$0xff] }
 0xb9d   :  { %6006 = vpow2.f32 %v5683_v26  ;;  %v8209_v26 = vld [vmem:[#allocation11 + $0x178] sm:$0xff] }
 0xb9e   :  { %6008 = vpow2.f32 %v5684_v13  ;;  %v8215_v13 = vld [vmem:[#allocation11 + $0x170] sm:$0xff] }
 0xba8   :  { %v6005_v37 = vpop.eup %6004 }
 0xba9   :  { %v3166_v19 = vadd.f32 1.0, %v6005_v37  ;;  %v8218_v37 = vld [vmem:[#allocation11 + $0x148] sm:$0xff] }
 0xbaa   :  { %v6007_v40 = vpop.eup %6006 }
 0xbab   :  { %6010 = vrcp.f32 %v3166_v19  ;;  %v3175_v36 = vadd.f32 1.0, %v6007_v40  ;;  %v6009_v10 = vpop.eup %6008  ;;  %v8224_v19 = vld [vmem:[#allocation11 + $0x140] sm:$0xff]  ;;  %v8227_v40 = vld [vmem:[#allocation11 + $0x150] sm:$0xff] }
 0xbac   :  { %6012 = vtanh.f32 %v3178_v28  ;;  %v3186_v12 = vadd.f32 1.0, %v6009_v10  ;;  %v8221_v28 = vld [vmem:[#allocation11 + $0x158] sm:$0xff] }
 0xbad   :  { %6014 = vrcp.f32 %v3175_v36  ;;  %v8230_v36 = vld [vmem:[#allocation11 + $0x128] sm:$0xff]  ;;  %v8233_v10 = vld [vmem:[#allocation11 + $0x138] sm:$0xff] }
 0xbae   :  { %6016 = vrcp.f32 %v3186_v12  ;;  %v8245_v12 = vld [vmem:[#allocation11 + $0x118] sm:$0xff] }
 0xbaf   :  { %9816 = vst [vmem:[#allocation51_spill] sm:$0xff] %v8245_v12 }
 0xbb8   :  { %v6011_v11 = vpop.eup %6010 }
 0xbb9   :  { %v6013_v56 = vpop.eup %6012 }
 0xbba   :  { %v6015_v0 = vpop.eup %6014  ;;  %v3190_v21 = vmul.f32 %v6013_v56, %v6011_v11  ;;  %v8236_v11 = vld [vmem:[#allocation11 + $0x120] sm:$0xff]  ;;  %v8239_v56 = vld [vmem:[#allocation11 + $0x130] sm:$0xff] }
 0xbbb   :  { %v3189_v33 = vmul.f32 %v6015_v0, %v8086_v24  ;;  %v6017_v2 = vpop.eup %6016  ;;  %v8170_v24 = vld [vmem:[#allocation11 + $0x1c8] sm:$0xff] }
 0xbbc   :  { %v8242_v0 = vld [vmem:[#allocation11 + $0x108] sm:$0xff] }
 0xbbd   :  { %v8161_v53 = vadd.f32 %v3190_v21, %v3189_v33  ;;  %v8248_v33 = vld [vmem:[#allocation11 + $0x100] sm:$0xff]  ;;  %v8251_v21 = vld [vmem:[#allocation11 + $0x110] sm:$0xff] }
 0xbbe   :  { %9817 = vst [vmem:[#allocation35_spill] sm:$0xff] %v8248_v33  ;;  %9818 = vst [vmem:[#allocation61_spill] sm:$0xff] %v8251_v21 }
 0xbbf   :  { %6018 = vtanh.f32 %v8161_v53 }
 0xbcc   :  { %v6019_v54 = vpop.eup %6018 }
 0xbcd   :  { %v3193_v61 = vmul.f32 %v6019_v54, %v6017_v2  ;;  %v8254_v2 = vld [vmem:[#allocation11 + $0xe8] sm:$0xff]  ;;  %v8257_v54 = vld [vmem:[#allocation11 + $0xf8] sm:$0xff] }
 0xbcf   :  { %3259 = vmatmul.mubr.f32.vlgmr.msra.gmra.mxu0 %v3193_v61  ;;  %3330 = vmatmul.mubr.f32.vlgmr.msra.gmra.mxu1 %v3193_v61  ;;  %v8260_v61 = vld [vmem:[#allocation11 + $0xe0] sm:$0xff] }
 0xbd0   :  { %3391 = vmatpush1.msra.mxu0 %v8164_v62  ;;  %3462 = vmatpush1.msra.mxu1 %v8167_v63 }
 0xbd1   :  { %3392 = vmatprep.subr.mxu0 %v8170_v24  ;;  %3463 = vmatprep.subr.mxu1 %v8173_v5 }
 0xbd2   :  { %3393 = vmatpush1.msra.mxu0 %v8176_v6  ;;  %3464 = vmatpush1.msra.mxu1 %v8179_v8 }
 0xbd3   :  { %3394 = vmatprep.subr.mxu0 %v8182_v9  ;;  %3465 = vmatprep.subr.mxu1 %v8185_v14 }
 0xbd4   :  { %3395 = vmatpush1.msra.mxu0 %v8188_v15  ;;  %3466 = vmatpush1.msra.mxu1 %v8191_v16 }
 0xbd5   :  { %3396 = vmatprep.subr.mxu0 %v8194_v17  ;;  %3467 = vmatprep.subr.mxu1 %v8197_v34 }
 0xbd6   :  { %3397 = vmatpush1.msra.mxu0 %v8200_v35  ;;  %3468 = vmatpush1.msra.mxu1 %v8203_v38 }
 0xbd7   :  { %3398 = vmatprep.subr.mxu0 %v8206_v25  ;;  %3469 = vmatprep.subr.mxu1 %v8209_v26 }
 0xbd8   :  { %3399 = vmatpush1.msra.mxu0 %v8212_v23  ;;  %3470 = vmatpush1.msra.mxu1 %v8215_v13 }
 0xbd9   :  { %3400 = vmatprep.subr.mxu0 %v8218_v37  ;;  %3471 = vmatprep.subr.mxu1 %v8221_v28 }
 0xbda   :  { %3401 = vmatpush1.msra.mxu0 %v8224_v19  ;;  %3472 = vmatpush1.msra.mxu1 %v8227_v40 }
 0xbdb   :  { %3402 = vmatprep.subr.mxu0 %v8230_v36  ;;  %3473 = vmatprep.subr.mxu1 %v8233_v10 }
 0xbdc   :  { %3403 = vmatpush1.msra.mxu0 %v8236_v11  ;;  %3474 = vmatpush1.msra.mxu1 %v8239_v56 }
 0xbdd   :  { %3404 = vmatprep.subr.mxu0 %v8242_v0  ;;  %3475 = vmatprep.subr.mxu1 %v8245_v12  ;;  %v8263_v12 = vld [vmem:[#allocation11 + $0xf0] sm:$0xff] }
 0xbde   :  { %3405 = vmatpush1.msra.mxu0 %v8248_v33  ;;  %3476 = vmatpush1.msra.mxu1 %v8251_v21  ;;  %v8266_v33 = vld [vmem:[#allocation11 + $0xc8] sm:$0xff]  ;;  %v8269_v21 = vld [vmem:[#allocation11 + $0xd8] sm:$0xff] }
 0xbdf   :  { %3406 = vmatprep.subr.mxu0 %v8254_v2  ;;  %3477 = vmatprep.subr.mxu1 %v8257_v54 }
 0xbe0   :  { %3407 = vmatpush1.msra.mxu0 %v8260_v61  ;;  %3478 = vmatpush1.msra.mxu1 %v8263_v12 }
 0xbe1   :  { %3408 = vmatprep.subr.mxu0 %v8266_v33  ;;  %3479 = vmatprep.subr.mxu1 %v8269_v21 }
 0xbe2   :  { %3409 = vmatpush1.msra.mxu0 %v7781_v55  ;;  %3480 = vmatpush1.msra.mxu1 %v7783_v20  ;;  %v8300_v55 = vld [vmem:[#allocation11 + $0x1e8] sm:$0xff]  ;;  %v8303_v20 = vld [vmem:[#allocation11 + $0x1f8] sm:$0xff] }
 0xbe3   :  { %3410 = vmatprep.subr.mxu0 %v7787_v39  ;;  %3481 = vmatprep.subr.mxu1 %v9732_v29  ;;  %9819 = vst [vmem:[#allocation62_spill] sm:$0xff] %v8300_v55  ;;  %9820 = vst [vmem:[#allocation33_spill] sm:$0xff] %v8303_v20 }
 0xbe4   :  { %3411 = vmatpush1.msra.mxu0 %v9733_v3  ;;  %3482 = vmatpush1.msra.mxu1 %v9765_v32 }
 0xbe5   :  { %3412 = vmatprep.subr.mxu0 %v9790_v1  ;;  %3483 = vmatprep.subr.mxu1 %v9791_v27 }
 0xbe6   :  { %3413 = vmatpush1.msra.mxu0 %v9792_v30  ;;  %3484 = vmatpush1.msra.mxu1 %v9793_v7 }
 0xbe7   :  { %3414 = vmatprep.subr.mxu0 %v9794_v18  ;;  %3485 = vmatprep.subr.mxu1 %v9795_v41  ;;  %v9821_v41 = vcombine.high %v9813_v31, %v9814_v4 }
 0xbe8   :  { %3415 = vmatpush1.msra.mxu0 %v9796_v42  ;;  %3486 = vmatpush1.msra.mxu1 %v9797_v43 }
 0xbe9   :  { %3416 = vmatprep.subr.mxu0 %v9798_v44  ;;  %3487 = vmatprep.subr.mxu1 %v9799_v45 }
 0xbea   :  { %3417 = vmatpush1.msra.mxu0 %v9800_v46  ;;  %3488 = vmatpush1.msra.mxu1 %v9801_v47 }
 0xbeb   :  { %3418 = vmatprep.subr.mxu0 %v9802_v48  ;;  %3489 = vmatprep.subr.mxu1 %v9803_v49 }
 0xbec   :  { %3419 = vmatpush1.msra.mxu0 %v9804_v50  ;;  %3490 = vmatpush1.msra.mxu1 %v9805_v51 }
 0xbed   :  { %3420 = vmatprep.subr.mxu0 %v9806_v52  ;;  %3491 = vmatprep.subr.mxu1 %v9807_v57 }
 0xbee   :  { %3421 = vmatpush1.msra.mxu0 %v9808_v58  ;;  %3454 = vmatprep.mubr.f32.mxu0 %v9809_v59 }
 0xbef   :  { %3492 = vmatpush1.msra.mxu1 %v9810_v60  ;;  %3525 = vmatprep.mubr.f32.mxu1 %v9809_v59 }
 0xbf0   :  { %3586 = vmatprep.subr.mxu0 %v8300_v55  ;;  %3657 = vmatprep.subr.mxu1 %v8303_v20 }
 0xc8f   :  { %v3260_v39 = vpop.f32.mrf.mxu0  ;;  %v3331_v29 = vpop.f32.mrf.mxu1 }
 0xc91   :  { %v3262_v3 = vpop.f32.mrf.mxu0  ;;  %v3333_v32 = vpop.f32.mrf.mxu1 }
 0xc92   :  { %v3340_v1 = vcombine.low %v3260_v39, %v3262_v3  ;;  %v3341_v27 = vcombine.low %v3331_v29, %v3333_v32 }
 0xc94   :  { %v3348_v30 = vrot.slane %v3340_v1, %v9540_v22  ;;  %v3355_v7 = vrot.slane %v3341_v27, %v9540_v22 }
 0xc96   :  { %v3356_v18 = vcombine.low %v3348_v30, %v3355_v7  ;;  %v9823_v30 = vld [vmem:[#allocation35_spill] sm:$0xff]  ;;  %v9824_v7 = vld [vmem:[#allocation61_spill] sm:$0xff] }
 0xc98   :  { %v3358_v42 = vadd.f32 %v3356_v18, %v9821_v41  ;;  %v8351_v18 = vld [vmem:[#allocation11 + $0xc0] sm:$0xff]  ;;  %v8354_v41 = vld [vmem:[#allocation11 + $0xd0] sm:$0xff] }
 0xc9a   :  { %v5685_v43 = vmul.f32 -1.442695, %v3358_v42  ;;  %v3366_v44 = vrot.slane %v3358_v42, 2  ;;  %v3377_v46 = vrot.slane %v3358_v42, 6  ;;  %v3374_v49 = vrot.slane %v3358_v42, 4  ;;  %v8357_v42 = vld [vmem:[#allocation11 + $0xa8] sm:$0xff] }
 0xc9c   :  { %6020 = vpow2.f32 %v5685_v43  ;;  %v5686_v45 = vmul.f32 -1.442695, %v3366_v44  ;;  %v5687_v47 = vmul.f32 -1.442695, %v3377_v46  ;;  %v8360_v43 = vld [vmem:[#allocation11 + $0xb8] sm:$0xff]  ;;  %v8363_v44 = vld [vmem:[#allocation11 + $0xa0] sm:$0xff] }
 0xc9d   :  { %v8369_v46 = vld [vmem:[#allocation11 + $0x88] sm:$0xff] }
 0xc9e   :  { %6022 = vpow2.f32 %v5686_v45  ;;  %v8366_v45 = vld [vmem:[#allocation11 + $0xb0] sm:$0xff]  ;;  %9825 = vst [vmem:[#allocation34_spill] sm:$0xff] %v8369_v46 }
 0xc9f   :  { %6024 = vpow2.f32 %v5687_v47  ;;  %v8372_v47 = vld [vmem:[#allocation11 + $0x98] sm:$0xff] }
 0xca0   :  { %9826 = vst [vmem:[#allocation36_spill] sm:$0xff] %v8372_v47 }
 0xca9   :  { %v6021_v48 = vpop.eup %6020 }
 0xcaa   :  { %v3362_v50 = vadd.f32 1.0, %v6021_v48  ;;  %v8375_v48 = vld [vmem:[#allocation11 + $0x80] sm:$0xff] }
 0xcab   :  { %v6023_v51 = vpop.eup %6022  ;;  %9827 = vst [vmem:[#allocation37_spill] sm:$0xff] %v8375_v48 }
 0xcac   :  { %6026 = vrcp.f32 %v3362_v50  ;;  %v3371_v52 = vadd.f32 1.0, %v6023_v51  ;;  %v6025_v57 = vpop.eup %6024  ;;  %v8381_v50 = vld [vmem:[#allocation11 + $0x68] sm:$0xff]  ;;  %v8384_v51 = vld [vmem:[#allocation11 + $0x78] sm:$0xff] }
 0xcad   :  { %6028 = vtanh.f32 %v3374_v49  ;;  %v3382_v4 = vadd.f32 1.0, %v6025_v57  ;;  %v8378_v49 = vld [vmem:[#allocation11 + $0x90] sm:$0xff]  ;;  %9829 = vst [vmem:[#allocation39_spill] sm:$0xff] %v8381_v50  ;;  %9830 = vst [vmem:[#allocation30_spill] sm:$0xff] %v8384_v51 }
 0xcae   :  { %6030 = vrcp.f32 %v3371_v52  ;;  %9828 = vst [vmem:[#allocation38_spill] sm:$0xff] %v8378_v49  ;;  %v8387_v52 = vld [vmem:[#allocation11 + $0x60] sm:$0xff]  ;;  %v8390_v57 = vld [vmem:[#allocation11 + $0x70] sm:$0xff] }
 0xcaf   :  { %6032 = vrcp.f32 %v3382_v4  ;;  %9831 = vst [vmem:[#allocation31_spill] sm:$0xff] %v8387_v52  ;;  %9832 = vst [vmem:[#allocation58_spill] sm:$0xff] %v8390_v57  ;;  %v8402_v4 = vld [vmem:[#allocation11 + $0x50] sm:$0xff] }
 0xcb0   :  { %9836 = vst [vmem:[#allocation42_spill] sm:$0xff] %v8402_v4 }
 0xcb9   :  { %v6027_v58 = vpop.eup %6026 }
 0xcba   :  { %v6029_v60 = vpop.eup %6028 }
 0xcbb   :  { %v6031_v31 = vpop.eup %6030  ;;  %v3386_v29 = vmul.f32 %v6029_v60, %v6027_v58  ;;  %v8393_v58 = vld [vmem:[#allocation11 + $0x48] sm:$0xff]  ;;  %v8396_v60 = vld [vmem:[#allocation11 + $0x58] sm:$0xff] }
 0xcbc   :  { %v3385_v39 = vmul.f32 %v6031_v31, %v8161_v53  ;;  %v6033_v32 = vpop.eup %6032  ;;  %v9822_v53 = vld [vmem:[#allocation51_spill] sm:$0xff]  ;;  %9833 = vst [vmem:[#allocation59_spill] sm:$0xff] %v8393_v58  ;;  %9834 = vst [vmem:[#allocation40_spill] sm:$0xff] %v8396_v60 }
 0xcbd   :  { %v8399_v31 = vld [vmem:[#allocation11 + $0x40] sm:$0xff] }
 0xcbe   :  { %v8312_v3 = vadd.f32 %v3386_v29, %v3385_v39  ;;  %9835 = vst [vmem:[#allocation41_spill] sm:$0xff] %v8399_v31  ;;  %v8405_v39 = vld [vmem:[#allocation11 + $0x28] sm:$0xff]  ;;  %v8408_v29 = vld [vmem:[#allocation11 + $0x38] sm:$0xff] }
 0xcbf   :  { %9837 = vst [vmem:[#allocation43_spill] sm:$0xff] %v8405_v39  ;;  %9838 = vst [vmem:[#allocation44_spill] sm:$0xff] %v8408_v29 }
 0xcc0   :  { %6034 = vtanh.f32 %v8312_v3 }
 0xccd   :  { %v6035_v1 = vpop.eup %6034 }
 0xcce   :  { %v3389_v27 = vmul.f32 %v6035_v1, %v6033_v32  ;;  %v8411_v32 = vld [vmem:[#allocation11 + $0x20] sm:$0xff]  ;;  %v8414_v1 = vld [vmem:[#allocation11 + $0x30] sm:$0xff] }
 0xccf   :  { %9839 = vst [vmem:[#allocation45_spill] sm:$0xff] %v8411_v32  ;;  %9840 = vst [vmem:[#allocation46_spill] sm:$0xff] %v8414_v1 }
 0xcd0   :  { %3455 = vmatmul.mubr.f32.vlgmr.msra.gmra.mxu0 %v3389_v27  ;;  %3526 = vmatmul.mubr.f32.vlgmr.msra.gmra.mxu1 %v3389_v27  ;;  %v8417_v27 = vld [vmem:[#allocation11 + $0x8] sm:$0xff] }
 0xcd1   :  { %3587 = vmatpush1.msra.mxu0 %v8164_v62  ;;  %3658 = vmatpush1.msra.mxu1 %v8167_v63  ;;  %9841 = vst [vmem:[#allocation47_spill] sm:$0xff] %v8417_v27 }
 0xcd2   :  { %3588 = vmatprep.subr.mxu0 %v8170_v24  ;;  %3659 = vmatprep.subr.mxu1 %v8173_v5 }
 0xcd3   :  { %3589 = vmatpush1.msra.mxu0 %v8176_v6  ;;  %3660 = vmatpush1.msra.mxu1 %v8179_v8 }
 0xcd4   :  { %3590 = vmatprep.subr.mxu0 %v8182_v9  ;;  %3661 = vmatprep.subr.mxu1 %v8185_v14 }
 0xcd5   :  { %3591 = vmatpush1.msra.mxu0 %v8188_v15  ;;  %3662 = vmatpush1.msra.mxu1 %v8191_v16 }
 0xcd6   :  { %3592 = vmatprep.subr.mxu0 %v8194_v17  ;;  %3663 = vmatprep.subr.mxu1 %v8197_v34 }
 0xcd7   :  { %3593 = vmatpush1.msra.mxu0 %v8200_v35  ;;  %3664 = vmatpush1.msra.mxu1 %v8203_v38 }
 0xcd8   :  { %3594 = vmatprep.subr.mxu0 %v8206_v25  ;;  %3665 = vmatprep.subr.mxu1 %v8209_v26 }
 0xcd9   :  { %3595 = vmatpush1.msra.mxu0 %v8212_v23  ;;  %3666 = vmatpush1.msra.mxu1 %v8215_v13 }
 0xcda   :  { %3596 = vmatprep.subr.mxu0 %v8218_v37  ;;  %3667 = vmatprep.subr.mxu1 %v8221_v28 }
 0xcdb   :  { %3597 = vmatpush1.msra.mxu0 %v8224_v19  ;;  %3668 = vmatpush1.msra.mxu1 %v8227_v40 }
 0xcdc   :  { %3598 = vmatprep.subr.mxu0 %v8230_v36  ;;  %3669 = vmatprep.subr.mxu1 %v8233_v10 }
 0xcdd   :  { %3599 = vmatpush1.msra.mxu0 %v8236_v11  ;;  %3670 = vmatpush1.msra.mxu1 %v8239_v56 }
 0xcde   :  { %3600 = vmatprep.subr.mxu0 %v8242_v0  ;;  %3671 = vmatprep.subr.mxu1 %v9822_v53 }
 0xcdf   :  { %3601 = vmatpush1.msra.mxu0 %v9823_v30  ;;  %3672 = vmatpush1.msra.mxu1 %v9824_v7 }
 0xce0   :  { %3602 = vmatprep.subr.mxu0 %v8254_v2  ;;  %3673 = vmatprep.subr.mxu1 %v8257_v54 }
 0xce1   :  { %3603 = vmatpush1.msra.mxu0 %v8260_v61  ;;  %3674 = vmatpush1.msra.mxu1 %v8263_v12 }
 0xce2   :  { %3604 = vmatprep.subr.mxu0 %v8266_v33  ;;  %3675 = vmatprep.subr.mxu1 %v8269_v21 }
 0xce3   :  { %3605 = vmatpush1.msra.mxu0 %v8351_v18  ;;  %3676 = vmatpush1.msra.mxu1 %v8354_v41 }
 0xce4   :  { %3606 = vmatprep.subr.mxu0 %v8357_v42  ;;  %3677 = vmatprep.subr.mxu1 %v8360_v43 }
 0xce5   :  { %3607 = vmatpush1.msra.mxu0 %v8363_v44  ;;  %3678 = vmatpush1.msra.mxu1 %v8366_v45 }
 0xce6   :  { %3608 = vmatprep.subr.mxu0 %v8369_v46  ;;  %3679 = vmatprep.subr.mxu1 %v8372_v47 }
 0xce7   :  { %3609 = vmatpush1.msra.mxu0 %v8375_v48  ;;  %3680 = vmatpush1.msra.mxu1 %v8378_v49 }
 0xce8   :  { %3610 = vmatprep.subr.mxu0 %v8381_v50  ;;  %3681 = vmatprep.subr.mxu1 %v8384_v51  ;;  %v9846_v51 = vld [vmem:[#allocation60_spill] sm:$0xff] }
 0xce9   :  { %3611 = vmatpush1.msra.mxu0 %v8387_v52  ;;  %3682 = vmatpush1.msra.mxu1 %v8390_v57  ;;  %v9845_v52 = vld [vmem:[#allocation52_spill] sm:$0xff] }
 0xcea   :  { %3612 = vmatprep.subr.mxu0 %v8393_v58  ;;  %3683 = vmatprep.subr.mxu1 %v8396_v60 }
 0xceb   :  { %3613 = vmatpush1.msra.mxu0 %v8399_v31  ;;  %3684 = vmatpush1.msra.mxu1 %v8402_v4  ;;  %v8420_v4 = vld [vmem:[#allocation11 + $0x18] sm:$0xff] }
 0xcec   :  { %3614 = vmatprep.subr.mxu0 %v8405_v39  ;;  %3685 = vmatprep.subr.mxu1 %v8408_v29  ;;  %9842 = vst [vmem:[#allocation48_spill] sm:$0xff] %v8420_v4  ;;  %v8423_v39 = vld [vmem:[#allocation11] sm:$0xff]  ;;  %v8427_v29 = vld [vmem:[#allocation11 + $0x10] sm:$0xff] }
 0xced   :  { %3615 = vmatpush1.msra.mxu0 %v8411_v32  ;;  %3686 = vmatpush1.msra.mxu1 %v8414_v1  ;;  %9843 = vst [vmem:[#allocation49_spill] sm:$0xff] %v8423_v39  ;;  %9844 = vst [vmem:[#allocation53_spill] sm:$0xff] %v8427_v29 }
 0xcee   :  { %3616 = vmatprep.subr.mxu0 %v8417_v27  ;;  %3687 = vmatprep.subr.mxu1 %v8420_v4 }
 0xcef   :  { %3617 = vmatpush1.msra.mxu0 %v8423_v39  ;;  %3650 = vmatprep.mubr.f32.mxu0 %v9809_v59 }
 0xcf0   :  { %3688 = vmatpush1.msra.mxu1 %v8427_v29  ;;  %3721 = vmatprep.mubr.f32.mxu1 %v9809_v59  ;;  %v9847_v29 = vcombine.low %v9845_v52, %v9846_v51 }
 0xcf1   :  { %3782 = vmatprep.subr.mxu0 %v8300_v55  ;;  %3853 = vmatprep.subr.mxu1 %v8303_v20 }
 0xd90   :  { %v3456_v27 = vpop.f32.mrf.mxu0  ;;  %v3527_v1 = vpop.f32.mrf.mxu1 }
 0xd92   :  { %v3458_v32 = vpop.f32.mrf.mxu0  ;;  %v3529_v4 = vpop.f32.mrf.mxu1 }
 0xd93   :  { %v3536_v31 = vcombine.low %v3456_v27, %v3458_v32  ;;  %v3537_v60 = vcombine.low %v3527_v1, %v3529_v4  ;;  %v9851_v1 = vld [vmem:[#allocation38_spill] sm:$0xff]  ;;  %v9852_v27 = vld [vmem:[#allocation39_spill] sm:$0xff] }
 0xd95   :  { %v3544_v39 = vrot.slane %v3536_v31, %v9540_v22  ;;  %v3551_v58 = vrot.slane %v3537_v60, %v9540_v22 }
 0xd97   :  { %v3552_v57 = vcombine.low %v3544_v39, %v3551_v58 }
 0xd99   :  { %v3554_v50 = vadd.f32 %v3552_v57, %v9847_v29 }
 0xd9b   :  { %v5688_v59 = vmul.f32 -1.442695, %v3554_v50  ;;  %v3562_v49 = vrot.slane %v3554_v50, 2  ;;  %v3573_v20 = vrot.slane %v3554_v50, 6  ;;  %v3570_v46 = vrot.slane %v3554_v50, 4  ;;  %v9850_v50 = vld [vmem:[#allocation37_spill] sm:$0xff] }
 0xd9d   :  { %6036 = vpow2.f32 %v5688_v59  ;;  %v5689_v55 = vmul.f32 -1.442695, %v3562_v49  ;;  %v5690_v48 = vmul.f32 -1.442695, %v3573_v20 }
 0xd9f   :  { %6038 = vpow2.f32 %v5689_v55 }
 0xda0   :  { %6040 = vpow2.f32 %v5690_v48 }
 0xdaa   :  { %v6037_v47 = vpop.eup %6036 }
 0xdab   :  { %v3558_v32 = vadd.f32 1.0, %v6037_v47 }
 0xdac   :  { %v6039_v4 = vpop.eup %6038 }
 0xdad   :  { %6042 = vrcp.f32 %v3558_v32  ;;  %v3567_v31 = vadd.f32 1.0, %v6039_v4  ;;  %v6041_v58 = vpop.eup %6040  ;;  %v9853_v32 = vld [vmem:[#allocation30_spill] sm:$0xff]  ;;  %v9854_v4 = vld [vmem:[#allocation31_spill] sm:$0xff] }
 0xdae   :  { %6044 = vtanh.f32 %v3570_v46  ;;  %v3578_v29 = vadd.f32 1.0, %v6041_v58  ;;  %v9849_v46 = vld [vmem:[#allocation36_spill] sm:$0xff]  ;;  %v9856_v58 = vld [vmem:[#allocation59_spill] sm:$0xff] }
 0xdaf   :  { %6046 = vrcp.f32 %v3567_v31  ;;  %v9855_v31 = vld [vmem:[#allocation58_spill] sm:$0xff] }
 0xdb0   :  { %6048 = vrcp.f32 %v3578_v29  ;;  %v9860_v29 = vld [vmem:[#allocation43_spill] sm:$0xff] }
 0xdba   :  { %v6043_v60 = vpop.eup %6042 }
 0xdbb   :  { %v6045_v39 = vpop.eup %6044 }
 0xdbc   :  { %v6047_v57 = vpop.eup %6046  ;;  %v3582_v49 = vmul.f32 %v6045_v39, %v6043_v60  ;;  %v9857_v60 = vld [vmem:[#allocation40_spill] sm:$0xff]  ;;  %v9858_v39 = vld [vmem:[#allocation41_spill] sm:$0xff] }
 0xdbd   :  { %v3581_v59 = vmul.f32 %v6047_v57, %v8312_v3  ;;  %v6049_v20 = vpop.eup %6048  ;;  %v9848_v3 = vld [vmem:[#allocation34_spill] sm:$0xff] }
 0xdbe   :  { %v9859_v57 = vld [vmem:[#allocation42_spill] sm:$0xff] }
 0xdbf   :  { %v8439_v55 = vadd.f32 %v3582_v49, %v3581_v59  ;;  %v9861_v59 = vld [vmem:[#allocation44_spill] sm:$0xff]  ;;  %v9862_v49 = vld [vmem:[#allocation45_spill] sm:$0xff] }
 0xdc1   :  { %6050 = vtanh.f32 %v8439_v55 }
 0xdce   :  { %v6051_v47 = vpop.eup %6050 }
 0xdcf   :  { %v3585_v48 = vmul.f32 %v6051_v47, %v6049_v20  ;;  %v9863_v20 = vld [vmem:[#allocation46_spill] sm:$0xff]  ;;  %v9864_v47 = vld [vmem:[#allocation47_spill] sm:$0xff] }
 0xdd1   :  { %3651 = vmatmul.mubr.f32.vlgmr.msra.gmra.mxu0 %v3585_v48  ;;  %3722 = vmatmul.mubr.f32.vlgmr.msra.gmra.mxu1 %v3585_v48  ;;  %v9865_v48 = vld [vmem:[#allocation48_spill] sm:$0xff] }
 0xdd2   :  { %3783 = vmatpush1.msra.mxu0 %v8164_v62  ;;  %3854 = vmatpush1.msra.mxu1 %v8167_v63 }
 0xdd3   :  { %3784 = vmatprep.subr.mxu0 %v8170_v24  ;;  %3855 = vmatprep.subr.mxu1 %v8173_v5 }
 0xdd4   :  { %3785 = vmatpush1.msra.mxu0 %v8176_v6  ;;  %3856 = vmatpush1.msra.mxu1 %v8179_v8 }
 0xdd5   :  { %3786 = vmatprep.subr.mxu0 %v8182_v9  ;;  %3857 = vmatprep.subr.mxu1 %v8185_v14 }
 0xdd6   :  { %3787 = vmatpush1.msra.mxu0 %v8188_v15  ;;  %3858 = vmatpush1.msra.mxu1 %v8191_v16 }
 0xdd7   :  { %3788 = vmatprep.subr.mxu0 %v8194_v17  ;;  %3859 = vmatprep.subr.mxu1 %v8197_v34 }
 0xdd8   :  { %3789 = vmatpush1.msra.mxu0 %v8200_v35  ;;  %3860 = vmatpush1.msra.mxu1 %v8203_v38 }
 0xdd9   :  { %3790 = vmatprep.subr.mxu0 %v8206_v25  ;;  %3861 = vmatprep.subr.mxu1 %v8209_v26 }
 0xdda   :  { %3791 = vmatpush1.msra.mxu0 %v8212_v23  ;;  %3862 = vmatpush1.msra.mxu1 %v8215_v13 }
 0xddb   :  { %3792 = vmatprep.subr.mxu0 %v8218_v37  ;;  %3863 = vmatprep.subr.mxu1 %v8221_v28 }
 0xddc   :  { %3793 = vmatpush1.msra.mxu0 %v8224_v19  ;;  %3864 = vmatpush1.msra.mxu1 %v8227_v40 }
 0xddd   :  { %3794 = vmatprep.subr.mxu0 %v8230_v36  ;;  %3865 = vmatprep.subr.mxu1 %v8233_v10 }
 0xdde   :  { %3795 = vmatpush1.msra.mxu0 %v8236_v11  ;;  %3866 = vmatpush1.msra.mxu1 %v8239_v56 }
 0xddf   :  { %3796 = vmatprep.subr.mxu0 %v8242_v0  ;;  %3867 = vmatprep.subr.mxu1 %v9822_v53 }
 0xde0   :  { %3797 = vmatpush1.msra.mxu0 %v9823_v30  ;;  %3868 = vmatpush1.msra.mxu1 %v9824_v7 }
 0xde1   :  { %3798 = vmatprep.subr.mxu0 %v8254_v2  ;;  %3869 = vmatprep.subr.mxu1 %v8257_v54 }
 0xde2   :  { %3799 = vmatpush1.msra.mxu0 %v8260_v61  ;;  %3870 = vmatpush1.msra.mxu1 %v8263_v12 }
 0xde3   :  { %3800 = vmatprep.subr.mxu0 %v8266_v33  ;;  %3871 = vmatprep.subr.mxu1 %v8269_v21 }
 0xde4   :  { %3801 = vmatpush1.msra.mxu0 %v8351_v18  ;;  %3872 = vmatpush1.msra.mxu1 %v8354_v41 }
 0xde5   :  { %3802 = vmatprep.subr.mxu0 %v8357_v42  ;;  %3873 = vmatprep.subr.mxu1 %v8360_v43 }
 0xde6   :  { %3803 = vmatpush1.msra.mxu0 %v8363_v44  ;;  %3874 = vmatpush1.msra.mxu1 %v8366_v45 }
 0xde7   :  { %3804 = vmatprep.subr.mxu0 %v9848_v3  ;;  %3875 = vmatprep.subr.mxu1 %v9849_v46 }
 0xde8   :  { %3805 = vmatpush1.msra.mxu0 %v9850_v50  ;;  %3876 = vmatpush1.msra.mxu1 %v9851_v1 }
 0xde9   :  { %3806 = vmatprep.subr.mxu0 %v9852_v27  ;;  %3877 = vmatprep.subr.mxu1 %v9853_v32 }
 0xdea   :  { %3807 = vmatpush1.msra.mxu0 %v9854_v4  ;;  %3878 = vmatpush1.msra.mxu1 %v9855_v31  ;;  %v9866_v31 = vld [vmem:[#allocation49_spill] sm:$0xff] }
 0xdeb   :  { %3808 = vmatprep.subr.mxu0 %v9856_v58  ;;  %3879 = vmatprep.subr.mxu1 %v9857_v60  ;;  %v9867_v58 = vmov 0.0   ;;  %v9868_v60 = vld [vmem:[#allocation53_spill] sm:$0xff] }
 0xdec   :  { %3809 = vmatpush1.msra.mxu0 %v9858_v39  ;;  %3880 = vmatpush1.msra.mxu1 %v9859_v57  ;;  %v9869_v57 = vld [vmem:[#allocation62_spill] sm:$0xff] }
 0xded   :  { %3810 = vmatprep.subr.mxu0 %v9860_v29  ;;  %3881 = vmatprep.subr.mxu1 %v9861_v59  ;;  %v9870_v29 = vld [vmem:[#allocation33_spill] sm:$0xff] }
 0xdee   :  { %3811 = vmatpush1.msra.mxu0 %v9862_v49  ;;  %3882 = vmatpush1.msra.mxu1 %v9863_v20 }
 0xdef   :  { %3812 = vmatprep.subr.mxu0 %v9864_v47  ;;  %3883 = vmatprep.subr.mxu1 %v9865_v48 }
 0xdf0   :  { %3813 = vmatpush1.msra.mxu0 %v9866_v31  ;;  %3846 = vmatprep.mubr.f32.mxu0 %v9867_v58 }
 0xdf1   :  { %3884 = vmatpush1.msra.mxu1 %v9868_v60  ;;  %3917 = vmatprep.mubr.f32.mxu1 %v9867_v58  ;;  %v9871_v60 = vcombine.high %v9845_v52, %v9846_v51 }
 0xdf2   :  { %3978 = vmatprep.subr.mxu0 %v9869_v57  ;;  %4049 = vmatprep.subr.mxu1 %v9870_v29 }
 0xe91   :  { %v3652_v59 = vpop.f32.mrf.mxu0  ;;  %v3723_v49 = vpop.f32.mrf.mxu1 }
 0xe93   :  { %v3654_v39 = vpop.f32.mrf.mxu0  ;;  %v3725_v20 = vpop.f32.mrf.mxu1 }
 0xe94   :  { %v3732_v4 = vcombine.low %v3652_v59, %v3654_v39  ;;  %v3733_v47 = vcombine.low %v3723_v49, %v3725_v20 }
 0xe96   :  { %v3740_v48 = vrot.slane %v3732_v4, %v9540_v22  ;;  %v3747_v31 = vrot.slane %v3733_v47, %v9540_v22 }
 0xe98   :  { %v3748_v32 = vcombine.low %v3740_v48, %v3747_v31 }
 0xe9a   :  { %v3750_v27 = vadd.f32 %v3748_v32, %v9871_v60 }
 0xe9c   :  { %v5691_v58 = vmul.f32 -1.442695, %v3750_v27  ;;  %v3758_v1 = vrot.slane %v3750_v27, 2  ;;  %v3769_v29 = vrot.slane %v3750_v27, 6  ;;  %v3766_v3 = vrot.slane %v3750_v27, 4 }
 0xe9e   :  { %6052 = vpow2.f32 %v5691_v58  ;;  %v5692_v57 = vmul.f32 -1.442695, %v3758_v1  ;;  %v5693_v50 = vmul.f32 -1.442695, %v3769_v29 }
 0xea0   :  { %6054 = vpow2.f32 %v5692_v57 }
 0xea1   :  { %6056 = vpow2.f32 %v5693_v50 }
 0xeab   :  { %v6053_v46 = vpop.eup %6052 }
 0xeac   :  { %v3754_v39 = vadd.f32 1.0, %v6053_v46 }
 0xead   :  { %v6055_v59 = vpop.eup %6054 }
 0xeae   :  { %6058 = vrcp.f32 %v3754_v39  ;;  %v3763_v4 = vadd.f32 1.0, %v6055_v59  ;;  %v6057_v31 = vpop.eup %6056 }
 0xeaf   :  { %6060 = vtanh.f32 %v3766_v3  ;;  %v3774_v32 = vadd.f32 1.0, %v6057_v31 }
 0xeb0   :  { %6062 = vrcp.f32 %v3763_v4 }
 0xeb1   :  { %6064 = vrcp.f32 %v3774_v32 }
 0xebb   :  { %v6059_v49 = vpop.eup %6058 }
 0xebc   :  { %v6061_v51 = vpop.eup %6060 }
 0xebd   :  { %v6063_v52 = vpop.eup %6062  ;;  %v3778_v1 = vmul.f32 %v6061_v51, %v6059_v49  ;;  %v6566_v51 = vmov 1966171168  }
 0xebe   :  { %v3777_v58 = vmul.f32 %v6063_v52, %v8439_v55  ;;  %v6065_v46 = vpop.eup %6064  ;;  %v4274_v52 = vunpack.c.l.s4 %v6566_v51  ;;  %v8709_v51 = vld [vmem:[#allocation14 + $0xa8] sm:$0xff] }
 0xec0   :  { %v8514_v60 = vadd.f32 %v3778_v1, %v3777_v58  ;;  %v4275_v32 = vunpack.c.0.s8 %v4274_v52  ;;  %v4174_v58 = vld [vmem:[#allocation5] sm:$0x1]  ;;  %v4175_v1 = vld [vmem:[#allocation5 + $0x1] sm:$0x1] }
 0xec1   :  { %v8711_v52 = vld [vmem:[#allocation14 + $0xb8] sm:$0xff] }
 0xec2   :  { %6066 = vtanh.f32 %v8514_v60 }
 0xecf   :  { %v6067_v27 = vpop.eup %6066 }
 0xed0   :  { %v3781_v50 = vmul.f32 %v6067_v27, %v6065_v46  ;;  %v4272_v46 = vcombine.low %v4174_v58, %v4175_v1  ;;  %v9897_v27 = vld [vmem:[#allocation28_spill] sm:$0xff]  ;;  %v8717_v58 = vld [vmem:[#allocation14 + $0xb0] sm:$0xff] }
 0xed1   :  { %v8721_v1 = vld [vmem:[#allocation14 + $0x88] sm:$0xff] }
 0xed2   :  { %3847 = vmatmul.mubr.f32.vlgmr.msra.gmra.mxu0 %v3781_v50  ;;  %3918 = vmatmul.mubr.f32.vlgmr.msra.gmra.mxu1 %v3781_v50  ;;  %v4278_v50 = vsub.s32 %v4275_v32, %v9897_v27  ;;  %v8715_v32 = vld [vmem:[#allocation14 + $0xa0] sm:$0xff] }
 0xed3   :  { %3979 = vmatpush1.msra.mxu0 %v8164_v62  ;;  %4050 = vmatpush1.msra.mxu1 %v8167_v63  ;;  %v9872_v62 = vld [vmem:[#allocation34_spill] sm:$0xff]  ;;  %v9873_v63 = vld [vmem:[#allocation36_spill] sm:$0xff] }
 0xed4   :  { %3980 = vmatprep.subr.mxu0 %v8170_v24  ;;  %4051 = vmatprep.subr.mxu1 %v8173_v5  ;;  %v9874_v24 = vld [vmem:[#allocation37_spill] sm:$0xff]  ;;  %v9875_v5 = vld [vmem:[#allocation38_spill] sm:$0xff]  ;;  %v8727_v27 = vld [vmem:[#allocation14 + $0x80] sm:$0xff] }
 0xed5   :  { %3981 = vmatpush1.msra.mxu0 %v8176_v6  ;;  %4052 = vmatpush1.msra.mxu1 %v8179_v8  ;;  %v9876_v6 = vld [vmem:[#allocation39_spill] sm:$0xff]  ;;  %v9877_v8 = vld [vmem:[#allocation30_spill] sm:$0xff] }
 0xed6   :  { %3982 = vmatprep.subr.mxu0 %v8182_v9  ;;  %4053 = vmatprep.subr.mxu1 %v8185_v14  ;;  %v9878_v9 = vld [vmem:[#allocation31_spill] sm:$0xff]  ;;  %v9879_v14 = vld [vmem:[#allocation58_spill] sm:$0xff] }
 0xed7   :  { %3983 = vmatpush1.msra.mxu0 %v8188_v15  ;;  %4054 = vmatpush1.msra.mxu1 %v8191_v16  ;;  %v9880_v15 = vld [vmem:[#allocation59_spill] sm:$0xff]  ;;  %v9881_v16 = vld [vmem:[#allocation40_spill] sm:$0xff] }
 0xed8   :  { %3984 = vmatprep.subr.mxu0 %v8194_v17  ;;  %4055 = vmatprep.subr.mxu1 %v8197_v34  ;;  %v9882_v17 = vld [vmem:[#allocation41_spill] sm:$0xff]  ;;  %v9883_v34 = vld [vmem:[#allocation42_spill] sm:$0xff] }
 0xed9   :  { %3985 = vmatpush1.msra.mxu0 %v8200_v35  ;;  %4056 = vmatpush1.msra.mxu1 %v8203_v38  ;;  %v9884_v35 = vld [vmem:[#allocation43_spill] sm:$0xff]  ;;  %v9885_v38 = vld [vmem:[#allocation44_spill] sm:$0xff] }
 0xeda   :  { %3986 = vmatprep.subr.mxu0 %v8206_v25  ;;  %4057 = vmatprep.subr.mxu1 %v8209_v26  ;;  %v9886_v25 = vld [vmem:[#allocation45_spill] sm:$0xff]  ;;  %v9887_v26 = vld [vmem:[#allocation46_spill] sm:$0xff] }
 0xedb   :  { %3987 = vmatpush1.msra.mxu0 %v8212_v23  ;;  %4058 = vmatpush1.msra.mxu1 %v8215_v13  ;;  %v9888_v23 = vld [vmem:[#allocation47_spill] sm:$0xff]  ;;  %v9889_v13 = vld [vmem:[#allocation48_spill] sm:$0xff] }
 0xedc   :  { %3988 = vmatprep.subr.mxu0 %v8218_v37  ;;  %4059 = vmatprep.subr.mxu1 %v8221_v28  ;;  %v9890_v37 = vld [vmem:[#allocation49_spill] sm:$0xff] }
 0xedd   :  { %3989 = vmatpush1.msra.mxu0 %v8224_v19  ;;  %4060 = vmatpush1.msra.mxu1 %v8227_v40  ;;  %v9891_v28 = vld [vmem:[#allocation53_spill] sm:$0xff]  ;;  %v9892_v19 = vmov 0.0  }
 0xede   :  { %3990 = vmatprep.subr.mxu0 %v8230_v36  ;;  %4061 = vmatprep.subr.mxu1 %v8233_v10  ;;  %v4181_v40 = vld [vmem:[#allocation13 + $0x28] sm:$0xff]  ;;  %v4183_v36 = vld [vmem:[#allocation13 + $0x38] sm:$0xff] }
 0xedf   :  { %3991 = vmatpush1.msra.mxu0 %v8236_v11  ;;  %4062 = vmatpush1.msra.mxu1 %v8239_v56 }
 0xee0   :  { %3992 = vmatprep.subr.mxu0 %v8242_v0  ;;  %4063 = vmatprep.subr.mxu1 %v9822_v53  ;;  %v9894_v53 = vld [vmem:[#allocation50_spill] sm:$0xff] }
 0xee1   :  { %3993 = vmatpush1.msra.mxu0 %v9823_v30  ;;  %4064 = vmatpush1.msra.mxu1 %v9824_v7 }
 0xee2   :  { %3994 = vmatprep.subr.mxu0 %v8254_v2  ;;  %4065 = vmatprep.subr.mxu1 %v8257_v54 }
 0xee3   :  { %3995 = vmatpush1.msra.mxu0 %v8260_v61  ;;  %4066 = vmatpush1.msra.mxu1 %v8263_v12  ;;  %v9893_v61 = vld [vmem:[#allocation64_spill] sm:$0xff] }
 0xee4   :  { %3996 = vmatprep.subr.mxu0 %v8266_v33  ;;  %4067 = vmatprep.subr.mxu1 %v8269_v21  ;;  %v9895_v30 = vcombine.low %v9893_v61, %v9894_v53  ;;  %v8769_v53 = vld [vmem:[#allocation14 + $0x8] sm:$0xff]  ;;  %v8771_v61 = vld [vmem:[#allocation14 + $0x18] sm:$0xff] }
 0xee5   :  { %3997 = vmatpush1.msra.mxu0 %v8351_v18  ;;  %4068 = vmatpush1.msra.mxu1 %v8354_v41 }
 0xee6   :  { %3998 = vmatprep.subr.mxu0 %v8357_v42  ;;  %4069 = vmatprep.subr.mxu1 %v8360_v43 }
 0xee7   :  { %3999 = vmatpush1.msra.mxu0 %v8363_v44  ;;  %4070 = vmatpush1.msra.mxu1 %v8366_v45 }
 0xee8   :  { %4000 = vmatprep.subr.mxu0 %v9872_v62  ;;  %4071 = vmatprep.subr.mxu1 %v9873_v63 }
 0xee9   :  { %4001 = vmatpush1.msra.mxu0 %v9874_v24  ;;  %4072 = vmatpush1.msra.mxu1 %v9875_v5  ;;  %v4180_v5 = vld [vmem:[#allocation13 + $0x20] sm:$0xff] }
 0xeea   :  { %4002 = vmatprep.subr.mxu0 %v9876_v6  ;;  %4073 = vmatprep.subr.mxu1 %v9877_v8  ;;  %v4182_v6 = vld [vmem:[#allocation13 + $0x30] sm:$0xff]  ;;  %v4177_v8 = vld [vmem:[#allocation13 + $0x8] sm:$0xff] }
 0xeeb   :  { %4003 = vmatpush1.msra.mxu0 %v9878_v9  ;;  %4074 = vmatpush1.msra.mxu1 %v9879_v14  ;;  %v4179_v9 = vld [vmem:[#allocation13 + $0x18] sm:$0xff]  ;;  %v4176_v14 = vld [vmem:[#allocation13] sm:$0xff] }
 0xeec   :  { %4004 = vmatprep.subr.mxu0 %v9880_v15  ;;  %4075 = vmatprep.subr.mxu1 %v9881_v16  ;;  %v4178_v15 = vld [vmem:[#allocation13 + $0x10] sm:$0xff]  ;;  %v8591_v16 = vld [vmem:[#allocation14 + $0x1e8] sm:$0xff] }
 0xeed   :  { %4005 = vmatpush1.msra.mxu0 %v9882_v17  ;;  %4076 = vmatpush1.msra.mxu1 %v9883_v34  ;;  %v8593_v17 = vld [vmem:[#allocation14 + $0x1f8] sm:$0xff] }
 0xeee   :  { %4006 = vmatprep.subr.mxu0 %v9884_v35  ;;  %4077 = vmatprep.subr.mxu1 %v9885_v38  ;;  %v8597_v35 = vld [vmem:[#allocation14 + $0x1e0] sm:$0xff]  ;;  %v8599_v38 = vld [vmem:[#allocation14 + $0x1f0] sm:$0xff] }
 0xeef   :  { %4007 = vmatpush1.msra.mxu0 %v9886_v25  ;;  %4078 = vmatpush1.msra.mxu1 %v9887_v26  ;;  %v8603_v25 = vld [vmem:[#allocation14 + $0x1c8] sm:$0xff]  ;;  %v8605_v26 = vld [vmem:[#allocation14 + $0x1d8] sm:$0xff] }
 0xef0   :  { %4008 = vmatprep.subr.mxu0 %v9888_v23  ;;  %4079 = vmatprep.subr.mxu1 %v9889_v13  ;;  %v8607_v23 = vld [vmem:[#allocation14 + $0x1c0] sm:$0xff]  ;;  %v8609_v13 = vld [vmem:[#allocation14 + $0x1d0] sm:$0xff] }
 0xef1   :  { %4009 = vmatpush1.msra.mxu0 %v9890_v37  ;;  %4080 = vmatpush1.msra.mxu1 %v9891_v28  ;;  %v8613_v37 = vld [vmem:[#allocation14 + $0x1a8] sm:$0xff]  ;;  %v8615_v28 = vld [vmem:[#allocation14 + $0x1b8] sm:$0xff] }
 0xef2   :  { %4042 = vmatprep.mubr.f32.mxu0 %v9892_v19  ;;  %4113 = vmatprep.mubr.f32.mxu1 %v9892_v19 }
 0xef3   :  { %4318 = vmatprep.subr.mxu0 %v4181_v40  ;;  %4389 = vmatprep.subr.mxu1 %v4183_v36  ;;  %v8619_v40 = vld [vmem:[#allocation14 + $0x1a0] sm:$0xff]  ;;  %v8621_v36 = vld [vmem:[#allocation14 + $0x1b0] sm:$0xff] }
 0xf92   :  { %v3848_v10 = vpop.f32.mrf.mxu0  ;;  %v3919_v11 = vpop.f32.mrf.mxu1 }
 0xf94   :  { %v3850_v56 = vpop.f32.mrf.mxu0  ;;  %v3921_v0 = vpop.f32.mrf.mxu1 }
 0xf95   :  { %v3928_v12 = vcombine.low %v3848_v10, %v3850_v56  ;;  %v3929_v33 = vcombine.low %v3919_v11, %v3921_v0  ;;  %v8625_v10 = vld [vmem:[#allocation14 + $0x188] sm:$0xff]  ;;  %v8627_v11 = vld [vmem:[#allocation14 + $0x198] sm:$0xff]  ;;  %v8631_v56 = vld [vmem:[#allocation14 + $0x180] sm:$0xff] }
 0xf96   :  { %v8633_v0 = vld [vmem:[#allocation14 + $0x190] sm:$0xff] }
 0xf97   :  { %v3936_v21 = vrot.slane %v3928_v12, %v9540_v22  ;;  %v3943_v2 = vrot.slane %v3929_v33, %v9540_v22  ;;  %v8637_v12 = vld [vmem:[#allocation14 + $0x168] sm:$0xff]  ;;  %v8639_v33 = vld [vmem:[#allocation14 + $0x178] sm:$0xff]  ;;  %v8775_v22 = vld [vmem:[#allocation14] sm:$0xff] }
 0xf99   :  { %v3944_v54 = vcombine.low %v3936_v21, %v3943_v2  ;;  %v8643_v21 = vld [vmem:[#allocation14 + $0x160] sm:$0xff]  ;;  %v8645_v2 = vld [vmem:[#allocation14 + $0x170] sm:$0xff] }
 0xf9b   :  { %v3946_v7 = vadd.f32 %v3944_v54, %v9895_v30  ;;  %v8649_v54 = vld [vmem:[#allocation14 + $0x148] sm:$0xff]  ;;  %v8651_v30 = vld [vmem:[#allocation14 + $0x158] sm:$0xff] }
 0xf9d   :  { %v5694_v18 = vmul.f32 -1.442695, %v3946_v7  ;;  %v3954_v41 = vrot.slane %v3946_v7, 2  ;;  %v3965_v43 = vrot.slane %v3946_v7, 6  ;;  %v3962_v55 = vrot.slane %v3946_v7, 4  ;;  %v8655_v7 = vld [vmem:[#allocation14 + $0x140] sm:$0xff] }
 0xf9f   :  { %6068 = vpow2.f32 %v5694_v18  ;;  %v5695_v42 = vmul.f32 -1.442695, %v3954_v41  ;;  %v5696_v44 = vmul.f32 -1.442695, %v3965_v43  ;;  %v8657_v18 = vld [vmem:[#allocation14 + $0x150] sm:$0xff]  ;;  %v8661_v41 = vld [vmem:[#allocation14 + $0x128] sm:$0xff] }
 0xfa0   :  { %v8667_v43 = vld [vmem:[#allocation14 + $0x120] sm:$0xff] }
 0xfa1   :  { %6070 = vpow2.f32 %v5695_v42  ;;  %v8663_v42 = vld [vmem:[#allocation14 + $0x138] sm:$0xff] }
 0xfa2   :  { %6072 = vpow2.f32 %v5696_v44  ;;  %v8669_v44 = vld [vmem:[#allocation14 + $0x130] sm:$0xff] }
 0xfac   :  { %v6069_v45 = vpop.eup %6068 }
 0xfad   :  { %v3950_v3 = vadd.f32 1.0, %v6069_v45  ;;  %v8673_v45 = vld [vmem:[#allocation14 + $0x108] sm:$0xff] }
 0xfae   :  { %v6071_v20 = vpop.eup %6070 }
 0xfaf   :  { %6074 = vrcp.f32 %v3950_v3  ;;  %v3959_v47 = vadd.f32 1.0, %v6071_v20  ;;  %v6073_v48 = vpop.eup %6072  ;;  %v8679_v3 = vld [vmem:[#allocation14 + $0x100] sm:$0xff]  ;;  %v8681_v20 = vld [vmem:[#allocation14 + $0x110] sm:$0xff] }
 0xfb0   :  { %6076 = vtanh.f32 %v3962_v55  ;;  %v3970_v59 = vadd.f32 1.0, %v6073_v48  ;;  %v8675_v55 = vld [vmem:[#allocation14 + $0x118] sm:$0xff] }
 0xfb1   :  { %6078 = vrcp.f32 %v3959_v47  ;;  %v8685_v47 = vld [vmem:[#allocation14 + $0xe8] sm:$0xff]  ;;  %v8687_v48 = vld [vmem:[#allocation14 + $0xf8] sm:$0xff] }
 0xfb2   :  { %6080 = vrcp.f32 %v3970_v59  ;;  %v8699_v59 = vld [vmem:[#allocation14 + $0xd8] sm:$0xff] }
 0xfbc   :  { %v6075_v57 = vpop.eup %6074 }
 0xfbd   :  { %v6077_v29 = vpop.eup %6076 }
 0xfbe   :  { %v6079_v39 = vpop.eup %6078  ;;  %v3974_v31 = vmul.f32 %v6077_v29, %v6075_v57  ;;  %v8691_v57 = vld [vmem:[#allocation14 + $0xe0] sm:$0xff]  ;;  %v8693_v29 = vld [vmem:[#allocation14 + $0xf0] sm:$0xff] }
 0xfbf   :  { %v3973_v4 = vmul.f32 %v6079_v39, %v8514_v60  ;;  %v6081_v62 = vpop.eup %6080  ;;  %v4279_v60 = vrot.slane %v4272_v46, %v4278_v50  ;;  %v8697_v39 = vld [vmem:[#allocation14 + $0xc8] sm:$0xff]  ;;  %v8723_v46 = vld [vmem:[#allocation14 + $0x98] sm:$0xff] }
 0xfc1   :  { %v8587_v49 = vadd.f32 %v3974_v31, %v3973_v4  ;;  %v4286_v34 = vrot.slane %v4279_v60, %v4278_v50  ;;  %v8703_v4 = vld [vmem:[#allocation14 + $0xc0] sm:$0xff]  ;;  %v8705_v31 = vld [vmem:[#allocation14 + $0xd0] sm:$0xff]  ;;  %v8747_v60 = vld [vmem:[#allocation14 + $0x58] sm:$0xff] }
 0xfc2   :  { %v8729_v50 = vld [vmem:[#allocation14 + $0x90] sm:$0xff]  ;;  %9898 = vst [vmem:[#allocation63_spill] sm:$0xff] %v8747_v60 }
 0xfc3   :  { %9896 = vst [vmem:[#allocation32_spill] sm:$0xff] %v8587_v49  ;;  %6082 = vtanh.f32 %v8587_v49  ;;  %v8765_v49 = vld [vmem:[#allocation14 + $0x30] sm:$0xff] }
 0xfd0   :  { %v6083_v63 = vpop.eup %6082 }
 0xfd1   :  { %v3977_v24 = vmul.f32 %v6083_v63, %v6081_v62  ;;  %v8733_v62 = vld [vmem:[#allocation14 + $0x68] sm:$0xff]  ;;  %v8735_v63 = vld [vmem:[#allocation14 + $0x78] sm:$0xff] }
 0xfd3   :  { %4043 = vmatmul.mubr.f32.vlgmr.msra.gmra.mxu0 %v3977_v24  ;;  %4114 = vmatmul.mubr.f32.vlgmr.msra.gmra.mxu1 %v3977_v24  ;;  %v8739_v24 = vld [vmem:[#allocation14 + $0x60] sm:$0xff] }
 0xfd4   :  { %4319 = vmatpush1.msra.mxu0 %v4180_v5  ;;  %4390 = vmatpush1.msra.mxu1 %v4182_v6  ;;  %v8741_v5 = vld [vmem:[#allocation14 + $0x70] sm:$0xff]  ;;  %v8745_v6 = vld [vmem:[#allocation14 + $0x48] sm:$0xff] }
 0xfd5   :  { %4320 = vmatprep.subr.mxu0 %v4177_v8  ;;  %4391 = vmatprep.subr.mxu1 %v4179_v9  ;;  %v8751_v8 = vld [vmem:[#allocation14 + $0x40] sm:$0xff]  ;;  %v8753_v9 = vld [vmem:[#allocation14 + $0x50] sm:$0xff] }
 0xfd6   :  { %4321 = vmatpush1.msra.mxu0 %v4176_v14  ;;  %4392 = vmatpush1.msra.mxu1 %v4178_v15  ;;  %v8757_v14 = vld [vmem:[#allocation14 + $0x28] sm:$0xff]  ;;  %v8759_v15 = vld [vmem:[#allocation14 + $0x38] sm:$0xff] }
 0xfd7   :  { %4354 = vmatprep.mubr.f32.mxu0 %v9892_v19  ;;  %4425 = vmatprep.mubr.f32.mxu1 %v9892_v19 }
 0xfd8   :  { %4432 = vmatprep.subr.mxu0 %v8591_v16  ;;  %4503 = vmatprep.subr.mxu1 %v8593_v17 }
 0xfd9   :  { %5700 = vmatmul.mubr.msk.f32.vlgmr.msra.gmra.mxu0 %vm4287_vm1, %v4286_v34  ;;  %5701 = vmatmul.mubr.msk.f32.vlgmr.msra.gmra.mxu1 %vm4287_vm1, %v4286_v34  ;;  %v8763_v34 = vld [vmem:[#allocation14 + $0x20] sm:$0xff] }
 0xfda   :  { %4433 = vmatpush1.msra.mxu0 %v8597_v35  ;;  %4504 = vmatpush1.msra.mxu1 %v8599_v38 }
 0xfdb   :  { %4434 = vmatprep.subr.mxu0 %v8603_v25  ;;  %4505 = vmatprep.subr.mxu1 %v8605_v26 }
 0xfdc   :  { %4435 = vmatpush1.msra.mxu0 %v8607_v23  ;;  %4506 = vmatpush1.msra.mxu1 %v8609_v13 }
 0xfdd   :  { %4436 = vmatprep.subr.mxu0 %v8613_v37  ;;  %4507 = vmatprep.subr.mxu1 %v8615_v28 }
 0xfde   :  { %4437 = vmatpush1.msra.mxu0 %v8619_v40  ;;  %4508 = vmatpush1.msra.mxu1 %v8621_v36 }
 0xfdf   :  { %4438 = vmatprep.subr.mxu0 %v8625_v10  ;;  %4509 = vmatprep.subr.mxu1 %v8627_v11 }
 0xfe0   :  { %4439 = vmatpush1.msra.mxu0 %v8631_v56  ;;  %4510 = vmatpush1.msra.mxu1 %v8633_v0 }
 0xfe1   :  { %4440 = vmatprep.subr.mxu0 %v8637_v12  ;;  %4511 = vmatprep.subr.mxu1 %v8639_v33 }
 0xfe2   :  { %4441 = vmatpush1.msra.mxu0 %v8643_v21  ;;  %4512 = vmatpush1.msra.mxu1 %v8645_v2 }
 0xfe3   :  { %4442 = vmatprep.subr.mxu0 %v8649_v54  ;;  %4513 = vmatprep.subr.mxu1 %v8651_v30 }
 0xfe4   :  { %4443 = vmatpush1.msra.mxu0 %v8655_v7  ;;  %4514 = vmatpush1.msra.mxu1 %v8657_v18 }
 0xfe5   :  { %4444 = vmatprep.subr.mxu0 %v8661_v41  ;;  %4515 = vmatprep.subr.mxu1 %v8663_v42 }
 0xfe6   :  { %4445 = vmatpush1.msra.mxu0 %v8667_v43  ;;  %4516 = vmatpush1.msra.mxu1 %v8669_v44 }
 0xfe7   :  { %4446 = vmatprep.subr.mxu0 %v8673_v45  ;;  %4517 = vmatprep.subr.mxu1 %v8675_v55 }
 0xfe8   :  { %4447 = vmatpush1.msra.mxu0 %v8679_v3  ;;  %4518 = vmatpush1.msra.mxu1 %v8681_v20 }
 0xfe9   :  { %4448 = vmatprep.subr.mxu0 %v8685_v47  ;;  %4519 = vmatprep.subr.mxu1 %v8687_v48 }
 0xfea   :  { %4449 = vmatpush1.msra.mxu0 %v8691_v57  ;;  %4520 = vmatpush1.msra.mxu1 %v8693_v29 }
 0xfeb   :  { %4450 = vmatprep.subr.mxu0 %v8697_v39  ;;  %4521 = vmatprep.subr.mxu1 %v8699_v59 }
 0xfec   :  { %4451 = vmatpush1.msra.mxu0 %v8703_v4  ;;  %4522 = vmatpush1.msra.mxu1 %v8705_v31 }
 0xfed   :  { %4452 = vmatprep.subr.mxu0 %v8709_v51  ;;  %4523 = vmatprep.subr.mxu1 %v8711_v52 }
 0xfee   :  { %4453 = vmatpush1.msra.mxu0 %v8715_v32  ;;  %4524 = vmatpush1.msra.mxu1 %v8717_v58 }
 0xfef   :  { %4454 = vmatprep.subr.mxu0 %v8721_v1  ;;  %4525 = vmatprep.subr.mxu1 %v8723_v46 }
 0xff0   :  { %4455 = vmatpush1.msra.mxu0 %v8727_v27  ;;  %4526 = vmatpush1.msra.mxu1 %v8729_v50 }
 0xff1   :  { %4456 = vmatprep.subr.mxu0 %v8733_v62  ;;  %4527 = vmatprep.subr.mxu1 %v8735_v63 }
 0xff2   :  { %4457 = vmatpush1.msra.mxu0 %v8739_v24  ;;  %4528 = vmatpush1.msra.mxu1 %v8741_v5 }
 0xff3   :  { %4458 = vmatprep.subr.mxu0 %v8745_v6  ;;  %4529 = vmatprep.subr.mxu1 %v8747_v60  ;;  %v8779_v60 = vld [vmem:[#allocation14 + $0x10] sm:$0xff] }
 0xff4   :  { %4459 = vmatpush1.msra.mxu0 %v8751_v8  ;;  %4530 = vmatpush1.msra.mxu1 %v8753_v9 }
 0xff5   :  { %4460 = vmatprep.subr.mxu0 %v8757_v14  ;;  %4531 = vmatprep.subr.mxu1 %v8759_v15 }
 0xff6   :  { %4461 = vmatpush1.msra.mxu0 %v8763_v34  ;;  %4532 = vmatpush1.msra.mxu1 %v8765_v49 }
 0xff7   :  { %4462 = vmatprep.subr.mxu0 %v8769_v53  ;;  %4533 = vmatprep.subr.mxu1 %v8771_v61 }
 0xff8   :  { %4463 = vmatpush1.msra.mxu0 %v8775_v22  ;;  %4496 = vmatprep.mubr.f32.mxu0 %v9892_v19 }
 0xff9   :  { %4534 = vmatpush1.msra.mxu1 %v8779_v60  ;;  %4567 = vmatprep.mubr.f32.mxu1 %v9892_v19 }
 0xffa   :  { %4497 = vmatmul.mubr.f32.vlgmr.msra.gmra.mxu0 %v9892_v19  ;;  %4568 = vmatmul.mubr.f32.vlgmr.msra.gmra.mxu1 %v9892_v19 }
 0xffb   :  { %4602 = vmatprep.subr.mxu0 %v8591_v16  ;;  %4673 = vmatprep.subr.mxu1 %v8593_v17  ;;  %v9899_v16 = vld [vmem:[#allocation63_spill] sm:$0xff] }
 0xffc   :  { %4603 = vmatpush1.msra.mxu0 %v8597_v35  ;;  %4674 = vmatpush1.msra.mxu1 %v8599_v38 }
 0xffd   :  { %4604 = vmatprep.subr.mxu0 %v8603_v25  ;;  %4675 = vmatprep.subr.mxu1 %v8605_v26 }
 0xffe   :  { %4605 = vmatpush1.msra.mxu0 %v8607_v23  ;;  %4676 = vmatpush1.msra.mxu1 %v8609_v13  ;;  %v9900_v13 = vld [vmem:[#allocation29_spill] sm:$0xff] }
 0xfff   :  { %4606 = vmatprep.subr.mxu0 %v8613_v37  ;;  %4677 = vmatprep.subr.mxu1 %v8615_v28  ;;  %v9902_v28 = vld [vmem:[#allocation50_spill] sm:$0xff] }
0x1000   :  { %4607 = vmatpush1.msra.mxu0 %v8619_v40  ;;  %4678 = vmatpush1.msra.mxu1 %v8621_v36  ;;  %v4248_v36 = vld [vmem:[%s9247_s10] sm:$0xf] }
0x1001   :  { %4608 = vmatprep.subr.mxu0 %v8625_v10  ;;  %4679 = vmatprep.subr.mxu1 %v8627_v11  ;;  %v9905_v11 = vld [vmem:[#allocation54_spill] sm:$0xff] }
0x1002   :  { %4609 = vmatpush1.msra.mxu0 %v8631_v56  ;;  %4680 = vmatpush1.msra.mxu1 %v8633_v0  ;;  %v4253_v56 = vrot.slane %v4248_v36, %v9905_v11  ;;  %v9906_v0 = vld [vmem:[#allocation56_spill] sm:$0xff] }
0x1003   :  { %4610 = vmatprep.subr.mxu0 %v8637_v12  ;;  %4681 = vmatprep.subr.mxu1 %v8639_v33  ;;  %v4257_v12 = vrot.slane %v4248_v36, %v9906_v0  ;;  %v9075_v0 = vld [vmem:[#allocation17 + $0x18] sm:$0xff]  ;;  %v9079_v11 = vld [vmem:[#allocation17] sm:$0xff] }
0x1004   :  { %4611 = vmatpush1.msra.mxu0 %v8643_v21  ;;  %4682 = vmatpush1.msra.mxu1 %v8645_v2 }
0x1005   :  { %4612 = vmatprep.subr.mxu0 %v8649_v54  ;;  %4683 = vmatprep.subr.mxu1 %v8651_v30 }
0x1006   :  { %4613 = vmatpush1.msra.mxu0 %v8655_v7  ;;  %4684 = vmatpush1.msra.mxu1 %v8657_v18 }
0x1007   :  { %4614 = vmatprep.subr.mxu0 %v8661_v41  ;;  %4685 = vmatprep.subr.mxu1 %v8663_v42 }
0x1008   :  { %4615 = vmatpush1.msra.mxu0 %v8667_v43  ;;  %4686 = vmatpush1.msra.mxu1 %v8669_v44 }
0x1009   :  { %4616 = vmatprep.subr.mxu0 %v8673_v45  ;;  %4687 = vmatprep.subr.mxu1 %v8675_v55  ;;  %v9907_v55 = vld [vmem:[#allocation57_spill] sm:$0xff] }
0x100a   :  { %4617 = vmatpush1.msra.mxu0 %v8679_v3  ;;  %4688 = vmatpush1.msra.mxu1 %v8681_v20  ;;  %v4265_v3 = vrot.slane %v4248_v36, %v9907_v55  ;;  %v9073_v55 = vld [vmem:[#allocation17 + $0x8] sm:$0xff] }
0x100b   :  { %4618 = vmatprep.subr.mxu0 %v8685_v47  ;;  %4689 = vmatprep.subr.mxu1 %v8687_v48  ;;  %v9908_v48 = vld [vmem:[#allocation55_spill] sm:$0xff] }
0x100c   :  { %4619 = vmatpush1.msra.mxu0 %v8691_v57  ;;  %4690 = vmatpush1.msra.mxu1 %v8693_v29  ;;  %v4261_v57 = vrot.slane %v4248_v36, %v9908_v48  ;;  %v4835_v36 = vld [vmem:[#allocation16 + $0x170] sm:$0xff] }
0x100d   :  { %4620 = vmatprep.subr.mxu0 %v8697_v39  ;;  %4691 = vmatprep.subr.mxu1 %v8699_v59  ;;  %v9069_v48 = vld [vmem:[#allocation17 + $0x30] sm:$0xff] }
0x100e   :  { %4621 = vmatpush1.msra.mxu0 %v8703_v4  ;;  %4692 = vmatpush1.msra.mxu1 %v8705_v31 }
0x100f   :  { %4622 = vmatprep.subr.mxu0 %v8709_v51  ;;  %4693 = vmatprep.subr.mxu1 %v8711_v52 }
0x1010   :  { %4623 = vmatpush1.msra.mxu0 %v8715_v32  ;;  %4694 = vmatpush1.msra.mxu1 %v8717_v58 }
0x1011   :  { %4624 = vmatprep.subr.mxu0 %v8721_v1  ;;  %4695 = vmatprep.subr.mxu1 %v8723_v46 }
0x1012   :  { %4625 = vmatpush1.msra.mxu0 %v8727_v27  ;;  %4696 = vmatpush1.msra.mxu1 %v8729_v50 }
0x1013   :  { %4626 = vmatprep.subr.mxu0 %v8733_v62  ;;  %4697 = vmatprep.subr.mxu1 %v8735_v63 }
0x1014   :  { %4627 = vmatpush1.msra.mxu0 %v8739_v24  ;;  %4698 = vmatpush1.msra.mxu1 %v8741_v5 }
0x1015   :  { %4628 = vmatprep.subr.mxu0 %v8745_v6  ;;  %4699 = vmatprep.subr.mxu1 %v9899_v16  ;;  %v4848_v16 = vld [vmem:[#allocation16 + $0x1d8] sm:$0xff] }
0x1016   :  { %4629 = vmatpush1.msra.mxu0 %v8751_v8  ;;  %4700 = vmatpush1.msra.mxu1 %v8753_v9  ;;  %v4850_v8 = vld [vmem:[#allocation16 + $0x1e8] sm:$0xff]  ;;  %v4852_v9 = vld [vmem:[#allocation16 + $0x1f8] sm:$0xff] }
0x1017   :  { %4630 = vmatprep.subr.mxu0 %v8757_v14  ;;  %4701 = vmatprep.subr.mxu1 %v8759_v15  ;;  %v4849_v14 = vld [vmem:[#allocation16 + $0x1e0] sm:$0xff]  ;;  %v4851_v15 = vld [vmem:[#allocation16 + $0x1f0] sm:$0xff] }
0x1018   :  { %4631 = vmatpush1.msra.mxu0 %v8763_v34  ;;  %4702 = vmatpush1.msra.mxu1 %v8765_v49  ;;  %v4846_v34 = vld [vmem:[#allocation16 + $0x1c8] sm:$0xff] }
0x1019   :  { %4632 = vmatprep.subr.mxu0 %v8769_v53  ;;  %4703 = vmatprep.subr.mxu1 %v8771_v61  ;;  %v9901_v61 = vld [vmem:[#allocation64_spill] sm:$0xff] }
0x101a   :  { %4633 = vmatpush1.msra.mxu0 %v8775_v22  ;;  %4666 = vmatprep.mubr.f32.mxu0 %v9892_v19  ;;  %v9903_v22 = vcombine.high %v9901_v61, %v9902_v28  ;;  %v4834_v61 = vld [vmem:[#allocation16 + $0x168] sm:$0xff]  ;;  %v4836_v28 = vld [vmem:[#allocation16 + $0x178] sm:$0xff] }
0x101b   :  { %4704 = vmatpush1.msra.mxu1 %v8779_v60  ;;  %4737 = vmatprep.mubr.f32.mxu1 %v9892_v19 }
0x101c   :  { %4944 = vmatprep.subr.mxu0 %v4850_v8  ;;  %5015 = vmatprep.subr.mxu1 %v4852_v9  ;;  %v4798_v8 = vld [vmem:[#allocation16 + $0x48] sm:$0xff]  ;;  %v4800_v9 = vld [vmem:[#allocation16 + $0x58] sm:$0xff] }
0x1093   :  { %v4044_v17 = vpop.f32.mrf.mxu0  ;;  %v4115_v35 = vpop.f32.mrf.mxu1 }
0x1095   :  { %v4046_v38 = vpop.f32.mrf.mxu0  ;;  %v4117_v25 = vpop.f32.mrf.mxu1 }
0x1096   :  { %v4124_v26 = vcombine.low %v4044_v17, %v4046_v38  ;;  %v4125_v23 = vcombine.low %v4115_v35, %v4117_v25  ;;  %v4845_v17 = vld [vmem:[#allocation16 + $0x1c0] sm:$0xff]  ;;  %v4847_v35 = vld [vmem:[#allocation16 + $0x1d0] sm:$0xff]  ;;  %v4842_v38 = vld [vmem:[#allocation16 + $0x1a8] sm:$0xff] }
0x1097   :  { %v4844_v25 = vld [vmem:[#allocation16 + $0x1b8] sm:$0xff] }
0x1098   :  { %v4132_v49 = vrot.slane %v4124_v26, %v9900_v13  ;;  %v4139_v53 = vrot.slane %v4125_v23, %v9900_v13  ;;  %v4841_v26 = vld [vmem:[#allocation16 + $0x1a0] sm:$0xff]  ;;  %v4843_v23 = vld [vmem:[#allocation16 + $0x1b0] sm:$0xff]  ;;  %v4838_v13 = vld [vmem:[#allocation16 + $0x188] sm:$0xff] }
0x1099   :  { %v4356_v10 = vpop.f32.mrf.mxu0  ;;  %v4427_v2 = vpop.f32.mrf.mxu1 }
0x109a   :  { %v4140_v37 = vcombine.low %v4132_v49, %v4139_v53  ;;  %v8867_v21 = vadd.f32 %v4356_v10, %v4253_v56  ;;  %v8878_v39 = vadd.f32 %v4427_v2, %v4261_v57  ;;  %v4840_v49 = vld [vmem:[#allocation16 + $0x198] sm:$0xff]  ;;  %v4837_v53 = vld [vmem:[#allocation16 + $0x180] sm:$0xff]  ;;  %v4830_v10 = vld [vmem:[#allocation16 + $0x148] sm:$0xff] }
0x109b   :  { %v4358_v33 = vpop.f32.mrf.mxu0  ;;  %v4429_v41 = vpop.f32.mrf.mxu1  ;;  %v4832_v56 = vld [vmem:[#allocation16 + $0x158] sm:$0xff]  ;;  %v4826_v2 = vld [vmem:[#allocation16 + $0x128] sm:$0xff]  ;;  %v4819_v57 = vld [vmem:[#allocation16 + $0xf0] sm:$0xff] }
0x109c   :  { %v8860_v40 = vadd.f32 %v4140_v37, %v9903_v22  ;;  %v8869_v30 = vadd.f32 %v4358_v33, %v4257_v12  ;;  %v8874_v47 = vadd.f32 %v4429_v41, %v4265_v3  ;;  %v4839_v37 = vld [vmem:[#allocation16 + $0x190] sm:$0xff]  ;;  %v4833_v22 = vld [vmem:[#allocation16 + $0x160] sm:$0xff]  ;;  %v4822_v41 = vld [vmem:[#allocation16 + $0x108] sm:$0xff] }
0x109d   :  { %v4829_v12 = vld [vmem:[#allocation16 + $0x140] sm:$0xff]  ;;  %v4831_v33 = vld [vmem:[#allocation16 + $0x150] sm:$0xff]  ;;  %v4820_v3 = vld [vmem:[#allocation16 + $0xf8] sm:$0xff] }
0x109e   :  { %9904 = vst [vmem:[#allocation65_spill] sm:$0xff] %v8860_v40  ;;  %v9067_v40 = vld [vmem:[#allocation17 + $0x20] sm:$0xff] }
0x10ba   :  { %v4498_v54 = vpop.f32.mrf.mxu0  ;;  %v4569_v44 = vpop.f32.mrf.mxu1 }
0x10bb   :  { %v4574_v7 = vadd.f32 %v4498_v54, %v8867_v21  ;;  %v4576_v31 = vadd.f32 %v4569_v44, %v8878_v39  ;;  %v4828_v54 = vld [vmem:[#allocation16 + $0x138] sm:$0xff]  ;;  %v4823_v44 = vld [vmem:[#allocation16 + $0x110] sm:$0xff] }
0x10bc   :  { %v4500_v18 = vpop.f32.mrf.mxu0  ;;  %v4571_v20 = vpop.f32.mrf.mxu1 }
0x10bd   :  { %v5702_v42 = vmul.f32 -1.442695, %v4574_v7  ;;  %v4575_v43 = vadd.f32 %v4500_v18, %v8869_v30  ;;  %v4577_v29 = vadd.f32 %v4571_v20, %v8874_v47  ;;  %v4825_v7 = vld [vmem:[#allocation16 + $0x120] sm:$0xff]  ;;  %v4827_v18 = vld [vmem:[#allocation16 + $0x130] sm:$0xff] }
0x10be   :  { %v4817_v20 = vld [vmem:[#allocation16 + $0xe0] sm:$0xff] }
0x10bf   :  { %6084 = vpow2.f32 %v5702_v42  ;;  %v5703_v45 = vmul.f32 -1.442695, %v4575_v43  ;;  %v5704_v59 = vmul.f32 -1.442695, %v4577_v29  ;;  %v4824_v42 = vld [vmem:[#allocation16 + $0x118] sm:$0xff]  ;;  %v4821_v43 = vld [vmem:[#allocation16 + $0x100] sm:$0xff] }
0x10c0   :  { %v4814_v29 = vld [vmem:[#allocation16 + $0xc8] sm:$0xff] }
0x10c1   :  { %6086 = vpow2.f32 %v5703_v45  ;;  %v4818_v45 = vld [vmem:[#allocation16 + $0xe8] sm:$0xff] }
0x10c2   :  { %6088 = vpow2.f32 %v5704_v59  ;;  %v4816_v59 = vld [vmem:[#allocation16 + $0xd8] sm:$0xff] }
0x10cc   :  { %v6085_v4 = vpop.eup %6084 }
0x10cd   :  { %v4581_v51 = vadd.f32 1.0, %v6085_v4  ;;  %v4813_v4 = vld [vmem:[#allocation16 + $0xc0] sm:$0xff] }
0x10ce   :  { %v6087_v52 = vpop.eup %6086 }
0x10cf   :  { %6090 = vrcp.f32 %v4581_v51  ;;  %v4587_v32 = vadd.f32 1.0, %v6087_v52  ;;  %v6089_v58 = vpop.eup %6088  ;;  %v4810_v51 = vld [vmem:[#allocation16 + $0xa8] sm:$0xff]  ;;  %v4812_v52 = vld [vmem:[#allocation16 + $0xb8] sm:$0xff] }
0x10d0   :  { %6092 = vtanh.f32 %v4576_v31  ;;  %v4594_v50 = vadd.f32 1.0, %v6089_v58  ;;  %v4815_v31 = vld [vmem:[#allocation16 + $0xd0] sm:$0xff] }
0x10d1   :  { %6094 = vrcp.f32 %v4587_v32  ;;  %v4809_v32 = vld [vmem:[#allocation16 + $0xa0] sm:$0xff]  ;;  %v4811_v58 = vld [vmem:[#allocation16 + $0xb0] sm:$0xff] }
0x10d2   :  { %6096 = vrcp.f32 %v4594_v50  ;;  %v4807_v50 = vld [vmem:[#allocation16 + $0x90] sm:$0xff] }
0x10dc   :  { %v6091_v1 = vpop.eup %6090 }
0x10dd   :  { %v6093_v46 = vpop.eup %6092 }
0x10de   :  { %v6095_v27 = vpop.eup %6094  ;;  %v4598_v63 = vmul.f32 %v6093_v46, %v6091_v1  ;;  %v4806_v1 = vld [vmem:[#allocation16 + $0x88] sm:$0xff]  ;;  %v4808_v46 = vld [vmem:[#allocation16 + $0x98] sm:$0xff] }
0x10df   :  { %v4597_v62 = vmul.f32 0.0, %v6095_v27  ;;  %v6097_v5 = vpop.eup %6096  ;;  %v4805_v27 = vld [vmem:[#allocation16 + $0x80] sm:$0xff] }
0x10e1   :  { %v8881_v24 = vadd.f32 %v4598_v63, %v4597_v62  ;;  %v4802_v62 = vld [vmem:[#allocation16 + $0x68] sm:$0xff]  ;;  %v4804_v63 = vld [vmem:[#allocation16 + $0x78] sm:$0xff] }
0x10e3   :  { %6098 = vtanh.f32 %v8881_v24 }
0x10f0   :  { %v6099_v6 = vpop.eup %6098 }
0x10f1   :  { %v8884_v60 = vmul.f32 %v6099_v6, %v6097_v5  ;;  %v4801_v5 = vld [vmem:[#allocation16 + $0x60] sm:$0xff]  ;;  %v4803_v6 = vld [vmem:[#allocation16 + $0x70] sm:$0xff] }
0x10f3   :  { %4667 = vmatmul.mubr.f32.vlgmr.msra.gmra.mxu0 %v8884_v60  ;;  %4738 = vmatmul.mubr.f32.vlgmr.msra.gmra.mxu1 %v8884_v60 }
0x10f4   :  { %5008 = vmatprep.mubr.f32.mxu0 %v9892_v19  ;;  %5079 = vmatprep.mubr.f32.mxu1 %v9892_v19 }
0x10f5   :  { %4945 = vmatpush1.msra.mxu0 %v4849_v14  ;;  %5016 = vmatpush1.msra.mxu1 %v4851_v15  ;;  %v4797_v14 = vld [vmem:[#allocation16 + $0x40] sm:$0xff]  ;;  %v4799_v15 = vld [vmem:[#allocation16 + $0x50] sm:$0xff] }
0x10f6   :  { %4946 = vmatprep.subr.mxu0 %v4846_v34  ;;  %5017 = vmatprep.subr.mxu1 %v4848_v16  ;;  %v4794_v34 = vld [vmem:[#allocation16 + $0x28] sm:$0xff]  ;;  %v4796_v16 = vld [vmem:[#allocation16 + $0x38] sm:$0xff] }
0x10f7   :  { %4947 = vmatpush1.msra.mxu0 %v4845_v17  ;;  %5018 = vmatpush1.msra.mxu1 %v4847_v35  ;;  %v4793_v17 = vld [vmem:[#allocation16 + $0x20] sm:$0xff]  ;;  %v4795_v35 = vld [vmem:[#allocation16 + $0x30] sm:$0xff] }
0x10f8   :  { %4948 = vmatprep.subr.mxu0 %v4842_v38  ;;  %5019 = vmatprep.subr.mxu1 %v4844_v25  ;;  %v4790_v38 = vld [vmem:[#allocation16 + $0x8] sm:$0xff]  ;;  %v4792_v25 = vld [vmem:[#allocation16 + $0x18] sm:$0xff] }
0x10f9   :  { %4949 = vmatpush1.msra.mxu0 %v4841_v26  ;;  %5020 = vmatpush1.msra.mxu1 %v4843_v23  ;;  %v4789_v26 = vld [vmem:[#allocation16] sm:$0xff]  ;;  %v4791_v23 = vld [vmem:[#allocation16 + $0x10] sm:$0xff] }
0x10fa   :  { %4950 = vmatprep.subr.mxu0 %v4838_v13  ;;  %5021 = vmatprep.subr.mxu1 %v4840_v49  ;;  %v8890_v13 = vld [vmem:[#allocation17 + $0x1e8] sm:$0xff]  ;;  %v8892_v49 = vld [vmem:[#allocation17 + $0x1f8] sm:$0xff] }
0x10fb   :  { %4951 = vmatpush1.msra.mxu0 %v4837_v53  ;;  %5022 = vmatpush1.msra.mxu1 %v4839_v37 }
0x10fc   :  { %4952 = vmatprep.subr.mxu0 %v4834_v61  ;;  %5023 = vmatprep.subr.mxu1 %v4836_v28 }
0x10fd   :  { %4953 = vmatpush1.msra.mxu0 %v4833_v22  ;;  %5024 = vmatpush1.msra.mxu1 %v4835_v36 }
0x10fe   :  { %4954 = vmatprep.subr.mxu0 %v4830_v10  ;;  %5025 = vmatprep.subr.mxu1 %v4832_v56 }
0x10ff   :  { %4955 = vmatpush1.msra.mxu0 %v4829_v12  ;;  %5026 = vmatpush1.msra.mxu1 %v4831_v33 }
0x1100   :  { %4956 = vmatprep.subr.mxu0 %v4826_v2  ;;  %5027 = vmatprep.subr.mxu1 %v4828_v54 }
0x1101   :  { %4957 = vmatpush1.msra.mxu0 %v4825_v7  ;;  %5028 = vmatpush1.msra.mxu1 %v4827_v18 }
0x1102   :  { %4958 = vmatprep.subr.mxu0 %v4822_v41  ;;  %5029 = vmatprep.subr.mxu1 %v4824_v42 }
0x1103   :  { %4959 = vmatpush1.msra.mxu0 %v4821_v43  ;;  %5030 = vmatpush1.msra.mxu1 %v4823_v44 }
0x1104   :  { %4960 = vmatprep.subr.mxu0 %v4818_v45  ;;  %5031 = vmatprep.subr.mxu1 %v4820_v3 }
0x1105   :  { %4961 = vmatpush1.msra.mxu0 %v4817_v20  ;;  %5032 = vmatpush1.msra.mxu1 %v4819_v57  ;;  %v4780_v20 = vrot.slane %v8881_v24, 7  ;;  %v8909_v24 = vld [vmem:[#allocation17 + $0x1d8] sm:$0xff] }
0x1106   :  { %4962 = vmatprep.subr.mxu0 %v4814_v29  ;;  %5033 = vmatprep.subr.mxu1 %v4816_v59 }
0x1107   :  { %4963 = vmatpush1.msra.mxu0 %v4813_v4  ;;  %5034 = vmatpush1.msra.mxu1 %v4815_v31 }
0x1108   :  { %4964 = vmatprep.subr.mxu0 %v4810_v51  ;;  %5035 = vmatprep.subr.mxu1 %v4812_v52  ;;  %v8901_v52 = vld [vmem:[#allocation17 + $0x1e0] sm:$0xff] }
0x1109   :  { %4965 = vmatpush1.msra.mxu0 %v4809_v32  ;;  %5036 = vmatpush1.msra.mxu1 %v4811_v58  ;;  %v8903_v32 = vld [vmem:[#allocation17 + $0x1f0] sm:$0xff] }
0x110a   :  { %4966 = vmatprep.subr.mxu0 %v4806_v1  ;;  %5037 = vmatprep.subr.mxu1 %v4808_v46  ;;  %v8907_v1 = vld [vmem:[#allocation17 + $0x1c8] sm:$0xff]  ;;  %v8911_v46 = vld [vmem:[#allocation17 + $0x1c0] sm:$0xff] }
0x110b   :  { %4967 = vmatpush1.msra.mxu0 %v4805_v27  ;;  %5038 = vmatpush1.msra.mxu1 %v4807_v50  ;;  %v8913_v27 = vld [vmem:[#allocation17 + $0x1d0] sm:$0xff]  ;;  %v8917_v50 = vld [vmem:[#allocation17 + $0x1a8] sm:$0xff] }
0x110c   :  { %4968 = vmatprep.subr.mxu0 %v4802_v62  ;;  %5039 = vmatprep.subr.mxu1 %v4804_v63  ;;  %v8919_v62 = vld [vmem:[#allocation17 + $0x1b8] sm:$0xff]  ;;  %v8925_v63 = vld [vmem:[#allocation17 + $0x1b0] sm:$0xff] }
0x110d   :  { %4969 = vmatpush1.msra.mxu0 %v4801_v5  ;;  %5040 = vmatpush1.msra.mxu1 %v4803_v6  ;;  %v8929_v5 = vld [vmem:[#allocation17 + $0x188] sm:$0xff]  ;;  %v8931_v6 = vld [vmem:[#allocation17 + $0x198] sm:$0xff] }
0x110e   :  { %4970 = vmatprep.subr.mxu0 %v4798_v8  ;;  %5041 = vmatprep.subr.mxu1 %v4800_v9  ;;  %v8935_v8 = vld [vmem:[#allocation17 + $0x180] sm:$0xff]  ;;  %v8937_v9 = vld [vmem:[#allocation17 + $0x190] sm:$0xff] }
0x110f   :  { %4971 = vmatpush1.msra.mxu0 %v4797_v14  ;;  %5042 = vmatpush1.msra.mxu1 %v4799_v15  ;;  %v8941_v14 = vld [vmem:[#allocation17 + $0x168] sm:$0xff]  ;;  %v8943_v15 = vld [vmem:[#allocation17 + $0x178] sm:$0xff] }
0x1110   :  { %4972 = vmatprep.subr.mxu0 %v4794_v34  ;;  %5043 = vmatprep.subr.mxu1 %v4796_v16  ;;  %v8947_v34 = vld [vmem:[#allocation17 + $0x160] sm:$0xff]  ;;  %v8949_v16 = vld [vmem:[#allocation17 + $0x170] sm:$0xff] }
0x1111   :  { %4973 = vmatpush1.msra.mxu0 %v4793_v17  ;;  %5044 = vmatpush1.msra.mxu1 %v4795_v35  ;;  %v8953_v17 = vld [vmem:[#allocation17 + $0x148] sm:$0xff]  ;;  %v8955_v35 = vld [vmem:[#allocation17 + $0x158] sm:$0xff] }
0x1112   :  { %4974 = vmatprep.subr.mxu0 %v4790_v38  ;;  %5045 = vmatprep.subr.mxu1 %v4792_v25  ;;  %v8959_v38 = vld [vmem:[#allocation17 + $0x140] sm:$0xff]  ;;  %v8961_v25 = vld [vmem:[#allocation17 + $0x150] sm:$0xff] }
0x1113   :  { %4975 = vmatpush1.msra.mxu0 %v4789_v26  ;;  %5046 = vmatpush1.msra.mxu1 %v4791_v23  ;;  %v8965_v26 = vld [vmem:[#allocation17 + $0x128] sm:$0xff]  ;;  %v8967_v23 = vld [vmem:[#allocation17 + $0x138] sm:$0xff] }
0x1114   :  { %5086 = vmatprep.subr.mxu0 %v8890_v13  ;;  %5157 = vmatprep.subr.mxu1 %v8892_v49 }
0x11b3   :  { %v4668_v53 = vpop.f32.mrf.mxu0  ;;  %v4739_v22 = vpop.f32.mrf.mxu1 }
0x11b4   :  { %v4748_v37 = vrot.slane %v4668_v53, 7  ;;  %v4750_v7 = vrot.slane %v4739_v22, 7  ;;  %v8971_v53 = vld [vmem:[#allocation17 + $0x120] sm:$0xff] }
0x11b5   :  { %v4670_v61 = vpop.f32.mrf.mxu0  ;;  %v4741_v33 = vpop.f32.mrf.mxu1  ;;  %v8983_v22 = vld [vmem:[#allocation17 + $0x100] sm:$0xff] }
0x11b6   :  { %v4756_v28 = vadd.f32 %v4748_v37, %v8867_v21  ;;  %v4749_v36 = vrot.slane %v4670_v61, 7  ;;  %v4751_v2 = vrot.slane %v4741_v33, 7  ;;  %v4758_v42 = vadd.f32 %v4750_v7, %v8878_v39  ;;  %v8973_v37 = vld [vmem:[#allocation17 + $0x130] sm:$0xff]  ;;  %v8977_v61 = vld [vmem:[#allocation17 + $0x108] sm:$0xff]  ;;  %v9007_v7 = vld [vmem:[#allocation17 + $0xc0] sm:$0xff] }
0x11b7   :  { %v8997_v33 = vld [vmem:[#allocation17 + $0xf0] sm:$0xff] }
0x11b8   :  { %v5705_v10 = vmul.f32 -1.442695, %v4756_v28  ;;  %v4757_v56 = vadd.f32 %v4749_v36, %v8869_v30  ;;  %v4759_v54 = vadd.f32 %v4751_v2, %v8874_v47  ;;  %v8979_v28 = vld [vmem:[#allocation17 + $0x118] sm:$0xff]  ;;  %v8985_v36 = vld [vmem:[#allocation17 + $0x110] sm:$0xff]  ;;  %v9001_v2 = vld [vmem:[#allocation17 + $0xc8] sm:$0xff] }
0x11ba   :  { %6100 = vpow2.f32 %v5705_v10  ;;  %v5706_v12 = vmul.f32 -1.442695, %v4757_v56  ;;  %v5707_v18 = vmul.f32 -1.442695, %v4759_v54  ;;  %v8989_v10 = vld [vmem:[#allocation17 + $0xe8] sm:$0xff]  ;;  %v8991_v56 = vld [vmem:[#allocation17 + $0xf8] sm:$0xff] }
0x11bb   :  { %v9003_v54 = vld [vmem:[#allocation17 + $0xd8] sm:$0xff] }
0x11bc   :  { %6102 = vpow2.f32 %v5706_v12  ;;  %v8995_v12 = vld [vmem:[#allocation17 + $0xe0] sm:$0xff] }
0x11bd   :  { %6104 = vpow2.f32 %v5707_v18  ;;  %v9009_v18 = vld [vmem:[#allocation17 + $0xd0] sm:$0xff] }
0x11c7   :  { %v6101_v41 = vpop.eup %6100 }
0x11c8   :  { %v4763_v43 = vadd.f32 1.0, %v6101_v41  ;;  %v9013_v41 = vld [vmem:[#allocation17 + $0xa8] sm:$0xff] }
0x11c9   :  { %v6103_v44 = vpop.eup %6102 }
0x11ca   :  { %6106 = vrcp.f32 %v4763_v43  ;;  %v4769_v21 = vadd.f32 1.0, %v6103_v44  ;;  %v6105_v30 = vpop.eup %6104  ;;  %v9019_v43 = vld [vmem:[#allocation17 + $0xa0] sm:$0xff]  ;;  %v9021_v44 = vld [vmem:[#allocation17 + $0xb0] sm:$0xff] }
0x11cb   :  { %6108 = vtanh.f32 %v4758_v42  ;;  %v4776_v29 = vadd.f32 1.0, %v6105_v30  ;;  %v9015_v42 = vld [vmem:[#allocation17 + $0xb8] sm:$0xff] }
0x11cc   :  { %6110 = vrcp.f32 %v4769_v21  ;;  %v9025_v21 = vld [vmem:[#allocation17 + $0x88] sm:$0xff]  ;;  %v9027_v30 = vld [vmem:[#allocation17 + $0x98] sm:$0xff] }
0x11cd   :  { %6112 = vrcp.f32 %v4776_v29  ;;  %v9043_v29 = vld [vmem:[#allocation17 + $0x60] sm:$0xff] }
0x11d7   :  { %v6107_v45 = vpop.eup %6106 }
0x11d8   :  { %v6109_v3 = vpop.eup %6108 }
0x11d9   :  { %v6111_v57 = vpop.eup %6110  ;;  %v4783_v47 = vmul.f32 %v6109_v3, %v6107_v45  ;;  %v9031_v45 = vld [vmem:[#allocation17 + $0x80] sm:$0xff]  ;;  %v9033_v3 = vld [vmem:[#allocation17 + $0x90] sm:$0xff] }
0x11da   :  { %v4782_v59 = vmul.f32 %v6111_v57, %v4780_v20  ;;  %v6113_v39 = vpop.eup %6112  ;;  %v9037_v20 = vld [vmem:[#allocation17 + $0x68] sm:$0xff]  ;;  %v9039_v57 = vld [vmem:[#allocation17 + $0x78] sm:$0xff] }
0x11dc   :  { %v4784_v4 = vadd.f32 %v4783_v47, %v4782_v59  ;;  %v9045_v47 = vld [vmem:[#allocation17 + $0x70] sm:$0xff]  ;;  %v9049_v59 = vld [vmem:[#allocation17 + $0x48] sm:$0xff] }
0x11dd   :  { %9909 = vst [vmem:[#allocation51_spill] sm:$0xff] %v9049_v59 }
0x11de   :  { %6114 = vtanh.f32 %v4784_v4  ;;  %v9051_v4 = vld [vmem:[#allocation17 + $0x58] sm:$0xff] }
0x11eb   :  { %v6115_v31 = vpop.eup %6114 }
0x11ec   :  { %v4786_v51 = vmul.f32 %v6115_v31, %v6113_v39  ;;  %v9055_v39 = vld [vmem:[#allocation17 + $0x40] sm:$0xff]  ;;  %v9057_v31 = vld [vmem:[#allocation17 + $0x50] sm:$0xff] }
0x11ee   :  { %v4942_v58 = vsel %vm4941_vm2, %v4786_v51, %v8884_v60  ;;  %v8923_v60 = vld [vmem:[#allocation17 + $0x1a0] sm:$0xff]  ;;  %v9061_v51 = vld [vmem:[#allocation17 + $0x28] sm:$0xff] }
0x11ef   :  { %5009 = vmatmul.mubr.f32.vlgmr.msra.gmra.mxu0 %v4942_v58  ;;  %5080 = vmatmul.mubr.f32.vlgmr.msra.gmra.mxu1 %v4942_v58  ;;  %v9063_v58 = vld [vmem:[#allocation17 + $0x38] sm:$0xff] }
0x11f0   :  { %5087 = vmatpush1.msra.mxu0 %v8901_v52  ;;  %5158 = vmatpush1.msra.mxu1 %v8903_v32 }
0x11f1   :  { %5088 = vmatprep.subr.mxu0 %v8907_v1  ;;  %5159 = vmatprep.subr.mxu1 %v8909_v24 }
0x11f2   :  { %5089 = vmatpush1.msra.mxu0 %v8911_v46  ;;  %5160 = vmatpush1.msra.mxu1 %v8913_v27 }
0x11f3   :  { %5090 = vmatprep.subr.mxu0 %v8917_v50  ;;  %5161 = vmatprep.subr.mxu1 %v8919_v62 }
0x11f4   :  { %5091 = vmatpush1.msra.mxu0 %v8923_v60  ;;  %5162 = vmatpush1.msra.mxu1 %v8925_v63 }
0x11f5   :  { %5092 = vmatprep.subr.mxu0 %v8929_v5  ;;  %5163 = vmatprep.subr.mxu1 %v8931_v6 }
0x11f6   :  { %5093 = vmatpush1.msra.mxu0 %v8935_v8  ;;  %5164 = vmatpush1.msra.mxu1 %v8937_v9 }
0x11f7   :  { %5094 = vmatprep.subr.mxu0 %v8941_v14  ;;  %5165 = vmatprep.subr.mxu1 %v8943_v15 }
0x11f8   :  { %5095 = vmatpush1.msra.mxu0 %v8947_v34  ;;  %5166 = vmatpush1.msra.mxu1 %v8949_v16 }
0x11f9   :  { %5096 = vmatprep.subr.mxu0 %v8953_v17  ;;  %5167 = vmatprep.subr.mxu1 %v8955_v35 }
0x11fa   :  { %5097 = vmatpush1.msra.mxu0 %v8959_v38  ;;  %5168 = vmatpush1.msra.mxu1 %v8961_v25 }
0x11fb   :  { %5098 = vmatprep.subr.mxu0 %v8965_v26  ;;  %5169 = vmatprep.subr.mxu1 %v8967_v23 }
0x11fc   :  { %5099 = vmatpush1.msra.mxu0 %v8971_v53  ;;  %5170 = vmatpush1.msra.mxu1 %v8973_v37 }
0x11fd   :  { %5100 = vmatprep.subr.mxu0 %v8977_v61  ;;  %5171 = vmatprep.subr.mxu1 %v8979_v28 }
0x11fe   :  { %5101 = vmatpush1.msra.mxu0 %v8983_v22  ;;  %5172 = vmatpush1.msra.mxu1 %v8985_v36 }
0x11ff   :  { %5102 = vmatprep.subr.mxu0 %v8989_v10  ;;  %5173 = vmatprep.subr.mxu1 %v8991_v56 }
0x1200   :  { %5103 = vmatpush1.msra.mxu0 %v8995_v12  ;;  %5174 = vmatpush1.msra.mxu1 %v8997_v33 }
0x1201   :  { %5104 = vmatprep.subr.mxu0 %v9001_v2  ;;  %5175 = vmatprep.subr.mxu1 %v9003_v54 }
0x1202   :  { %5105 = vmatpush1.msra.mxu0 %v9007_v7  ;;  %5176 = vmatpush1.msra.mxu1 %v9009_v18 }
0x1203   :  { %5106 = vmatprep.subr.mxu0 %v9013_v41  ;;  %5177 = vmatprep.subr.mxu1 %v9015_v42 }
0x1204   :  { %5107 = vmatpush1.msra.mxu0 %v9019_v43  ;;  %5178 = vmatpush1.msra.mxu1 %v9021_v44 }
0x1205   :  { %5108 = vmatprep.subr.mxu0 %v9025_v21  ;;  %5179 = vmatprep.subr.mxu1 %v9027_v30 }
0x1206   :  { %5109 = vmatpush1.msra.mxu0 %v9031_v45  ;;  %5180 = vmatpush1.msra.mxu1 %v9033_v3 }
0x1207   :  { %5110 = vmatprep.subr.mxu0 %v9037_v20  ;;  %5181 = vmatprep.subr.mxu1 %v9039_v57 }
0x1208   :  { %5111 = vmatpush1.msra.mxu0 %v9043_v29  ;;  %5182 = vmatpush1.msra.mxu1 %v9045_v47 }
0x1209   :  { %5112 = vmatprep.subr.mxu0 %v9049_v59  ;;  %5183 = vmatprep.subr.mxu1 %v9051_v4  ;;  %v9083_v59 = vld [vmem:[#allocation17 + $0x10] sm:$0xff] }
0x120a   :  { %5113 = vmatpush1.msra.mxu0 %v9055_v39  ;;  %5184 = vmatpush1.msra.mxu1 %v9057_v31 }
0x120b   :  { %5114 = vmatprep.subr.mxu0 %v9061_v51  ;;  %5185 = vmatprep.subr.mxu1 %v9063_v58 }
0x120c   :  { %5115 = vmatpush1.msra.mxu0 %v9067_v40  ;;  %5186 = vmatpush1.msra.mxu1 %v9069_v48 }
0x120d   :  { %5116 = vmatprep.subr.mxu0 %v9073_v55  ;;  %5187 = vmatprep.subr.mxu1 %v9075_v0 }
0x120e   :  { %5117 = vmatpush1.msra.mxu0 %v9079_v11  ;;  %5150 = vmatprep.mubr.f32.mxu0 %v9892_v19 }
0x120f   :  { %5188 = vmatpush1.msra.mxu1 %v9083_v59  ;;  %5221 = vmatprep.mubr.f32.mxu1 %v9892_v19 }
0x1210   :  { %5151 = vmatmul.mubr.f32.vlgmr.msra.gmra.mxu0 %v9892_v19  ;;  %5222 = vmatmul.mubr.f32.vlgmr.msra.gmra.mxu1 %v9892_v19 }
0x1211   :  { %5327 = vmatprep.subr.mxu1 %v8892_v49  ;;  %5256 = vmatprep.subr.mxu0 %v8890_v13  ;;  %v9910_v13 = vld [vmem:[#allocation51_spill] sm:$0xff] }
0x1212   :  { %5328 = vmatpush1.msra.mxu1 %v8903_v32  ;;  %5257 = vmatpush1.msra.mxu0 %v8901_v52 }
0x1213   :  { %5329 = vmatprep.subr.mxu1 %v8909_v24  ;;  %5258 = vmatprep.subr.mxu0 %v8907_v1 }
0x1214   :  { %5330 = vmatpush1.msra.mxu1 %v8913_v27  ;;  %5259 = vmatpush1.msra.mxu0 %v8911_v46 }
0x1215   :  { %5331 = vmatprep.subr.mxu1 %v8919_v62  ;;  %5260 = vmatprep.subr.mxu0 %v8917_v50 }
0x1216   :  { %5332 = vmatpush1.msra.mxu1 %v8925_v63  ;;  %5261 = vmatpush1.msra.mxu0 %v8923_v60 }
0x1217   :  { %5333 = vmatprep.subr.mxu1 %v8931_v6  ;;  %5262 = vmatprep.subr.mxu0 %v8929_v5 }
0x1218   :  { %5334 = vmatpush1.msra.mxu1 %v8937_v9  ;;  %5263 = vmatpush1.msra.mxu0 %v8935_v8  ;;  %v9913_v8 = vld [vmem:[#allocation57_spill] sm:$0xff] }
0x1219   :  { %5335 = vmatprep.subr.mxu1 %v8943_v15  ;;  %5264 = vmatprep.subr.mxu0 %v8941_v14 }
0x121a   :  { %5336 = vmatpush1.msra.mxu1 %v8949_v16  ;;  %5265 = vmatpush1.msra.mxu0 %v8947_v34  ;;  %v9914_v34 = vld [vmem:[#allocation55_spill] sm:$0xff] }
0x121b   :  { %5337 = vmatprep.subr.mxu1 %v8955_v35  ;;  %5266 = vmatprep.subr.mxu0 %v8953_v17 }
0x121c   :  { %5338 = vmatpush1.msra.mxu1 %v8961_v25  ;;  %5267 = vmatpush1.msra.mxu0 %v8959_v38 }
0x121d   :  { %5339 = vmatprep.subr.mxu1 %v8967_v23  ;;  %5268 = vmatprep.subr.mxu0 %v8965_v26  ;;  %v9915_v23 = vld [vmem:[#allocation65_spill] sm:$0xff] }
0x121e   :  { %5340 = vmatpush1.msra.mxu1 %v8973_v37  ;;  %5269 = vmatpush1.msra.mxu0 %v8971_v53  ;;  %v4150_v53 = vrot.slane %v9915_v23, 2 }
0x121f   :  { %5341 = vmatprep.subr.mxu1 %v8979_v28  ;;  %5270 = vmatprep.subr.mxu0 %v8977_v61 }
0x1220   :  { %5342 = vmatpush1.msra.mxu1 %v8985_v36  ;;  %5271 = vmatpush1.msra.mxu0 %v8983_v22  ;;  %v5698_v22 = vmul.f32 -1.442695, %v4150_v53  ;;  %v5697_v36 = vmul.f32 -1.442695, %v9915_v23  ;;  %v5467_v53 = vld [vmem:[#allocation19 + $0xc0] sm:$0xff] }
0x1221   :  { %5343 = vmatprep.subr.mxu1 %v8991_v56  ;;  %5272 = vmatprep.subr.mxu0 %v8989_v10 }
0x1222   :  { %5344 = vmatpush1.msra.mxu1 %v8997_v33  ;;  %5273 = vmatpush1.msra.mxu0 %v8995_v12 }
0x1223   :  { %5345 = vmatprep.subr.mxu1 %v9003_v54  ;;  %5274 = vmatprep.subr.mxu0 %v9001_v2 }
0x1224   :  { %5346 = vmatpush1.msra.mxu1 %v9009_v18  ;;  %5275 = vmatpush1.msra.mxu0 %v9007_v7 }
0x1225   :  { %5347 = vmatprep.subr.mxu1 %v9015_v42  ;;  %5276 = vmatprep.subr.mxu0 %v9013_v41 }
0x1226   :  { %5348 = vmatpush1.msra.mxu1 %v9021_v44  ;;  %5277 = vmatpush1.msra.mxu0 %v9019_v43 }
0x1227   :  { %5349 = vmatprep.subr.mxu1 %v9027_v30  ;;  %5278 = vmatprep.subr.mxu0 %v9025_v21  ;;  %v4161_v21 = vrot.slane %v9915_v23, 6  ;;  %v4158_v30 = vrot.slane %v9915_v23, 4  ;;  %v5468_v23 = vld [vmem:[#allocation19 + $0xc8] sm:$0xff] }
0x1228   :  { %5350 = vmatpush1.msra.mxu1 %v9033_v3  ;;  %5279 = vmatpush1.msra.mxu0 %v9031_v45 }
0x1229   :  { %5351 = vmatprep.subr.mxu1 %v9039_v57  ;;  %5280 = vmatprep.subr.mxu0 %v9037_v20  ;;  %v5699_v45 = vmul.f32 -1.442695, %v4161_v21 }
0x122a   :  { %5352 = vmatpush1.msra.mxu1 %v9045_v47  ;;  %5281 = vmatpush1.msra.mxu0 %v9043_v29  ;;  %v5458_v29 = vld [vmem:[#allocation19 + $0x78] sm:$0xff]  ;;  %v5457_v47 = vld [vmem:[#allocation19 + $0x70] sm:$0xff] }
0x122b   :  { %5353 = vmatprep.subr.mxu1 %v9051_v4  ;;  %5282 = vmatprep.subr.mxu0 %v9910_v13 }
0x122c   :  { %5354 = vmatpush1.msra.mxu1 %v9057_v31  ;;  %5283 = vmatpush1.msra.mxu0 %v9055_v39  ;;  %v5455_v39 = vld [vmem:[#allocation19 + $0x60] sm:$0xff] }
0x122d   :  { %5355 = vmatprep.subr.mxu1 %v9063_v58  ;;  %5284 = vmatprep.subr.mxu0 %v9061_v51  ;;  %v5454_v51 = vld [vmem:[#allocation19 + $0x58] sm:$0xff]  ;;  %v9916_v58 = vld [vmem:[#allocation32_spill] sm:$0xff] }
0x122e   :  { %5356 = vmatpush1.msra.mxu1 %v9069_v48  ;;  %5285 = vmatpush1.msra.mxu0 %v9067_v40  ;;  %v4917_v40 = vld [vmem:[%s9250_s13] sm:$0xf] }
0x122f   :  { %5357 = vmatprep.subr.mxu1 %v9075_v0  ;;  %5286 = vmatprep.subr.mxu0 %v9073_v55  ;;  %v9911_v0 = vld [vmem:[#allocation54_spill] sm:$0xff]  ;;  %v9912_v55 = vld [vmem:[#allocation56_spill] sm:$0xff]  ;;  %v4934_v9 = vrot.slane %v4917_v40, %v9913_v8  ;;  %v4930_v16 = vrot.slane %v4917_v40, %v9914_v34 }
0x1230   :  { %5358 = vmatpush1.msra.mxu1 %v9083_v59  ;;  %5287 = vmatpush1.msra.mxu0 %v9079_v11  ;;  %v4922_v49 = vrot.slane %v4917_v40, %v9911_v0  ;;  %v4926_v52 = vrot.slane %v4917_v40, %v9912_v55  ;;  %v5456_v59 = vld [vmem:[#allocation19 + $0x68] sm:$0xff]  ;;  %v5443_v8 = vld [vmem:[#allocation19] sm:$0xff]  ;;  %v5474_v34 = vld [vmem:[#allocation19 + $0xf8] sm:$0xff] }
0x1231   :  { %5320 = vmatprep.mubr.f32.mxu0 %v9892_v19  ;;  %5391 = vmatprep.mubr.f32.mxu1 %v9892_v19  ;;  %v5452_v55 = vld [vmem:[#allocation19 + $0x48] sm:$0xff] }
0x1232   :  { %5786 = vmatprep.subr.mxu1 %v9892_v19  ;;  %5751 = vmatprep.subr.mxu0 %v9892_v19 }
0x12af   :  { %v5010_v48 = vpop.f32.mrf.mxu0  ;;  %v5081_v11 = vpop.f32.mrf.mxu1 }
0x12b0   :  { %v9166_v1 = vadd.f32 %v5010_v48, %v4922_v49  ;;  %v9177_v35 = vadd.f32 %v5081_v11, %v4930_v16  ;;  %v5453_v48 = vld [vmem:[#allocation19 + $0x50] sm:$0xff]  ;;  %v5451_v11 = vld [vmem:[#allocation19 + $0x40] sm:$0xff] }
0x12b1   :  { %v5012_v32 = vpop.f32.mrf.mxu0  ;;  %v5083_v62 = vpop.f32.mrf.mxu1  ;;  %v5473_v16 = vld [vmem:[#allocation19 + $0xf0] sm:$0xff] }
0x12b2   :  { %v9168_v46 = vadd.f32 %v5012_v32, %v4926_v52  ;;  %v9173_v15 = vadd.f32 %v5083_v62, %v4934_v9  ;;  %v5447_v62 = vld [vmem:[#allocation19 + $0x20] sm:$0xff] }
0x12d0   :  { %v5152_v24 = vpop.f32.mrf.mxu0  ;;  %v5223_v5 = vpop.f32.mrf.mxu1 }
0x12d1   :  { %v5228_v27 = vadd.f32 %v5152_v24, %v9166_v1  ;;  %v5230_v26 = vadd.f32 %v5223_v5, %v9177_v35  ;;  %v5450_v24 = vld [vmem:[#allocation19 + $0x38] sm:$0xff]  ;;  %v5444_v5 = vld [vmem:[#allocation19 + $0x8] sm:$0xff] }
0x12d2   :  { %v5154_v50 = vpop.f32.mrf.mxu0  ;;  %v5225_v14 = vpop.f32.mrf.mxu1 }
0x12d3   :  { %v5709_v60 = vmul.f32 -1.442695, %v5228_v27  ;;  %v5229_v63 = vadd.f32 %v5154_v50, %v9168_v46  ;;  %v5231_v17 = vadd.f32 %v5225_v14, %v9173_v15  ;;  %v5449_v27 = vld [vmem:[#allocation19 + $0x30] sm:$0xff]  ;;  %v5448_v50 = vld [vmem:[#allocation19 + $0x28] sm:$0xff] }
0x12d5   :  { %6116 = vpow2.f32 %v5709_v60  ;;  %v5710_v6 = vmul.f32 -1.442695, %v5229_v63  ;;  %v5711_v38 = vmul.f32 -1.442695, %v5231_v17  ;;  %v5446_v60 = vld [vmem:[#allocation19 + $0x18] sm:$0xff]  ;;  %v5445_v63 = vld [vmem:[#allocation19 + $0x10] sm:$0xff] }
0x12d6   :  { %v5472_v17 = vld [vmem:[#allocation19 + $0xe8] sm:$0xff] }
0x12d7   :  { %6118 = vpow2.f32 %v5710_v6 }
0x12d8   :  { %6120 = vpow2.f32 %v5711_v38  ;;  %v5471_v38 = vld [vmem:[#allocation19 + $0xe0] sm:$0xff] }
0x12e2   :  { %v6117_v25 = vpop.eup %6116 }
0x12e3   :  { %v5235_v37 = vadd.f32 1.0, %v6117_v25  ;;  %v5470_v25 = vld [vmem:[#allocation19 + $0xd8] sm:$0xff] }
0x12e4   :  { %v6119_v61 = vpop.eup %6118 }
0x12e5   :  { %6122 = vrcp.f32 %v5235_v37  ;;  %v5241_v28 = vadd.f32 1.0, %v6119_v61  ;;  %v6121_v10 = vpop.eup %6120  ;;  %v5466_v37 = vld [vmem:[#allocation19 + $0xb8] sm:$0xff]  ;;  %v5465_v61 = vld [vmem:[#allocation19 + $0xb0] sm:$0xff] }
0x12e6   :  { %6124 = vtanh.f32 %v5230_v26  ;;  %v5248_v2 = vadd.f32 1.0, %v6121_v10  ;;  %v5469_v26 = vld [vmem:[#allocation19 + $0xd0] sm:$0xff] }
0x12e7   :  { %6126 = vrcp.f32 %v5241_v28  ;;  %v5464_v28 = vld [vmem:[#allocation19 + $0xa8] sm:$0xff]  ;;  %v5461_v10 = vld [vmem:[#allocation19 + $0x90] sm:$0xff] }
0x12e8   :  { %6128 = vpow2.f32 %v5698_v22  ;;  %v5463_v22 = vld [vmem:[#allocation19 + $0xa0] sm:$0xff] }
0x12e9   :  { %6130 = vpow2.f32 %v5697_v36  ;;  %v5462_v36 = vld [vmem:[#allocation19 + $0x98] sm:$0xff] }
0x12ea   :  { %6132 = vrcp.f32 %v5248_v2 }
0x12f2   :  { %v6123_v56 = vpop.eup %6122 }
0x12f3   :  { %v6125_v12 = vpop.eup %6124 }
0x12f4   :  { %v6127_v33 = vpop.eup %6126  ;;  %v5252_v7 = vmul.f32 %v6125_v12, %v6123_v56  ;;  %v5460_v56 = vld [vmem:[#allocation19 + $0x88] sm:$0xff]  ;;  %v5459_v12 = vld [vmem:[#allocation19 + $0x80] sm:$0xff] }
0x12f5   :  { %v5251_v54 = vmul.f32 0.0, %v6127_v33  ;;  %v6129_v41 = vpop.eup %6128 }
0x12f6   :  { %v6131_v42 = vpop.eup %6130  ;;  %v4155_v43 = vadd.f32 1.0, %v6129_v41 }
0x12f7   :  { %v9182_v18 = vadd.f32 %v5252_v7, %v5251_v54  ;;  %v4146_v44 = vadd.f32 1.0, %v6131_v42  ;;  %v6133_v3 = vpop.eup %6132 }
0x12f9   :  { %6134 = vtanh.f32 %v9182_v18 }
0x12fa   :  { %6136 = vrcp.f32 %v4155_v43 }
0x12fb   :  { %6138 = vrcp.f32 %v4146_v44 }
0x12fc   :  { %6140 = vtanh.f32 %v4158_v30 }
0x12fd   :  { %6142 = vpow2.f32 %v5699_v45 }
0x1306   :  { %v6135_v20 = vpop.eup %6134 }
0x1307   :  { %v9187_v57 = vmul.f32 %v6135_v20, %v6133_v3  ;;  %v6137_v4 = vpop.eup %6136 }
0x1308   :  { %v6139_v31 = vpop.eup %6138  ;;  %v4169_v13 = vmul.f32 %v6137_v4, %v9916_v58 }
0x1309   :  { %5321 = vmatmul.mubr.f32.vlgmr.msra.gmra.mxu0 %v9187_v57  ;;  %5392 = vmatmul.mubr.f32.vlgmr.msra.gmra.mxu1 %v9187_v57  ;;  %v6141_v40 = vpop.eup %6140 }
0x130a   :  { %5787 = vmatpush3.msra.mxu1 %v5458_v29  ;;  %5818 = vmatprep.mubr.msk.f32.mxu1 %vm6567_vm3, %v9892_v19  ;;  %v4170_v0 = vmul.f32 %v6141_v40, %v6139_v31  ;;  %v6143_v49 = vpop.eup %6142 }
0x130b   :  { %5788 = vmatprep.subr.mxu1 %v9892_v19  ;;  %5783 = vmatprep.mubr.msk.f32.mxu0 %vm6567_vm3, %v9892_v19  ;;  %v4166_v32 = vadd.f32 1.0, %v6143_v49 }
0x130c   :  { %5789 = vmatpush3.msra.mxu1 %v5457_v47  ;;  %v4171_v52 = vadd.f32 %v4170_v0, %v4169_v13  ;;  %5752 = vmatpush3.msra.mxu0 %v5474_v34  ;;  %v5434_v13 = vrot.slane %v9182_v18, 7 }
0x130d   :  { %5790 = vmatprep.subr.mxu1 %v9892_v19  ;;  %5753 = vmatprep.subr.mxu0 %v9892_v19 }
0x130e   :  { %5791 = vmatpush3.msra.mxu1 %v5456_v59  ;;  %6144 = vtanh.f32 %v4171_v52  ;;  %5754 = vmatpush3.msra.mxu0 %v5473_v16 }
0x130f   :  { %5792 = vmatprep.subr.mxu1 %v9892_v19  ;;  %6146 = vrcp.f32 %v4166_v32  ;;  %5755 = vmatprep.subr.mxu0 %v9892_v19 }
0x1310   :  { %5793 = vmatpush3.msra.mxu1 %v5455_v39  ;;  %5756 = vmatpush3.msra.mxu0 %v5472_v17 }
0x1311   :  { %5794 = vmatprep.subr.mxu1 %v9892_v19  ;;  %5757 = vmatprep.subr.mxu0 %v9892_v19 }
0x1312   :  { %5795 = vmatpush3.msra.mxu1 %v5454_v51  ;;  %5758 = vmatpush3.msra.mxu0 %v5471_v38 }
0x1313   :  { %5796 = vmatprep.subr.mxu1 %v9892_v19  ;;  %5759 = vmatprep.subr.mxu0 %v9892_v19 }
0x1314   :  { %5797 = vmatpush3.msra.mxu1 %v5453_v48  ;;  %5760 = vmatpush3.msra.mxu0 %v5470_v25 }
0x1315   :  { %5798 = vmatprep.subr.mxu1 %v9892_v19  ;;  %5761 = vmatprep.subr.mxu0 %v9892_v19 }
0x1316   :  { %5799 = vmatpush3.msra.mxu1 %v5452_v55  ;;  %5762 = vmatpush3.msra.mxu0 %v5469_v26 }
0x1317   :  { %5800 = vmatprep.subr.mxu1 %v9892_v19  ;;  %5763 = vmatprep.subr.mxu0 %v9892_v19 }
0x1318   :  { %5801 = vmatpush3.msra.mxu1 %v5451_v11  ;;  %5764 = vmatpush3.msra.mxu0 %v5468_v23 }
0x1319   :  { %5802 = vmatprep.subr.mxu1 %v9892_v19  ;;  %5765 = vmatprep.subr.mxu0 %v9892_v19 }
0x131a   :  { %5803 = vmatpush3.msra.mxu1 %v5450_v24  ;;  %5766 = vmatpush3.msra.mxu0 %v5467_v53  ;;  %v5716_v24 = vld [vmem:[%s9252_s15] ss:$0 sm:$0xff] }
0x131b   :  { %5804 = vmatprep.subr.mxu1 %v9892_v19  ;;  %v6145_v6 = vpop.eup %6144  ;;  %5767 = vmatprep.subr.mxu0 %v9892_v19 }
0x131c   :  { %5805 = vmatpush3.msra.mxu1 %v5449_v27  ;;  %v6147_v9 = vpop.eup %6146  ;;  %5768 = vmatpush3.msra.mxu0 %v5466_v37 }
0x131d   :  { %5806 = vmatprep.subr.mxu1 %v9892_v19  ;;  %v4173_v14 = vmul.f32 %v6147_v9, %v6145_v6  ;;  %5769 = vmatprep.subr.mxu0 %v9892_v19 }
0x131e   :  { %5807 = vmatpush3.msra.mxu1 %v5448_v50  ;;  %5770 = vmatpush3.msra.mxu0 %v5465_v61 }
0x131f   :  { %5808 = vmatprep.subr.mxu1 %v9892_v19  ;;  %5771 = vmatprep.subr.mxu0 %v9892_v19 }
0x1320   :  { %5809 = vmatpush3.msra.mxu1 %v5447_v62  ;;  %5772 = vmatpush3.msra.mxu0 %v5464_v28 }
0x1321   :  { %5810 = vmatprep.subr.mxu1 %v9892_v19  ;;  %5773 = vmatprep.subr.mxu0 %v9892_v19 }
0x1322   :  { %5811 = vmatpush3.msra.mxu1 %v5446_v60  ;;  %5774 = vmatpush3.msra.mxu0 %v5463_v22 }
0x1323   :  { %5812 = vmatprep.subr.mxu1 %v9892_v19  ;;  %5775 = vmatprep.subr.mxu0 %v9892_v19 }
0x1324   :  { %5813 = vmatpush3.msra.mxu1 %v5445_v63  ;;  %5776 = vmatpush3.msra.mxu0 %v5462_v36 }
0x1325   :  { %5814 = vmatprep.subr.mxu1 %v9892_v19  ;;  %5777 = vmatprep.subr.mxu0 %v9892_v19 }
0x1326   :  { %5815 = vmatpush3.msra.mxu1 %v5444_v5  ;;  %5778 = vmatpush3.msra.mxu0 %v5461_v10 }
0x1327   :  { %5816 = vmatprep.subr.mxu1 %v9892_v19  ;;  %5779 = vmatprep.subr.mxu0 %v9892_v19 }
0x1328   :  { %5817 = vmatpush3.msra.mxu1 %v5443_v8  ;;  %5780 = vmatpush3.msra.mxu0 %v5460_v56 }
0x1329   :  { %5819 = vmatmul.mubr.f32.vlgmr.msra.gmra.mxu1 %v4173_v14  ;;  %5781 = vmatprep.subr.mxu0 %v9892_v19 }
0x132a   :  { %5782 = vmatpush3.msra.mxu0 %v5459_v12 }
0x13c9   :  { %v5322_v33 = vpop.f32.mrf.mxu0  ;;  %v5393_v41 = vpop.f32.mrf.mxu1 }
0x13ca   :  { %v5402_v2 = vrot.slane %v5322_v33, 7  ;;  %v5404_v20 = vrot.slane %v5393_v41, 7 }
0x13cb   :  { %v5324_v54 = vpop.f32.mrf.mxu0  ;;  %v5395_v30 = vpop.f32.mrf.mxu1 }
0x13cc   :  { %v5410_v7 = vadd.f32 %v5402_v2, %v9166_v1  ;;  %v5403_v42 = vrot.slane %v5324_v54, 7  ;;  %v5405_v45 = vrot.slane %v5395_v30, 7  ;;  %v5412_v47 = vadd.f32 %v5404_v20, %v9177_v35 }
0x13ce   :  { %v5712_v43 = vmul.f32 -1.442695, %v5410_v7  ;;  %v5411_v44 = vadd.f32 %v5403_v42, %v9168_v46  ;;  %v5413_v3 = vadd.f32 %v5405_v45, %v9173_v15 }
0x13d0   :  { %6148 = vpow2.f32 %v5712_v43  ;;  %v5713_v21 = vmul.f32 -1.442695, %v5411_v44  ;;  %v5714_v19 = vmul.f32 -1.442695, %v5413_v3 }
0x13d2   :  { %6150 = vpow2.f32 %v5713_v21 }
0x13d3   :  { %6152 = vpow2.f32 %v5714_v19 }
0x13dd   :  { %v6149_v29 = vpop.eup %6148 }
0x13de   :  { %v5417_v59 = vadd.f32 1.0, %v6149_v29 }
0x13df   :  { %v6151_v4 = vpop.eup %6150 }
0x13e0   :  { %6154 = vrcp.f32 %v5417_v59  ;;  %v5423_v1 = vadd.f32 1.0, %v6151_v4  ;;  %v6153_v31 = vpop.eup %6152 }
0x13e1   :  { %6156 = vtanh.f32 %v5412_v47  ;;  %v5430_v40 = vadd.f32 1.0, %v6153_v31 }
0x13e2   :  { %6158 = vrcp.f32 %v5423_v1 }
0x13e3   :  { %6160 = vrcp.f32 %v5430_v40 }
0x13e9   :  { %v5615_v46 = vpop.f32.mrf.mxu1 }
0x13eb   :  { %v5820_v39 = vpop.f32.mrf.mxu1 }
0x13ed   :  { %v6155_v51 = vpop.eup %6154 }
0x13ee   :  { %v6157_v58 = vpop.eup %6156 }
0x13ef   :  { %v6159_v15 = vpop.eup %6158  ;;  %v5437_v48 = vmul.f32 %v6157_v58, %v6155_v51 }
0x13f0   :  { %v5436_v0 = vmul.f32 %v6159_v15, %v5434_v13  ;;  %v6161_v35 = vpop.eup %6160 }
0x13f2   :  { %v5438_v49 = vadd.f32 %v5437_v48, %v5436_v0 }
0x13f4   :  { %6162 = vtanh.f32 %v5438_v49 }
0x1401   :  { %v6163_v55 = vpop.eup %6162 }
0x1402   :  { %v5440_v52 = vmul.f32 %v6163_v55, %v6161_v35 }
0x1404   :  { %v5477_v32 = vsel %vm4941_vm2, %v5440_v52, %v9187_v57 }
0x1405   :  { %5784 = vmatmul.mubr.f32.vlgmr.msra.gmra.mxu0 %v5477_v32 }
0x14c5   :  { %v5545_v11 = vpop.f32.mrf.mxu0 }
0x14c6   :  { %v5616_v18 = vadd.f32 %v5615_v46, %v5545_v11 }
0x14c7   :  { %v5785_v27 = vpop.f32.mrf.mxu0 }
0x14c8   :  { %v5626_v50 = vadd.f32 %v5716_v24, %v5616_v18 }
0x14ca   :  { %5627 = vst [vmem:[#allocation20] sm:$0x3] %v5626_v50 }
0x14cb   :  { %6523 = shalt.err (!%p6520_p3)
}
0x14cc   :  { %5637 = dma.vmem_to_hbm [thread:$0]  %s5635_s30, 32, %s9253_s16, [#allocation4]  }
0x14cd   :  { %6544 = dma.done.wait [#allocation4], 32  }
0x14ce   :  { %6545 = vsyncadd [#allocation4], 4294967264 }
0x14cf   :  { %5641 = vsyncpa [#allocation3], 1 }
0x14d0   :  { %5642 = vsyncpa [#allocation6], 1 }
0x14d1   :  { %5643 = vsyncpa [#allocation9], 1 }
0x14d2   :  { %5644 = vsyncpa [#allocation12], 1 }
0x14d3   :  { %5645 = vsyncpa [#allocation15], 1 }
0x14d4   :  { %5646 = vsyncpa [#allocation18], 1 }
0x14d5   :  { %5647 = vsyncpa [#allocation4], 1 }

</bundles_post_ra>
